<compile_context>
chip_gen: v7x
topology: tpu7x:2x2x1
jax: 0.10.0
libtpu: 0.0.40
codegen_flags: <defaults>
</compile_context>

<pallas_src>
import functools

import jax
import jax.numpy as jnp
from jax.experimental import pallas as pl
from jax.experimental.pallas import tpu as pltpu

TM_MAX = 512    # row tile   (v7x-safe; VMEM stays well under the scoped limit)
TK_MAX = 1024   # K tile
LANES = 128     # Cout is always padded to a multiple of 128 inside the matmul
SUB = 16        # sublane rounding (bf16-friendly)


def _round_up(x, m):
    return (x + m - 1) // m * m


def _cdiv(a, b):
    return -(-a // b)


def _row_plan(m):
    m16 = _round_up(max(m, 1), SUB)
    tm = min(TM_MAX, m16)
    return tm, _round_up(m16, tm)


def _k_plan(k):
    k128 = _round_up(max(k, 1), 128)
    ks = _cdiv(k128, TK_MAX)
    tk = _round_up(_cdiv(k128, ks), 128)
    return tk, tk * ks


# ----------------------------------------------------------------------------
# Pallas kernels
# ----------------------------------------------------------------------------
def _mm_stats_kernel(a_ref, b_ref, y_ref, sum_ref, sq_ref, acc_ref):
    """Tiled bf16 matmul with f32 accumulation; emits the bf16 product plus
    per-row-tile column sum / sum-of-squares (for BatchNorm batch stats)."""
    k = pl.program_id(2)

    @pl.when(k == 0)
    def _init():
        acc_ref[...] = jnp.zeros_like(acc_ref)

    acc_ref[...] += jnp.dot(a_ref[...], b_ref[...],
                            preferred_element_type=jnp.float32)

    @pl.when(k == pl.num_programs(2) - 1)
    def _finalize():
        y = acc_ref[...]
        y_ref[...] = y.astype(y_ref.dtype)
        s = jnp.sum(y, axis=0, keepdims=True)
        q = jnp.sum(y * y, axis=0, keepdims=True)
        sum_ref[...] = jnp.broadcast_to(s, sum_ref.shape)
        sq_ref[...] = jnp.broadcast_to(q, sq_ref.shape)


def _bn_apply_kernel(*refs, relu, has_res):
    """Fused BN scale/shift (+ optional residual add) (+ optional ReLU).
    Operates on the 128-lane-padded channel layout (lane-dense loads/stores);
    padded channel columns get scale=shift=0 so they stay exactly zero."""
    if has_res:
        y_ref, s_ref, t_ref, r_ref, o_ref = refs
    else:
        y_ref, s_ref, t_ref, o_ref = refs
    z = y_ref[...].astype(jnp.float32) * s_ref[...] + t_ref[...]
    if has_res:
        z = z + r_ref[...].astype(jnp.float32)
    if relu:
        z = jnp.maximum(z, 0.0)
    o_ref[...] = z.astype(o_ref.dtype)


def _maxpool_kernel(x_ref, o_ref, acc_ref):
    """Running max over the k^3 shifted slabs on a flat lane-dense layout."""
    w = pl.program_id(1)

    @pl.when(w == 0)
    def _init():
        acc_ref[...] = jnp.full_like(acc_ref, -jnp.inf)

    acc_ref[...] = jnp.maximum(acc_ref[...], x_ref[0])

    @pl.when(w == pl.num_programs(1) - 1)
    def _finalize():
        o_ref[...] = acc_ref[...]


def _mlp_head_kernel(x_ref, w1_ref, b1_ref, g_ref, bt_ref, w2_ref, b2_ref,
                     o_ref, *, eps):
    """GlobalAvgPool -> Linear -> BatchNorm1d (batch stats) -> ReLU -> Linear,
    fully fused (everything is small by the time it gets here)."""
    x = jnp.mean(x_ref[...].astype(jnp.float32), axis=1)          # (N, C)
    h = jnp.dot(x, w1_ref[...], preferred_element_type=jnp.float32) + b1_ref[...]
    mean = jnp.mean(h, axis=0, keepdims=True)
    var = jnp.mean(jnp.square(h - mean), axis=0, keepdims=True)
    h = (h - mean) * jax.lax.rsqrt(var + eps) * g_ref[...] + bt_ref[...]
    h = jnp.maximum(h, 0.0)
    o_ref[...] = jnp.dot(h, w2_ref[...],
                         preferred_element_type=jnp.float32) + b2_ref[...]


# ----------------------------------------------------------------------------
# Layer wrappers
# ----------------------------------------------------------------------------
def _matmul_bn_stats(a, bm, cout):
    """a: (M, K) bf16, bm: (K, cout) bf16 -> (M_pad, N_pad) bf16 + BN stats."""
    m, k = a.shape
    tm, m_pad = _row_plan(m)
    tk, k_pad = _k_plan(k)
    n_pad = max(LANES, _round_up(cout, LANES))
    tn = 256 if n_pad % 256 == 0 else LANES          # 256x256 MXU on v6e/v7x
    mt, nt, kt = m_pad // tm, n_pad // tn, k_pad // tk

    if (m_pad, k_pad) != (m, k):
        a = jnp.pad(a, ((0, m_pad - m), (0, k_pad - k)))
    b = jnp.pad(bm, ((0, k_pad - k), (0, n_pad - cout)))

    y, sums, sqs = pl.pallas_call(
        _mm_stats_kernel,
        out_shape=(jax.ShapeDtypeStruct((m_pad, n_pad), jnp.bfloat16),
                   jax.ShapeDtypeStruct((mt * 8, n_pad), jnp.float32),
                   jax.ShapeDtypeStruct((mt * 8, n_pad), jnp.float32)),
        grid=(mt, nt, kt),
        in_specs=[pl.BlockSpec((tm, tk), lambda i, j, kk: (i, kk)),
                  pl.BlockSpec((tk, tn), lambda i, j, kk: (kk, j))],
        out_specs=(pl.BlockSpec((tm, tn), lambda i, j, kk: (i, j)),
                   pl.BlockSpec((8, tn), lambda i, j, kk: (i, j)),
                   pl.BlockSpec((8, tn), lambda i, j, kk: (i, j))),
        scratch_shapes=[pltpu.VMEM((tm, tn), jnp.float32)],
        compiler_params=pltpu.CompilerParams(
            dimension_semantics=("parallel", "parallel", "arbitrary")),
    )(a, b)
    return y, sums, sqs, tm, m_pad, n_pad


def _bn_apply(y, gamma, beta, sums, sqs, m_true, cout, tm, relu,
              residual=None, eps=1e-5):
    """Applies fused BN (+residual +ReLU); output stays in the lane-dense
    (M_pad, N_pad=128k) bf16 layout."""
    m_pad, n_pad = y.shape
    mt = m_pad // tm
    # Batch statistics (biased variance == PyTorch train-mode BN), f32.
    # NOTE: E[x^2]-E[x]^2 form; acceptable here since the conv itself is bf16.
    mean = jnp.sum(sums, axis=0) / (8.0 * m_true)
    msq = jnp.sum(sqs, axis=0) / (8.0 * m_true)
    var = jnp.maximum(msq - mean * mean, 0.0)
    g = jnp.pad(gamma, (0, n_pad - cout))
    b = jnp.pad(beta, (0, n_pad - cout))
    scale = (g * jax.lax.rsqrt(var + eps)).reshape(1, n_pad)
    shift = (b.reshape(1, n_pad) - mean.reshape(1, n_pad) * scale)

    has_res = residual is not None
    inputs = [y, scale, shift]
    in_specs = [pl.BlockSpec((tm, n_pad), lambda i: (i, 0)),
                pl.BlockSpec((1, n_pad), lambda i: (0, 0)),
                pl.BlockSpec((1, n_pad), lambda i: (0, 0))]
    if has_res:
        inputs.append(residual)
        in_specs.append(pl.BlockSpec((tm, n_pad), lambda i: (i, 0)))

    return pl.pallas_call(
        functools.partial(_bn_apply_kernel, relu=relu, has_res=has_res),
        out_shape=jax.ShapeDtypeStruct((m_pad, n_pad), jnp.bfloat16),
        grid=(mt,),
        in_specs=in_specs,
        out_specs=pl.BlockSpec((tm, n_pad), lambda i: (i, 0)),
        compiler_params=pltpu.CompilerParams(
            dimension_semantics=("parallel",)),
    )(*inputs)


def conv_bn(x, w, gamma, beta, stride, padding, *, relu, residual=None):
    """x: (N, D, H, W, Cin) bf16 channels-last; w: (Cout, Cin, kd, kh, kw) f32.
    Returns (lane-dense padded output (M_pad, N_pad) bf16, 5-D shape, M)."""
    n, d, h, wd, cin = x.shape
    cout, _, kd, kh, kw = w.shape
    sd, sh, sw = stride
    pd, ph, pw = padding
    do = (d + 2 * pd - kd) // sd + 1
    ho = (h + 2 * ph - kh) // sh + 1
    wo = (wd + 2 * pw - kw) // sw + 1
    m = n * do * ho * wo
    k = kd * kh * kw * cin

    # TODO(synk): fold the taps into the matmul K grid axis with manual strided
    # DMA instead of materializing the bf16 im2col matrix via XLA slicing.
    xp = jnp.pad(x, ((0, 0), (pd, pd), (ph, ph), (pw, pw), (0, 0)))
    cols = []
    for a in range(kd):
        for b in range(kh):
            for c in range(kw):
                cols.append(xp[:, a:a + sd * do:sd,
                               b:b + sh * ho:sh,
                               c:c + sw * wo:sw, :])
    patches = jnp.concatenate(cols, axis=-1).reshape(m, k)          # bf16
    wm = w.transpose(2, 3, 4, 1, 0).reshape(k, cout).astype(jnp.bfloat16)

    y, sums, sqs, tm, m_pad, n_pad = _matmul_bn_stats(patches, wm, cout)
    if residual is not None:
        rm, rc = residual.shape
        if (rm, rc) != (m_pad, n_pad):
            residual = jnp.pad(residual, ((0, m_pad - rm), (0, n_pad - rc)))
    out_pad = _bn_apply(y, gamma, beta, sums, sqs, float(m), cout, tm,
                        relu, residual)
    return out_pad, (n, do, ho, wo, cout), m


def maxpool3d_cl(x, k=3, s=2, p=1):
    """MaxPool3d on channels-last bf16 input, lane-dense flat layout."""
    n, d, h, w, c = x.shape
    neg = float(jnp.finfo(jnp.bfloat16).min)
    xp = jnp.pad(x, ((0, 0), (p, p), (p, p), (p, p), (0, 0)),
                 constant_values=neg)
    do = (d + 2 * p - k) // s + 1
    ho = (h + 2 * p - k) // s + 1
    wo = (w + 2 * p - k) // s + 1
    m = n * do * ho * wo
    # TODO(synk): gather the taps in-kernel from the padded activation instead
    # of stacking k^3 shifted copies via XLA (kept bf16 to halve the bytes).
    slabs = []
    for a in range(k):
        for b in range(k):
            for cc in range(k):
                slabs.append(xp[:, a:a + s * do:s, b:b + s * ho:s,
                                cc:cc + s * wo:s, :].reshape(m * c))
    stacked = jnp.stack(slabs, axis=0)                      # (k^3, M*C) bf16

    L = m * c
    rows = _cdiv(L, LANES)
    tm_r, rows_pad = _row_plan(rows)
    Lp = rows_pad * LANES
    if Lp != L:
        stacked = jnp.pad(stacked, ((0, 0), (0, Lp - L)), constant_values=neg)
    stacked = stacked.reshape(k * k * k, rows_pad, LANES)   # free reshape

    out = pl.pallas_call(
        _maxpool_kernel,
        out_shape=jax.ShapeDtypeStruct((rows_pad, LANES), jnp.bfloat16),
        grid=(rows_pad // tm_r, k * k * k),
        in_specs=[pl.BlockSpec((1, tm_r, LANES), lambda i, wi: (wi, i, 0))],
        out_specs=pl.BlockSpec((tm_r, LANES), lambda i, wi: (i, 0)),
        scratch_shapes=[pltpu.VMEM((tm_r, LANES), jnp.bfloat16)],
        compiler_params=pltpu.CompilerParams(
            dimension_semantics=("parallel", "arbitrary")),
    )(stacked)
    return out.reshape(-1)[:L].reshape(n, do, ho, wo, c)


def mlp_head(p, x3):
    """x3: (N, S, C) bf16 final activation; avg-pool fused into the head."""
    n, s, c = x3.shape
    proj = p['fc2_w'].shape[1]
    w_args = (p['fc1_w'], p['fc1_b'].reshape(1, -1),
              p['bn_g'].reshape(1, -1), p['bn_b'].reshape(1, -1),
              p['fc2_w'], p['fc2_b'].reshape(1, -1))
    in_specs = [pl.BlockSpec(x3.shape, lambda i: (0, 0, 0))]
    in_specs += [pl.BlockSpec(a.shape, lambda i: (0, 0)) for a in w_args]
    return pl.pallas_call(
        functools.partial(_mlp_head_kernel, eps=1e-5),
        out_shape=jax.ShapeDtypeStruct((n, proj), jnp.float32),
        grid=(1,),
        in_specs=in_specs,
        out_specs=pl.BlockSpec((n, proj), lambda i: (0, 0)),
    )(x3, *w_args)


# ----------------------------------------------------------------------------
# 3-D ResNet-10 encoder + MLPHead projection (forward)
# ----------------------------------------------------------------------------
def basic_block(x, p, stride):
    planes = p['conv1_w'].shape[0]
    h1_pad, shp1, m1 = conv_bn(x, p['conv1_w'], p['bn1_g'], p['bn1_b'],
                               (stride,) * 3, (1, 1, 1), relu=True)
    hid = h1_pad[:m1, :planes].reshape(shp1)

    if 'down_w' in p:                                   # shortcut type 'B'
        id_pad, _, _ = conv_bn(x, p['down_w'], p['down_g'], p['down_b'],
                               (stride,) * 3, (0, 0, 0), relu=False)
    else:                                               # identity shortcut
        id_pad = x.reshape(-1, x.shape[-1])             # (M, Cin) bf16

    out_pad, shp2, m2 = conv_bn(hid, p['conv2_w'], p['bn2_g'], p['bn2_b'],
                                (1, 1, 1), (1, 1, 1), relu=True,
                                residual=id_pad)
    return out_pad[:m2, :planes].reshape(shp2)


def resnet_forward(params, x):
    # Module I/O is NCDHW (PyTorch Conv3d); go channels-last + bf16 once.
    x = jnp.transpose(x, (0, 2, 3, 4, 1)).astype(jnp.bfloat16)
    h_pad, shp, m = conv_bn(x, params['conv1_w'], params['bn1_g'],
                            params['bn1_b'], (1, 2, 2), (3, 3, 3), relu=True)
    h = h_pad[:m, :shp[-1]].reshape(shp)
    h = maxpool3d_cl(h, 3, 2, 1)
    for li, stride in zip(range(1, 5), (1, 2, 2, 2)):
        h = basic_block(h, params[f'layer{li}'], stride)
    n_, d_, hh_, w_, c_ = h.shape
    feat3 = h.reshape(n_, d_ * hh_ * w_, c_)            # AdaptiveAvgPool + flatten
    return mlp_head(params['proj'], feat3)              # self.projetion(h)


# ----------------------------------------------------------------------------
# Deterministic parameter construction (depth-10 BasicBlock [1,1,1,1],
# scaled-down widths so the script runs quickly)
# ----------------------------------------------------------------------------
def _conv_init(key, cout, cin, k):
    fan_in = cin * k[0] * k[1] * k[2]
    return (jax.random.normal(key, (cout, cin, *k), jnp.float32)
            * (2.0 / fan_in) ** 0.5)


def _linear_init(key, din, dout):
    kw, kb = jax.random.split(key)
    w = jax.random.normal(kw, (din, dout), jnp.float32) * (1.0 / din) ** 0.5
    b = jax.random.normal(kb, (dout,), jnp.float32) * 0.01
    return w, b


def init_params(key, in_ch=3, inplanes=(8, 16, 32, 64),
                mlp_hidden=64, projection=16):
    keys = iter(jax.random.split(key, 64))
    nxt = lambda: next(keys)
    p = {}
    p['conv1_w'] = _conv_init(nxt(), inplanes[0], in_ch, (7, 7, 7))
    p['bn1_g'] = jnp.ones((inplanes[0],), jnp.float32)
    p['bn1_b'] = jnp.zeros((inplanes[0],), jnp.float32)
    in_p = inplanes[0]
    for li, (planes, stride) in enumerate(zip(inplanes, (1, 2, 2, 2)), 1):
        blk = {
            'conv1_w': _conv_init(nxt(), planes, in_p, (3, 3, 3)),
            'bn1_g': jnp.ones((planes,), jnp.float32),
            'bn1_b': jnp.zeros((planes,), jnp.float32),
            'conv2_w': _conv_init(nxt(), planes, planes, (3, 3, 3)),
            'bn2_g': jnp.ones((planes,), jnp.float32),
            'bn2_b': jnp.zeros((planes,), jnp.float32),
        }
        if stride != 1 or in_p != planes:
            blk['down_w'] = _conv_init(nxt(), planes, in_p, (1, 1, 1))
            blk['down_g'] = jnp.ones((planes,), jnp.float32)
            blk['down_b'] = jnp.zeros((planes,), jnp.float32)
        p[f'layer{li}'] = blk
        in_p = planes
    w1, b1 = _linear_init(nxt(), in_p, mlp_hidden)      # stored as (din, dout)
    w2, b2 = _linear_init(nxt(), mlp_hidden, projection)
    p['proj'] = dict(fc1_w=w1, fc1_b=b1,
                     bn_g=jnp.ones((mlp_hidden,), jnp.float32),
                     bn_b=jnp.zeros((mlp_hidden,), jnp.float32),
                     fc2_w=w2, fc2_b=b2)
    return p


if __name__ == "__main__":
    key = jax.random.PRNGKey(0)
    k_param, k_x = jax.random.split(key)
    params = init_params(k_param)
    # Small 3-D volume input, NCDHW (batch=2, channels=3, D=8, H=W=16)
    x = jax.random.normal(k_x, (2, 3, 8, 16, 16), jnp.float32)

    fwd = jax.jit(resnet_forward)
    out = fwd(params, x)
    jax.block_until_ready(out)
    assert out.shape == (2, 16) and out.dtype == jnp.float32
    assert bool(jnp.all(jnp.isfinite(out)))
    print("KERNEL_OK")
</pallas_src>

<mosaic_0001>
module attributes {stable_mosaic.version = 11 : i64} {
  func.func @_mm_stats_kernel(%arg0: i32, %arg1: i32, %arg2: i32, %arg3: memref<512x640xbf16, #tpu.memory_space<vmem>>, %arg4: memref<640x128xbf16, #tpu.memory_space<vmem>>, %arg5: memref<512x128xbf16, #tpu.memory_space<vmem>>, %arg6: memref<8x128xf32, #tpu.memory_space<vmem>>, %arg7: memref<8x128xf32, #tpu.memory_space<vmem>>, %arg8: memref<512x128xf32, #tpu.memory_space<vmem>>) attributes {dimension_semantics = [#tpu.dimension_semantics<parallel>, #tpu.dimension_semantics<parallel>, #tpu.dimension_semantics<arbitrary>], iteration_bounds = array<i64: 2, 1, 2>, scalar_prefetch = 0 : i64, scratch_operands = 1 : i64, tpu.core_type = #tpu.core_type<tc>, window_params = [{transform_indices = @transform_0, window_bounds = array<i64: 512, 640>}, {transform_indices = @transform_1, window_bounds = array<i64: 640, 128>}, {transform_indices = @transform_2, window_bounds = array<i64: 512, 128>}, {transform_indices = @transform_3, window_bounds = array<i64: 8, 128>}, {transform_indices = @transform_4, window_bounds = array<i64: 8, 128>}]} {
    %c0_i32 = arith.constant 0 : i32
    %0 = arith.cmpi eq, %arg2, %c0_i32 : i32
    %1 = arith.extui %0 : i1 to i32
    %c0_i32_0 = arith.constant 0 : i32
    %2 = arith.cmpi ne, %1, %c0_i32_0 : i32
    scf.if %2 {
      %cst_9 = arith.constant 0.000000e+00 : f32
      %12 = vector.broadcast %cst_9 : f32 to vector<512x128xf32>
      %c0_10 = arith.constant 0 : index
      %c0_11 = arith.constant 0 : index
      %13 = vector.load %arg8[%c0_10, %c0_11] : memref<512x128xf32, #tpu.memory_space<vmem>>, vector<512x128xf32>
      tpu.vector_store %arg8[%c0_10, %c0_11], %12 {strides = array<i32>} : memref<512x128xf32, #tpu.memory_space<vmem>>, vector<512x128xf32>,
    } else {
    }
    %c0 = arith.constant 0 : index
    %c0_1 = arith.constant 0 : index
    %3 = vector.load %arg8[%c0, %c0_1] : memref<512x128xf32, #tpu.memory_space<vmem>>, vector<512x128xf32>
    %c0_2 = arith.constant 0 : index
    %c0_3 = arith.constant 0 : index
    %4 = vector.load %arg3[%c0_2, %c0_3] : memref<512x640xbf16, #tpu.memory_space<vmem>>, vector<512x640xbf16>
    %c0_4 = arith.constant 0 : index
    %c0_5 = arith.constant 0 : index
    %5 = vector.load %arg4[%c0_4, %c0_5] : memref<640x128xbf16, #tpu.memory_space<vmem>>, vector<640x128xbf16>
    %cst = arith.constant dense<0.000000e+00> : vector<512x128xf32>
    %6 = tpu.matmul %4, %5, %cst {dimension_numbers = #tpu.dot_dimension_numbers<[1], [0], [0], [1], [0, 0, 1, 1], [], []>} : vector<512x640xbf16>, vector<640x128xbf16>, vector<512x128xf32> -> vector<512x128xf32>
    %7 = arith.addf %3, %6 : vector<512x128xf32>
    %c0_6 = arith.constant 0 : index
    %c0_7 = arith.constant 0 : index
    %8 = vector.load %arg8[%c0_6, %c0_7] : memref<512x128xf32, #tpu.memory_space<vmem>>, vector<512x128xf32>
    tpu.vector_store %arg8[%c0_6, %c0_7], %7 {strides = array<i32>} : memref<512x128xf32, #tpu.memory_space<vmem>>, vector<512x128xf32>,
    %c1_i32 = arith.constant 1 : i32
    %9 = arith.cmpi eq, %arg2, %c1_i32 : i32
    %10 = arith.extui %9 : i1 to i32
    %c0_i32_8 = arith.constant 0 : i32
    %11 = arith.cmpi ne, %10, %c0_i32_8 : i32
    scf.if %11 {
      %c0_9 = arith.constant 0 : index
      %c0_10 = arith.constant 0 : index
      %12 = vector.load %arg8[%c0_9, %c0_10] : memref<512x128xf32, #tpu.memory_space<vmem>>, vector<512x128xf32>
      %13 = arith.truncf %12 : vector<512x128xf32> to vector<512x128xbf16>
      %c0_11 = arith.constant 0 : index
      %c0_12 = arith.constant 0 : index
      %14 = vector.load %arg5[%c0_11, %c0_12] : memref<512x128xbf16, #tpu.memory_space<vmem>>, vector<512x128xbf16>
      tpu.vector_store %arg5[%c0_11, %c0_12], %13 {strides = array<i32>} : memref<512x128xbf16, #tpu.memory_space<vmem>>, vector<512x128xbf16>,
      %cst_13 = arith.constant dense<0.000000e+00> : vector<128xf32>
      %15 = vector.multi_reduction <add>, %12, %cst_13 [0] : vector<512x128xf32> to vector<128xf32>
      %16 = vector.shape_cast %15 : vector<128xf32> to vector<1x128xf32>
      %17 = arith.mulf %12, %12 : vector<512x128xf32>
      %cst_14 = arith.constant dense<0.000000e+00> : vector<128xf32>
      %18 = vector.multi_reduction <add>, %17, %cst_14 [0] : vector<512x128xf32> to vector<128xf32>
      %19 = vector.shape_cast %18 : vector<128xf32> to vector<1x128xf32>
      %20 = vector.shape_cast %16 : vector<1x128xf32> to vector<1x128xf32>
      %21 = vector.broadcast %20 : vector<1x128xf32> to vector<8x128xf32>
      %c0_15 = arith.constant 0 : index
      %c0_16 = arith.constant 0 : index
      %22 = vector.load %arg6[%c0_15, %c0_16] : memref<8x128xf32, #tpu.memory_space<vmem>>, vector<8x128xf32>
      tpu.vector_store %arg6[%c0_15, %c0_16], %21 {strides = array<i32>} : memref<8x128xf32, #tpu.memory_space<vmem>>, vector<8x128xf32>,
      %23 = vector.shape_cast %19 : vector<1x128xf32> to vector<1x128xf32>
      %24 = vector.broadcast %23 : vector<1x128xf32> to vector<8x128xf32>
      %c0_17 = arith.constant 0 : index
      %c0_18 = arith.constant 0 : index
      %25 = vector.load %arg7[%c0_17, %c0_18] : memref<8x128xf32, #tpu.memory_space<vmem>>, vector<8x128xf32>
      tpu.vector_store %arg7[%c0_17, %c0_18], %24 {strides = array<i32>} : memref<8x128xf32, #tpu.memory_space<vmem>>, vector<8x128xf32>,
    } else {
    }
    return
  }
  func.func @transform_0(%arg0: i32, %arg1: i32, %arg2: i32) -> (i32, i32) {
    %c0_i32 = arith.constant 0 : i32
    return %arg0, %arg2 : i32, i32
  }
  func.func @transform_1(%arg0: i32, %arg1: i32, %arg2: i32) -> (i32, i32) {
    %c0_i32 = arith.constant 0 : i32
    return %arg2, %arg1 : i32, i32
  }
  func.func @transform_2(%arg0: i32, %arg1: i32, %arg2: i32) -> (i32, i32) {
    %c0_i32 = arith.constant 0 : i32
    return %arg0, %arg1 : i32, i32
  }
  func.func @transform_3(%arg0: i32, %arg1: i32, %arg2: i32) -> (i32, i32) {
    %c0_i32 = arith.constant 0 : i32
    return %arg0, %arg1 : i32, i32
  }
  func.func @transform_4(%arg0: i32, %arg1: i32, %arg2: i32) -> (i32, i32) {
    %c0_i32 = arith.constant 0 : i32
    return %arg0, %arg1 : i32, i32
  }
}

module attributes {stable_mosaic.version = 11 : i64} {
  func.func @_bn_apply_kernel(%arg0: i32, %arg1: memref<512x128xbf16, #tpu.memory_space<vmem>>, %arg2: memref<1x128xf32, #tpu.memory_space<vmem>>, %arg3: memref<1x128xf32, #tpu.memory_space<vmem>>, %arg4: memref<512x128xbf16, #tpu.memory_space<vmem>>) attributes {dimension_semantics = [#tpu.dimension_semantics<parallel>], iteration_bounds = array<i64: 2>, scalar_prefetch = 0 : i64, scratch_operands = 0 : i64, tpu.core_type = #tpu.core_type<tc>, window_params = [{transform_indices = @transform_0, window_bounds = array<i64: 512, 128>}, {pipeline_mode = #tpu.pipeline_mode<synchronous>, transform_indices = @transform_1, window_bounds = array<i64: 1, 128>}, {pipeline_mode = #tpu.pipeline_mode<synchronous>, transform_indices = @transform_2, window_bounds = array<i64: 1, 128>}, {transform_indices = @transform_3, window_bounds = array<i64: 512, 128>}]} {
    %c0 = arith.constant 0 : index
    %c0_0 = arith.constant 0 : index
    %0 = vector.load %arg1[%c0, %c0_0] : memref<512x128xbf16, #tpu.memory_space<vmem>>, vector<512x128xbf16>
    %1 = arith.extf %0 : vector<512x128xbf16> to vector<512x128xf32>
    %c0_1 = arith.constant 0 : index
    %c0_2 = arith.constant 0 : index
    %2 = vector.load %arg2[%c0_1, %c0_2] : memref<1x128xf32, #tpu.memory_space<vmem>>, vector<1x128xf32>
    %3 = vector.broadcast %2 : vector<1x128xf32> to vector<512x128xf32>
    %4 = arith.mulf %1, %3 : vector<512x128xf32>
    %c0_3 = arith.constant 0 : index
    %c0_4 = arith.constant 0 : index
    %5 = vector.load %arg3[%c0_3, %c0_4] : memref<1x128xf32, #tpu.memory_space<vmem>>, vector<1x128xf32>
    %6 = vector.broadcast %5 : vector<1x128xf32> to vector<512x128xf32>
    %7 = arith.addf %4, %6 : vector<512x128xf32>
    %cst = arith.constant 0.000000e+00 : f32
    %8 = vector.broadcast %cst : f32 to vector<512x128xf32>
    %9 = arith.maximumf %7, %8 : vector<512x128xf32>
    %10 = arith.truncf %9 : vector<512x128xf32> to vector<512x128xbf16>
    %c0_5 = arith.constant 0 : index
    %c0_6 = arith.constant 0 : index
    %11 = vector.load %arg4[%c0_5, %c0_6] : memref<512x128xbf16, #tpu.memory_space<vmem>>, vector<512x128xbf16>
    tpu.vector_store %arg4[%c0_5, %c0_6], %10 {strides = array<i32>} : memref<512x128xbf16, #tpu.memory_space<vmem>>, vector<512x128xbf16>,
    return
  }
  func.func @transform_0(%arg0: i32) -> (i32, i32) {
    %c0_i32 = arith.constant 0 : i32
    %c0_i32_0 = arith.constant 0 : i32
    return %arg0, %c0_i32 : i32, i32
  }
  func.func @transform_1(%arg0: i32) -> (i32, i32) {
    %c0_i32 = arith.constant 0 : i32
    %c0_i32_0 = arith.constant 0 : i32
    %c0_i32_1 = arith.constant 0 : i32
    return %c0_i32, %c0_i32_0 : i32, i32
  }
  func.func @transform_2(%arg0: i32) -> (i32, i32) {
    %c0_i32 = arith.constant 0 : i32
    %c0_i32_0 = arith.constant 0 : i32
    %c0_i32_1 = arith.constant 0 : i32
    return %c0_i32, %c0_i32_0 : i32, i32
  }
  func.func @transform_3(%arg0: i32) -> (i32, i32) {
    %c0_i32 = arith.constant 0 : i32
    %c0_i32_0 = arith.constant 0 : i32
    return %arg0, %c0_i32 : i32, i32
  }
}

module attributes {stable_mosaic.version = 11 : i64} {
  func.func @_maxpool_kernel(%arg0: i32, %arg1: i32, %arg2: memref<1x16x128xbf16, #tpu.memory_space<vmem>>, %arg3: memref<16x128xbf16, #tpu.memory_space<vmem>>, %arg4: memref<16x128xbf16, #tpu.memory_space<vmem>>) attributes {dimension_semantics = [#tpu.dimension_semantics<parallel>, #tpu.dimension_semantics<arbitrary>], iteration_bounds = array<i64: 1, 27>, scalar_prefetch = 0 : i64, scratch_operands = 1 : i64, tpu.core_type = #tpu.core_type<tc>, window_params = [{transform_indices = @transform_0, window_bounds = array<i64: 1, 16, 128>}, {transform_indices = @transform_1, window_bounds = array<i64: 16, 128>}]} {
    %c0_i32 = arith.constant 0 : i32
    %0 = arith.cmpi eq, %arg1, %c0_i32 : i32
    %1 = arith.extui %0 : i1 to i32
    %c0_i32_0 = arith.constant 0 : i32
    %2 = arith.cmpi ne, %1, %c0_i32_0 : i32
    scf.if %2 {
      %cst = arith.constant 0xFF80 : bf16
      %11 = vector.broadcast %cst : bf16 to vector<16x128xbf16>
      %c0_8 = arith.constant 0 : index
      %c0_9 = arith.constant 0 : index
      %12 = vector.load %arg4[%c0_8, %c0_9] : memref<16x128xbf16, #tpu.memory_space<vmem>>, vector<16x128xbf16>
      tpu.vector_store %arg4[%c0_8, %c0_9], %11 {strides = array<i32>} : memref<16x128xbf16, #tpu.memory_space<vmem>>, vector<16x128xbf16>,
    } else {
    }
    %c0 = arith.constant 0 : index
    %c0_1 = arith.constant 0 : index
    %3 = vector.load %arg4[%c0, %c0_1] : memref<16x128xbf16, #tpu.memory_space<vmem>>, vector<16x128xbf16>
    %c0_2 = arith.constant 0 : index
    %c0_3 = arith.constant 0 : index
    %c0_4 = arith.constant 0 : index
    %4 = vector.load %arg2[%c0_2, %c0_3, %c0_4] : memref<1x16x128xbf16, #tpu.memory_space<vmem>>, vector<1x16x128xbf16>
    %5 = vector.shape_cast %4 : vector<1x16x128xbf16> to vector<16x128xbf16>
    %6 = arith.maximumf %3, %5 : vector<16x128xbf16>
    %c0_5 = arith.constant 0 : index
    %c0_6 = arith.constant 0 : index
    %7 = vector.load %arg4[%c0_5, %c0_6] : memref<16x128xbf16, #tpu.memory_space<vmem>>, vector<16x128xbf16>
    tpu.vector_store %arg4[%c0_5, %c0_6], %6 {strides = array<i32>} : memref<16x128xbf16, #tpu.memory_space<vmem>>, vector<16x128xbf16>,
    %c26_i32 = arith.constant 26 : i32
    %8 = arith.cmpi eq, %arg1, %c26_i32 : i32
    %9 = arith.extui %8 : i1 to i32
    %c0_i32_7 = arith.constant 0 : i32
    %10 = arith.cmpi ne, %9, %c0_i32_7 : i32
    scf.if %10 {
      %c0_8 = arith.constant 0 : index
      %c0_9 = arith.constant 0 : index
      %11 = vector.load %arg4[%c0_8, %c0_9] : memref<16x128xbf16, #tpu.memory_space<vmem>>, vector<16x128xbf16>
      %c0_10 = arith.constant 0 : index
      %c0_11 = arith.constant 0 : index
      %12 = vector.load %arg3[%c0_10, %c0_11] : memref<16x128xbf16, #tpu.memory_space<vmem>>, vector<16x128xbf16>
      tpu.vector_store %arg3[%c0_10, %c0_11], %11 {strides = array<i32>} : memref<16x128xbf16, #tpu.memory_space<vmem>>, vector<16x128xbf16>,
    } else {
    }
    return
  }
  func.func @transform_0(%arg0: i32, %arg1: i32) -> (i32, i32, i32) {
    %c0_i32 = arith.constant 0 : i32
    %c0_i32_0 = arith.constant 0 : i32
    return %arg1, %arg0, %c0_i32 : i32, i32, i32
  }
  func.func @transform_1(%arg0: i32, %arg1: i32) -> (i32, i32) {
    %c0_i32 = arith.constant 0 : i32
    %c0_i32_0 = arith.constant 0 : i32
    return %arg0, %c0_i32 : i32, i32
  }
}

module attributes {stable_mosaic.version = 11 : i64} {
  func.func @_bn_apply_kernel(%arg0: i32, %arg1: memref<128x128xbf16, #tpu.memory_space<vmem>>, %arg2: memref<1x128xf32, #tpu.memory_space<vmem>>, %arg3: memref<1x128xf32, #tpu.memory_space<vmem>>, %arg4: memref<128x128xbf16, #tpu.memory_space<vmem>>) attributes {dimension_semantics = [#tpu.dimension_semantics<parallel>], iteration_bounds = array<i64: 1>, scalar_prefetch = 0 : i64, scratch_operands = 0 : i64, tpu.core_type = #tpu.core_type<tc>, window_params = [{transform_indices = @transform_0, window_bounds = array<i64: 128, 128>}, {pipeline_mode = #tpu.pipeline_mode<synchronous>, transform_indices = @transform_1, window_bounds = array<i64: 1, 128>}, {pipeline_mode = #tpu.pipeline_mode<synchronous>, transform_indices = @transform_2, window_bounds = array<i64: 1, 128>}, {transform_indices = @transform_3, window_bounds = array<i64: 128, 128>}]} {
    %c0 = arith.constant 0 : index
    %c0_0 = arith.constant 0 : index
    %0 = vector.load %arg1[%c0, %c0_0] : memref<128x128xbf16, #tpu.memory_space<vmem>>, vector<128x128xbf16>
    %1 = arith.extf %0 : vector<128x128xbf16> to vector<128x128xf32>
    %c0_1 = arith.constant 0 : index
    %c0_2 = arith.constant 0 : index
    %2 = vector.load %arg2[%c0_1, %c0_2] : memref<1x128xf32, #tpu.memory_space<vmem>>, vector<1x128xf32>
    %3 = vector.broadcast %2 : vector<1x128xf32> to vector<128x128xf32>
    %4 = arith.mulf %1, %3 : vector<128x128xf32>
    %c0_3 = arith.constant 0 : index
    %c0_4 = arith.constant 0 : index
    %5 = vector.load %arg3[%c0_3, %c0_4] : memref<1x128xf32, #tpu.memory_space<vmem>>, vector<1x128xf32>
    %6 = vector.broadcast %5 : vector<1x128xf32> to vector<128x128xf32>
    %7 = arith.addf %4, %6 : vector<128x128xf32>
    %cst = arith.constant 0.000000e+00 : f32
    %8 = vector.broadcast %cst : f32 to vector<128x128xf32>
    %9 = arith.maximumf %7, %8 : vector<128x128xf32>
    %10 = arith.truncf %9 : vector<128x128xf32> to vector<128x128xbf16>
    %c0_5 = arith.constant 0 : index
    %c0_6 = arith.constant 0 : index
    %11 = vector.load %arg4[%c0_5, %c0_6] : memref<128x128xbf16, #tpu.memory_space<vmem>>, vector<128x128xbf16>
    tpu.vector_store %arg4[%c0_5, %c0_6], %10 {strides = array<i32>} : memref<128x128xbf16, #tpu.memory_space<vmem>>, vector<128x128xbf16>,
    return
  }
  func.func @transform_0(%arg0: i32) -> (i32, i32) {
    %c0_i32 = arith.constant 0 : i32
    %c0_i32_0 = arith.constant 0 : i32
    return %arg0, %c0_i32 : i32, i32
  }
  func.func @transform_1(%arg0: i32) -> (i32, i32) {
    %c0_i32 = arith.constant 0 : i32
    %c0_i32_0 = arith.constant 0 : i32
    %c0_i32_1 = arith.constant 0 : i32
    return %c0_i32, %c0_i32_0 : i32, i32
  }
  func.func @transform_2(%arg0: i32) -> (i32, i32) {
    %c0_i32 = arith.constant 0 : i32
    %c0_i32_0 = arith.constant 0 : i32
    %c0_i32_1 = arith.constant 0 : i32
    return %c0_i32, %c0_i32_0 : i32, i32
  }
  func.func @transform_3(%arg0: i32) -> (i32, i32) {
    %c0_i32 = arith.constant 0 : i32
    %c0_i32_0 = arith.constant 0 : i32
    return %arg0, %c0_i32 : i32, i32
  }
}

module attributes {stable_mosaic.version = 11 : i64} {
  func.func @_mm_stats_kernel(%arg0: i32, %arg1: i32, %arg2: i32, %arg3: memref<128x256xbf16, #tpu.memory_space<vmem>>, %arg4: memref<256x128xbf16, #tpu.memory_space<vmem>>, %arg5: memref<128x128xbf16, #tpu.memory_space<vmem>>, %arg6: memref<8x128xf32, #tpu.memory_space<vmem>>, %arg7: memref<8x128xf32, #tpu.memory_space<vmem>>, %arg8: memref<128x128xf32, #tpu.memory_space<vmem>>) attributes {dimension_semantics = [#tpu.dimension_semantics<parallel>, #tpu.dimension_semantics<parallel>, #tpu.dimension_semantics<arbitrary>], iteration_bounds = array<i64: 1, 1, 1>, scalar_prefetch = 0 : i64, scratch_operands = 1 : i64, tpu.core_type = #tpu.core_type<tc>, window_params = [{transform_indices = @transform_0, window_bounds = array<i64: 128, 256>}, {transform_indices = @transform_1, window_bounds = array<i64: 256, 128>}, {transform_indices = @transform_2, window_bounds = array<i64: 128, 128>}, {transform_indices = @transform_3, window_bounds = array<i64: 8, 128>}, {transform_indices = @transform_4, window_bounds = array<i64: 8, 128>}]} {
    %c0_i32 = arith.constant 0 : i32
    %0 = arith.cmpi eq, %arg2, %c0_i32 : i32
    %1 = arith.extui %0 : i1 to i32
    %c0_i32_0 = arith.constant 0 : i32
    %2 = arith.cmpi ne, %1, %c0_i32_0 : i32
    scf.if %2 {
      %cst_10 = arith.constant 0.000000e+00 : f32
      %12 = vector.broadcast %cst_10 : f32 to vector<128x128xf32>
      %c0_11 = arith.constant 0 : index
      %c0_12 = arith.constant 0 : index
      %13 = vector.load %arg8[%c0_11, %c0_12] : memref<128x128xf32, #tpu.memory_space<vmem>>, vector<128x128xf32>
      tpu.vector_store %arg8[%c0_11, %c0_12], %12 {strides = array<i32>} : memref<128x128xf32, #tpu.memory_space<vmem>>, vector<128x128xf32>,
    } else {
    }
    %c0 = arith.constant 0 : index
    %c0_1 = arith.constant 0 : index
    %3 = vector.load %arg8[%c0, %c0_1] : memref<128x128xf32, #tpu.memory_space<vmem>>, vector<128x128xf32>
    %c0_2 = arith.constant 0 : index
    %c0_3 = arith.constant 0 : index
    %4 = vector.load %arg3[%c0_2, %c0_3] : memref<128x256xbf16, #tpu.memory_space<vmem>>, vector<128x256xbf16>
    %c0_4 = arith.constant 0 : index
    %c0_5 = arith.constant 0 : index
    %5 = vector.load %arg4[%c0_4, %c0_5] : memref<256x128xbf16, #tpu.memory_space<vmem>>, vector<256x128xbf16>
    %cst = arith.constant dense<0.000000e+00> : vector<128x128xf32>
    %6 = tpu.matmul %4, %5, %cst {dimension_numbers = #tpu.dot_dimension_numbers<[1], [0], [0], [1], [0, 0, 1, 1], [], []>} : vector<128x256xbf16>, vector<256x128xbf16>, vector<128x128xf32> -> vector<128x128xf32>
    %7 = arith.addf %3, %6 : vector<128x128xf32>
    %c0_6 = arith.constant 0 : index
    %c0_7 = arith.constant 0 : index
    %8 = vector.load %arg8[%c0_6, %c0_7] : memref<128x128xf32, #tpu.memory_space<vmem>>, vector<128x128xf32>
    tpu.vector_store %arg8[%c0_6, %c0_7], %7 {strides = array<i32>} : memref<128x128xf32, #tpu.memory_space<vmem>>, vector<128x128xf32>,
    %c0_i32_8 = arith.constant 0 : i32
    %9 = arith.cmpi eq, %arg2, %c0_i32_8 : i32
    %10 = arith.extui %9 : i1 to i32
    %c0_i32_9 = arith.constant 0 : i32
    %11 = arith.cmpi ne, %10, %c0_i32_9 : i32
    scf.if %11 {
      %c0_10 = arith.constant 0 : index
      %c0_11 = arith.constant 0 : index
      %12 = vector.load %arg8[%c0_10, %c0_11] : memref<128x128xf32, #tpu.memory_space<vmem>>, vector<128x128xf32>
      %13 = arith.truncf %12 : vector<128x128xf32> to vector<128x128xbf16>
      %c0_12 = arith.constant 0 : index
      %c0_13 = arith.constant 0 : index
      %14 = vector.load %arg5[%c0_12, %c0_13] : memref<128x128xbf16, #tpu.memory_space<vmem>>, vector<128x128xbf16>
      tpu.vector_store %arg5[%c0_12, %c0_13], %13 {strides = array<i32>} : memref<128x128xbf16, #tpu.memory_space<vmem>>, vector<128x128xbf16>,
      %cst_14 = arith.constant dense<0.000000e+00> : vector<128xf32>
      %15 = vector.multi_reduction <add>, %12, %cst_14 [0] : vector<128x128xf32> to vector<128xf32>
      %16 = vector.shape_cast %15 : vector<128xf32> to vector<1x128xf32>
      %17 = arith.mulf %12, %12 : vector<128x128xf32>
      %cst_15 = arith.constant dense<0.000000e+00> : vector<128xf32>
      %18 = vector.multi_reduction <add>, %17, %cst_15 [0] : vector<128x128xf32> to vector<128xf32>
      %19 = vector.shape_cast %18 : vector<128xf32> to vector<1x128xf32>
      %20 = vector.shape_cast %16 : vector<1x128xf32> to vector<1x128xf32>
      %21 = vector.broadcast %20 : vector<1x128xf32> to vector<8x128xf32>
      %c0_16 = arith.constant 0 : index
      %c0_17 = arith.constant 0 : index
      %22 = vector.load %arg6[%c0_16, %c0_17] : memref<8x128xf32, #tpu.memory_space<vmem>>, vector<8x128xf32>
      tpu.vector_store %arg6[%c0_16, %c0_17], %21 {strides = array<i32>} : memref<8x128xf32, #tpu.memory_space<vmem>>, vector<8x128xf32>,
      %23 = vector.shape_cast %19 : vector<1x128xf32> to vector<1x128xf32>
      %24 = vector.broadcast %23 : vector<1x128xf32> to vector<8x128xf32>
      %c0_18 = arith.constant 0 : index
      %c0_19 = arith.constant 0 : index
      %25 = vector.load %arg7[%c0_18, %c0_19] : memref<8x128xf32, #tpu.memory_space<vmem>>, vector<8x128xf32>
      tpu.vector_store %arg7[%c0_18, %c0_19], %24 {strides = array<i32>} : memref<8x128xf32, #tpu.memory_space<vmem>>, vector<8x128xf32>,
    } else {
    }
    return
  }
  func.func @transform_0(%arg0: i32, %arg1: i32, %arg2: i32) -> (i32, i32) {
    %c0_i32 = arith.constant 0 : i32
    return %arg0, %arg2 : i32, i32
  }
  func.func @transform_1(%arg0: i32, %arg1: i32, %arg2: i32) -> (i32, i32) {
    %c0_i32 = arith.constant 0 : i32
    return %arg2, %arg1 : i32, i32
  }
  func.func @transform_2(%arg0: i32, %arg1: i32, %arg2: i32) -> (i32, i32) {
    %c0_i32 = arith.constant 0 : i32
    return %arg0, %arg1 : i32, i32
  }
  func.func @transform_3(%arg0: i32, %arg1: i32, %arg2: i32) -> (i32, i32) {
    %c0_i32 = arith.constant 0 : i32
    return %arg0, %arg1 : i32, i32
  }
  func.func @transform_4(%arg0: i32, %arg1: i32, %arg2: i32) -> (i32, i32) {
    %c0_i32 = arith.constant 0 : i32
    return %arg0, %arg1 : i32, i32
  }
}

module attributes {stable_mosaic.version = 11 : i64} {
  func.func @_bn_apply_kernel(%arg0: i32, %arg1: memref<128x128xbf16, #tpu.memory_space<vmem>>, %arg2: memref<1x128xf32, #tpu.memory_space<vmem>>, %arg3: memref<1x128xf32, #tpu.memory_space<vmem>>, %arg4: memref<128x128xbf16, #tpu.memory_space<vmem>>, %arg5: memref<128x128xbf16, #tpu.memory_space<vmem>>) attributes {dimension_semantics = [#tpu.dimension_semantics<parallel>], iteration_bounds = array<i64: 1>, scalar_prefetch = 0 : i64, scratch_operands = 0 : i64, tpu.core_type = #tpu.core_type<tc>, window_params = [{transform_indices = @transform_0, window_bounds = array<i64: 128, 128>}, {pipeline_mode = #tpu.pipeline_mode<synchronous>, transform_indices = @transform_1, window_bounds = array<i64: 1, 128>}, {pipeline_mode = #tpu.pipeline_mode<synchronous>, transform_indices = @transform_2, window_bounds = array<i64: 1, 128>}, {transform_indices = @transform_3, window_bounds = array<i64: 128, 128>}, {transform_indices = @transform_4, window_bounds = array<i64: 128, 128>}]} {
    %c0 = arith.constant 0 : index
    %c0_0 = arith.constant 0 : index
    %0 = vector.load %arg1[%c0, %c0_0] : memref<128x128xbf16, #tpu.memory_space<vmem>>, vector<128x128xbf16>
    %1 = arith.extf %0 : vector<128x128xbf16> to vector<128x128xf32>
    %c0_1 = arith.constant 0 : index
    %c0_2 = arith.constant 0 : index
    %2 = vector.load %arg2[%c0_1, %c0_2] : memref<1x128xf32, #tpu.memory_space<vmem>>, vector<1x128xf32>
    %3 = vector.broadcast %2 : vector<1x128xf32> to vector<128x128xf32>
    %4 = arith.mulf %1, %3 : vector<128x128xf32>
    %c0_3 = arith.constant 0 : index
    %c0_4 = arith.constant 0 : index
    %5 = vector.load %arg3[%c0_3, %c0_4] : memref<1x128xf32, #tpu.memory_space<vmem>>, vector<1x128xf32>
    %6 = vector.broadcast %5 : vector<1x128xf32> to vector<128x128xf32>
    %7 = arith.addf %4, %6 : vector<128x128xf32>
    %c0_5 = arith.constant 0 : index
    %c0_6 = arith.constant 0 : index
    %8 = vector.load %arg4[%c0_5, %c0_6] : memref<128x128xbf16, #tpu.memory_space<vmem>>, vector<128x128xbf16>
    %9 = arith.extf %8 : vector<128x128xbf16> to vector<128x128xf32>
    %10 = arith.addf %7, %9 : vector<128x128xf32>
    %cst = arith.constant 0.000000e+00 : f32
    %11 = vector.broadcast %cst : f32 to vector<128x128xf32>
    %12 = arith.maximumf %10, %11 : vector<128x128xf32>
    %13 = arith.truncf %12 : vector<128x128xf32> to vector<128x128xbf16>
    %c0_7 = arith.constant 0 : index
    %c0_8 = arith.constant 0 : index
    %14 = vector.load %arg5[%c0_7, %c0_8] : memref<128x128xbf16, #tpu.memory_space<vmem>>, vector<128x128xbf16>
    tpu.vector_store %arg5[%c0_7, %c0_8], %13 {strides = array<i32>} : memref<128x128xbf16, #tpu.memory_space<vmem>>, vector<128x128xbf16>,
    return
  }
  func.func @transform_0(%arg0: i32) -> (i32, i32) {
    %c0_i32 = arith.constant 0 : i32
    %c0_i32_0 = arith.constant 0 : i32
    return %arg0, %c0_i32 : i32, i32
  }
  func.func @transform_1(%arg0: i32) -> (i32, i32) {
    %c0_i32 = arith.constant 0 : i32
    %c0_i32_0 = arith.constant 0 : i32
    %c0_i32_1 = arith.constant 0 : i32
    return %c0_i32, %c0_i32_0 : i32, i32
  }
  func.func @transform_2(%arg0: i32) -> (i32, i32) {
    %c0_i32 = arith.constant 0 : i32
    %c0_i32_0 = arith.constant 0 : i32
    %c0_i32_1 = arith.constant 0 : i32
    return %c0_i32, %c0_i32_0 : i32, i32
  }
  func.func @transform_3(%arg0: i32) -> (i32, i32) {
    %c0_i32 = arith.constant 0 : i32
    %c0_i32_0 = arith.constant 0 : i32
    return %arg0, %c0_i32 : i32, i32
  }
  func.func @transform_4(%arg0: i32) -> (i32, i32) {
    %c0_i32 = arith.constant 0 : i32
    %c0_i32_0 = arith.constant 0 : i32
    return %arg0, %c0_i32 : i32, i32
  }
}

module attributes {stable_mosaic.version = 11 : i64} {
  func.func @_bn_apply_kernel(%arg0: i32, %arg1: memref<16x128xbf16, #tpu.memory_space<vmem>>, %arg2: memref<1x128xf32, #tpu.memory_space<vmem>>, %arg3: memref<1x128xf32, #tpu.memory_space<vmem>>, %arg4: memref<16x128xbf16, #tpu.memory_space<vmem>>) attributes {dimension_semantics = [#tpu.dimension_semantics<parallel>], iteration_bounds = array<i64: 1>, scalar_prefetch = 0 : i64, scratch_operands = 0 : i64, tpu.core_type = #tpu.core_type<tc>, window_params = [{transform_indices = @transform_0, window_bounds = array<i64: 16, 128>}, {pipeline_mode = #tpu.pipeline_mode<synchronous>, transform_indices = @transform_1, window_bounds = array<i64: 1, 128>}, {pipeline_mode = #tpu.pipeline_mode<synchronous>, transform_indices = @transform_2, window_bounds = array<i64: 1, 128>}, {transform_indices = @transform_3, window_bounds = array<i64: 16, 128>}]} {
    %c0 = arith.constant 0 : index
    %c0_0 = arith.constant 0 : index
    %0 = vector.load %arg1[%c0, %c0_0] : memref<16x128xbf16, #tpu.memory_space<vmem>>, vector<16x128xbf16>
    %1 = arith.extf %0 : vector<16x128xbf16> to vector<16x128xf32>
    %c0_1 = arith.constant 0 : index
    %c0_2 = arith.constant 0 : index
    %2 = vector.load %arg2[%c0_1, %c0_2] : memref<1x128xf32, #tpu.memory_space<vmem>>, vector<1x128xf32>
    %3 = vector.broadcast %2 : vector<1x128xf32> to vector<16x128xf32>
    %4 = arith.mulf %1, %3 : vector<16x128xf32>
    %c0_3 = arith.constant 0 : index
    %c0_4 = arith.constant 0 : index
    %5 = vector.load %arg3[%c0_3, %c0_4] : memref<1x128xf32, #tpu.memory_space<vmem>>, vector<1x128xf32>
    %6 = vector.broadcast %5 : vector<1x128xf32> to vector<16x128xf32>
    %7 = arith.addf %4, %6 : vector<16x128xf32>
    %8 = arith.truncf %7 : vector<16x128xf32> to vector<16x128xbf16>
    %c0_5 = arith.constant 0 : index
    %c0_6 = arith.constant 0 : index
    %9 = vector.load %arg4[%c0_5, %c0_6] : memref<16x128xbf16, #tpu.memory_space<vmem>>, vector<16x128xbf16>
    tpu.vector_store %arg4[%c0_5, %c0_6], %8 {strides = array<i32>} : memref<16x128xbf16, #tpu.memory_space<vmem>>, vector<16x128xbf16>,
    return
  }
  func.func @transform_0(%arg0: i32) -> (i32, i32) {
    %c0_i32 = arith.constant 0 : i32
    %c0_i32_0 = arith.constant 0 : i32
    return %arg0, %c0_i32 : i32, i32
  }
  func.func @transform_1(%arg0: i32) -> (i32, i32) {
    %c0_i32 = arith.constant 0 : i32
    %c0_i32_0 = arith.constant 0 : i32
    %c0_i32_1 = arith.constant 0 : i32
    return %c0_i32, %c0_i32_0 : i32, i32
  }
  func.func @transform_2(%arg0: i32) -> (i32, i32) {
    %c0_i32 = arith.constant 0 : i32
    %c0_i32_0 = arith.constant 0 : i32
    %c0_i32_1 = arith.constant 0 : i32
    return %c0_i32, %c0_i32_0 : i32, i32
  }
  func.func @transform_3(%arg0: i32) -> (i32, i32) {
    %c0_i32 = arith.constant 0 : i32
    %c0_i32_0 = arith.constant 0 : i32
    return %arg0, %c0_i32 : i32, i32
  }
}

module attributes {stable_mosaic.version = 11 : i64} {
  func.func @_mm_stats_kernel(%arg0: i32, %arg1: i32, %arg2: i32, %arg3: memref<16x128xbf16, #tpu.memory_space<vmem>>, %arg4: memref<128x128xbf16, #tpu.memory_space<vmem>>, %arg5: memref<16x128xbf16, #tpu.memory_space<vmem>>, %arg6: memref<8x128xf32, #tpu.memory_space<vmem>>, %arg7: memref<8x128xf32, #tpu.memory_space<vmem>>, %arg8: memref<16x128xf32, #tpu.memory_space<vmem>>) attributes {dimension_semantics = [#tpu.dimension_semantics<parallel>, #tpu.dimension_semantics<parallel>, #tpu.dimension_semantics<arbitrary>], iteration_bounds = array<i64: 1, 1, 1>, scalar_prefetch = 0 : i64, scratch_operands = 1 : i64, tpu.core_type = #tpu.core_type<tc>, window_params = [{transform_indices = @transform_0, window_bounds = array<i64: 16, 128>}, {transform_indices = @transform_1, window_bounds = array<i64: 128, 128>}, {transform_indices = @transform_2, window_bounds = array<i64: 16, 128>}, {transform_indices = @transform_3, window_bounds = array<i64: 8, 128>}, {transform_indices = @transform_4, window_bounds = array<i64: 8, 128>}]} {
    %c0_i32 = arith.constant 0 : i32
    %0 = arith.cmpi eq, %arg2, %c0_i32 : i32
    %1 = arith.extui %0 : i1 to i32
    %c0_i32_0 = arith.constant 0 : i32
    %2 = arith.cmpi ne, %1, %c0_i32_0 : i32
    scf.if %2 {
      %cst_10 = arith.constant 0.000000e+00 : f32
      %12 = vector.broadcast %cst_10 : f32 to vector<16x128xf32>
      %c0_11 = arith.constant 0 : index
      %c0_12 = arith.constant 0 : index
      %13 = vector.load %arg8[%c0_11, %c0_12] : memref<16x128xf32, #tpu.memory_space<vmem>>, vector<16x128xf32>
      tpu.vector_store %arg8[%c0_11, %c0_12], %12 {strides = array<i32>} : memref<16x128xf32, #tpu.memory_space<vmem>>, vector<16x128xf32>,
    } else {
    }
    %c0 = arith.constant 0 : index
    %c0_1 = arith.constant 0 : index
    %3 = vector.load %arg8[%c0, %c0_1] : memref<16x128xf32, #tpu.memory_space<vmem>>, vector<16x128xf32>
    %c0_2 = arith.constant 0 : index
    %c0_3 = arith.constant 0 : index
    %4 = vector.load %arg3[%c0_2, %c0_3] : memref<16x128xbf16, #tpu.memory_space<vmem>>, vector<16x128xbf16>
    %c0_4 = arith.constant 0 : index
    %c0_5 = arith.constant 0 : index
    %5 = vector.load %arg4[%c0_4, %c0_5] : memref<128x128xbf16, #tpu.memory_space<vmem>>, vector<128x128xbf16>
    %cst = arith.constant dense<0.000000e+00> : vector<16x128xf32>
    %6 = tpu.matmul %4, %5, %cst {dimension_numbers = #tpu.dot_dimension_numbers<[1], [0], [0], [1], [0, 0, 1, 1], [], []>} : vector<16x128xbf16>, vector<128x128xbf16>, vector<16x128xf32> -> vector<16x128xf32>
    %7 = arith.addf %3, %6 : vector<16x128xf32>
    %c0_6 = arith.constant 0 : index
    %c0_7 = arith.constant 0 : index
    %8 = vector.load %arg8[%c0_6, %c0_7] : memref<16x128xf32, #tpu.memory_space<vmem>>, vector<16x128xf32>
    tpu.vector_store %arg8[%c0_6, %c0_7], %7 {strides = array<i32>} : memref<16x128xf32, #tpu.memory_space<vmem>>, vector<16x128xf32>,
    %c0_i32_8 = arith.constant 0 : i32
    %9 = arith.cmpi eq, %arg2, %c0_i32_8 : i32
    %10 = arith.extui %9 : i1 to i32
    %c0_i32_9 = arith.constant 0 : i32
    %11 = arith.cmpi ne, %10, %c0_i32_9 : i32
    scf.if %11 {
      %c0_10 = arith.constant 0 : index
      %c0_11 = arith.constant 0 : index
      %12 = vector.load %arg8[%c0_10, %c0_11] : memref<16x128xf32, #tpu.memory_space<vmem>>, vector<16x128xf32>
      %13 = arith.truncf %12 : vector<16x128xf32> to vector<16x128xbf16>
      %c0_12 = arith.constant 0 : index
      %c0_13 = arith.constant 0 : index
      %14 = vector.load %arg5[%c0_12, %c0_13] : memref<16x128xbf16, #tpu.memory_space<vmem>>, vector<16x128xbf16>
      tpu.vector_store %arg5[%c0_12, %c0_13], %13 {strides = array<i32>} : memref<16x128xbf16, #tpu.memory_space<vmem>>, vector<16x128xbf16>,
      %cst_14 = arith.constant dense<0.000000e+00> : vector<128xf32>
      %15 = vector.multi_reduction <add>, %12, %cst_14 [0] : vector<16x128xf32> to vector<128xf32>
      %16 = vector.shape_cast %15 : vector<128xf32> to vector<1x128xf32>
      %17 = arith.mulf %12, %12 : vector<16x128xf32>
      %cst_15 = arith.constant dense<0.000000e+00> : vector<128xf32>
      %18 = vector.multi_reduction <add>, %17, %cst_15 [0] : vector<16x128xf32> to vector<128xf32>
      %19 = vector.shape_cast %18 : vector<128xf32> to vector<1x128xf32>
      %20 = vector.shape_cast %16 : vector<1x128xf32> to vector<1x128xf32>
      %21 = vector.broadcast %20 : vector<1x128xf32> to vector<8x128xf32>
      %c0_16 = arith.constant 0 : index
      %c0_17 = arith.constant 0 : index
      %22 = vector.load %arg6[%c0_16, %c0_17] : memref<8x128xf32, #tpu.memory_space<vmem>>, vector<8x128xf32>
      tpu.vector_store %arg6[%c0_16, %c0_17], %21 {strides = array<i32>} : memref<8x128xf32, #tpu.memory_space<vmem>>, vector<8x128xf32>,
      %23 = vector.shape_cast %19 : vector<1x128xf32> to vector<1x128xf32>
      %24 = vector.broadcast %23 : vector<1x128xf32> to vector<8x128xf32>
      %c0_18 = arith.constant 0 : index
      %c0_19 = arith.constant 0 : index
      %25 = vector.load %arg7[%c0_18, %c0_19] : memref<8x128xf32, #tpu.memory_space<vmem>>, vector<8x128xf32>
      tpu.vector_store %arg7[%c0_18, %c0_19], %24 {strides = array<i32>} : memref<8x128xf32, #tpu.memory_space<vmem>>, vector<8x128xf32>,
    } else {
    }
    return
  }
  func.func @transform_0(%arg0: i32, %arg1: i32, %arg2: i32) -> (i32, i32) {
    %c0_i32 = arith.constant 0 : i32
    return %arg0, %arg2 : i32, i32
  }
  func.func @transform_1(%arg0: i32, %arg1: i32, %arg2: i32) -> (i32, i32) {
    %c0_i32 = arith.constant 0 : i32
    return %arg2, %arg1 : i32, i32
  }
  func.func @transform_2(%arg0: i32, %arg1: i32, %arg2: i32) -> (i32, i32) {
    %c0_i32 = arith.constant 0 : i32
    return %arg0, %arg1 : i32, i32
  }
  func.func @transform_3(%arg0: i32, %arg1: i32, %arg2: i32) -> (i32, i32) {
    %c0_i32 = arith.constant 0 : i32
    return %arg0, %arg1 : i32, i32
  }
  func.func @transform_4(%arg0: i32, %arg1: i32, %arg2: i32) -> (i32, i32) {
    %c0_i32 = arith.constant 0 : i32
    return %arg0, %arg1 : i32, i32
  }
}

module attributes {stable_mosaic.version = 11 : i64} {
  func.func @_mm_stats_kernel(%arg0: i32, %arg1: i32, %arg2: i32, %arg3: memref<16x256xbf16, #tpu.memory_space<vmem>>, %arg4: memref<256x128xbf16, #tpu.memory_space<vmem>>, %arg5: memref<16x128xbf16, #tpu.memory_space<vmem>>, %arg6: memref<8x128xf32, #tpu.memory_space<vmem>>, %arg7: memref<8x128xf32, #tpu.memory_space<vmem>>, %arg8: memref<16x128xf32, #tpu.memory_space<vmem>>) attributes {dimension_semantics = [#tpu.dimension_semantics<parallel>, #tpu.dimension_semantics<parallel>, #tpu.dimension_semantics<arbitrary>], iteration_bounds = array<i64: 1, 1, 1>, scalar_prefetch = 0 : i64, scratch_operands = 1 : i64, tpu.core_type = #tpu.core_type<tc>, window_params = [{transform_indices = @transform_0, window_bounds = array<i64: 16, 256>}, {transform_indices = @transform_1, window_bounds = array<i64: 256, 128>}, {transform_indices = @transform_2, window_bounds = array<i64: 16, 128>}, {transform_indices = @transform_3, window_bounds = array<i64: 8, 128>}, {transform_indices = @transform_4, window_bounds = array<i64: 8, 128>}]} {
    %c0_i32 = arith.constant 0 : i32
    %0 = arith.cmpi eq, %arg2, %c0_i32 : i32
    %1 = arith.extui %0 : i1 to i32
    %c0_i32_0 = arith.constant 0 : i32
    %2 = arith.cmpi ne, %1, %c0_i32_0 : i32
    scf.if %2 {
      %cst_10 = arith.constant 0.000000e+00 : f32
      %12 = vector.broadcast %cst_10 : f32 to vector<16x128xf32>
      %c0_11 = arith.constant 0 : index
      %c0_12 = arith.constant 0 : index
      %13 = vector.load %arg8[%c0_11, %c0_12] : memref<16x128xf32, #tpu.memory_space<vmem>>, vector<16x128xf32>
      tpu.vector_store %arg8[%c0_11, %c0_12], %12 {strides = array<i32>} : memref<16x128xf32, #tpu.memory_space<vmem>>, vector<16x128xf32>,
    } else {
    }
    %c0 = arith.constant 0 : index
    %c0_1 = arith.constant 0 : index
    %3 = vector.load %arg8[%c0, %c0_1] : memref<16x128xf32, #tpu.memory_space<vmem>>, vector<16x128xf32>
    %c0_2 = arith.constant 0 : index
    %c0_3 = arith.constant 0 : index
    %4 = vector.load %arg3[%c0_2, %c0_3] : memref<16x256xbf16, #tpu.memory_space<vmem>>, vector<16x256xbf16>
    %c0_4 = arith.constant 0 : index
    %c0_5 = arith.constant 0 : index
    %5 = vector.load %arg4[%c0_4, %c0_5] : memref<256x128xbf16, #tpu.memory_space<vmem>>, vector<256x128xbf16>
    %cst = arith.constant dense<0.000000e+00> : vector<16x128xf32>
    %6 = tpu.matmul %4, %5, %cst {dimension_numbers = #tpu.dot_dimension_numbers<[1], [0], [0], [1], [0, 0, 1, 1], [], []>} : vector<16x256xbf16>, vector<256x128xbf16>, vector<16x128xf32> -> vector<16x128xf32>
    %7 = arith.addf %3, %6 : vector<16x128xf32>
    %c0_6 = arith.constant 0 : index
    %c0_7 = arith.constant 0 : index
    %8 = vector.load %arg8[%c0_6, %c0_7] : memref<16x128xf32, #tpu.memory_space<vmem>>, vector<16x128xf32>
    tpu.vector_store %arg8[%c0_6, %c0_7], %7 {strides = array<i32>} : memref<16x128xf32, #tpu.memory_space<vmem>>, vector<16x128xf32>,
    %c0_i32_8 = arith.constant 0 : i32
    %9 = arith.cmpi eq, %arg2, %c0_i32_8 : i32
    %10 = arith.extui %9 : i1 to i32
    %c0_i32_9 = arith.constant 0 : i32
    %11 = arith.cmpi ne, %10, %c0_i32_9 : i32
    scf.if %11 {
      %c0_10 = arith.constant 0 : index
      %c0_11 = arith.constant 0 : index
      %12 = vector.load %arg8[%c0_10, %c0_11] : memref<16x128xf32, #tpu.memory_space<vmem>>, vector<16x128xf32>
      %13 = arith.truncf %12 : vector<16x128xf32> to vector<16x128xbf16>
      %c0_12 = arith.constant 0 : index
      %c0_13 = arith.constant 0 : index
      %14 = vector.load %arg5[%c0_12, %c0_13] : memref<16x128xbf16, #tpu.memory_space<vmem>>, vector<16x128xbf16>
      tpu.vector_store %arg5[%c0_12, %c0_13], %13 {strides = array<i32>} : memref<16x128xbf16, #tpu.memory_space<vmem>>, vector<16x128xbf16>,
      %cst_14 = arith.constant dense<0.000000e+00> : vector<128xf32>
      %15 = vector.multi_reduction <add>, %12, %cst_14 [0] : vector<16x128xf32> to vector<128xf32>
      %16 = vector.shape_cast %15 : vector<128xf32> to vector<1x128xf32>
      %17 = arith.mulf %12, %12 : vector<16x128xf32>
      %cst_15 = arith.constant dense<0.000000e+00> : vector<128xf32>
      %18 = vector.multi_reduction <add>, %17, %cst_15 [0] : vector<16x128xf32> to vector<128xf32>
      %19 = vector.shape_cast %18 : vector<128xf32> to vector<1x128xf32>
      %20 = vector.shape_cast %16 : vector<1x128xf32> to vector<1x128xf32>
      %21 = vector.broadcast %20 : vector<1x128xf32> to vector<8x128xf32>
      %c0_16 = arith.constant 0 : index
      %c0_17 = arith.constant 0 : index
      %22 = vector.load %arg6[%c0_16, %c0_17] : memref<8x128xf32, #tpu.memory_space<vmem>>, vector<8x128xf32>
      tpu.vector_store %arg6[%c0_16, %c0_17], %21 {strides = array<i32>} : memref<8x128xf32, #tpu.memory_space<vmem>>, vector<8x128xf32>,
      %23 = vector.shape_cast %19 : vector<1x128xf32> to vector<1x128xf32>
      %24 = vector.broadcast %23 : vector<1x128xf32> to vector<8x128xf32>
      %c0_18 = arith.constant 0 : index
      %c0_19 = arith.constant 0 : index
      %25 = vector.load %arg7[%c0_18, %c0_19] : memref<8x128xf32, #tpu.memory_space<vmem>>, vector<8x128xf32>
      tpu.vector_store %arg7[%c0_18, %c0_19], %24 {strides = array<i32>} : memref<8x128xf32, #tpu.memory_space<vmem>>, vector<8x128xf32>,
    } else {
    }
    return
  }
  func.func @transform_0(%arg0: i32, %arg1: i32, %arg2: i32) -> (i32, i32) {
    %c0_i32 = arith.constant 0 : i32
    return %arg0, %arg2 : i32, i32
  }
  func.func @transform_1(%arg0: i32, %arg1: i32, %arg2: i32) -> (i32, i32) {
    %c0_i32 = arith.constant 0 : i32
    return %arg2, %arg1 : i32, i32
  }
  func.func @transform_2(%arg0: i32, %arg1: i32, %arg2: i32) -> (i32, i32) {
    %c0_i32 = arith.constant 0 : i32
    return %arg0, %arg1 : i32, i32
  }
  func.func @transform_3(%arg0: i32, %arg1: i32, %arg2: i32) -> (i32, i32) {
    %c0_i32 = arith.constant 0 : i32
    return %arg0, %arg1 : i32, i32
  }
  func.func @transform_4(%arg0: i32, %arg1: i32, %arg2: i32) -> (i32, i32) {
    %c0_i32 = arith.constant 0 : i32
    return %arg0, %arg1 : i32, i32
  }
}

module attributes {stable_mosaic.version = 11 : i64} {
  func.func @_bn_apply_kernel(%arg0: i32, %arg1: memref<16x128xbf16, #tpu.memory_space<vmem>>, %arg2: memref<1x128xf32, #tpu.memory_space<vmem>>, %arg3: memref<1x128xf32, #tpu.memory_space<vmem>>, %arg4: memref<16x128xbf16, #tpu.memory_space<vmem>>) attributes {dimension_semantics = [#tpu.dimension_semantics<parallel>], iteration_bounds = array<i64: 1>, scalar_prefetch = 0 : i64, scratch_operands = 0 : i64, tpu.core_type = #tpu.core_type<tc>, window_params = [{transform_indices = @transform_0, window_bounds = array<i64: 16, 128>}, {pipeline_mode = #tpu.pipeline_mode<synchronous>, transform_indices = @transform_1, window_bounds = array<i64: 1, 128>}, {pipeline_mode = #tpu.pipeline_mode<synchronous>, transform_indices = @transform_2, window_bounds = array<i64: 1, 128>}, {transform_indices = @transform_3, window_bounds = array<i64: 16, 128>}]} {
    %c0 = arith.constant 0 : index
    %c0_0 = arith.constant 0 : index
    %0 = vector.load %arg1[%c0, %c0_0] : memref<16x128xbf16, #tpu.memory_space<vmem>>, vector<16x128xbf16>
    %1 = arith.extf %0 : vector<16x128xbf16> to vector<16x128xf32>
    %c0_1 = arith.constant 0 : index
    %c0_2 = arith.constant 0 : index
    %2 = vector.load %arg2[%c0_1, %c0_2] : memref<1x128xf32, #tpu.memory_space<vmem>>, vector<1x128xf32>
    %3 = vector.broadcast %2 : vector<1x128xf32> to vector<16x128xf32>
    %4 = arith.mulf %1, %3 : vector<16x128xf32>
    %c0_3 = arith.constant 0 : index
    %c0_4 = arith.constant 0 : index
    %5 = vector.load %arg3[%c0_3, %c0_4] : memref<1x128xf32, #tpu.memory_space<vmem>>, vector<1x128xf32>
    %6 = vector.broadcast %5 : vector<1x128xf32> to vector<16x128xf32>
    %7 = arith.addf %4, %6 : vector<16x128xf32>
    %cst = arith.constant 0.000000e+00 : f32
    %8 = vector.broadcast %cst : f32 to vector<16x128xf32>
    %9 = arith.maximumf %7, %8 : vector<16x128xf32>
    %10 = arith.truncf %9 : vector<16x128xf32> to vector<16x128xbf16>
    %c0_5 = arith.constant 0 : index
    %c0_6 = arith.constant 0 : index
    %11 = vector.load %arg4[%c0_5, %c0_6] : memref<16x128xbf16, #tpu.memory_space<vmem>>, vector<16x128xbf16>
    tpu.vector_store %arg4[%c0_5, %c0_6], %10 {strides = array<i32>} : memref<16x128xbf16, #tpu.memory_space<vmem>>, vector<16x128xbf16>,
    return
  }
  func.func @transform_0(%arg0: i32) -> (i32, i32) {
    %c0_i32 = arith.constant 0 : i32
    %c0_i32_0 = arith.constant 0 : i32
    return %arg0, %c0_i32 : i32, i32
  }
  func.func @transform_1(%arg0: i32) -> (i32, i32) {
    %c0_i32 = arith.constant 0 : i32
    %c0_i32_0 = arith.constant 0 : i32
    %c0_i32_1 = arith.constant 0 : i32
    return %c0_i32, %c0_i32_0 : i32, i32
  }
  func.func @transform_2(%arg0: i32) -> (i32, i32) {
    %c0_i32 = arith.constant 0 : i32
    %c0_i32_0 = arith.constant 0 : i32
    %c0_i32_1 = arith.constant 0 : i32
    return %c0_i32, %c0_i32_0 : i32, i32
  }
  func.func @transform_3(%arg0: i32) -> (i32, i32) {
    %c0_i32 = arith.constant 0 : i32
    %c0_i32_0 = arith.constant 0 : i32
    return %arg0, %c0_i32 : i32, i32
  }
}

module attributes {stable_mosaic.version = 11 : i64} {
  func.func @_bn_apply_kernel(%arg0: i32, %arg1: memref<16x128xbf16, #tpu.memory_space<vmem>>, %arg2: memref<1x128xf32, #tpu.memory_space<vmem>>, %arg3: memref<1x128xf32, #tpu.memory_space<vmem>>, %arg4: memref<16x128xbf16, #tpu.memory_space<vmem>>, %arg5: memref<16x128xbf16, #tpu.memory_space<vmem>>) attributes {dimension_semantics = [#tpu.dimension_semantics<parallel>], iteration_bounds = array<i64: 1>, scalar_prefetch = 0 : i64, scratch_operands = 0 : i64, tpu.core_type = #tpu.core_type<tc>, window_params = [{transform_indices = @transform_0, window_bounds = array<i64: 16, 128>}, {pipeline_mode = #tpu.pipeline_mode<synchronous>, transform_indices = @transform_1, window_bounds = array<i64: 1, 128>}, {pipeline_mode = #tpu.pipeline_mode<synchronous>, transform_indices = @transform_2, window_bounds = array<i64: 1, 128>}, {transform_indices = @transform_3, window_bounds = array<i64: 16, 128>}, {transform_indices = @transform_4, window_bounds = array<i64: 16, 128>}]} {
    %c0 = arith.constant 0 : index
    %c0_0 = arith.constant 0 : index
    %0 = vector.load %arg1[%c0, %c0_0] : memref<16x128xbf16, #tpu.memory_space<vmem>>, vector<16x128xbf16>
    %1 = arith.extf %0 : vector<16x128xbf16> to vector<16x128xf32>
    %c0_1 = arith.constant 0 : index
    %c0_2 = arith.constant 0 : index
    %2 = vector.load %arg2[%c0_1, %c0_2] : memref<1x128xf32, #tpu.memory_space<vmem>>, vector<1x128xf32>
    %3 = vector.broadcast %2 : vector<1x128xf32> to vector<16x128xf32>
    %4 = arith.mulf %1, %3 : vector<16x128xf32>
    %c0_3 = arith.constant 0 : index
    %c0_4 = arith.constant 0 : index
    %5 = vector.load %arg3[%c0_3, %c0_4] : memref<1x128xf32, #tpu.memory_space<vmem>>, vector<1x128xf32>
    %6 = vector.broadcast %5 : vector<1x128xf32> to vector<16x128xf32>
    %7 = arith.addf %4, %6 : vector<16x128xf32>
    %c0_5 = arith.constant 0 : index
    %c0_6 = arith.constant 0 : index
    %8 = vector.load %arg4[%c0_5, %c0_6] : memref<16x128xbf16, #tpu.memory_space<vmem>>, vector<16x128xbf16>
    %9 = arith.extf %8 : vector<16x128xbf16> to vector<16x128xf32>
    %10 = arith.addf %7, %9 : vector<16x128xf32>
    %cst = arith.constant 0.000000e+00 : f32
    %11 = vector.broadcast %cst : f32 to vector<16x128xf32>
    %12 = arith.maximumf %10, %11 : vector<16x128xf32>
    %13 = arith.truncf %12 : vector<16x128xf32> to vector<16x128xbf16>
    %c0_7 = arith.constant 0 : index
    %c0_8 = arith.constant 0 : index
    %14 = vector.load %arg5[%c0_7, %c0_8] : memref<16x128xbf16, #tpu.memory_space<vmem>>, vector<16x128xbf16>
    tpu.vector_store %arg5[%c0_7, %c0_8], %13 {strides = array<i32>} : memref<16x128xbf16, #tpu.memory_space<vmem>>, vector<16x128xbf16>,
    return
  }
  func.func @transform_0(%arg0: i32) -> (i32, i32) {
    %c0_i32 = arith.constant 0 : i32
    %c0_i32_0 = arith.constant 0 : i32
    return %arg0, %c0_i32 : i32, i32
  }
  func.func @transform_1(%arg0: i32) -> (i32, i32) {
    %c0_i32 = arith.constant 0 : i32
    %c0_i32_0 = arith.constant 0 : i32
    %c0_i32_1 = arith.constant 0 : i32
    return %c0_i32, %c0_i32_0 : i32, i32
  }
  func.func @transform_2(%arg0: i32) -> (i32, i32) {
    %c0_i32 = arith.constant 0 : i32
    %c0_i32_0 = arith.constant 0 : i32
    %c0_i32_1 = arith.constant 0 : i32
    return %c0_i32, %c0_i32_0 : i32, i32
  }
  func.func @transform_3(%arg0: i32) -> (i32, i32) {
    %c0_i32 = arith.constant 0 : i32
    %c0_i32_0 = arith.constant 0 : i32
    return %arg0, %c0_i32 : i32, i32
  }
  func.func @transform_4(%arg0: i32) -> (i32, i32) {
    %c0_i32 = arith.constant 0 : i32
    %c0_i32_0 = arith.constant 0 : i32
    return %arg0, %c0_i32 : i32, i32
  }
}

module attributes {stable_mosaic.version = 11 : i64} {
  func.func @_mm_stats_kernel(%arg0: i32, %arg1: i32, %arg2: i32, %arg3: memref<16x512xbf16, #tpu.memory_space<vmem>>, %arg4: memref<512x128xbf16, #tpu.memory_space<vmem>>, %arg5: memref<16x128xbf16, #tpu.memory_space<vmem>>, %arg6: memref<8x128xf32, #tpu.memory_space<vmem>>, %arg7: memref<8x128xf32, #tpu.memory_space<vmem>>, %arg8: memref<16x128xf32, #tpu.memory_space<vmem>>) attributes {dimension_semantics = [#tpu.dimension_semantics<parallel>, #tpu.dimension_semantics<parallel>, #tpu.dimension_semantics<arbitrary>], iteration_bounds = array<i64: 1, 1, 1>, scalar_prefetch = 0 : i64, scratch_operands = 1 : i64, tpu.core_type = #tpu.core_type<tc>, window_params = [{transform_indices = @transform_0, window_bounds = array<i64: 16, 512>}, {transform_indices = @transform_1, window_bounds = array<i64: 512, 128>}, {transform_indices = @transform_2, window_bounds = array<i64: 16, 128>}, {transform_indices = @transform_3, window_bounds = array<i64: 8, 128>}, {transform_indices = @transform_4, window_bounds = array<i64: 8, 128>}]} {
    %c0_i32 = arith.constant 0 : i32
    %0 = arith.cmpi eq, %arg2, %c0_i32 : i32
    %1 = arith.extui %0 : i1 to i32
    %c0_i32_0 = arith.constant 0 : i32
    %2 = arith.cmpi ne, %1, %c0_i32_0 : i32
    scf.if %2 {
      %cst_10 = arith.constant 0.000000e+00 : f32
      %12 = vector.broadcast %cst_10 : f32 to vector<16x128xf32>
      %c0_11 = arith.constant 0 : index
      %c0_12 = arith.constant 0 : index
      %13 = vector.load %arg8[%c0_11, %c0_12] : memref<16x128xf32, #tpu.memory_space<vmem>>, vector<16x128xf32>
      tpu.vector_store %arg8[%c0_11, %c0_12], %12 {strides = array<i32>} : memref<16x128xf32, #tpu.memory_space<vmem>>, vector<16x128xf32>,
    } else {
    }
    %c0 = arith.constant 0 : index
    %c0_1 = arith.constant 0 : index
    %3 = vector.load %arg8[%c0, %c0_1] : memref<16x128xf32, #tpu.memory_space<vmem>>, vector<16x128xf32>
    %c0_2 = arith.constant 0 : index
    %c0_3 = arith.constant 0 : index
    %4 = vector.load %arg3[%c0_2, %c0_3] : memref<16x512xbf16, #tpu.memory_space<vmem>>, vector<16x512xbf16>
    %c0_4 = arith.constant 0 : index
    %c0_5 = arith.constant 0 : index
    %5 = vector.load %arg4[%c0_4, %c0_5] : memref<512x128xbf16, #tpu.memory_space<vmem>>, vector<512x128xbf16>
    %cst = arith.constant dense<0.000000e+00> : vector<16x128xf32>
    %6 = tpu.matmul %4, %5, %cst {dimension_numbers = #tpu.dot_dimension_numbers<[1], [0], [0], [1], [0, 0, 1, 1], [], []>} : vector<16x512xbf16>, vector<512x128xbf16>, vector<16x128xf32> -> vector<16x128xf32>
    %7 = arith.addf %3, %6 : vector<16x128xf32>
    %c0_6 = arith.constant 0 : index
    %c0_7 = arith.constant 0 : index
    %8 = vector.load %arg8[%c0_6, %c0_7] : memref<16x128xf32, #tpu.memory_space<vmem>>, vector<16x128xf32>
    tpu.vector_store %arg8[%c0_6, %c0_7], %7 {strides = array<i32>} : memref<16x128xf32, #tpu.memory_space<vmem>>, vector<16x128xf32>,
    %c0_i32_8 = arith.constant 0 : i32
    %9 = arith.cmpi eq, %arg2, %c0_i32_8 : i32
    %10 = arith.extui %9 : i1 to i32
    %c0_i32_9 = arith.constant 0 : i32
    %11 = arith.cmpi ne, %10, %c0_i32_9 : i32
    scf.if %11 {
      %c0_10 = arith.constant 0 : index
      %c0_11 = arith.constant 0 : index
      %12 = vector.load %arg8[%c0_10, %c0_11] : memref<16x128xf32, #tpu.memory_space<vmem>>, vector<16x128xf32>
      %13 = arith.truncf %12 : vector<16x128xf32> to vector<16x128xbf16>
      %c0_12 = arith.constant 0 : index
      %c0_13 = arith.constant 0 : index
      %14 = vector.load %arg5[%c0_12, %c0_13] : memref<16x128xbf16, #tpu.memory_space<vmem>>, vector<16x128xbf16>
      tpu.vector_store %arg5[%c0_12, %c0_13], %13 {strides = array<i32>} : memref<16x128xbf16, #tpu.memory_space<vmem>>, vector<16x128xbf16>,
      %cst_14 = arith.constant dense<0.000000e+00> : vector<128xf32>
      %15 = vector.multi_reduction <add>, %12, %cst_14 [0] : vector<16x128xf32> to vector<128xf32>
      %16 = vector.shape_cast %15 : vector<128xf32> to vector<1x128xf32>
      %17 = arith.mulf %12, %12 : vector<16x128xf32>
      %cst_15 = arith.constant dense<0.000000e+00> : vector<128xf32>
      %18 = vector.multi_reduction <add>, %17, %cst_15 [0] : vector<16x128xf32> to vector<128xf32>
      %19 = vector.shape_cast %18 : vector<128xf32> to vector<1x128xf32>
      %20 = vector.shape_cast %16 : vector<1x128xf32> to vector<1x128xf32>
      %21 = vector.broadcast %20 : vector<1x128xf32> to vector<8x128xf32>
      %c0_16 = arith.constant 0 : index
      %c0_17 = arith.constant 0 : index
      %22 = vector.load %arg6[%c0_16, %c0_17] : memref<8x128xf32, #tpu.memory_space<vmem>>, vector<8x128xf32>
      tpu.vector_store %arg6[%c0_16, %c0_17], %21 {strides = array<i32>} : memref<8x128xf32, #tpu.memory_space<vmem>>, vector<8x128xf32>,
      %23 = vector.shape_cast %19 : vector<1x128xf32> to vector<1x128xf32>
      %24 = vector.broadcast %23 : vector<1x128xf32> to vector<8x128xf32>
      %c0_18 = arith.constant 0 : index
      %c0_19 = arith.constant 0 : index
      %25 = vector.load %arg7[%c0_18, %c0_19] : memref<8x128xf32, #tpu.memory_space<vmem>>, vector<8x128xf32>
      tpu.vector_store %arg7[%c0_18, %c0_19], %24 {strides = array<i32>} : memref<8x128xf32, #tpu.memory_space<vmem>>, vector<8x128xf32>,
    } else {
    }
    return
  }
  func.func @transform_0(%arg0: i32, %arg1: i32, %arg2: i32) -> (i32, i32) {
    %c0_i32 = arith.constant 0 : i32
    return %arg0, %arg2 : i32, i32
  }
  func.func @transform_1(%arg0: i32, %arg1: i32, %arg2: i32) -> (i32, i32) {
    %c0_i32 = arith.constant 0 : i32
    return %arg2, %arg1 : i32, i32
  }
  func.func @transform_2(%arg0: i32, %arg1: i32, %arg2: i32) -> (i32, i32) {
    %c0_i32 = arith.constant 0 : i32
    return %arg0, %arg1 : i32, i32
  }
  func.func @transform_3(%arg0: i32, %arg1: i32, %arg2: i32) -> (i32, i32) {
    %c0_i32 = arith.constant 0 : i32
    return %arg0, %arg1 : i32, i32
  }
  func.func @transform_4(%arg0: i32, %arg1: i32, %arg2: i32) -> (i32, i32) {
    %c0_i32 = arith.constant 0 : i32
    return %arg0, %arg1 : i32, i32
  }
}

module attributes {stable_mosaic.version = 11 : i64} {
  func.func @_mm_stats_kernel(%arg0: i32, %arg1: i32, %arg2: i32, %arg3: memref<16x896xbf16, #tpu.memory_space<vmem>>, %arg4: memref<896x128xbf16, #tpu.memory_space<vmem>>, %arg5: memref<16x128xbf16, #tpu.memory_space<vmem>>, %arg6: memref<8x128xf32, #tpu.memory_space<vmem>>, %arg7: memref<8x128xf32, #tpu.memory_space<vmem>>, %arg8: memref<16x128xf32, #tpu.memory_space<vmem>>) attributes {dimension_semantics = [#tpu.dimension_semantics<parallel>, #tpu.dimension_semantics<parallel>, #tpu.dimension_semantics<arbitrary>], iteration_bounds = array<i64: 1, 1, 1>, scalar_prefetch = 0 : i64, scratch_operands = 1 : i64, tpu.core_type = #tpu.core_type<tc>, window_params = [{transform_indices = @transform_0, window_bounds = array<i64: 16, 896>}, {transform_indices = @transform_1, window_bounds = array<i64: 896, 128>}, {transform_indices = @transform_2, window_bounds = array<i64: 16, 128>}, {transform_indices = @transform_3, window_bounds = array<i64: 8, 128>}, {transform_indices = @transform_4, window_bounds = array<i64: 8, 128>}]} {
    %c0_i32 = arith.constant 0 : i32
    %0 = arith.cmpi eq, %arg2, %c0_i32 : i32
    %1 = arith.extui %0 : i1 to i32
    %c0_i32_0 = arith.constant 0 : i32
    %2 = arith.cmpi ne, %1, %c0_i32_0 : i32
    scf.if %2 {
      %cst_10 = arith.constant 0.000000e+00 : f32
      %12 = vector.broadcast %cst_10 : f32 to vector<16x128xf32>
      %c0_11 = arith.constant 0 : index
      %c0_12 = arith.constant 0 : index
      %13 = vector.load %arg8[%c0_11, %c0_12] : memref<16x128xf32, #tpu.memory_space<vmem>>, vector<16x128xf32>
      tpu.vector_store %arg8[%c0_11, %c0_12], %12 {strides = array<i32>} : memref<16x128xf32, #tpu.memory_space<vmem>>, vector<16x128xf32>,
    } else {
    }
    %c0 = arith.constant 0 : index
    %c0_1 = arith.constant 0 : index
    %3 = vector.load %arg8[%c0, %c0_1] : memref<16x128xf32, #tpu.memory_space<vmem>>, vector<16x128xf32>
    %c0_2 = arith.constant 0 : index
    %c0_3 = arith.constant 0 : index
    %4 = vector.load %arg3[%c0_2, %c0_3] : memref<16x896xbf16, #tpu.memory_space<vmem>>, vector<16x896xbf16>
    %c0_4 = arith.constant 0 : index
    %c0_5 = arith.constant 0 : index
    %5 = vector.load %arg4[%c0_4, %c0_5] : memref<896x128xbf16, #tpu.memory_space<vmem>>, vector<896x128xbf16>
    %cst = arith.constant dense<0.000000e+00> : vector<16x128xf32>
    %6 = tpu.matmul %4, %5, %cst {dimension_numbers = #tpu.dot_dimension_numbers<[1], [0], [0], [1], [0, 0, 1, 1], [], []>} : vector<16x896xbf16>, vector<896x128xbf16>, vector<16x128xf32> -> vector<16x128xf32>
    %7 = arith.addf %3, %6 : vector<16x128xf32>
    %c0_6 = arith.constant 0 : index
    %c0_7 = arith.constant 0 : index
    %8 = vector.load %arg8[%c0_6, %c0_7] : memref<16x128xf32, #tpu.memory_space<vmem>>, vector<16x128xf32>
    tpu.vector_store %arg8[%c0_6, %c0_7], %7 {strides = array<i32>} : memref<16x128xf32, #tpu.memory_space<vmem>>, vector<16x128xf32>,
    %c0_i32_8 = arith.constant 0 : i32
    %9 = arith.cmpi eq, %arg2, %c0_i32_8 : i32
    %10 = arith.extui %9 : i1 to i32
    %c0_i32_9 = arith.constant 0 : i32
    %11 = arith.cmpi ne, %10, %c0_i32_9 : i32
    scf.if %11 {
      %c0_10 = arith.constant 0 : index
      %c0_11 = arith.constant 0 : index
      %12 = vector.load %arg8[%c0_10, %c0_11] : memref<16x128xf32, #tpu.memory_space<vmem>>, vector<16x128xf32>
      %13 = arith.truncf %12 : vector<16x128xf32> to vector<16x128xbf16>
      %c0_12 = arith.constant 0 : index
      %c0_13 = arith.constant 0 : index
      %14 = vector.load %arg5[%c0_12, %c0_13] : memref<16x128xbf16, #tpu.memory_space<vmem>>, vector<16x128xbf16>
      tpu.vector_store %arg5[%c0_12, %c0_13], %13 {strides = array<i32>} : memref<16x128xbf16, #tpu.memory_space<vmem>>, vector<16x128xbf16>,
      %cst_14 = arith.constant dense<0.000000e+00> : vector<128xf32>
      %15 = vector.multi_reduction <add>, %12, %cst_14 [0] : vector<16x128xf32> to vector<128xf32>
      %16 = vector.shape_cast %15 : vector<128xf32> to vector<1x128xf32>
      %17 = arith.mulf %12, %12 : vector<16x128xf32>
      %cst_15 = arith.constant dense<0.000000e+00> : vector<128xf32>
      %18 = vector.multi_reduction <add>, %17, %cst_15 [0] : vector<16x128xf32> to vector<128xf32>
      %19 = vector.shape_cast %18 : vector<128xf32> to vector<1x128xf32>
      %20 = vector.shape_cast %16 : vector<1x128xf32> to vector<1x128xf32>
      %21 = vector.broadcast %20 : vector<1x128xf32> to vector<8x128xf32>
      %c0_16 = arith.constant 0 : index
      %c0_17 = arith.constant 0 : index
      %22 = vector.load %arg6[%c0_16, %c0_17] : memref<8x128xf32, #tpu.memory_space<vmem>>, vector<8x128xf32>
      tpu.vector_store %arg6[%c0_16, %c0_17], %21 {strides = array<i32>} : memref<8x128xf32, #tpu.memory_space<vmem>>, vector<8x128xf32>,
      %23 = vector.shape_cast %19 : vector<1x128xf32> to vector<1x128xf32>
      %24 = vector.broadcast %23 : vector<1x128xf32> to vector<8x128xf32>
      %c0_18 = arith.constant 0 : index
      %c0_19 = arith.constant 0 : index
      %25 = vector.load %arg7[%c0_18, %c0_19] : memref<8x128xf32, #tpu.memory_space<vmem>>, vector<8x128xf32>
      tpu.vector_store %arg7[%c0_18, %c0_19], %24 {strides = array<i32>} : memref<8x128xf32, #tpu.memory_space<vmem>>, vector<8x128xf32>,
    } else {
    }
    return
  }
  func.func @transform_0(%arg0: i32, %arg1: i32, %arg2: i32) -> (i32, i32) {
    %c0_i32 = arith.constant 0 : i32
    return %arg0, %arg2 : i32, i32
  }
  func.func @transform_1(%arg0: i32, %arg1: i32, %arg2: i32) -> (i32, i32) {
    %c0_i32 = arith.constant 0 : i32
    return %arg2, %arg1 : i32, i32
  }
  func.func @transform_2(%arg0: i32, %arg1: i32, %arg2: i32) -> (i32, i32) {
    %c0_i32 = arith.constant 0 : i32
    return %arg0, %arg1 : i32, i32
  }
  func.func @transform_3(%arg0: i32, %arg1: i32, %arg2: i32) -> (i32, i32) {
    %c0_i32 = arith.constant 0 : i32
    return %arg0, %arg1 : i32, i32
  }
  func.func @transform_4(%arg0: i32, %arg1: i32, %arg2: i32) -> (i32, i32) {
    %c0_i32 = arith.constant 0 : i32
    return %arg0, %arg1 : i32, i32
  }
}

module attributes {stable_mosaic.version = 11 : i64} {
  func.func @_mm_stats_kernel(%arg0: i32, %arg1: i32, %arg2: i32, %arg3: memref<16x896xbf16, #tpu.memory_space<vmem>>, %arg4: memref<896x128xbf16, #tpu.memory_space<vmem>>, %arg5: memref<16x128xbf16, #tpu.memory_space<vmem>>, %arg6: memref<8x128xf32, #tpu.memory_space<vmem>>, %arg7: memref<8x128xf32, #tpu.memory_space<vmem>>, %arg8: memref<16x128xf32, #tpu.memory_space<vmem>>) attributes {dimension_semantics = [#tpu.dimension_semantics<parallel>, #tpu.dimension_semantics<parallel>, #tpu.dimension_semantics<arbitrary>], iteration_bounds = array<i64: 1, 1, 2>, scalar_prefetch = 0 : i64, scratch_operands = 1 : i64, tpu.core_type = #tpu.core_type<tc>, window_params = [{transform_indices = @transform_0, window_bounds = array<i64: 16, 896>}, {transform_indices = @transform_1, window_bounds = array<i64: 896, 128>}, {transform_indices = @transform_2, window_bounds = array<i64: 16, 128>}, {transform_indices = @transform_3, window_bounds = array<i64: 8, 128>}, {transform_indices = @transform_4, window_bounds = array<i64: 8, 128>}]} {
    %c0_i32 = arith.constant 0 : i32
    %0 = arith.cmpi eq, %arg2, %c0_i32 : i32
    %1 = arith.extui %0 : i1 to i32
    %c0_i32_0 = arith.constant 0 : i32
    %2 = arith.cmpi ne, %1, %c0_i32_0 : i32
    scf.if %2 {
      %cst_9 = arith.constant 0.000000e+00 : f32
      %12 = vector.broadcast %cst_9 : f32 to vector<16x128xf32>
      %c0_10 = arith.constant 0 : index
      %c0_11 = arith.constant 0 : index
      %13 = vector.load %arg8[%c0_10, %c0_11] : memref<16x128xf32, #tpu.memory_space<vmem>>, vector<16x128xf32>
      tpu.vector_store %arg8[%c0_10, %c0_11], %12 {strides = array<i32>} : memref<16x128xf32, #tpu.memory_space<vmem>>, vector<16x128xf32>,
    } else {
    }
    %c0 = arith.constant 0 : index
    %c0_1 = arith.constant 0 : index
    %3 = vector.load %arg8[%c0, %c0_1] : memref<16x128xf32, #tpu.memory_space<vmem>>, vector<16x128xf32>
    %c0_2 = arith.constant 0 : index
    %c0_3 = arith.constant 0 : index
    %4 = vector.load %arg3[%c0_2, %c0_3] : memref<16x896xbf16, #tpu.memory_space<vmem>>, vector<16x896xbf16>
    %c0_4 = arith.constant 0 : index
    %c0_5 = arith.constant 0 : index
    %5 = vector.load %arg4[%c0_4, %c0_5] : memref<896x128xbf16, #tpu.memory_space<vmem>>, vector<896x128xbf16>
    %cst = arith.constant dense<0.000000e+00> : vector<16x128xf32>
    %6 = tpu.matmul %4, %5, %cst {dimension_numbers = #tpu.dot_dimension_numbers<[1], [0], [0], [1], [0, 0, 1, 1], [], []>} : vector<16x896xbf16>, vector<896x128xbf16>, vector<16x128xf32> -> vector<16x128xf32>
    %7 = arith.addf %3, %6 : vector<16x128xf32>
    %c0_6 = arith.constant 0 : index
    %c0_7 = arith.constant 0 : index
    %8 = vector.load %arg8[%c0_6, %c0_7] : memref<16x128xf32, #tpu.memory_space<vmem>>, vector<16x128xf32>
    tpu.vector_store %arg8[%c0_6, %c0_7], %7 {strides = array<i32>} : memref<16x128xf32, #tpu.memory_space<vmem>>, vector<16x128xf32>,
    %c1_i32 = arith.constant 1 : i32
    %9 = arith.cmpi eq, %arg2, %c1_i32 : i32
    %10 = arith.extui %9 : i1 to i32
    %c0_i32_8 = arith.constant 0 : i32
    %11 = arith.cmpi ne, %10, %c0_i32_8 : i32
    scf.if %11 {
      %c0_9 = arith.constant 0 : index
      %c0_10 = arith.constant 0 : index
      %12 = vector.load %arg8[%c0_9, %c0_10] : memref<16x128xf32, #tpu.memory_space<vmem>>, vector<16x128xf32>
      %13 = arith.truncf %12 : vector<16x128xf32> to vector<16x128xbf16>
      %c0_11 = arith.constant 0 : index
      %c0_12 = arith.constant 0 : index
      %14 = vector.load %arg5[%c0_11, %c0_12] : memref<16x128xbf16, #tpu.memory_space<vmem>>, vector<16x128xbf16>
      tpu.vector_store %arg5[%c0_11, %c0_12], %13 {strides = array<i32>} : memref<16x128xbf16, #tpu.memory_space<vmem>>, vector<16x128xbf16>,
      %cst_13 = arith.constant dense<0.000000e+00> : vector<128xf32>
      %15 = vector.multi_reduction <add>, %12, %cst_13 [0] : vector<16x128xf32> to vector<128xf32>
      %16 = vector.shape_cast %15 : vector<128xf32> to vector<1x128xf32>
      %17 = arith.mulf %12, %12 : vector<16x128xf32>
      %cst_14 = arith.constant dense<0.000000e+00> : vector<128xf32>
      %18 = vector.multi_reduction <add>, %17, %cst_14 [0] : vector<16x128xf32> to vector<128xf32>
      %19 = vector.shape_cast %18 : vector<128xf32> to vector<1x128xf32>
      %20 = vector.shape_cast %16 : vector<1x128xf32> to vector<1x128xf32>
      %21 = vector.broadcast %20 : vector<1x128xf32> to vector<8x128xf32>
      %c0_15 = arith.constant 0 : index
      %c0_16 = arith.constant 0 : index
      %22 = vector.load %arg6[%c0_15, %c0_16] : memref<8x128xf32, #tpu.memory_space<vmem>>, vector<8x128xf32>
      tpu.vector_store %arg6[%c0_15, %c0_16], %21 {strides = array<i32>} : memref<8x128xf32, #tpu.memory_space<vmem>>, vector<8x128xf32>,
      %23 = vector.shape_cast %19 : vector<1x128xf32> to vector<1x128xf32>
      %24 = vector.broadcast %23 : vector<1x128xf32> to vector<8x128xf32>
      %c0_17 = arith.constant 0 : index
      %c0_18 = arith.constant 0 : index
      %25 = vector.load %arg7[%c0_17, %c0_18] : memref<8x128xf32, #tpu.memory_space<vmem>>, vector<8x128xf32>
      tpu.vector_store %arg7[%c0_17, %c0_18], %24 {strides = array<i32>} : memref<8x128xf32, #tpu.memory_space<vmem>>, vector<8x128xf32>,
    } else {
    }
    return
  }
  func.func @transform_0(%arg0: i32, %arg1: i32, %arg2: i32) -> (i32, i32) {
    %c0_i32 = arith.constant 0 : i32
    return %arg0, %arg2 : i32, i32
  }
  func.func @transform_1(%arg0: i32, %arg1: i32, %arg2: i32) -> (i32, i32) {
    %c0_i32 = arith.constant 0 : i32
    return %arg2, %arg1 : i32, i32
  }
  func.func @transform_2(%arg0: i32, %arg1: i32, %arg2: i32) -> (i32, i32) {
    %c0_i32 = arith.constant 0 : i32
    return %arg0, %arg1 : i32, i32
  }
  func.func @transform_3(%arg0: i32, %arg1: i32, %arg2: i32) -> (i32, i32) {
    %c0_i32 = arith.constant 0 : i32
    return %arg0, %arg1 : i32, i32
  }
  func.func @transform_4(%arg0: i32, %arg1: i32, %arg2: i32) -> (i32, i32) {
    %c0_i32 = arith.constant 0 : i32
    return %arg0, %arg1 : i32, i32
  }
}

module attributes {stable_mosaic.version = 11 : i64} {
  func.func @_mlp_head_kernel(%arg0: i32, %arg1: memref<2x1x64xbf16, #tpu.memory_space<vmem>>, %arg2: memref<64x64xf32, #tpu.memory_space<vmem>>, %arg3: memref<1x64xf32, #tpu.memory_space<vmem>>, %arg4: memref<1x64xf32, #tpu.memory_space<vmem>>, %arg5: memref<1x64xf32, #tpu.memory_space<vmem>>, %arg6: memref<64x16xf32, #tpu.memory_space<vmem>>, %arg7: memref<1x16xf32, #tpu.memory_space<vmem>>, %arg8: memref<2x16xf32, #tpu.memory_space<vmem>>) attributes {dimension_semantics = [#tpu.dimension_semantics<arbitrary>], iteration_bounds = array<i64: 1>, scalar_prefetch = 0 : i64, scratch_operands = 0 : i64, tpu.core_type = #tpu.core_type<tc>, window_params = [{pipeline_mode = #tpu.pipeline_mode<synchronous>, transform_indices = @transform_0, window_bounds = array<i64: 2, 1, 64>}, {pipeline_mode = #tpu.pipeline_mode<synchronous>, transform_indices = @transform_1, window_bounds = array<i64: 64, 64>}, {pipeline_mode = #tpu.pipeline_mode<synchronous>, transform_indices = @transform_2, window_bounds = array<i64: 1, 64>}, {pipeline_mode = #tpu.pipeline_mode<synchronous>, transform_indices = @transform_3, window_bounds = array<i64: 1, 64>}, {pipeline_mode = #tpu.pipeline_mode<synchronous>, transform_indices = @transform_4, window_bounds = array<i64: 1, 64>}, {pipeline_mode = #tpu.pipeline_mode<synchronous>, transform_indices = @transform_5, window_bounds = array<i64: 64, 16>}, {pipeline_mode = #tpu.pipeline_mode<synchronous>, transform_indices = @transform_6, window_bounds = array<i64: 1, 16>}, {pipeline_mode = #tpu.pipeline_mode<synchronous>, transform_indices = @transform_7, window_bounds = array<i64: 2, 16>}]} {
    %c0 = arith.constant 0 : index
    %c0_0 = arith.constant 0 : index
    %c0_1 = arith.constant 0 : index
    %0 = vector.load %arg1[%c0, %c0_0, %c0_1] : memref<2x1x64xbf16, #tpu.memory_space<vmem>>, vector<2x1x64xbf16>
    %1 = arith.extf %0 : vector<2x1x64xbf16> to vector<2x1x64xf32>
    %cst = arith.constant dense<0.000000e+00> : vector<2x64xf32>
    %2 = vector.multi_reduction <add>, %1, %cst [1] : vector<2x1x64xf32> to vector<2x64xf32>
    %cst_2 = arith.constant 1.000000e+00 : f32
    %3 = vector.broadcast %cst_2 : f32 to vector<2x64xf32>
    %4 = arith.divf %2, %3 : vector<2x64xf32>
    %c0_3 = arith.constant 0 : index
    %c0_4 = arith.constant 0 : index
    %5 = vector.load %arg2[%c0_3, %c0_4] : memref<64x64xf32, #tpu.memory_space<vmem>>, vector<64x64xf32>
    %cst_5 = arith.constant dense<0.000000e+00> : vector<2x64xf32>
    %6 = tpu.matmul %4, %5, %cst_5 {dimension_numbers = #tpu.dot_dimension_numbers<[1], [0], [0], [1], [0, 0, 1, 1], [], []>} : vector<2x64xf32>, vector<64x64xf32>, vector<2x64xf32> -> vector<2x64xf32>
    %c0_6 = arith.constant 0 : index
    %c0_7 = arith.constant 0 : index
    %7 = vector.load %arg3[%c0_6, %c0_7] : memref<1x64xf32, #tpu.memory_space<vmem>>, vector<1x64xf32>
    %8 = vector.broadcast %7 : vector<1x64xf32> to vector<2x64xf32>
    %9 = arith.addf %6, %8 : vector<2x64xf32>
    %cst_8 = arith.constant dense<0.000000e+00> : vector<64xf32>
    %10 = vector.multi_reduction <add>, %9, %cst_8 [0] : vector<2x64xf32> to vector<64xf32>
    %11 = vector.shape_cast %10 : vector<64xf32> to vector<1x64xf32>
    %cst_9 = arith.constant 2.000000e+00 : f32
    %12 = vector.broadcast %cst_9 : f32 to vector<1x64xf32>
    %13 = arith.divf %11, %12 : vector<1x64xf32>
    %14 = vector.broadcast %13 : vector<1x64xf32> to vector<2x64xf32>
    %15 = arith.subf %9, %14 : vector<2x64xf32>
    %16 = arith.mulf %15, %15 : vector<2x64xf32>
    %cst_10 = arith.constant dense<0.000000e+00> : vector<64xf32>
    %17 = vector.multi_reduction <add>, %16, %cst_10 [0] : vector<2x64xf32> to vector<64xf32>
    %18 = vector.shape_cast %17 : vector<64xf32> to vector<1x64xf32>
    %cst_11 = arith.constant 2.000000e+00 : f32
    %19 = vector.broadcast %cst_11 : f32 to vector<1x64xf32>
    %20 = arith.divf %18, %19 : vector<1x64xf32>
    %21 = vector.broadcast %13 : vector<1x64xf32> to vector<2x64xf32>
    %22 = arith.subf %9, %21 : vector<2x64xf32>
    %cst_12 = arith.constant 9.99999974E-6 : f32
    %23 = vector.broadcast %cst_12 : f32 to vector<1x64xf32>
    %24 = arith.addf %20, %23 : vector<1x64xf32>
    %25 = math.rsqrt %24 : vector<1x64xf32>
    %26 = vector.broadcast %25 : vector<1x64xf32> to vector<2x64xf32>
    %27 = arith.mulf %22, %26 : vector<2x64xf32>
    %c0_13 = arith.constant 0 : index
    %c0_14 = arith.constant 0 : index
    %28 = vector.load %arg4[%c0_13, %c0_14] : memref<1x64xf32, #tpu.memory_space<vmem>>, vector<1x64xf32>
    %29 = vector.broadcast %28 : vector<1x64xf32> to vector<2x64xf32>
    %30 = arith.mulf %27, %29 : vector<2x64xf32>
    %c0_15 = arith.constant 0 : index
    %c0_16 = arith.constant 0 : index
    %31 = vector.load %arg5[%c0_15, %c0_16] : memref<1x64xf32, #tpu.memory_space<vmem>>, vector<1x64xf32>
    %32 = vector.broadcast %31 : vector<1x64xf32> to vector<2x64xf32>
    %33 = arith.addf %30, %32 : vector<2x64xf32>
    %cst_17 = arith.constant 0.000000e+00 : f32
    %34 = vector.broadcast %cst_17 : f32 to vector<2x64xf32>
    %35 = arith.maximumf %33, %34 : vector<2x64xf32>
    %c0_18 = arith.constant 0 : index
    %c0_19 = arith.constant 0 : index
    %36 = vector.load %arg6[%c0_18, %c0_19] : memref<64x16xf32, #tpu.memory_space<vmem>>, vector<64x16xf32>
    %cst_20 = arith.constant dense<0.000000e+00> : vector<2x16xf32>
    %37 = tpu.matmul %35, %36, %cst_20 {dimension_numbers = #tpu.dot_dimension_numbers<[1], [0], [0], [1], [0, 0, 1, 1], [], []>} : vector<2x64xf32>, vector<64x16xf32>, vector<2x16xf32> -> vector<2x16xf32>
    %c0_21 = arith.constant 0 : index
    %c0_22 = arith.constant 0 : index
    %38 = vector.load %arg7[%c0_21, %c0_22] : memref<1x16xf32, #tpu.memory_space<vmem>>, vector<1x16xf32>
    %39 = vector.broadcast %38 : vector<1x16xf32> to vector<2x16xf32>
    %40 = arith.addf %37, %39 : vector<2x16xf32>
    %c0_23 = arith.constant 0 : index
    %c0_24 = arith.constant 0 : index
    %41 = vector.load %arg8[%c0_23, %c0_24] : memref<2x16xf32, #tpu.memory_space<vmem>>, vector<2x16xf32>
    tpu.vector_store %arg8[%c0_23, %c0_24], %40 {strides = array<i32>} : memref<2x16xf32, #tpu.memory_space<vmem>>, vector<2x16xf32>,
    return
  }
  func.func @transform_0(%arg0: i32) -> (i32, i32, i32) {
    %c0_i32 = arith.constant 0 : i32
    %c0_i32_0 = arith.constant 0 : i32
    %c0_i32_1 = arith.constant 0 : i32
    %c0_i32_2 = arith.constant 0 : i32
    return %c0_i32, %c0_i32_0, %c0_i32_1 : i32, i32, i32
  }
  func.func @transform_1(%arg0: i32) -> (i32, i32) {
    %c0_i32 = arith.constant 0 : i32
    %c0_i32_0 = arith.constant 0 : i32
    %c0_i32_1 = arith.constant 0 : i32
    return %c0_i32, %c0_i32_0 : i32, i32
  }
  func.func @transform_2(%arg0: i32) -> (i32, i32) {
    %c0_i32 = arith.constant 0 : i32
    %c0_i32_0 = arith.constant 0 : i32
    %c0_i32_1 = arith.constant 0 : i32
    return %c0_i32, %c0_i32_0 : i32, i32
  }
  func.func @transform_3(%arg0: i32) -> (i32, i32) {
    %c0_i32 = arith.constant 0 : i32
    %c0_i32_0 = arith.constant 0 : i32
    %c0_i32_1 = arith.constant 0 : i32
    return %c0_i32, %c0_i32_0 : i32, i32
  }
  func.func @transform_4(%arg0: i32) -> (i32, i32) {
    %c0_i32 = arith.constant 0 : i32
    %c0_i32_0 = arith.constant 0 : i32
    %c0_i32_1 = arith.constant 0 : i32
    return %c0_i32, %c0_i32_0 : i32, i32
  }
  func.func @transform_5(%arg0: i32) -> (i32, i32) {
    %c0_i32 = arith.constant 0 : i32
    %c0_i32_0 = arith.constant 0 : i32
    %c0_i32_1 = arith.constant 0 : i32
    return %c0_i32, %c0_i32_0 : i32, i32
  }
  func.func @transform_6(%arg0: i32) -> (i32, i32) {
    %c0_i32 = arith.constant 0 : i32
    %c0_i32_0 = arith.constant 0 : i32
    %c0_i32_1 = arith.constant 0 : i32
    return %c0_i32, %c0_i32_0 : i32, i32
  }
  func.func @transform_7(%arg0: i32) -> (i32, i32) {
    %c0_i32 = arith.constant 0 : i32
    %c0_i32_0 = arith.constant 0 : i32
    %c0_i32_1 = arith.constant 0 : i32
    return %c0_i32, %c0_i32_0 : i32, i32
  }
}

</mosaic_0001>

<bundles_post_ra>
// kernel: resnet_forward.27
= control target key start
LH: loop header
LB: loop body
LE: loop exit
PB: predicated region body
PF: predicated region fallthrough
CT: control target
= control target key end

     0   :  { %s1411_s12 = smov 0   ;;  %s1641_s0 = inlined_call_operand.vmem [shape: bf16[1024,128], index: 0, kind: input, shape index: {}]   ;;  %s1642_s1 = inlined_call_operand.vmem [shape: f32[1,128], index: 1, kind: input, shape index: {}]   ;;  %s1643_s2 = inlined_call_operand.vmem [shape: f32[1,128], index: 2, kind: input, shape index: {}]   ;;  %s1644_s3 = inlined_call_operand.vmem [shape: bf16[1024,128], index: 3, kind: output, shape index: {}]  }
   0x1 LB: > { %s884_s13 = sadd.s32 4294967295, %s1389_s12   ;;  %p888_p0 = scmp.ge.s32.totalorder %s1389_s12, 1  ;;  %s1389_s12 = sphi %s1411_s12, %s13_s12  }
   0x2   : > { %p138_p1 = scmp.lt.s32.totalorder %s1389_s12, 3 }
   0x4   : > { %p139_p2 = pnand %p888_p0, %p138_p1 }
   0x5   : > { %s889_s14 = sshll.u32 (!%p139_p2), %s884_s13, 6  ;;  %v1432_v0 = vld [vmem:[%s1642_s1] ss:$0 sm:$0xff] (!%p139_p2) }
   0x6   : > { %142 = sbr.rel (%p139_p2) target bundleno = 95 (0x5f), region = 32  ;;  %p163_p3 = scmp.lt.s32.totalorder (!%p139_p2), %s889_s14, 127  ;;  %v1441_v9 = vld [vmem:[%s1643_s2] ss:$0 sm:$0xff] (!%p139_p2) }
   0xd   : > { %s1646_s14 = smov (!%p163_p3, %s889_s14), 127 }
   0xe   : > { %s890_s15 = sshll.u32 %s1646_s14, 2 }
   0xf   : > { %s1427_s18 = scalar_lea.vmem %s1641_s0, %s890_s15  ;;  %s1466_s25 = scalar_lea.vmem %s1644_s3, %s890_s15 }
  0x10   : > { %v1026_v1 = vld [vmem:[%s1427_s18] sm:$0xff]   ;;  %v1313_v2 = vld [vmem:[%s1427_s18 + $0x8] sm:$0xff]   ;;  %v1314_v3 = vld [vmem:[%s1427_s18 + $0x10] sm:$0xff]  }
  0x11   : > { %v1027_v4 = vunpack.c.l.bf16 %v1026_v1  ;;  %v1028_v5 = vunpack.c.h.bf16 %v1026_v1  ;;  %v1031_v6 = vunpack.c.l.bf16 %v1313_v2  ;;  %v1032_v7 = vunpack.c.h.bf16 %v1313_v2  ;;  %v1315_v8 = vld [vmem:[%s1427_s18 + $0x18] sm:$0xff]   ;;  %v1316_v30 = vld [vmem:[%s1427_s18 + $0x20] sm:$0xff]   ;;  %v1317_v35 = vld [vmem:[%s1427_s18 + $0x28] sm:$0xff]  }
  0x12   : > { %v1035_v10 = vunpack.c.l.bf16 %v1314_v3  ;;  %v1036_v11 = vunpack.c.h.bf16 %v1314_v3  ;;  %v1039_v12 = vunpack.c.l.bf16 %v1315_v8  ;;  %v1040_v13 = vunpack.c.h.bf16 %v1315_v8  ;;  %v1318_v40 = vld [vmem:[%s1427_s18 + $0x30] sm:$0xff]   ;;  %v1319_v45 = vld [vmem:[%s1427_s18 + $0x38] sm:$0xff]   ;;  %v1320_v3 = vld [vmem:[%s1427_s18 + $0x40] sm:$0xff]  }
  0x13   : > { %v309_v14 = vmul.f32 %v1027_v4, %v1432_v0  ;;  %v310_v15 = vmul.f32 %v1028_v5, %v1432_v0  ;;  %v311_v16 = vmul.f32 %v1031_v6, %v1432_v0  ;;  %v312_v17 = vmul.f32 %v1032_v7, %v1432_v0 }
  0x14   : > { %v313_v18 = vmul.f32 %v1035_v10, %v1432_v0  ;;  %v314_v19 = vmul.f32 %v1036_v11, %v1432_v0  ;;  %v315_v20 = vmul.f32 %v1039_v12, %v1432_v0  ;;  %v316_v21 = vmul.f32 %v1040_v13, %v1432_v0  ;;  %v1321_v13 = vld [vmem:[%s1427_s18 + $0x48] sm:$0xff]  }
  0x15   : > { %v380_v22 = vadd.f32 %v1441_v9, %v309_v14  ;;  %v381_v23 = vadd.f32 %v1441_v9, %v310_v15  ;;  %v382_v24 = vadd.f32 %v1441_v9, %v311_v16  ;;  %v383_v25 = vadd.f32 %v1441_v9, %v312_v17 }
  0x16   : > { %v384_v26 = vadd.f32 %v1441_v9, %v313_v18  ;;  %v385_v27 = vadd.f32 %v1441_v9, %v314_v19  ;;  %v386_v28 = vadd.f32 %v1441_v9, %v315_v20  ;;  %v387_v29 = vadd.f32 %v1441_v9, %v316_v21  ;;  %v1322_v18 = vld [vmem:[%s1427_s18 + $0x50] sm:$0xff]  }
  0x17   : > { %v444_v31 = vmax.f32 %v380_v22, 0.0  ;;  %v445_v32 = vmax.f32 %v381_v23, 0.0  ;;  %v446_v33 = vmax.f32 %v382_v24, 0.0  ;;  %v447_v34 = vmax.f32 %v383_v25, 0.0  ;;  %v1323_v23 = vld [vmem:[%s1427_s18 + $0x58] sm:$0xff]  }
  0x18   : > { %v448_v36 = vmax.f32 %v384_v26, 0.0  ;;  %v449_v37 = vmax.f32 %v385_v27, 0.0  ;;  %v450_v38 = vmax.f32 %v386_v28, 0.0  ;;  %v451_v39 = vmax.f32 %v387_v29, 0.0 }
  0x19   : > { %v1156_v41 = vpack.c.bf16 %v445_v32, %v444_v31  ;;  %v1161_v42 = vpack.c.bf16 %v447_v34, %v446_v33  ;;  %v1043_v43 = vunpack.c.l.bf16 %v1316_v30  ;;  %v1044_v44 = vunpack.c.h.bf16 %v1316_v30 }
  0x1a   : > { %v1166_v46 = vpack.c.bf16 %v449_v37, %v448_v36  ;;  %v1171_v47 = vpack.c.bf16 %v451_v39, %v450_v38  ;;  %v1047_v48 = vunpack.c.l.bf16 %v1317_v35  ;;  %v1048_v49 = vunpack.c.h.bf16 %v1317_v35 }
  0x1b   : > { %1157 = vst [vmem:[%s1466_s25] sm:$0xff] %v1156_v41   ;;  %1344 = vst [vmem:[%s1466_s25 + $0x8] sm:$0xff] %v1161_v42   ;;  %v317_v50 = vmul.f32 %v1043_v43, %v1432_v0  ;;  %v318_v51 = vmul.f32 %v1044_v44, %v1432_v0  ;;  %v1051_v52 = vunpack.c.l.bf16 %v1318_v40  ;;  %v1052_v53 = vunpack.c.h.bf16 %v1318_v40  ;;  %v1324_v40 = vld [vmem:[%s1427_s18 + $0x60] sm:$0xff]  }
  0x1c   : > { %1345 = vst [vmem:[%s1466_s25 + $0x10] sm:$0xff] %v1166_v46   ;;  %1346 = vst [vmem:[%s1466_s25 + $0x18] sm:$0xff] %v1171_v47   ;;  %v319_v54 = vmul.f32 %v1047_v48, %v1432_v0  ;;  %v320_v55 = vmul.f32 %v1048_v49, %v1432_v0  ;;  %v1055_v56 = vunpack.c.l.bf16 %v1319_v45  ;;  %v1056_v57 = vunpack.c.h.bf16 %v1319_v45 }
  0x1d   : > { %v388_v58 = vadd.f32 %v1441_v9, %v317_v50  ;;  %v389_v59 = vadd.f32 %v1441_v9, %v318_v51  ;;  %v321_v60 = vmul.f32 %v1051_v52, %v1432_v0  ;;  %v322_v61 = vmul.f32 %v1052_v53, %v1432_v0  ;;  %v1325_v53 = vld [vmem:[%s1427_s18 + $0x68] sm:$0xff]  }
  0x1e   : > { %v390_v62 = vadd.f32 %v1441_v9, %v319_v54  ;;  %v391_v63 = vadd.f32 %v1441_v9, %v320_v55  ;;  %v323_v1 = vmul.f32 %v1055_v56, %v1432_v0  ;;  %v324_v2 = vmul.f32 %v1056_v57, %v1432_v0 }
  0x1f   : > { %v452_v4 = vmax.f32 %v388_v58, 0.0  ;;  %v453_v5 = vmax.f32 %v389_v59, 0.0  ;;  %v392_v6 = vadd.f32 %v1441_v9, %v321_v60  ;;  %v393_v7 = vadd.f32 %v1441_v9, %v322_v61  ;;  %v1326_v58 = vld [vmem:[%s1427_s18 + $0x70] sm:$0xff]  }
  0x20   : > { %v454_v8 = vmax.f32 %v390_v62, 0.0  ;;  %v455_v10 = vmax.f32 %v391_v63, 0.0  ;;  %v394_v11 = vadd.f32 %v1441_v9, %v323_v1  ;;  %v395_v12 = vadd.f32 %v1441_v9, %v324_v2  ;;  %v1327_v63 = vld [vmem:[%s1427_s18 + $0x78] sm:$0xff]  }
  0x21   : > { %v1176_v14 = vpack.c.bf16 %v453_v5, %v452_v4  ;;  %v456_v15 = vmax.f32 %v392_v6, 0.0  ;;  %v457_v16 = vmax.f32 %v393_v7, 0.0  ;;  %v1059_v17 = vunpack.c.l.bf16 %v1320_v3 }
  0x22   : > { %v1181_v19 = vpack.c.bf16 %v455_v10, %v454_v8  ;;  %v458_v20 = vmax.f32 %v394_v11, 0.0  ;;  %v459_v21 = vmax.f32 %v395_v12, 0.0  ;;  %v1060_v22 = vunpack.c.h.bf16 %v1320_v3 }
  0x23   : > { %1347 = vst [vmem:[%s1466_s25 + $0x20] sm:$0xff] %v1176_v14   ;;  %v1186_v24 = vpack.c.bf16 %v457_v16, %v456_v15  ;;  %v325_v25 = vmul.f32 %v1059_v17, %v1432_v0  ;;  %v1063_v26 = vunpack.c.l.bf16 %v1321_v13  ;;  %v1064_v27 = vunpack.c.h.bf16 %v1321_v13  ;;  %v1328_v14 = vld [vmem:[%s1427_s18 + $0x80] sm:$0xff]  }
  0x24   : > { %1348 = vst [vmem:[%s1466_s25 + $0x28] sm:$0xff] %v1181_v19   ;;  %v1191_v28 = vpack.c.bf16 %v459_v21, %v458_v20  ;;  %v326_v29 = vmul.f32 %v1060_v22, %v1432_v0  ;;  %v1067_v30 = vunpack.c.l.bf16 %v1322_v18  ;;  %v1068_v31 = vunpack.c.h.bf16 %v1322_v18 }
  0x25   : > { %1349 = vst [vmem:[%s1466_s25 + $0x30] sm:$0xff] %v1186_v24   ;;  %v396_v32 = vadd.f32 %v1441_v9, %v325_v25  ;;  %v327_v33 = vmul.f32 %v1063_v26, %v1432_v0  ;;  %v328_v34 = vmul.f32 %v1064_v27, %v1432_v0  ;;  %v1071_v35 = vunpack.c.l.bf16 %v1323_v23 }
  0x26   : > { %1350 = vst [vmem:[%s1466_s25 + $0x38] sm:$0xff] %v1191_v28   ;;  %v397_v36 = vadd.f32 %v1441_v9, %v326_v29  ;;  %v329_v37 = vmul.f32 %v1067_v30, %v1432_v0  ;;  %v330_v38 = vmul.f32 %v1068_v31, %v1432_v0  ;;  %v1072_v39 = vunpack.c.h.bf16 %v1323_v23  ;;  %v1329_v31 = vld [vmem:[%s1427_s18 + $0x88] sm:$0xff]  }
  0x27   : > { %v460_v41 = vmax.f32 %v396_v32, 0.0  ;;  %v398_v42 = vadd.f32 %v1441_v9, %v327_v33  ;;  %v399_v43 = vadd.f32 %v1441_v9, %v328_v34  ;;  %v331_v44 = vmul.f32 %v1071_v35, %v1432_v0 }
  0x28   : > { %v461_v45 = vmax.f32 %v397_v36, 0.0  ;;  %v400_v46 = vadd.f32 %v1441_v9, %v329_v37  ;;  %v401_v47 = vadd.f32 %v1441_v9, %v330_v38  ;;  %v332_v48 = vmul.f32 %v1072_v39, %v1432_v0  ;;  %v1330_v36 = vld [vmem:[%s1427_s18 + $0x90] sm:$0xff]  }
  0x29   : > { %v462_v49 = vmax.f32 %v398_v42, 0.0  ;;  %v463_v50 = vmax.f32 %v399_v43, 0.0  ;;  %v402_v51 = vadd.f32 %v1441_v9, %v331_v44  ;;  %v1075_v52 = vunpack.c.l.bf16 %v1324_v40 }
  0x2a   : > { %v1196_v54 = vpack.c.bf16 %v461_v45, %v460_v41  ;;  %v464_v55 = vmax.f32 %v400_v46, 0.0  ;;  %v465_v56 = vmax.f32 %v401_v47, 0.0  ;;  %v403_v57 = vadd.f32 %v1441_v9, %v332_v48  ;;  %v1331_v41 = vld [vmem:[%s1427_s18 + $0x98] sm:$0xff]  }
  0x2b   : > { %v1201_v59 = vpack.c.bf16 %v463_v50, %v462_v49  ;;  %v466_v60 = vmax.f32 %v402_v51, 0.0  ;;  %v1076_v61 = vunpack.c.h.bf16 %v1324_v40  ;;  %v333_v62 = vmul.f32 %v1075_v52, %v1432_v0 }
  0x2c   : > { %1351 = vst [vmem:[%s1466_s25 + $0x40] sm:$0xff] %v1196_v54   ;;  %v1206_v1 = vpack.c.bf16 %v465_v56, %v464_v55  ;;  %v467_v2 = vmax.f32 %v403_v57, 0.0  ;;  %v1079_v3 = vunpack.c.l.bf16 %v1325_v53  ;;  %v1080_v4 = vunpack.c.h.bf16 %v1325_v53  ;;  %v1332_v54 = vld [vmem:[%s1427_s18 + $0xa0] sm:$0xff]  }
  0x2d   : > { %1352 = vst [vmem:[%s1466_s25 + $0x48] sm:$0xff] %v1201_v59   ;;  %v334_v5 = vmul.f32 %v1076_v61, %v1432_v0  ;;  %v404_v6 = vadd.f32 %v1441_v9, %v333_v62  ;;  %v1083_v7 = vunpack.c.l.bf16 %v1326_v58  ;;  %v1084_v8 = vunpack.c.h.bf16 %v1326_v58 }
  0x2e   : > { %1353 = vst [vmem:[%s1466_s25 + $0x50] sm:$0xff] %v1206_v1   ;;  %v1211_v10 = vpack.c.bf16 %v467_v2, %v466_v60  ;;  %v335_v11 = vmul.f32 %v1079_v3, %v1432_v0  ;;  %v336_v12 = vmul.f32 %v1080_v4, %v1432_v0  ;;  %v1087_v13 = vunpack.c.l.bf16 %v1327_v63  ;;  %v1333_v4 = vld [vmem:[%s1427_s18 + $0xa8] sm:$0xff]  }
  0x2f   : > { %v405_v15 = vadd.f32 %v1441_v9, %v334_v5  ;;  %v468_v16 = vmax.f32 %v404_v6, 0.0  ;;  %v337_v17 = vmul.f32 %v1083_v7, %v1432_v0  ;;  %v338_v18 = vmul.f32 %v1084_v8, %v1432_v0 }
  0x30   : > { %1354 = vst [vmem:[%s1466_s25 + $0x58] sm:$0xff] %v1211_v10   ;;  %v406_v19 = vadd.f32 %v1441_v9, %v335_v11  ;;  %v407_v20 = vadd.f32 %v1441_v9, %v336_v12  ;;  %v1088_v21 = vunpack.c.h.bf16 %v1327_v63  ;;  %v339_v22 = vmul.f32 %v1087_v13, %v1432_v0 }
  0x31   : > { %v469_v23 = vmax.f32 %v405_v15, 0.0  ;;  %v408_v24 = vadd.f32 %v1441_v9, %v337_v17  ;;  %v409_v25 = vadd.f32 %v1441_v9, %v338_v18  ;;  %v1091_v26 = vunpack.c.l.bf16 %v1328_v14 }
  0x32   : > { %v470_v27 = vmax.f32 %v406_v19, 0.0  ;;  %v471_v28 = vmax.f32 %v407_v20, 0.0  ;;  %v340_v29 = vmul.f32 %v1088_v21, %v1432_v0  ;;  %v410_v30 = vadd.f32 %v1441_v9, %v339_v22  ;;  %v1335_v19 = vld [vmem:[%s1427_s18 + $0xb8] sm:$0xff]  }
  0x33   : > { %v1216_v32 = vpack.c.bf16 %v469_v23, %v468_v16  ;;  %v472_v33 = vmax.f32 %v408_v24, 0.0  ;;  %v473_v34 = vmax.f32 %v409_v25, 0.0  ;;  %v1092_v35 = vunpack.c.h.bf16 %v1328_v14  ;;  %v1334_v14 = vld [vmem:[%s1427_s18 + $0xb0] sm:$0xff]  }
  0x34   : > { %v1221_v37 = vpack.c.bf16 %v471_v28, %v470_v27  ;;  %v411_v38 = vadd.f32 %v1441_v9, %v340_v29  ;;  %v474_v39 = vmax.f32 %v410_v30, 0.0  ;;  %v341_v40 = vmul.f32 %v1091_v26, %v1432_v0 }
  0x35   : > { %1355 = vst [vmem:[%s1466_s25 + $0x60] sm:$0xff] %v1216_v32   ;;  %v1226_v42 = vpack.c.bf16 %v473_v34, %v472_v33  ;;  %v342_v43 = vmul.f32 %v1092_v35, %v1432_v0  ;;  %v1095_v44 = vunpack.c.l.bf16 %v1329_v31  ;;  %v1096_v45 = vunpack.c.h.bf16 %v1329_v31  ;;  %v1336_v32 = vld [vmem:[%s1427_s18 + $0xc0] sm:$0xff]  }
  0x36   : > { %1356 = vst [vmem:[%s1466_s25 + $0x68] sm:$0xff] %v1221_v37   ;;  %v475_v46 = vmax.f32 %v411_v38, 0.0  ;;  %v412_v47 = vadd.f32 %v1441_v9, %v341_v40  ;;  %v1099_v48 = vunpack.c.l.bf16 %v1330_v36  ;;  %v1100_v49 = vunpack.c.h.bf16 %v1330_v36 }
  0x37   : > { %1357 = vst [vmem:[%s1466_s25 + $0x70] sm:$0xff] %v1226_v42   ;;  %v413_v50 = vadd.f32 %v1441_v9, %v342_v43  ;;  %v343_v51 = vmul.f32 %v1095_v44, %v1432_v0  ;;  %v344_v52 = vmul.f32 %v1096_v45, %v1432_v0  ;;  %v1103_v53 = vunpack.c.l.bf16 %v1331_v41  ;;  %v1337_v45 = vld [vmem:[%s1427_s18 + $0xc8] sm:$0xff]  }
  0x38   : > { %v1231_v55 = vpack.c.bf16 %v475_v46, %v474_v39  ;;  %v476_v56 = vmax.f32 %v412_v47, 0.0  ;;  %v345_v57 = vmul.f32 %v1099_v48, %v1432_v0  ;;  %v346_v58 = vmul.f32 %v1100_v49, %v1432_v0 }
  0x39   : > { %v477_v59 = vmax.f32 %v413_v50, 0.0  ;;  %v414_v60 = vadd.f32 %v1441_v9, %v343_v51  ;;  %v415_v61 = vadd.f32 %v1441_v9, %v344_v52  ;;  %v1104_v62 = vunpack.c.h.bf16 %v1331_v41 }
  0x3a   : > { %1358 = vst [vmem:[%s1466_s25 + $0x78] sm:$0xff] %v1231_v55   ;;  %v416_v63 = vadd.f32 %v1441_v9, %v345_v57  ;;  %v417_v1 = vadd.f32 %v1441_v9, %v346_v58  ;;  %v347_v2 = vmul.f32 %v1103_v53, %v1432_v0  ;;  %v1107_v3 = vunpack.c.l.bf16 %v1332_v54 }
  0x3b   : > { %v1236_v5 = vpack.c.bf16 %v477_v59, %v476_v56  ;;  %v478_v6 = vmax.f32 %v414_v60, 0.0  ;;  %v479_v7 = vmax.f32 %v415_v61, 0.0  ;;  %v348_v8 = vmul.f32 %v1104_v62, %v1432_v0 }
  0x3c   : > { %v480_v10 = vmax.f32 %v416_v63, 0.0  ;;  %v481_v11 = vmax.f32 %v417_v1, 0.0  ;;  %v418_v12 = vadd.f32 %v1441_v9, %v347_v2  ;;  %v1108_v13 = vunpack.c.h.bf16 %v1332_v54  ;;  %v1338_v54 = vld [vmem:[%s1427_s18 + $0xd0] sm:$0xff]   ;;  %v1339_v63 = vld [vmem:[%s1427_s18 + $0xd8] sm:$0xff]  }
  0x3d   : > { %1359 = vst [vmem:[%s1466_s25 + $0x80] sm:$0xff] %v1236_v5   ;;  %v1241_v15 = vpack.c.bf16 %v479_v7, %v478_v6  ;;  %v419_v16 = vadd.f32 %v1441_v9, %v348_v8  ;;  %v349_v17 = vmul.f32 %v1107_v3, %v1432_v0  ;;  %v1111_v18 = vunpack.c.l.bf16 %v1333_v4 }
  0x3e   : > { %v1246_v20 = vpack.c.bf16 %v481_v11, %v480_v10  ;;  %v482_v21 = vmax.f32 %v418_v12, 0.0  ;;  %v350_v22 = vmul.f32 %v1108_v13, %v1432_v0  ;;  %v1112_v23 = vunpack.c.h.bf16 %v1333_v4  ;;  %v1340_v10 = vld [vmem:[%s1427_s18 + $0xe0] sm:$0xff]  }
  0x3f   : > { %1360 = vst [vmem:[%s1466_s25 + $0x88] sm:$0xff] %v1241_v15   ;;  %v483_v24 = vmax.f32 %v419_v16, 0.0  ;;  %v420_v25 = vadd.f32 %v1441_v9, %v349_v17  ;;  %v351_v26 = vmul.f32 %v1111_v18, %v1432_v0  ;;  %v1115_v27 = vunpack.c.l.bf16 %v1334_v14 }
  0x40   : > { %1361 = vst [vmem:[%s1466_s25 + $0x90] sm:$0xff] %v1246_v20   ;;  %v421_v28 = vadd.f32 %v1441_v9, %v350_v22  ;;  %v352_v29 = vmul.f32 %v1112_v23, %v1432_v0  ;;  %v1116_v30 = vunpack.c.h.bf16 %v1334_v14  ;;  %v1119_v31 = vunpack.c.l.bf16 %v1335_v19  ;;  %v1341_v23 = vld [vmem:[%s1427_s18 + $0xe8] sm:$0xff]  }
  0x41   : > { %v1251_v33 = vpack.c.bf16 %v483_v24, %v482_v21  ;;  %v484_v34 = vmax.f32 %v420_v25, 0.0  ;;  %v422_v35 = vadd.f32 %v1441_v9, %v351_v26  ;;  %v353_v36 = vmul.f32 %v1115_v27, %v1432_v0 }
  0x42   : > { %v485_v37 = vmax.f32 %v421_v28, 0.0  ;;  %v423_v38 = vadd.f32 %v1441_v9, %v352_v29  ;;  %v354_v39 = vmul.f32 %v1116_v30, %v1432_v0  ;;  %v1120_v40 = vunpack.c.h.bf16 %v1335_v19 }
  0x43   : > { %1362 = vst [vmem:[%s1466_s25 + $0x98] sm:$0xff] %v1251_v33   ;;  %v486_v41 = vmax.f32 %v422_v35, 0.0  ;;  %v424_v42 = vadd.f32 %v1441_v9, %v353_v36  ;;  %v355_v43 = vmul.f32 %v1119_v31, %v1432_v0  ;;  %v1123_v44 = vunpack.c.l.bf16 %v1336_v32 }
  0x44   : > { %v1256_v46 = vpack.c.bf16 %v485_v37, %v484_v34  ;;  %v487_v47 = vmax.f32 %v423_v38, 0.0  ;;  %v425_v48 = vadd.f32 %v1441_v9, %v354_v39  ;;  %v356_v49 = vmul.f32 %v1120_v40, %v1432_v0 }
  0x45   : > { %v488_v50 = vmax.f32 %v424_v42, 0.0  ;;  %v426_v51 = vadd.f32 %v1441_v9, %v355_v43  ;;  %v1124_v52 = vunpack.c.h.bf16 %v1336_v32  ;;  %v357_v53 = vmul.f32 %v1123_v44, %v1432_v0  ;;  %v1342_v32 = vld [vmem:[%s1427_s18 + $0xf0] sm:$0xff]  }
  0x46   : > { %1363 = vst [vmem:[%s1466_s25 + $0xa0] sm:$0xff] %v1256_v46   ;;  %v1261_v55 = vpack.c.bf16 %v487_v47, %v486_v41  ;;  %v489_v56 = vmax.f32 %v425_v48, 0.0  ;;  %v427_v57 = vadd.f32 %v1441_v9, %v356_v49  ;;  %v1127_v58 = vunpack.c.l.bf16 %v1337_v45  ;;  %v1343_v41 = vld [vmem:[%s1427_s18 + $0xf8] sm:$0xff]  }
  0x47   : > { %v490_v59 = vmax.f32 %v426_v51, 0.0  ;;  %v358_v60 = vmul.f32 %v1124_v52, %v1432_v0  ;;  %v428_v61 = vadd.f32 %v1441_v9, %v357_v53  ;;  %v1128_v62 = vunpack.c.h.bf16 %v1337_v45 }
  0x48   : > { %1364 = vst [vmem:[%s1466_s25 + $0xa8] sm:$0xff] %v1261_v55   ;;  %v1266_v1 = vpack.c.bf16 %v489_v56, %v488_v50  ;;  %v491_v2 = vmax.f32 %v427_v57, 0.0  ;;  %v359_v3 = vmul.f32 %v1127_v58, %v1432_v0  ;;  %v1131_v4 = vunpack.c.l.bf16 %v1338_v54 }
  0x49   : > { %v429_v5 = vadd.f32 %v1441_v9, %v358_v60  ;;  %v492_v6 = vmax.f32 %v428_v61, 0.0  ;;  %v360_v7 = vmul.f32 %v1128_v62, %v1432_v0  ;;  %v1132_v8 = vunpack.c.h.bf16 %v1338_v54 }
  0x4a   : > { %1365 = vst [vmem:[%s1466_s25 + $0xb0] sm:$0xff] %v1266_v1   ;;  %v1271_v11 = vpack.c.bf16 %v491_v2, %v490_v59  ;;  %v430_v12 = vadd.f32 %v1441_v9, %v359_v3  ;;  %v361_v13 = vmul.f32 %v1131_v4, %v1432_v0  ;;  %v1135_v14 = vunpack.c.l.bf16 %v1339_v63 }
  0x4b   : > { %v493_v15 = vmax.f32 %v429_v5, 0.0  ;;  %v431_v16 = vadd.f32 %v1441_v9, %v360_v7  ;;  %v362_v17 = vmul.f32 %v1132_v8, %v1432_v0  ;;  %v1136_v18 = vunpack.c.h.bf16 %v1339_v63 }
  0x4c   : > { %1366 = vst [vmem:[%s1466_s25 + $0xb8] sm:$0xff] %v1271_v11   ;;  %v494_v19 = vmax.f32 %v430_v12, 0.0  ;;  %v432_v20 = vadd.f32 %v1441_v9, %v361_v13  ;;  %v363_v21 = vmul.f32 %v1135_v14, %v1432_v0  ;;  %v1139_v22 = vunpack.c.l.bf16 %v1340_v10 }
  0x4d   : > { %v1276_v24 = vpack.c.bf16 %v493_v15, %v492_v6  ;;  %v495_v25 = vmax.f32 %v431_v16, 0.0  ;;  %v433_v26 = vadd.f32 %v1441_v9, %v362_v17  ;;  %v364_v27 = vmul.f32 %v1136_v18, %v1432_v0 }
  0x4e   : > { %v496_v28 = vmax.f32 %v432_v20, 0.0  ;;  %v434_v29 = vadd.f32 %v1441_v9, %v363_v21  ;;  %v1140_v30 = vunpack.c.h.bf16 %v1340_v10  ;;  %v365_v31 = vmul.f32 %v1139_v22, %v1432_v0 }
  0x4f   : > { %1367 = vst [vmem:[%s1466_s25 + $0xc0] sm:$0xff] %v1276_v24   ;;  %v1281_v33 = vpack.c.bf16 %v495_v25, %v494_v19  ;;  %v497_v34 = vmax.f32 %v433_v26, 0.0  ;;  %v435_v35 = vadd.f32 %v1441_v9, %v364_v27  ;;  %v1143_v36 = vunpack.c.l.bf16 %v1341_v23 }
  0x50   : > { %v498_v37 = vmax.f32 %v434_v29, 0.0  ;;  %v366_v38 = vmul.f32 %v1140_v30, %v1432_v0  ;;  %v436_v39 = vadd.f32 %v1441_v9, %v365_v31  ;;  %v1144_v40 = vunpack.c.h.bf16 %v1341_v23 }
  0x51   : > { %1368 = vst [vmem:[%s1466_s25 + $0xc8] sm:$0xff] %v1281_v33   ;;  %v1286_v42 = vpack.c.bf16 %v497_v34, %v496_v28  ;;  %v499_v43 = vmax.f32 %v435_v35, 0.0  ;;  %v367_v44 = vmul.f32 %v1143_v36, %v1432_v0  ;;  %v1147_v45 = vunpack.c.l.bf16 %v1342_v32 }
  0x52   : > { %v437_v46 = vadd.f32 %v1441_v9, %v366_v38  ;;  %v500_v47 = vmax.f32 %v436_v39, 0.0  ;;  %v368_v48 = vmul.f32 %v1144_v40, %v1432_v0  ;;  %v1148_v49 = vunpack.c.h.bf16 %v1342_v32 }
  0x53   : > { %1369 = vst [vmem:[%s1466_s25 + $0xd0] sm:$0xff] %v1286_v42   ;;  %v1291_v50 = vpack.c.bf16 %v499_v43, %v498_v37  ;;  %v438_v51 = vadd.f32 %v1441_v9, %v367_v44  ;;  %v369_v52 = vmul.f32 %v1147_v45, %v1432_v0  ;;  %v1151_v53 = vunpack.c.l.bf16 %v1343_v41 }
  0x54   : > { %v501_v54 = vmax.f32 %v437_v46, 0.0  ;;  %v439_v55 = vadd.f32 %v1441_v9, %v368_v48  ;;  %v370_v56 = vmul.f32 %v1148_v49, %v1432_v0  ;;  %v1152_v57 = vunpack.c.h.bf16 %v1343_v41 }
  0x55   : > { %1370 = vst [vmem:[%s1466_s25 + $0xd8] sm:$0xff] %v1291_v50   ;;  %v502_v58 = vmax.f32 %v438_v51, 0.0  ;;  %v440_v59 = vadd.f32 %v1441_v9, %v369_v52  ;;  %v371_v60 = vmul.f32 %v1151_v53, %v1432_v0 }
  0x56   : > { %v1296_v61 = vpack.c.bf16 %v501_v54, %v500_v47  ;;  %v503_v62 = vmax.f32 %v439_v55, 0.0  ;;  %v441_v63 = vadd.f32 %v1441_v9, %v370_v56  ;;  %v372_v1 = vmul.f32 %v1152_v57, %v1432_v0 }
  0x57   : > { %v504_v2 = vmax.f32 %v440_v59, 0.0  ;;  %v442_v3 = vadd.f32 %v1441_v9, %v371_v60 }
  0x58   : > { %1371 = vst [vmem:[%s1466_s25 + $0xe0] sm:$0xff] %v1296_v61   ;;  %v1301_v4 = vpack.c.bf16 %v503_v62, %v502_v58  ;;  %v505_v5 = vmax.f32 %v441_v63, 0.0  ;;  %v443_v6 = vadd.f32 %v1441_v9, %v372_v1 }
  0x59   : > { %v506_v7 = vmax.f32 %v442_v3, 0.0 }
  0x5a   : > { %1372 = vst [vmem:[%s1466_s25 + $0xe8] sm:$0xff] %v1301_v4   ;;  %v1306_v8 = vpack.c.bf16 %v505_v5, %v504_v2  ;;  %v507_v10 = vmax.f32 %v443_v6, 0.0 }
  0x5c   : > { %1373 = vst [vmem:[%s1466_s25 + $0xf0] sm:$0xff] %v1306_v8   ;;  %v1311_v11 = vpack.c.bf16 %v507_v10, %v506_v7 }
  0x5e   : > { %1374 = vst [vmem:[%s1466_s25 + $0xf8] sm:$0xff] %v1311_v11  }
  0x5f PF: > { %s13_s12 = sadd.s32 1, %s1389_s12  }
  0x60   : > { %p10_p4 = scmp.ge.s32.totalorder %s13_s12, 4  }
  0x62   :  { %12 = sbr.rel (!%p10_p4) target bundleno = 1 (0x1), region = 62 }

// kernel: resnet_forward.26
= control target key start
LH: loop header
LB: loop body
LE: loop exit
PB: predicated region body
PF: predicated region fallthrough
CT: control target
= control target key end

     0   :  { %s5273_s15 = smov 0   ;;  %s5275_s16 = smov 0   ;;  %s6761_s0 = inlined_call_operand.vmem [shape: bf16[1024,1280], index: 0, kind: input, shape index: {}]   ;;  %s6762_s1 = inlined_call_operand.vmem [shape: bf16[1280,128], index: 1, kind: input, shape index: {}]   ;;  %s6763_s2 = inlined_call_operand.vmem [shape: bf16[1024,128], index: 2, kind: output, shape index: {0}]   ;;  %s6764_s3 = inlined_call_operand.vmem [shape: f32[16,128], index: 3, kind: output, shape index: {1}]   ;;  %s6765_s4 = inlined_call_operand.vmem [shape: f32[16,128], index: 4, kind: output, shape index: {2}]  }
   0x1   :  { %s5277_s17 = smov 0   ;;  %s5279_s18 = smov 0  }
   0x2   :  { %s5281_s19 = smov 0   ;;  %s5283_s20 = smov 0  }
   0x3   :  { %s5285_s21 = smov 0  }
   0x4 LB: > { %s27_s22 = sadd.s32 1, %s5236_s19  ;;  %s34_s23 = sadd.s32 1, %s5240_s20  ;;  %s5244_s21 = sphi %s5285_s21, %s15_s21   ;;  %s5240_s20 = sphi %s5283_s20, %s6805_s20   ;;  %s5236_s19 = sphi %s5281_s19, %s6804_s19   ;;  %s5232_s18 = sphi %s5279_s18, %s6803_s18   ;;  %s5228_s17 = sphi %s5277_s17, %s6802_s17   ;;  %s5224_s16 = sphi %s5275_s16, %s6801_s16   ;;  %s5220_s15 = sphi %s5273_s15, %s6800_s15  }
   0x5   : > { %p28_p0 = scmp.ge.s32.totalorder %s27_s22, 2  ;;  %p50_p1 = scmp.ne.s32.totalorder %s5224_s16, %s5220_s15 }
   0x6   : > { %p51_p2 = scmp.eq.s32.totalorder %s5244_s21, 0  ;;  %s43_s27 = sadd.s32 1, %s5224_s16 }
   0x7   : > { %s6807_s22 = smov (%p28_p0, %s27_s22), 0  ;;  %s6809_s23 = smov (!%p28_p0, %s34_s23), %s5240_s20 }
   0x8   : > { %p52_p3 = por %p51_p2, %p50_p1  ;;  %p36_p4 = scmp.ge.s32.totalorder %s6809_s23, 2 }
   0x9   : > { %s39_s24 = ssub.s32 %s5236_s19, %s6807_s22  ;;  %p3972_p6 = scmp.ge.s32.totalorder %s5244_s21, 4 }
   0xa   : > { %s6811_s23 = smov (%p36_p4, %s6809_s23), 0 }
   0xb   : > { %s38_s25 = ssub.s32 %s5240_s20, %s6811_s23  ;;  %188 = sbr.rel (%p3972_p6) target bundleno = 133 (0x85), region = 16 }
   0xc   : > { %s40_s26 = sor.u32 %s39_s24, %s38_s25 }
   0xd   : > { %p41_p5 = scmp.eq.s32.totalorder %s40_s26, 0 }
   0xf   : > { %s5324_s28 = scalar_select %p41_p5, %s5224_s16, %s43_s27  }
  0x12   : > { %191 = sbr.rel (!%p52_p3) target bundleno = 133 (0x85), region = 20  ;;  %s193_s29 = sand.u32 (%p52_p3), 1, %s5224_s16  }
  0x13   : > { %s197_s30 = smul.u32 (%p52_p3), 5, %s5236_s19 }
  0x14   : > { %s4865_s5 = smul.u32 (%p52_p3), 1280, %s193_s29 }
  0x15   : > { %s4866_s6 = smul.u32 (%p52_p3), 640, %s5240_s20 }
  0x16   : > { %s5338_s12 = scalar_lea.vmem (%p52_p3), [#allocation3], %s4865_s5 }
  0x17   : > { %s199_s7 = sadd.s32 (%p52_p3), %s4866_s6, %s197_s30 }
  0x18   : > { %s3975_s8 = sshll.u32 (%p52_p3), %s199_s7, 2 }
  0x19   : > { %s5333_s11 = scalar_lea.vmem %s6761_s0, %s3975_s8 }
  0x1a   : > { %v216_v0 = vld [vmem:[%s5333_s11] sm:$0xff]  ;;  %v218_v1 = vld [vmem:[%s5333_s11 + $0x8] sm:$0xff]  ;;  %v222_v3 = vld [vmem:[%s5333_s11 + $0x30] sm:$0xff] }
  0x1b   : > { %v220_v2 = vld [vmem:[%s5333_s11 + $0x28] sm:$0xff]  ;;  %217 = vst [vmem:[%s5338_s12] sm:$0xff] %v216_v0  ;;  %219 = vst [vmem:[%s5338_s12 + $0x8] sm:$0xff] %v218_v1  ;;  %v224_v4 = vld [vmem:[%s5333_s11 + $0x50] sm:$0xff] }
  0x1c   : > { %221 = vst [vmem:[%s5338_s12 + $0x14] sm:$0xff] %v220_v2  ;;  %v226_v5 = vld [vmem:[%s5333_s11 + $0x58] sm:$0xff]  ;;  %223 = vst [vmem:[%s5338_s12 + $0x1c] sm:$0xff] %v222_v3  ;;  %v230_v7 = vld [vmem:[%s5333_s11 + $0x80] sm:$0xff] }
  0x1d   : > { %225 = vst [vmem:[%s5338_s12 + $0x28] sm:$0xff] %v224_v4  ;;  %227 = vst [vmem:[%s5338_s12 + $0x30] sm:$0xff] %v226_v5  ;;  %v228_v6 = vld [vmem:[%s5333_s11 + $0x78] sm:$0xff]  ;;  %v232_v8 = vld [vmem:[%s5333_s11 + $0xa0] sm:$0xff] }
  0x1e   : > { %229 = vst [vmem:[%s5338_s12 + $0x3c] sm:$0xff] %v228_v6  ;;  %231 = vst [vmem:[%s5338_s12 + $0x44] sm:$0xff] %v230_v7  ;;  %v234_v9 = vld [vmem:[%s5333_s11 + $0xa8] sm:$0xff]  ;;  %v238_v11 = vld [vmem:[%s5333_s11 + $0xd0] sm:$0xff] }
  0x1f   : > { %233 = vst [vmem:[%s5338_s12 + $0x50] sm:$0xff] %v232_v8  ;;  %v236_v10 = vld [vmem:[%s5333_s11 + $0xc8] sm:$0xff]  ;;  %235 = vst [vmem:[%s5338_s12 + $0x58] sm:$0xff] %v234_v9  ;;  %v240_v12 = vld [vmem:[%s5333_s11 + $0xf0] sm:$0xff] }
  0x20   : > { %237 = vst [vmem:[%s5338_s12 + $0x64] sm:$0xff] %v236_v10  ;;  %239 = vst [vmem:[%s5338_s12 + $0x6c] sm:$0xff] %v238_v11  ;;  %v242_v13 = vld [vmem:[%s5333_s11 + $0xf8] sm:$0xff]  ;;  %v246_v15 = vld [vmem:[%s5333_s11 + $0x120] sm:$0xff] }
  0x21   : > { %v244_v14 = vld [vmem:[%s5333_s11 + $0x118] sm:$0xff]  ;;  %241 = vst [vmem:[%s5338_s12 + $0x78] sm:$0xff] %v240_v12  ;;  %243 = vst [vmem:[%s5338_s12 + $0x80] sm:$0xff] %v242_v13  ;;  %v248_v16 = vld [vmem:[%s5333_s11 + $0x140] sm:$0xff] }
  0x22   : > { %245 = vst [vmem:[%s5338_s12 + $0x8c] sm:$0xff] %v244_v14  ;;  %v250_v17 = vld [vmem:[%s5333_s11 + $0x148] sm:$0xff]  ;;  %247 = vst [vmem:[%s5338_s12 + $0x94] sm:$0xff] %v246_v15  ;;  %v254_v19 = vld [vmem:[%s5333_s11 + $0x170] sm:$0xff] }
  0x23   : > { %249 = vst [vmem:[%s5338_s12 + $0xa0] sm:$0xff] %v248_v16  ;;  %251 = vst [vmem:[%s5338_s12 + $0xa8] sm:$0xff] %v250_v17  ;;  %v252_v18 = vld [vmem:[%s5333_s11 + $0x168] sm:$0xff]  ;;  %v256_v20 = vld [vmem:[%s5333_s11 + $0x190] sm:$0xff] }
  0x24   : > { %253 = vst [vmem:[%s5338_s12 + $0xb4] sm:$0xff] %v252_v18  ;;  %255 = vst [vmem:[%s5338_s12 + $0xbc] sm:$0xff] %v254_v19  ;;  %v258_v21 = vld [vmem:[%s5333_s11 + $0x198] sm:$0xff]  ;;  %v262_v23 = vld [vmem:[%s5333_s11 + $0x1c0] sm:$0xff] }
  0x25   : > { %257 = vst [vmem:[%s5338_s12 + $0xc8] sm:$0xff] %v256_v20  ;;  %v260_v22 = vld [vmem:[%s5333_s11 + $0x1b8] sm:$0xff]  ;;  %259 = vst [vmem:[%s5338_s12 + $0xd0] sm:$0xff] %v258_v21  ;;  %v264_v24 = vld [vmem:[%s5333_s11 + $0x1e0] sm:$0xff] }
  0x26   : > { %261 = vst [vmem:[%s5338_s12 + $0xdc] sm:$0xff] %v260_v22  ;;  %263 = vst [vmem:[%s5338_s12 + $0xe4] sm:$0xff] %v262_v23  ;;  %v266_v25 = vld [vmem:[%s5333_s11 + $0x1e8] sm:$0xff]  ;;  %v270_v27 = vld [vmem:[%s5333_s11 + $0x210] sm:$0xff] }
  0x27   : > { %v268_v26 = vld [vmem:[%s5333_s11 + $0x208] sm:$0xff]  ;;  %265 = vst [vmem:[%s5338_s12 + $0xf0] sm:$0xff] %v264_v24  ;;  %267 = vst [vmem:[%s5338_s12 + $0xf8] sm:$0xff] %v266_v25  ;;  %v272_v28 = vld [vmem:[%s5333_s11 + $0x230] sm:$0xff] }
  0x28   : > { %269 = vst [vmem:[%s5338_s12 + $0x104] sm:$0xff] %v268_v26  ;;  %v274_v29 = vld [vmem:[%s5333_s11 + $0x238] sm:$0xff]  ;;  %271 = vst [vmem:[%s5338_s12 + $0x10c] sm:$0xff] %v270_v27  ;;  %v278_v31 = vld [vmem:[%s5333_s11 + $0x260] sm:$0xff] }
  0x29   : > { %273 = vst [vmem:[%s5338_s12 + $0x118] sm:$0xff] %v272_v28  ;;  %275 = vst [vmem:[%s5338_s12 + $0x120] sm:$0xff] %v274_v29  ;;  %v276_v30 = vld [vmem:[%s5333_s11 + $0x258] sm:$0xff]  ;;  %v280_v32 = vld [vmem:[%s5333_s11 + $0x280] sm:$0xff] }
  0x2a   : > { %277 = vst [vmem:[%s5338_s12 + $0x12c] sm:$0xff] %v276_v30  ;;  %279 = vst [vmem:[%s5338_s12 + $0x134] sm:$0xff] %v278_v31  ;;  %v282_v33 = vld [vmem:[%s5333_s11 + $0x288] sm:$0xff]  ;;  %v286_v35 = vld [vmem:[%s5333_s11 + $0x2b0] sm:$0xff] }
  0x2b   : > { %281 = vst [vmem:[%s5338_s12 + $0x140] sm:$0xff] %v280_v32  ;;  %v284_v34 = vld [vmem:[%s5333_s11 + $0x2a8] sm:$0xff]  ;;  %283 = vst [vmem:[%s5338_s12 + $0x148] sm:$0xff] %v282_v33  ;;  %v288_v36 = vld [vmem:[%s5333_s11 + $0x2d0] sm:$0xff] }
  0x2c   : > { %285 = vst [vmem:[%s5338_s12 + $0x154] sm:$0xff] %v284_v34  ;;  %287 = vst [vmem:[%s5338_s12 + $0x15c] sm:$0xff] %v286_v35  ;;  %v290_v37 = vld [vmem:[%s5333_s11 + $0x2d8] sm:$0xff]  ;;  %v294_v39 = vld [vmem:[%s5333_s11 + $0x300] sm:$0xff] }
  0x2d   : > { %v292_v38 = vld [vmem:[%s5333_s11 + $0x2f8] sm:$0xff]  ;;  %289 = vst [vmem:[%s5338_s12 + $0x168] sm:$0xff] %v288_v36  ;;  %291 = vst [vmem:[%s5338_s12 + $0x170] sm:$0xff] %v290_v37  ;;  %v296_v40 = vld [vmem:[%s5333_s11 + $0x320] sm:$0xff] }
  0x2e   : > { %293 = vst [vmem:[%s5338_s12 + $0x17c] sm:$0xff] %v292_v38  ;;  %v298_v41 = vld [vmem:[%s5333_s11 + $0x328] sm:$0xff]  ;;  %295 = vst [vmem:[%s5338_s12 + $0x184] sm:$0xff] %v294_v39  ;;  %v302_v43 = vld [vmem:[%s5333_s11 + $0x350] sm:$0xff] }
  0x2f   : > { %297 = vst [vmem:[%s5338_s12 + $0x190] sm:$0xff] %v296_v40  ;;  %299 = vst [vmem:[%s5338_s12 + $0x198] sm:$0xff] %v298_v41  ;;  %v300_v42 = vld [vmem:[%s5333_s11 + $0x348] sm:$0xff]  ;;  %v304_v44 = vld [vmem:[%s5333_s11 + $0x370] sm:$0xff] }
  0x30   : > { %301 = vst [vmem:[%s5338_s12 + $0x1a4] sm:$0xff] %v300_v42  ;;  %303 = vst [vmem:[%s5338_s12 + $0x1ac] sm:$0xff] %v302_v43  ;;  %v306_v45 = vld [vmem:[%s5333_s11 + $0x378] sm:$0xff]  ;;  %v310_v47 = vld [vmem:[%s5333_s11 + $0x3a0] sm:$0xff] }
  0x31   : > { %305 = vst [vmem:[%s5338_s12 + $0x1b8] sm:$0xff] %v304_v44  ;;  %v308_v46 = vld [vmem:[%s5333_s11 + $0x398] sm:$0xff]  ;;  %307 = vst [vmem:[%s5338_s12 + $0x1c0] sm:$0xff] %v306_v45  ;;  %v312_v48 = vld [vmem:[%s5333_s11 + $0x3c0] sm:$0xff] }
  0x32   : > { %309 = vst [vmem:[%s5338_s12 + $0x1cc] sm:$0xff] %v308_v46  ;;  %311 = vst [vmem:[%s5338_s12 + $0x1d4] sm:$0xff] %v310_v47  ;;  %v314_v49 = vld [vmem:[%s5333_s11 + $0x3c8] sm:$0xff]  ;;  %v318_v51 = vld [vmem:[%s5333_s11 + $0x3f0] sm:$0xff] }
  0x33   : > { %v316_v50 = vld [vmem:[%s5333_s11 + $0x3e8] sm:$0xff]  ;;  %313 = vst [vmem:[%s5338_s12 + $0x1e0] sm:$0xff] %v312_v48  ;;  %315 = vst [vmem:[%s5338_s12 + $0x1e8] sm:$0xff] %v314_v49  ;;  %v320_v52 = vld [vmem:[%s5333_s11 + $0x410] sm:$0xff] }
  0x34   : > { %317 = vst [vmem:[%s5338_s12 + $0x1f4] sm:$0xff] %v316_v50  ;;  %v322_v53 = vld [vmem:[%s5333_s11 + $0x418] sm:$0xff]  ;;  %319 = vst [vmem:[%s5338_s12 + $0x1fc] sm:$0xff] %v318_v51  ;;  %v326_v55 = vld [vmem:[%s5333_s11 + $0x440] sm:$0xff] }
  0x35   : > { %321 = vst [vmem:[%s5338_s12 + $0x208] sm:$0xff] %v320_v52  ;;  %323 = vst [vmem:[%s5338_s12 + $0x210] sm:$0xff] %v322_v53  ;;  %v324_v54 = vld [vmem:[%s5333_s11 + $0x438] sm:$0xff]  ;;  %v328_v56 = vld [vmem:[%s5333_s11 + $0x460] sm:$0xff] }
  0x36   : > { %325 = vst [vmem:[%s5338_s12 + $0x21c] sm:$0xff] %v324_v54  ;;  %327 = vst [vmem:[%s5338_s12 + $0x224] sm:$0xff] %v326_v55  ;;  %v330_v57 = vld [vmem:[%s5333_s11 + $0x468] sm:$0xff]  ;;  %v334_v59 = vld [vmem:[%s5333_s11 + $0x490] sm:$0xff] }
  0x37   : > { %329 = vst [vmem:[%s5338_s12 + $0x230] sm:$0xff] %v328_v56  ;;  %v332_v58 = vld [vmem:[%s5333_s11 + $0x488] sm:$0xff]  ;;  %331 = vst [vmem:[%s5338_s12 + $0x238] sm:$0xff] %v330_v57  ;;  %v336_v60 = vld [vmem:[%s5333_s11 + $0x4b0] sm:$0xff] }
  0x38   : > { %333 = vst [vmem:[%s5338_s12 + $0x244] sm:$0xff] %v332_v58  ;;  %335 = vst [vmem:[%s5338_s12 + $0x24c] sm:$0xff] %v334_v59  ;;  %v338_v61 = vld [vmem:[%s5333_s11 + $0x4b8] sm:$0xff]  ;;  %v342_v63 = vld [vmem:[%s5333_s11 + $0x4e0] sm:$0xff] }
  0x39   : > { %v340_v62 = vld [vmem:[%s5333_s11 + $0x4d8] sm:$0xff]  ;;  %337 = vst [vmem:[%s5338_s12 + $0x258] sm:$0xff] %v336_v60  ;;  %339 = vst [vmem:[%s5338_s12 + $0x260] sm:$0xff] %v338_v61  ;;  %v344_v0 = vld [vmem:[%s5333_s11 + $0x500] sm:$0xff] }
  0x3a   : > { %341 = vst [vmem:[%s5338_s12 + $0x26c] sm:$0xff] %v340_v62  ;;  %v346_v1 = vld [vmem:[%s5333_s11 + $0x508] sm:$0xff]  ;;  %343 = vst [vmem:[%s5338_s12 + $0x274] sm:$0xff] %v342_v63  ;;  %v350_v3 = vld [vmem:[%s5333_s11 + $0x530] sm:$0xff] }
  0x3b   : > { %345 = vst [vmem:[%s5338_s12 + $0x280] sm:$0xff] %v344_v0  ;;  %347 = vst [vmem:[%s5338_s12 + $0x288] sm:$0xff] %v346_v1  ;;  %v348_v2 = vld [vmem:[%s5333_s11 + $0x528] sm:$0xff]  ;;  %v352_v4 = vld [vmem:[%s5333_s11 + $0x550] sm:$0xff] }
  0x3c   : > { %349 = vst [vmem:[%s5338_s12 + $0x294] sm:$0xff] %v348_v2  ;;  %351 = vst [vmem:[%s5338_s12 + $0x29c] sm:$0xff] %v350_v3  ;;  %v354_v5 = vld [vmem:[%s5333_s11 + $0x558] sm:$0xff]  ;;  %v358_v7 = vld [vmem:[%s5333_s11 + $0x580] sm:$0xff] }
  0x3d   : > { %353 = vst [vmem:[%s5338_s12 + $0x2a8] sm:$0xff] %v352_v4  ;;  %v356_v6 = vld [vmem:[%s5333_s11 + $0x578] sm:$0xff]  ;;  %355 = vst [vmem:[%s5338_s12 + $0x2b0] sm:$0xff] %v354_v5  ;;  %v360_v8 = vld [vmem:[%s5333_s11 + $0x5a0] sm:$0xff] }
  0x3e   : > { %357 = vst [vmem:[%s5338_s12 + $0x2bc] sm:$0xff] %v356_v6  ;;  %359 = vst [vmem:[%s5338_s12 + $0x2c4] sm:$0xff] %v358_v7  ;;  %v362_v9 = vld [vmem:[%s5333_s11 + $0x5a8] sm:$0xff]  ;;  %v366_v11 = vld [vmem:[%s5333_s11 + $0x5d0] sm:$0xff] }
  0x3f   : > { %v364_v10 = vld [vmem:[%s5333_s11 + $0x5c8] sm:$0xff]  ;;  %361 = vst [vmem:[%s5338_s12 + $0x2d0] sm:$0xff] %v360_v8  ;;  %363 = vst [vmem:[%s5338_s12 + $0x2d8] sm:$0xff] %v362_v9  ;;  %v368_v12 = vld [vmem:[%s5333_s11 + $0x5f0] sm:$0xff] }
  0x40   : > { %365 = vst [vmem:[%s5338_s12 + $0x2e4] sm:$0xff] %v364_v10  ;;  %v370_v13 = vld [vmem:[%s5333_s11 + $0x5f8] sm:$0xff]  ;;  %367 = vst [vmem:[%s5338_s12 + $0x2ec] sm:$0xff] %v366_v11  ;;  %v374_v15 = vld [vmem:[%s5333_s11 + $0x620] sm:$0xff] }
  0x41   : > { %369 = vst [vmem:[%s5338_s12 + $0x2f8] sm:$0xff] %v368_v12  ;;  %371 = vst [vmem:[%s5338_s12 + $0x300] sm:$0xff] %v370_v13  ;;  %v372_v14 = vld [vmem:[%s5333_s11 + $0x618] sm:$0xff]  ;;  %v376_v16 = vld [vmem:[%s5333_s11 + $0x640] sm:$0xff] }
  0x42   : > { %373 = vst [vmem:[%s5338_s12 + $0x30c] sm:$0xff] %v372_v14  ;;  %375 = vst [vmem:[%s5338_s12 + $0x314] sm:$0xff] %v374_v15  ;;  %v378_v17 = vld [vmem:[%s5333_s11 + $0x648] sm:$0xff]  ;;  %v382_v19 = vld [vmem:[%s5333_s11 + $0x670] sm:$0xff] }
  0x43   : > { %377 = vst [vmem:[%s5338_s12 + $0x320] sm:$0xff] %v376_v16  ;;  %v380_v18 = vld [vmem:[%s5333_s11 + $0x668] sm:$0xff]  ;;  %379 = vst [vmem:[%s5338_s12 + $0x328] sm:$0xff] %v378_v17  ;;  %v384_v20 = vld [vmem:[%s5333_s11 + $0x690] sm:$0xff] }
  0x44   : > { %381 = vst [vmem:[%s5338_s12 + $0x334] sm:$0xff] %v380_v18  ;;  %383 = vst [vmem:[%s5338_s12 + $0x33c] sm:$0xff] %v382_v19  ;;  %v386_v21 = vld [vmem:[%s5333_s11 + $0x698] sm:$0xff]  ;;  %v390_v23 = vld [vmem:[%s5333_s11 + $0x6c0] sm:$0xff] }
  0x45   : > { %v388_v22 = vld [vmem:[%s5333_s11 + $0x6b8] sm:$0xff]  ;;  %385 = vst [vmem:[%s5338_s12 + $0x348] sm:$0xff] %v384_v20  ;;  %387 = vst [vmem:[%s5338_s12 + $0x350] sm:$0xff] %v386_v21  ;;  %v392_v24 = vld [vmem:[%s5333_s11 + $0x6e0] sm:$0xff] }
  0x46   : > { %389 = vst [vmem:[%s5338_s12 + $0x35c] sm:$0xff] %v388_v22  ;;  %v394_v25 = vld [vmem:[%s5333_s11 + $0x6e8] sm:$0xff]  ;;  %391 = vst [vmem:[%s5338_s12 + $0x364] sm:$0xff] %v390_v23  ;;  %v398_v27 = vld [vmem:[%s5333_s11 + $0x710] sm:$0xff] }
  0x47   : > { %393 = vst [vmem:[%s5338_s12 + $0x370] sm:$0xff] %v392_v24  ;;  %395 = vst [vmem:[%s5338_s12 + $0x378] sm:$0xff] %v394_v25  ;;  %v396_v26 = vld [vmem:[%s5333_s11 + $0x708] sm:$0xff]  ;;  %v400_v28 = vld [vmem:[%s5333_s11 + $0x730] sm:$0xff] }
  0x48   : > { %397 = vst [vmem:[%s5338_s12 + $0x384] sm:$0xff] %v396_v26  ;;  %399 = vst [vmem:[%s5338_s12 + $0x38c] sm:$0xff] %v398_v27  ;;  %v402_v29 = vld [vmem:[%s5333_s11 + $0x738] sm:$0xff]  ;;  %v406_v31 = vld [vmem:[%s5333_s11 + $0x760] sm:$0xff] }
  0x49   : > { %401 = vst [vmem:[%s5338_s12 + $0x398] sm:$0xff] %v400_v28  ;;  %v404_v30 = vld [vmem:[%s5333_s11 + $0x758] sm:$0xff]  ;;  %403 = vst [vmem:[%s5338_s12 + $0x3a0] sm:$0xff] %v402_v29  ;;  %v408_v32 = vld [vmem:[%s5333_s11 + $0x780] sm:$0xff] }
  0x4a   : > { %405 = vst [vmem:[%s5338_s12 + $0x3ac] sm:$0xff] %v404_v30  ;;  %407 = vst [vmem:[%s5338_s12 + $0x3b4] sm:$0xff] %v406_v31  ;;  %v410_v33 = vld [vmem:[%s5333_s11 + $0x788] sm:$0xff]  ;;  %v414_v35 = vld [vmem:[%s5333_s11 + $0x7b0] sm:$0xff] }
  0x4b   : > { %v412_v34 = vld [vmem:[%s5333_s11 + $0x7a8] sm:$0xff]  ;;  %409 = vst [vmem:[%s5338_s12 + $0x3c0] sm:$0xff] %v408_v32  ;;  %411 = vst [vmem:[%s5338_s12 + $0x3c8] sm:$0xff] %v410_v33  ;;  %v416_v36 = vld [vmem:[%s5333_s11 + $0x7d0] sm:$0xff] }
  0x4c   : > { %413 = vst [vmem:[%s5338_s12 + $0x3d4] sm:$0xff] %v412_v34  ;;  %v418_v37 = vld [vmem:[%s5333_s11 + $0x7d8] sm:$0xff]  ;;  %415 = vst [vmem:[%s5338_s12 + $0x3dc] sm:$0xff] %v414_v35  ;;  %v422_v39 = vld [vmem:[%s5333_s11 + $0x800] sm:$0xff] }
  0x4d   : > { %417 = vst [vmem:[%s5338_s12 + $0x3e8] sm:$0xff] %v416_v36  ;;  %419 = vst [vmem:[%s5338_s12 + $0x3f0] sm:$0xff] %v418_v37  ;;  %v420_v38 = vld [vmem:[%s5333_s11 + $0x7f8] sm:$0xff]  ;;  %v424_v40 = vld [vmem:[%s5333_s11 + $0x820] sm:$0xff] }
  0x4e   : > { %421 = vst [vmem:[%s5338_s12 + $0x3fc] sm:$0xff] %v420_v38  ;;  %423 = vst [vmem:[%s5338_s12 + $0x404] sm:$0xff] %v422_v39  ;;  %v426_v41 = vld [vmem:[%s5333_s11 + $0x828] sm:$0xff]  ;;  %v430_v43 = vld [vmem:[%s5333_s11 + $0x850] sm:$0xff] }
  0x4f   : > { %425 = vst [vmem:[%s5338_s12 + $0x410] sm:$0xff] %v424_v40  ;;  %v428_v42 = vld [vmem:[%s5333_s11 + $0x848] sm:$0xff]  ;;  %427 = vst [vmem:[%s5338_s12 + $0x418] sm:$0xff] %v426_v41  ;;  %v432_v44 = vld [vmem:[%s5333_s11 + $0x870] sm:$0xff] }
  0x50   : > { %429 = vst [vmem:[%s5338_s12 + $0x424] sm:$0xff] %v428_v42  ;;  %431 = vst [vmem:[%s5338_s12 + $0x42c] sm:$0xff] %v430_v43  ;;  %v434_v45 = vld [vmem:[%s5333_s11 + $0x878] sm:$0xff]  ;;  %v438_v47 = vld [vmem:[%s5333_s11 + $0x8a0] sm:$0xff] }
  0x51   : > { %v436_v46 = vld [vmem:[%s5333_s11 + $0x898] sm:$0xff]  ;;  %433 = vst [vmem:[%s5338_s12 + $0x438] sm:$0xff] %v432_v44  ;;  %435 = vst [vmem:[%s5338_s12 + $0x440] sm:$0xff] %v434_v45  ;;  %v440_v48 = vld [vmem:[%s5333_s11 + $0x8c0] sm:$0xff] }
  0x52   : > { %437 = vst [vmem:[%s5338_s12 + $0x44c] sm:$0xff] %v436_v46  ;;  %v442_v49 = vld [vmem:[%s5333_s11 + $0x8c8] sm:$0xff]  ;;  %439 = vst [vmem:[%s5338_s12 + $0x454] sm:$0xff] %v438_v47  ;;  %v446_v51 = vld [vmem:[%s5333_s11 + $0x8f0] sm:$0xff] }
  0x53   : > { %441 = vst [vmem:[%s5338_s12 + $0x460] sm:$0xff] %v440_v48  ;;  %443 = vst [vmem:[%s5338_s12 + $0x468] sm:$0xff] %v442_v49  ;;  %v444_v50 = vld [vmem:[%s5333_s11 + $0x8e8] sm:$0xff]  ;;  %v448_v52 = vld [vmem:[%s5333_s11 + $0x910] sm:$0xff] }
  0x54   : > { %445 = vst [vmem:[%s5338_s12 + $0x474] sm:$0xff] %v444_v50  ;;  %447 = vst [vmem:[%s5338_s12 + $0x47c] sm:$0xff] %v446_v51  ;;  %v450_v53 = vld [vmem:[%s5333_s11 + $0x918] sm:$0xff]  ;;  %v454_v55 = vld [vmem:[%s5333_s11 + $0x940] sm:$0xff] }
  0x55   : > { %449 = vst [vmem:[%s5338_s12 + $0x488] sm:$0xff] %v448_v52  ;;  %v452_v54 = vld [vmem:[%s5333_s11 + $0x938] sm:$0xff]  ;;  %451 = vst [vmem:[%s5338_s12 + $0x490] sm:$0xff] %v450_v53  ;;  %v456_v56 = vld [vmem:[%s5333_s11 + $0x960] sm:$0xff] }
  0x56   : > { %453 = vst [vmem:[%s5338_s12 + $0x49c] sm:$0xff] %v452_v54  ;;  %455 = vst [vmem:[%s5338_s12 + $0x4a4] sm:$0xff] %v454_v55  ;;  %v458_v57 = vld [vmem:[%s5333_s11 + $0x968] sm:$0xff]  ;;  %v462_v59 = vld [vmem:[%s5333_s11 + $0x990] sm:$0xff] }
  0x57   : > { %v460_v58 = vld [vmem:[%s5333_s11 + $0x988] sm:$0xff]  ;;  %457 = vst [vmem:[%s5338_s12 + $0x4b0] sm:$0xff] %v456_v56  ;;  %459 = vst [vmem:[%s5338_s12 + $0x4b8] sm:$0xff] %v458_v57  ;;  %v464_v60 = vld [vmem:[%s5333_s11 + $0x9b0] sm:$0xff] }
  0x58   : > { %461 = vst [vmem:[%s5338_s12 + $0x4c4] sm:$0xff] %v460_v58  ;;  %v466_v61 = vld [vmem:[%s5333_s11 + $0x9b8] sm:$0xff]  ;;  %463 = vst [vmem:[%s5338_s12 + $0x4cc] sm:$0xff] %v462_v59  ;;  %v470_v63 = vld [vmem:[%s5333_s11 + $0x9e0] sm:$0xff] }
  0x59   : > { %465 = vst [vmem:[%s5338_s12 + $0x4d8] sm:$0xff] %v464_v60  ;;  %467 = vst [vmem:[%s5338_s12 + $0x4e0] sm:$0xff] %v466_v61  ;;  %v468_v62 = vld [vmem:[%s5333_s11 + $0x9d8] sm:$0xff]  ;;  %v3976_v0 = vld [vmem:[%s5333_s11 + $0x10] sm:$0xf] }
  0x5a   : > { %469 = vst [vmem:[%s5338_s12 + $0x4ec] sm:$0xff] %v468_v62  ;;  %471 = vst [vmem:[%s5338_s12 + $0x4f4] sm:$0xff] %v470_v63  ;;  %v3978_v1 = vld [vmem:[%s5333_s11 + $0x38] sm:$0xf]  ;;  %v3980_v2 = vld [vmem:[%s5333_s11 + $0x60] sm:$0xf] }
  0x5b   : > { %3977 = vst [vmem:[%s5338_s12 + $0x10] sm:$0xf] %v3976_v0  ;;  %v3982_v3 = vld [vmem:[%s5333_s11 + $0x88] sm:$0xf]  ;;  %3979 = vst [vmem:[%s5338_s12 + $0x24] sm:$0xf] %v3978_v1 }
  0x5c   : > { %3981 = vst [vmem:[%s5338_s12 + $0x38] sm:$0xf] %v3980_v2  ;;  %3983 = vst [vmem:[%s5338_s12 + $0x4c] sm:$0xf] %v3982_v3  ;;  %v3984_v4 = vld [vmem:[%s5333_s11 + $0xb0] sm:$0xf] }
  0x5d   : > { %v3986_v5 = vld [vmem:[%s5333_s11 + $0xd8] sm:$0xf]  ;;  %v3988_v6 = vld [vmem:[%s5333_s11 + $0x100] sm:$0xf]  ;;  %3985 = vst [vmem:[%s5338_s12 + $0x60] sm:$0xf] %v3984_v4 }
  0x5e   : > { %3987 = vst [vmem:[%s5338_s12 + $0x74] sm:$0xf] %v3986_v5  ;;  %3989 = vst [vmem:[%s5338_s12 + $0x88] sm:$0xf] %v3988_v6  ;;  %v3990_v7 = vld [vmem:[%s5333_s11 + $0x128] sm:$0xf] }
  0x5f   : > { %v3992_v8 = vld [vmem:[%s5333_s11 + $0x150] sm:$0xf]  ;;  %v3994_v9 = vld [vmem:[%s5333_s11 + $0x178] sm:$0xf]  ;;  %3991 = vst [vmem:[%s5338_s12 + $0x9c] sm:$0xf] %v3990_v7 }
  0x60   : > { %3993 = vst [vmem:[%s5338_s12 + $0xb0] sm:$0xf] %v3992_v8  ;;  %3995 = vst [vmem:[%s5338_s12 + $0xc4] sm:$0xf] %v3994_v9  ;;  %v3996_v10 = vld [vmem:[%s5333_s11 + $0x1a0] sm:$0xf] }
  0x61   : > { %v3998_v11 = vld [vmem:[%s5333_s11 + $0x1c8] sm:$0xf]  ;;  %v4000_v12 = vld [vmem:[%s5333_s11 + $0x1f0] sm:$0xf]  ;;  %3997 = vst [vmem:[%s5338_s12 + $0xd8] sm:$0xf] %v3996_v10 }
  0x62   : > { %3999 = vst [vmem:[%s5338_s12 + $0xec] sm:$0xf] %v3998_v11  ;;  %4001 = vst [vmem:[%s5338_s12 + $0x100] sm:$0xf] %v4000_v12  ;;  %v4002_v13 = vld [vmem:[%s5333_s11 + $0x218] sm:$0xf] }
  0x63   : > { %v4004_v14 = vld [vmem:[%s5333_s11 + $0x240] sm:$0xf]  ;;  %v4006_v15 = vld [vmem:[%s5333_s11 + $0x268] sm:$0xf]  ;;  %4003 = vst [vmem:[%s5338_s12 + $0x114] sm:$0xf] %v4002_v13 }
  0x64   : > { %4005 = vst [vmem:[%s5338_s12 + $0x128] sm:$0xf] %v4004_v14  ;;  %4007 = vst [vmem:[%s5338_s12 + $0x13c] sm:$0xf] %v4006_v15  ;;  %v4008_v16 = vld [vmem:[%s5333_s11 + $0x290] sm:$0xf] }
  0x65   : > { %v4010_v17 = vld [vmem:[%s5333_s11 + $0x2b8] sm:$0xf]  ;;  %v4012_v18 = vld [vmem:[%s5333_s11 + $0x2e0] sm:$0xf]  ;;  %4009 = vst [vmem:[%s5338_s12 + $0x150] sm:$0xf] %v4008_v16 }
  0x66   : > { %4011 = vst [vmem:[%s5338_s12 + $0x164] sm:$0xf] %v4010_v17  ;;  %4013 = vst [vmem:[%s5338_s12 + $0x178] sm:$0xf] %v4012_v18  ;;  %v4014_v19 = vld [vmem:[%s5333_s11 + $0x308] sm:$0xf] }
  0x67   : > { %v4016_v20 = vld [vmem:[%s5333_s11 + $0x330] sm:$0xf]  ;;  %v4018_v21 = vld [vmem:[%s5333_s11 + $0x358] sm:$0xf]  ;;  %4015 = vst [vmem:[%s5338_s12 + $0x18c] sm:$0xf] %v4014_v19 }
  0x68   : > { %4017 = vst [vmem:[%s5338_s12 + $0x1a0] sm:$0xf] %v4016_v20  ;;  %4019 = vst [vmem:[%s5338_s12 + $0x1b4] sm:$0xf] %v4018_v21  ;;  %v4020_v22 = vld [vmem:[%s5333_s11 + $0x380] sm:$0xf] }
  0x69   : > { %v4022_v23 = vld [vmem:[%s5333_s11 + $0x3a8] sm:$0xf]  ;;  %v4024_v24 = vld [vmem:[%s5333_s11 + $0x3d0] sm:$0xf]  ;;  %4021 = vst [vmem:[%s5338_s12 + $0x1c8] sm:$0xf] %v4020_v22 }
  0x6a   : > { %4023 = vst [vmem:[%s5338_s12 + $0x1dc] sm:$0xf] %v4022_v23  ;;  %4025 = vst [vmem:[%s5338_s12 + $0x1f0] sm:$0xf] %v4024_v24  ;;  %v4026_v25 = vld [vmem:[%s5333_s11 + $0x3f8] sm:$0xf] }
  0x6b   : > { %v4028_v26 = vld [vmem:[%s5333_s11 + $0x420] sm:$0xf]  ;;  %v4030_v27 = vld [vmem:[%s5333_s11 + $0x448] sm:$0xf]  ;;  %4027 = vst [vmem:[%s5338_s12 + $0x204] sm:$0xf] %v4026_v25 }
  0x6c   : > { %4029 = vst [vmem:[%s5338_s12 + $0x218] sm:$0xf] %v4028_v26  ;;  %4031 = vst [vmem:[%s5338_s12 + $0x22c] sm:$0xf] %v4030_v27  ;;  %v4032_v28 = vld [vmem:[%s5333_s11 + $0x470] sm:$0xf] }
  0x6d   : > { %v4034_v29 = vld [vmem:[%s5333_s11 + $0x498] sm:$0xf]  ;;  %v4036_v30 = vld [vmem:[%s5333_s11 + $0x4c0] sm:$0xf]  ;;  %4033 = vst [vmem:[%s5338_s12 + $0x240] sm:$0xf] %v4032_v28 }
  0x6e   : > { %4035 = vst [vmem:[%s5338_s12 + $0x254] sm:$0xf] %v4034_v29  ;;  %4037 = vst [vmem:[%s5338_s12 + $0x268] sm:$0xf] %v4036_v30  ;;  %v4038_v31 = vld [vmem:[%s5333_s11 + $0x4e8] sm:$0xf] }
  0x6f   : > { %v4040_v32 = vld [vmem:[%s5333_s11 + $0x510] sm:$0xf]  ;;  %v4042_v33 = vld [vmem:[%s5333_s11 + $0x538] sm:$0xf]  ;;  %4039 = vst [vmem:[%s5338_s12 + $0x27c] sm:$0xf] %v4038_v31 }
  0x70   : > { %4041 = vst [vmem:[%s5338_s12 + $0x290] sm:$0xf] %v4040_v32  ;;  %4043 = vst [vmem:[%s5338_s12 + $0x2a4] sm:$0xf] %v4042_v33  ;;  %v4044_v34 = vld [vmem:[%s5333_s11 + $0x560] sm:$0xf] }
  0x71   : > { %v4046_v35 = vld [vmem:[%s5333_s11 + $0x588] sm:$0xf]  ;;  %v4048_v36 = vld [vmem:[%s5333_s11 + $0x5b0] sm:$0xf]  ;;  %4045 = vst [vmem:[%s5338_s12 + $0x2b8] sm:$0xf] %v4044_v34 }
  0x72   : > { %4047 = vst [vmem:[%s5338_s12 + $0x2cc] sm:$0xf] %v4046_v35  ;;  %4049 = vst [vmem:[%s5338_s12 + $0x2e0] sm:$0xf] %v4048_v36  ;;  %v4050_v37 = vld [vmem:[%s5333_s11 + $0x5d8] sm:$0xf] }
  0x73   : > { %v4052_v38 = vld [vmem:[%s5333_s11 + $0x600] sm:$0xf]  ;;  %v4054_v39 = vld [vmem:[%s5333_s11 + $0x628] sm:$0xf]  ;;  %4051 = vst [vmem:[%s5338_s12 + $0x2f4] sm:$0xf] %v4050_v37 }
  0x74   : > { %4053 = vst [vmem:[%s5338_s12 + $0x308] sm:$0xf] %v4052_v38  ;;  %4055 = vst [vmem:[%s5338_s12 + $0x31c] sm:$0xf] %v4054_v39  ;;  %v4056_v40 = vld [vmem:[%s5333_s11 + $0x650] sm:$0xf] }
  0x75   : > { %v4058_v41 = vld [vmem:[%s5333_s11 + $0x678] sm:$0xf]  ;;  %v4060_v42 = vld [vmem:[%s5333_s11 + $0x6a0] sm:$0xf]  ;;  %4057 = vst [vmem:[%s5338_s12 + $0x330] sm:$0xf] %v4056_v40 }
  0x76   : > { %4059 = vst [vmem:[%s5338_s12 + $0x344] sm:$0xf] %v4058_v41  ;;  %4061 = vst [vmem:[%s5338_s12 + $0x358] sm:$0xf] %v4060_v42  ;;  %v4062_v43 = vld [vmem:[%s5333_s11 + $0x6c8] sm:$0xf] }
  0x77   : > { %v4064_v44 = vld [vmem:[%s5333_s11 + $0x6f0] sm:$0xf]  ;;  %v4066_v45 = vld [vmem:[%s5333_s11 + $0x718] sm:$0xf]  ;;  %4063 = vst [vmem:[%s5338_s12 + $0x36c] sm:$0xf] %v4062_v43 }
  0x78   : > { %4065 = vst [vmem:[%s5338_s12 + $0x380] sm:$0xf] %v4064_v44  ;;  %4067 = vst [vmem:[%s5338_s12 + $0x394] sm:$0xf] %v4066_v45  ;;  %v4068_v46 = vld [vmem:[%s5333_s11 + $0x740] sm:$0xf] }
  0x79   : > { %v4070_v47 = vld [vmem:[%s5333_s11 + $0x768] sm:$0xf]  ;;  %v4072_v48 = vld [vmem:[%s5333_s11 + $0x790] sm:$0xf]  ;;  %4069 = vst [vmem:[%s5338_s12 + $0x3a8] sm:$0xf] %v4068_v46 }
  0x7a   : > { %4071 = vst [vmem:[%s5338_s12 + $0x3bc] sm:$0xf] %v4070_v47  ;;  %4073 = vst [vmem:[%s5338_s12 + $0x3d0] sm:$0xf] %v4072_v48  ;;  %v4074_v49 = vld [vmem:[%s5333_s11 + $0x7b8] sm:$0xf] }
  0x7b   : > { %v4076_v50 = vld [vmem:[%s5333_s11 + $0x7e0] sm:$0xf]  ;;  %v4078_v51 = vld [vmem:[%s5333_s11 + $0x808] sm:$0xf]  ;;  %4075 = vst [vmem:[%s5338_s12 + $0x3e4] sm:$0xf] %v4074_v49 }
  0x7c   : > { %4077 = vst [vmem:[%s5338_s12 + $0x3f8] sm:$0xf] %v4076_v50  ;;  %4079 = vst [vmem:[%s5338_s12 + $0x40c] sm:$0xf] %v4078_v51  ;;  %v4080_v52 = vld [vmem:[%s5333_s11 + $0x830] sm:$0xf] }
  0x7d   : > { %v4082_v53 = vld [vmem:[%s5333_s11 + $0x858] sm:$0xf]  ;;  %v4084_v54 = vld [vmem:[%s5333_s11 + $0x880] sm:$0xf]  ;;  %4081 = vst [vmem:[%s5338_s12 + $0x420] sm:$0xf] %v4080_v52 }
  0x7e   : > { %4083 = vst [vmem:[%s5338_s12 + $0x434] sm:$0xf] %v4082_v53  ;;  %4085 = vst [vmem:[%s5338_s12 + $0x448] sm:$0xf] %v4084_v54  ;;  %v4086_v55 = vld [vmem:[%s5333_s11 + $0x8a8] sm:$0xf] }
  0x7f   : > { %v4088_v56 = vld [vmem:[%s5333_s11 + $0x8d0] sm:$0xf]  ;;  %v4090_v57 = vld [vmem:[%s5333_s11 + $0x8f8] sm:$0xf]  ;;  %4087 = vst [vmem:[%s5338_s12 + $0x45c] sm:$0xf] %v4086_v55 }
  0x80   : > { %4089 = vst [vmem:[%s5338_s12 + $0x470] sm:$0xf] %v4088_v56  ;;  %4091 = vst [vmem:[%s5338_s12 + $0x484] sm:$0xf] %v4090_v57  ;;  %v4092_v58 = vld [vmem:[%s5333_s11 + $0x920] sm:$0xf] }
  0x81   : > { %v4094_v59 = vld [vmem:[%s5333_s11 + $0x948] sm:$0xf]  ;;  %v4096_v60 = vld [vmem:[%s5333_s11 + $0x970] sm:$0xf]  ;;  %4093 = vst [vmem:[%s5338_s12 + $0x498] sm:$0xf] %v4092_v58 }
  0x82   : > { %4095 = vst [vmem:[%s5338_s12 + $0x4ac] sm:$0xf] %v4094_v59  ;;  %4097 = vst [vmem:[%s5338_s12 + $0x4c0] sm:$0xf] %v4096_v60  ;;  %v4098_v61 = vld [vmem:[%s5333_s11 + $0x998] sm:$0xf] }
  0x83   : > { %v4100_v62 = vld [vmem:[%s5333_s11 + $0x9c0] sm:$0xf]  ;;  %v4102_v63 = vld [vmem:[%s5333_s11 + $0x9e8] sm:$0xf]  ;;  %4099 = vst [vmem:[%s5338_s12 + $0x4d4] sm:$0xf] %v4098_v61 }
  0x84   : > { %4101 = vst [vmem:[%s5338_s12 + $0x4e8] sm:$0xf] %v4100_v62  ;;  %4103 = vst [vmem:[%s5338_s12 + $0x4fc] sm:$0xf] %v4102_v63 }
  0x85 PF: > { %p4104_p7 = scmp.ge.s32.totalorder %s5244_s21, 1  ;;  %p623_p8 = scmp.lt.s32.totalorder %s5244_s21, 5 }
  0x87   : > { %p624_p9 = pnand %p4104_p7, %p623_p8 }
  0x89   : > { %627 = sbr.rel (%p624_p9) target bundleno = 907 (0x38b), region = 50 }
  0x90   : > { %s630_s13 = sand.u32 1, %s5220_s15   ;;  %s682_s14 = smul.u32 80, %s5228_s17 }
  0x91   : > { %s4867_s24 = smul.u32 1280, %s630_s13  ;;  %s4106_s25 = sshll.u32 %s5232_s18, 6 }
  0x92   : > { %p683_p10 = scmp.lt.s32.totalorder %s682_s14, 159  ;;  %p692_p11 = scmp.lt.s32.totalorder %s4106_s25, 127 }
  0x93   : > { %p700_p12 = scmp.lt.s32.totalorder %s5232_s18, 1  ;;  %p4110_p13 = scmp.ne.s32.totalorder %s5228_s17, 0 }
  0x94   : > { %s6813_s14 = smov (!%p683_p10, %s682_s14), 159  ;;  %s6815_s25 = smov (!%p692_p11, %s4106_s25), 127 }
  0x95   : > { %s4105_s26 = sshll.u32 %s6813_s14, 2  ;;  %s4107_s5 = sshll.u32 %s6815_s25, 2  ;;  %v5246_v0 = vmov (!%p4110_p13), 0.0  }
  0x96   : > { %s5730_s30 = scalar_lea.vmem %s6762_s1, %s4105_s26  ;;  %s5735_s8 = scalar_lea.vmem %s6763_s2, %s4107_s5  ;;  %719 = vst [vmem:[#allocation2] sm:$0xff] (!%p4110_p13), %v5246_v0  ;;  %720 = vst [vmem:[#allocation2 + $0x8] sm:$0xff] (!%p4110_p13), %v5246_v0 }
  0x97   : > { %s6817_s18 = smov (!%p700_p12, %s5232_s18), 1  ;;  %s5748_s26 = scalar_lea.vmem [#allocation3], %s4867_s24  ;;  %721 = vst [vmem:[#allocation2 + $0x10] sm:$0xff] (!%p4110_p13), %v5246_v0  ;;  %722 = vst [vmem:[#allocation2 + $0x18] sm:$0xff] (!%p4110_p13), %v5246_v0 }
  0x98   : > { %s4108_s15 = sshll.u32 %s6817_s18, 3  ;;  %718 = sbr.rel (%p4110_p13) target bundleno = 182 (0xb6), region = 58  ;;  %723 = vst [vmem:[#allocation2 + $0x20] sm:$0xff] (!%p4110_p13), %v5246_v0  ;;  %724 = vst [vmem:[#allocation2 + $0x28] sm:$0xff] (!%p4110_p13), %v5246_v0 }
  0x99   : > { %s5741_s11 = scalar_lea.vmem %s6764_s3, %s4108_s15  ;;  %s5746_s14 = scalar_lea.vmem %s6765_s4, %s4108_s15  ;;  %725 = vst [vmem:[#allocation2 + $0x30] sm:$0xff] (!%p4110_p13), %v5246_v0  ;;  %726 = vst [vmem:[#allocation2 + $0x38] sm:$0xff] (!%p4110_p13), %v5246_v0 }
  0x9a   : > { %727 = vst [vmem:[#allocation2 + $0x40] sm:$0xff] (!%p4110_p13), %v5246_v0  ;;  %728 = vst [vmem:[#allocation2 + $0x48] sm:$0xff] (!%p4110_p13), %v5246_v0 }
  0x9b   : > { %729 = vst [vmem:[#allocation2 + $0x50] sm:$0xff] (!%p4110_p13), %v5246_v0  ;;  %730 = vst [vmem:[#allocation2 + $0x58] sm:$0xff] (!%p4110_p13), %v5246_v0 }
  0x9c   : > { %731 = vst [vmem:[#allocation2 + $0x60] sm:$0xff] (!%p4110_p13), %v5246_v0  ;;  %732 = vst [vmem:[#allocation2 + $0x68] sm:$0xff] (!%p4110_p13), %v5246_v0 }
  0x9d   : > { %733 = vst [vmem:[#allocation2 + $0x70] sm:$0xff] (!%p4110_p13), %v5246_v0  ;;  %734 = vst [vmem:[#allocation2 + $0x78] sm:$0xff] (!%p4110_p13), %v5246_v0 }
  0x9e   : > { %735 = vst [vmem:[#allocation2 + $0x80] sm:$0xff] (!%p4110_p13), %v5246_v0  ;;  %736 = vst [vmem:[#allocation2 + $0x88] sm:$0xff] (!%p4110_p13), %v5246_v0 }
  0x9f   : > { %737 = vst [vmem:[#allocation2 + $0x90] sm:$0xff] %v5246_v0  ;;  %738 = vst [vmem:[#allocation2 + $0x98] sm:$0xff] %v5246_v0 }
  0xa0   : > { %739 = vst [vmem:[#allocation2 + $0xa0] sm:$0xff] %v5246_v0  ;;  %740 = vst [vmem:[#allocation2 + $0xa8] sm:$0xff] %v5246_v0 }
  0xa1   : > { %741 = vst [vmem:[#allocation2 + $0xb0] sm:$0xff] %v5246_v0  ;;  %742 = vst [vmem:[#allocation2 + $0xb8] sm:$0xff] %v5246_v0 }
  0xa2   : > { %743 = vst [vmem:[#allocation2 + $0xc0] sm:$0xff] %v5246_v0  ;;  %744 = vst [vmem:[#allocation2 + $0xc8] sm:$0xff] %v5246_v0 }
  0xa3   : > { %745 = vst [vmem:[#allocation2 + $0xd0] sm:$0xff] %v5246_v0  ;;  %746 = vst [vmem:[#allocation2 + $0xd8] sm:$0xff] %v5246_v0 }
  0xa4   : > { %747 = vst [vmem:[#allocation2 + $0xe0] sm:$0xff] %v5246_v0  ;;  %748 = vst [vmem:[#allocation2 + $0xe8] sm:$0xff] %v5246_v0 }
  0xa5   : > { %749 = vst [vmem:[#allocation2 + $0xf0] sm:$0xff] %v5246_v0  ;;  %750 = vst [vmem:[#allocation2 + $0xf8] sm:$0xff] %v5246_v0 }
  0xa6   : > { %751 = vst [vmem:[#allocation2 + $0x100] sm:$0xff] %v5246_v0  ;;  %752 = vst [vmem:[#allocation2 + $0x108] sm:$0xff] %v5246_v0 }
  0xa7   : > { %753 = vst [vmem:[#allocation2 + $0x110] sm:$0xff] %v5246_v0  ;;  %754 = vst [vmem:[#allocation2 + $0x118] sm:$0xff] %v5246_v0 }
  0xa8   : > { %755 = vst [vmem:[#allocation2 + $0x120] sm:$0xff] %v5246_v0  ;;  %756 = vst [vmem:[#allocation2 + $0x128] sm:$0xff] %v5246_v0 }
  0xa9   : > { %757 = vst [vmem:[#allocation2 + $0x130] sm:$0xff] %v5246_v0  ;;  %758 = vst [vmem:[#allocation2 + $0x138] sm:$0xff] %v5246_v0 }
  0xaa   : > { %759 = vst [vmem:[#allocation2 + $0x140] sm:$0xff] %v5246_v0  ;;  %760 = vst [vmem:[#allocation2 + $0x148] sm:$0xff] %v5246_v0 }
  0xab   : > { %761 = vst [vmem:[#allocation2 + $0x150] sm:$0xff] %v5246_v0  ;;  %762 = vst [vmem:[#allocation2 + $0x158] sm:$0xff] %v5246_v0 }
  0xac   : > { %763 = vst [vmem:[#allocation2 + $0x160] sm:$0xff] %v5246_v0  ;;  %764 = vst [vmem:[#allocation2 + $0x168] sm:$0xff] %v5246_v0 }
  0xad   : > { %765 = vst [vmem:[#allocation2 + $0x170] sm:$0xff] %v5246_v0  ;;  %766 = vst [vmem:[#allocation2 + $0x178] sm:$0xff] %v5246_v0 }
  0xae   : > { %767 = vst [vmem:[#allocation2 + $0x180] sm:$0xff] %v5246_v0  ;;  %768 = vst [vmem:[#allocation2 + $0x188] sm:$0xff] %v5246_v0 }
  0xaf   : > { %769 = vst [vmem:[#allocation2 + $0x190] sm:$0xff] %v5246_v0  ;;  %770 = vst [vmem:[#allocation2 + $0x198] sm:$0xff] %v5246_v0 }
  0xb0   : > { %771 = vst [vmem:[#allocation2 + $0x1a0] sm:$0xff] %v5246_v0  ;;  %772 = vst [vmem:[#allocation2 + $0x1a8] sm:$0xff] %v5246_v0 }
  0xb1   : > { %773 = vst [vmem:[#allocation2 + $0x1b0] sm:$0xff] %v5246_v0  ;;  %774 = vst [vmem:[#allocation2 + $0x1b8] sm:$0xff] %v5246_v0 }
  0xb2   : > { %775 = vst [vmem:[#allocation2 + $0x1c0] sm:$0xff] %v5246_v0  ;;  %776 = vst [vmem:[#allocation2 + $0x1c8] sm:$0xff] %v5246_v0 }
  0xb3   : > { %777 = vst [vmem:[#allocation2 + $0x1d0] sm:$0xff] %v5246_v0  ;;  %778 = vst [vmem:[#allocation2 + $0x1d8] sm:$0xff] %v5246_v0 }
  0xb4   : > { %779 = vst [vmem:[#allocation2 + $0x1e0] sm:$0xff] %v5246_v0  ;;  %780 = vst [vmem:[#allocation2 + $0x1e8] sm:$0xff] %v5246_v0 }
  0xb5   : > { %781 = vst [vmem:[#allocation2 + $0x1f0] sm:$0xff] %v5246_v0  ;;  %782 = vst [vmem:[#allocation2 + $0x1f8] sm:$0xff] %v5246_v0 }
  0xb6 PF: > { %v4926_v1 = vld [vmem:[%s5730_s30] sm:$0xff]   ;;  %v5247_v2 = vmov 0   ;;  %v4927_v3 = vld [vmem:[%s5730_s30 + $0x8] sm:$0xff]   ;;  %v4928_v4 = vld [vmem:[%s5730_s30 + $0x10] sm:$0xff]   ;;  %p4311_p0 = scmp.ne.s32.totalorder %s5228_s17, 1 }
  0xb7   : > { %2191 = vmatprep.subr.bf16.mxu0 %v5247_v2  ;;  %4753 = vmatprep.subr.bf16.mxu1 %v5247_v2  ;;  %v4929_v5 = vld [vmem:[%s5730_s30 + $0x18] sm:$0xff]   ;;  %v4930_v6 = vld [vmem:[%s5730_s30 + $0x20] sm:$0xff]   ;;  %v4944_v7 = vld [vmem:[%s5748_s26 + $0x4] ss:$20 sps:$4 sm:$0xff]  }
  0xb8   : > { %2192 = vmatpush1.bf16.msra.mxu0 %v4926_v1  ;;  %4769 = vmatpush1.bf16.msra.mxu1 %v4926_v1  ;;  %v4931_v8 = vld [vmem:[%s5730_s30 + $0x28] sm:$0xff]   ;;  %v4932_v10 = vld [vmem:[%s5730_s30 + $0x30] sm:$0xff]   ;;  %v4933_v11 = vld [vmem:[%s5730_s30 + $0x38] sm:$0xff]  }
  0xb9   : > { %2193 = vmatprep.subr.bf16.mxu0 %v5247_v2  ;;  %4754 = vmatprep.subr.bf16.mxu1 %v5247_v2  ;;  %v4947_v9 = vld [vmem:[%s5748_s26 + $0x144] ss:$20 sps:$4 sm:$0xff]   ;;  %v4934_v12 = vld [vmem:[%s5730_s30 + $0x40] sm:$0xff]   ;;  %v4937_v15 = vld [vmem:[%s5730_s30 + $0x58] sm:$0xff]  }
  0xba   : > { %2223 = vmatprep.mubr.bf16.mxu0 %v4944_v7  ;;  %2287 = vmatprep.mubr.bf16.mxu1 %v4947_v9  ;;  %v4935_v13 = vld [vmem:[%s5730_s30 + $0x48] sm:$0xff]   ;;  %v4936_v14 = vld [vmem:[%s5730_s30 + $0x50] sm:$0xff]   ;;  %v4938_v16 = vld [vmem:[%s5730_s30 + $0x60] sm:$0xff]  }
  0xbb   : > { %v4939_v17 = vld [vmem:[%s5730_s30 + $0x68] sm:$0xff]   ;;  %v4940_v18 = vld [vmem:[%s5730_s30 + $0x70] sm:$0xff]   ;;  %v4941_v19 = vld [vmem:[%s5730_s30 + $0x78] sm:$0xff]  }
  0xbc   : > { %2194 = vmatpush1.bf16.msra.mxu0 %v4927_v3  ;;  %4770 = vmatpush1.bf16.msra.mxu1 %v4927_v3  ;;  %v4949_v20 = vld [vmem:[%s5730_s30 + $0x100] sm:$0xff]   ;;  %v4951_v24 = vld [vmem:[%s5748_s26 + $0x2c] ss:$20 sps:$4 sm:$0xff]   ;;  %v4974_v26 = vld [vmem:[%s5730_s30 + $0x108] sm:$0xff]  }
  0xbd   : > { %2195 = vmatprep.subr.bf16.mxu0 %v5247_v2  ;;  %4755 = vmatprep.subr.bf16.mxu1 %v5247_v2  ;;  %v4942_v21 = vld [vmem:[%s5748_s26] ss:$20 sps:$4 sm:$0xff]   ;;  %v4950_v27 = vld [vmem:[%s5730_s30 + $0x88] sm:$0xff]   ;;  %v5021_v34 = vld [vmem:[%s5730_s30 + $0x118] sm:$0xff]  }
  0xbe   : > { %v4945_v22 = vld [vmem:[%s5748_s26 + $0x140] ss:$20 sps:$4 sm:$0xff]   ;;  %v4955_v29 = vld [vmem:[%s5748_s26 + $0x28] ss:$20 sps:$4 sm:$0xff]   ;;  %v4963_v36 = vld [vmem:[%s5748_s26 + $0x50] ss:$20 sps:$4 sm:$0xff]  }
  0xbf   : > { %v4948_v23 = vld [vmem:[%s5730_s30 + $0x80] sm:$0xff]   ;;  %v4953_v25 = vld [vmem:[%s5748_s26 + $0x16c] ss:$20 sps:$4 sm:$0xff]   ;;  %v4956_v30 = vld [vmem:[%s5748_s26 + $0x168] ss:$20 sps:$4 sm:$0xff]  }
  0xc0   : > { %2196 = vmatpush1.bf16.msra.mxu0 %v4928_v4  ;;  %4771 = vmatpush1.bf16.msra.mxu1 %v4928_v4  ;;  %v4999_v28 = vld [vmem:[%s5730_s30 + $0x110] sm:$0xff]   ;;  %v4959_v32 = vld [vmem:[%s5748_s26 + $0x54] ss:$20 sps:$4 sm:$0xff]   ;;  %v4967_v39 = vld [vmem:[%s5748_s26 + $0x7c] ss:$20 sps:$4 sm:$0xff]  }
  0xc1   : > { %2197 = vmatprep.subr.bf16.mxu0 %v5247_v2  ;;  %4756 = vmatprep.subr.bf16.mxu1 %v5247_v2  ;;  %v4957_v31 = vld [vmem:[%s5730_s30 + $0x90] sm:$0xff]   ;;  %v4961_v33 = vld [vmem:[%s5748_s26 + $0x194] ss:$20 sps:$4 sm:$0xff]   ;;  %v4969_v40 = vld [vmem:[%s5748_s26 + $0x1bc] ss:$20 sps:$4 sm:$0xff]  }
  0xc2   : > { %v4958_v35 = vld [vmem:[%s5730_s30 + $0x98] sm:$0xff]   ;;  %v4964_v37 = vld [vmem:[%s5748_s26 + $0x190] ss:$20 sps:$4 sm:$0xff]   ;;  %v4966_v42 = vld [vmem:[%s5730_s30 + $0xa8] sm:$0xff]  }
  0xc3   : > { %v4965_v38 = vld [vmem:[%s5730_s30 + $0xa0] sm:$0xff]   ;;  %v5059_v43 = vld [vmem:[%s5730_s30 + $0x128] sm:$0xff]   ;;  %v4973_v46 = vld [vmem:[%s5730_s30 + $0xb0] sm:$0xff]  }
  0xc4   : > { %2198 = vmatpush1.bf16.msra.mxu0 %v4929_v5  ;;  %4772 = vmatpush1.bf16.msra.mxu1 %v4929_v5  ;;  %v5040_v41 = vld [vmem:[%s5730_s30 + $0x120] sm:$0xff]   ;;  %v4971_v44 = vld [vmem:[%s5748_s26 + $0x78] ss:$20 sps:$4 sm:$0xff]   ;;  %v5078_v49 = vld [vmem:[%s5730_s30 + $0x130] sm:$0xff]  }
  0xc5   : > { %2199 = vmatprep.subr.bf16.mxu0 %v5247_v2  ;;  %4757 = vmatprep.subr.bf16.mxu1 %v5247_v2  ;;  %v4972_v45 = vld [vmem:[%s5748_s26 + $0x1b8] ss:$20 sps:$4 sm:$0xff]   ;;  %v4980_v51 = vld [vmem:[%s5748_s26 + $0xa0] ss:$20 sps:$4 sm:$0xff]   ;;  %v4988_v57 = vld [vmem:[%s5748_s26 + $0xc8] ss:$20 sps:$4 sm:$0xff]  }
  0xc6   : > { %v4976_v47 = vld [vmem:[%s5748_s26 + $0xa4] ss:$20 sps:$4 sm:$0xff]   ;;  %v4975_v50 = vld [vmem:[%s5730_s30 + $0xb8] sm:$0xff]   ;;  %v4981_v52 = vld [vmem:[%s5748_s26 + $0x1e0] ss:$20 sps:$4 sm:$0xff]  }
  0xc7   : > { %v4978_v48 = vld [vmem:[%s5748_s26 + $0x1e4] ss:$20 sps:$4 sm:$0xff]   ;;  %v4982_v53 = vld [vmem:[%s5730_s30 + $0xc0] sm:$0xff]   ;;  %v4984_v54 = vld [vmem:[%s5748_s26 + $0xcc] ss:$20 sps:$4 sm:$0xff]  }
  0xc8   : > { %2200 = vmatpush1.bf16.msra.mxu0 %v4930_v6  ;;  %4773 = vmatpush1.bf16.msra.mxu1 %v4930_v6  ;;  %v4986_v55 = vld [vmem:[%s5748_s26 + $0x20c] ss:$20 sps:$4 sm:$0xff]   ;;  %v4983_v56 = vld [vmem:[%s5730_s30 + $0xc8] sm:$0xff]   ;;  %v4992_v60 = vld [vmem:[%s5748_s26 + $0xf4] ss:$20 sps:$4 sm:$0xff]  }
  0xc9   : > { %2201 = vmatprep.subr.bf16.mxu0 %v5247_v2  ;;  %4758 = vmatprep.subr.bf16.mxu1 %v5247_v2  ;;  %v4989_v58 = vld [vmem:[%s5748_s26 + $0x208] ss:$20 sps:$4 sm:$0xff]   ;;  %v4990_v59 = vld [vmem:[%s5730_s30 + $0xd0] sm:$0xff]   ;;  %v4998_v3 = vld [vmem:[%s5730_s30 + $0xe0] sm:$0xff]  }
  0xca   : > { %v4994_v61 = vld [vmem:[%s5748_s26 + $0x234] ss:$20 sps:$4 sm:$0xff]   ;;  %v4996_v0 = vld [vmem:[%s5748_s26 + $0xf0] ss:$20 sps:$4 sm:$0xff]   ;;  %v5000_v6 = vld [vmem:[%s5730_s30 + $0xe8] sm:$0xff]  }
  0xcb   : > { %v5097_v62 = vld [vmem:[%s5730_s30 + $0x138] sm:$0xff]   ;;  %v4997_v1 = vld [vmem:[%s5748_s26 + $0x230] ss:$20 sps:$4 sm:$0xff]  }
  0xcc   : > { %2202 = vmatpush1.bf16.msra.mxu0 %v4931_v8  ;;  %4774 = vmatpush1.bf16.msra.mxu1 %v4931_v8  ;;  %v4991_v63 = vld [vmem:[%s5730_s30 + $0xd8] sm:$0xff]   ;;  %v5001_v4 = vld [vmem:[%s5748_s26 + $0x11c] ss:$20 sps:$4 sm:$0xff]   ;;  %v5007_v9 = vld [vmem:[%s5730_s30 + $0xf0] sm:$0xff]  }
  0xcd   : > { %2203 = vmatprep.subr.bf16.mxu0 %v5247_v2  ;;  %4759 = vmatprep.subr.bf16.mxu1 %v5247_v2  ;;  %v5003_v5 = vld [vmem:[%s5748_s26 + $0x25c] ss:$20 sps:$4 sm:$0xff]   ;;  %v5005_v7 = vld [vmem:[%s5748_s26 + $0x118] ss:$20 sps:$4 sm:$0xff]  }
  0xce   : > { %v5006_v8 = vld [vmem:[%s5748_s26 + $0x258] ss:$20 sps:$4 sm:$0xff]  }
  0xd0   : > { %2204 = vmatpush1.bf16.msra.mxu0 %v4932_v10  ;;  %4775 = vmatpush1.bf16.msra.mxu1 %v4932_v10  ;;  %v5009_v10 = vld [vmem:[%s5748_s26 + $0x284] ss:$20 sps:$4 sm:$0xff]  }
  0xd1   : > { %2205 = vmatprep.subr.bf16.mxu0 %v5247_v2  ;;  %4760 = vmatprep.subr.bf16.mxu1 %v5247_v2 }
  0xd4   : > { %2206 = vmatpush1.bf16.msra.mxu0 %v4933_v11  ;;  %4776 = vmatpush1.bf16.msra.mxu1 %v4933_v11  ;;  %v5013_v11 = vld [vmem:[%s5748_s26 + $0xc] ss:$20 sps:$4 sm:$0xff]  }
  0xd5   : > { %2207 = vmatprep.subr.bf16.mxu0 %v5247_v2  ;;  %4761 = vmatprep.subr.bf16.mxu1 %v5247_v2 }
  0xd8   : > { %2208 = vmatpush1.bf16.msra.mxu0 %v4934_v12  ;;  %4777 = vmatpush1.bf16.msra.mxu1 %v4934_v12  ;;  %v5008_v12 = vld [vmem:[%s5730_s30 + $0xf8] sm:$0xff]  }
  0xd9   : > { %2209 = vmatprep.subr.bf16.mxu0 %v5247_v2  ;;  %4762 = vmatprep.subr.bf16.mxu1 %v5247_v2 }
  0xdc   : > { %2210 = vmatpush1.bf16.msra.mxu0 %v4935_v13  ;;  %4778 = vmatpush1.bf16.msra.mxu1 %v4935_v13  ;;  %v5011_v13 = vld [vmem:[%s5748_s26 + $0x8] ss:$20 sps:$4 sm:$0xff]  }
  0xdd   : > { %2211 = vmatprep.subr.bf16.mxu0 %v5247_v2  ;;  %4763 = vmatprep.subr.bf16.mxu1 %v5247_v2 }
  0xe0   : > { %2212 = vmatpush1.bf16.msra.mxu0 %v4936_v14  ;;  %4779 = vmatpush1.bf16.msra.mxu1 %v4936_v14  ;;  %v5014_v14 = vld [vmem:[%s5748_s26 + $0x280] ss:$20 sps:$4 sm:$0xff]  }
  0xe1   : > { %2213 = vmatprep.subr.bf16.mxu0 %v5247_v2  ;;  %4764 = vmatprep.subr.bf16.mxu1 %v5247_v2 }
  0xe4   : > { %2214 = vmatpush1.bf16.msra.mxu0 %v4937_v15  ;;  %4780 = vmatpush1.bf16.msra.mxu1 %v4937_v15  ;;  %v5015_v15 = vld [vmem:[%s5748_s26 + $0x2ac] ss:$20 sps:$4 sm:$0xff]  }
  0xe5   : > { %2215 = vmatprep.subr.bf16.mxu0 %v5247_v2  ;;  %4765 = vmatprep.subr.bf16.mxu1 %v5247_v2 }
  0xe8   : > { %2216 = vmatpush1.bf16.msra.mxu0 %v4938_v16  ;;  %4781 = vmatpush1.bf16.msra.mxu1 %v4938_v16  ;;  %v5017_v16 = vld [vmem:[%s5748_s26 + $0x34] ss:$20 sps:$4 sm:$0xff]  }
  0xe9   : > { %2217 = vmatprep.subr.bf16.mxu0 %v5247_v2  ;;  %4766 = vmatprep.subr.bf16.mxu1 %v5247_v2 }
  0xec   : > { %2218 = vmatpush1.bf16.msra.mxu0 %v4939_v17  ;;  %4782 = vmatpush1.bf16.msra.mxu1 %v4939_v17  ;;  %v5019_v17 = vld [vmem:[%s5748_s26 + $0x2a8] ss:$20 sps:$4 sm:$0xff]  }
  0xed   : > { %2219 = vmatprep.subr.bf16.mxu0 %v5247_v2  ;;  %4767 = vmatprep.subr.bf16.mxu1 %v5247_v2 }
  0xf0   : > { %2220 = vmatpush1.bf16.msra.mxu0 %v4940_v18  ;;  %4783 = vmatpush1.bf16.msra.mxu1 %v4940_v18  ;;  %v5020_v18 = vld [vmem:[%s5748_s26 + $0x30] ss:$20 sps:$4 sm:$0xff]  }
  0xf1   : > { %2221 = vmatprep.subr.bf16.mxu0 %v5247_v2  ;;  %4768 = vmatprep.subr.bf16.mxu1 %v5247_v2 }
  0xf4   : > { %2222 = vmatpush1.bf16.msra.mxu0 %v4941_v19  ;;  %4784 = vmatpush1.bf16.msra.mxu1 %v4941_v19  ;;  %v5022_v19 = vld [vmem:[%s5748_s26 + $0x2d4] ss:$20 sps:$4 sm:$0xff]  }
  0xf5   : > { %2480 = vmatprep.subr.bf16.mxu0 %v5247_v2  ;;  %4673 = vmatprep.subr.bf16.mxu1 %v4949_v20 }
  0xf7   : > { %2224 = vmatmul.mubr.bf16.vlgmr.msra.gmra.mrb[0].mxu0 %v4942_v21  ;;  %2288 = vmatmul.mubr.bf16.vlgmr.msra.gmra.mrb[0].mxu1 %v4945_v22  ;;  %v5027_v21 = vld [vmem:[%s5748_s26 + $0x58] ss:$20 sps:$4 sm:$0xff]   ;;  %v5028_v22 = vld [vmem:[%s5748_s26 + $0x2fc] ss:$20 sps:$4 sm:$0xff]  }
  0xf8   : > { %2481 = vmatpush1.bf16.msra.mxu0 %v4948_v23  ;;  %4674 = vmatpush3.bf16.msra.mxu1 %v4949_v20  ;;  %v5026_v20 = vld [vmem:[%s5748_s26 + $0x2d0] ss:$20 sps:$4 sm:$0xff]  }
  0xf9   : > { %2482 = vmatprep.subr.bf16.mxu0 %v5247_v2  ;;  %2231 = vmatprep.mubr.bf16.mxu0 %v4951_v24  ;;  %v5030_v23 = vld [vmem:[%s5748_s26 + $0x84] ss:$20 sps:$4 sm:$0xff]  }
  0xfa   : > { %2295 = vmatprep.mubr.bf16.mxu1 %v4953_v25  ;;  %4675 = vmatprep.subr.bf16.mxu1 %v4974_v26  ;;  %v5032_v24 = vld [vmem:[%s5748_s26 + $0x2f8] ss:$20 sps:$4 sm:$0xff]   ;;  %v5033_v25 = vld [vmem:[%s5748_s26 + $0x80] ss:$20 sps:$4 sm:$0xff]  }
  0xfc   : > { %2483 = vmatpush1.bf16.msra.mxu0 %v4950_v27  ;;  %4676 = vmatpush3.bf16.msra.mxu1 %v4974_v26  ;;  %v5034_v26 = vld [vmem:[%s5748_s26 + $0x324] ss:$20 sps:$4 sm:$0xff]   ;;  %v5036_v27 = vld [vmem:[%s5748_s26 + $0xac] ss:$20 sps:$4 sm:$0xff]  }
  0xfd   : > { %2484 = vmatprep.subr.bf16.mxu0 %v5247_v2  ;;  %4677 = vmatprep.subr.bf16.mxu1 %v4999_v28 }
  0xff   : > { %2232 = vmatmul.mubr.bf16.gmra.mrb[4].mxu0 %v4955_v29  ;;  %2296 = vmatmul.mubr.bf16.gmra.mrb[4].mxu1 %v4956_v30  ;;  %v5039_v29 = vld [vmem:[%s5748_s26 + $0xa8] ss:$20 sps:$4 sm:$0xff]   ;;  %v5041_v30 = vld [vmem:[%s5748_s26 + $0x34c] ss:$20 sps:$4 sm:$0xff]  }
 0x100   : > { %2485 = vmatpush1.bf16.msra.mxu0 %v4957_v31  ;;  %2239 = vmatprep.mubr.bf16.mxu0 %v4959_v32  ;;  %v5043_v31 = vld [vmem:[%s5748_s26 + $0xd4] ss:$20 sps:$4 sm:$0xff]  }
 0x101   : > { %2486 = vmatprep.subr.bf16.mxu0 %v5247_v2  ;;  %2303 = vmatprep.mubr.bf16.mxu1 %v4961_v33  ;;  %v5045_v32 = vld [vmem:[%s5748_s26 + $0x348] ss:$20 sps:$4 sm:$0xff]   ;;  %v5046_v33 = vld [vmem:[%s5748_s26 + $0xd0] ss:$20 sps:$4 sm:$0xff]  }
 0x102   : > { %4678 = vmatpush3.bf16.msra.mxu1 %v4999_v28  ;;  %v5038_v28 = vld [vmem:[%s5748_s26 + $0x320] ss:$20 sps:$4 sm:$0xff]  }
 0x103   : > { %4679 = vmatprep.subr.bf16.mxu1 %v5021_v34 }
 0x104   : > { %2487 = vmatpush1.bf16.msra.mxu0 %v4958_v35  ;;  %v5049_v35 = vld [vmem:[%s5748_s26 + $0xfc] ss:$20 sps:$4 sm:$0xff]  }
 0x105   : > { %2488 = vmatprep.subr.bf16.mxu0 %v5247_v2 }
 0x106   : > { %4680 = vmatpush3.bf16.msra.mxu1 %v5021_v34  ;;  %v5047_v34 = vld [vmem:[%s5748_s26 + $0x374] ss:$20 sps:$4 sm:$0xff]  }
 0x107   : > { %2240 = vmatmul.mubr.bf16.gmra.mrb[8].mxu0 %v4963_v36  ;;  %2304 = vmatmul.mubr.bf16.gmra.mrb[8].mxu1 %v4964_v37  ;;  %v5051_v36 = vld [vmem:[%s5748_s26 + $0x370] ss:$20 sps:$4 sm:$0xff]   ;;  %v5052_v37 = vld [vmem:[%s5748_s26 + $0xf8] ss:$20 sps:$4 sm:$0xff]  }
 0x108   : > { %2489 = vmatpush1.bf16.msra.mxu0 %v4965_v38  ;;  %2247 = vmatprep.mubr.bf16.mxu0 %v4967_v39  ;;  %v5053_v38 = vld [vmem:[%s5748_s26 + $0x39c] ss:$20 sps:$4 sm:$0xff]   ;;  %v5055_v39 = vld [vmem:[%s5748_s26 + $0x124] ss:$20 sps:$4 sm:$0xff]  }
 0x109   : > { %2490 = vmatprep.subr.bf16.mxu0 %v5247_v2  ;;  %2311 = vmatprep.mubr.bf16.mxu1 %v4969_v40  ;;  %v5057_v40 = vld [vmem:[%s5748_s26 + $0x398] ss:$20 sps:$4 sm:$0xff]  }
 0x10a   : > { %4681 = vmatprep.subr.bf16.mxu1 %v5040_v41 }
 0x10b   : > { %4682 = vmatpush3.bf16.msra.mxu1 %v5040_v41  ;;  %v5058_v41 = vld [vmem:[%s5748_s26 + $0x120] ss:$20 sps:$4 sm:$0xff]  }
 0x10c   : > { %2491 = vmatpush1.bf16.msra.mxu0 %v4966_v42  ;;  %4683 = vmatprep.subr.bf16.mxu1 %v5059_v43  ;;  %v5060_v42 = vld [vmem:[%s5748_s26 + $0x3c4] ss:$20 sps:$4 sm:$0xff]  }
 0x10d   : > { %2492 = vmatprep.subr.bf16.mxu0 %v5247_v2 }
 0x10f   : > { %2248 = vmatmul.mubr.bf16.gmra.mrb[12].mxu0 %v4971_v44  ;;  %2312 = vmatmul.mubr.bf16.gmra.mrb[12].mxu1 %v4972_v45  ;;  %v5064_v44 = vld [vmem:[%s5748_s26 + $0x3c0] ss:$20 sps:$4 sm:$0xff]   ;;  %v5065_v45 = vld [vmem:[%s5748_s26 + $0x148] ss:$20 sps:$4 sm:$0xff]  }
 0x110   : > { %2493 = vmatpush1.bf16.msra.mxu0 %v4973_v46  ;;  %2255 = vmatprep.mubr.bf16.mxu0 %v4976_v47  ;;  %v5066_v46 = vld [vmem:[%s5748_s26 + $0x3ec] ss:$20 sps:$4 sm:$0xff]   ;;  %v5068_v47 = vld [vmem:[%s5748_s26 + $0x174] ss:$20 sps:$4 sm:$0xff]  }
 0x111   : > { %2494 = vmatprep.subr.bf16.mxu0 %v5247_v2  ;;  %2319 = vmatprep.mubr.bf16.mxu1 %v4978_v48  ;;  %v5070_v48 = vld [vmem:[%s5748_s26 + $0x3e8] ss:$20 sps:$4 sm:$0xff]  }
 0x112   : > { %4684 = vmatpush3.bf16.msra.mxu1 %v5059_v43  ;;  %v5062_v43 = vld [vmem:[%s5748_s26 + $0x14c] ss:$20 sps:$4 sm:$0xff]  }
 0x113   : > { %4685 = vmatprep.subr.bf16.mxu1 %v5078_v49 }
 0x114   : > { %2495 = vmatpush1.bf16.msra.mxu0 %v4975_v50  ;;  %v5072_v50 = vld [vmem:[%s5748_s26 + $0x414] ss:$20 sps:$4 sm:$0xff]  }
 0x115   : > { %2496 = vmatprep.subr.bf16.mxu0 %v5247_v2 }
 0x116   : > { %4686 = vmatpush3.bf16.msra.mxu1 %v5078_v49  ;;  %v5071_v49 = vld [vmem:[%s5748_s26 + $0x170] ss:$20 sps:$4 sm:$0xff]  }
 0x117   : > { %2256 = vmatmul.mubr.bf16.gmra.mrb[16].mxu0 %v4980_v51  ;;  %2320 = vmatmul.mubr.bf16.gmra.mrb[16].mxu1 %v4981_v52  ;;  %v5074_v51 = vld [vmem:[%s5748_s26 + $0x19c] ss:$20 sps:$4 sm:$0xff]  }
 0x118   : > { %2497 = vmatpush1.bf16.msra.mxu0 %v4982_v53  ;;  %2263 = vmatprep.mubr.bf16.mxu0 %v4984_v54  ;;  %v5076_v52 = vld [vmem:[%s5748_s26 + $0x410] ss:$20 sps:$4 sm:$0xff]   ;;  %v5077_v53 = vld [vmem:[%s5748_s26 + $0x198] ss:$20 sps:$4 sm:$0xff]  }
 0x119   : > { %2498 = vmatprep.subr.bf16.mxu0 %v5247_v2  ;;  %2327 = vmatprep.mubr.bf16.mxu1 %v4986_v55  ;;  %v5079_v54 = vld [vmem:[%s5748_s26 + $0x43c] ss:$20 sps:$4 sm:$0xff]   ;;  %v5081_v55 = vld [vmem:[%s5748_s26 + $0x1c4] ss:$20 sps:$4 sm:$0xff]  }
 0x11a   : > { %4687 = vmatprep.subr.bf16.mxu1 %v5097_v62 }
 0x11b   : > { %4688 = vmatpush3.bf16.msra.mxu1 %v5097_v62  ;;  %v5091_v62 = vld [vmem:[%s5748_s26 + $0x48c] ss:$20 sps:$4 sm:$0xff]  }
 0x11c   : > { %2499 = vmatpush1.bf16.msra.mxu0 %v4983_v56  ;;  %v5083_v56 = vld [vmem:[%s5748_s26 + $0x438] ss:$20 sps:$4 sm:$0xff]  }
 0x11d   : > { %2500 = vmatprep.subr.bf16.mxu0 %v5247_v2 }
 0x11f   : > { %2264 = vmatmul.mubr.bf16.gmra.mrb[20].mxu0 %v4988_v57  ;;  %2328 = vmatmul.mubr.bf16.gmra.mrb[20].mxu1 %v4989_v58  ;;  %v5084_v57 = vld [vmem:[%s5748_s26 + $0x1c0] ss:$20 sps:$4 sm:$0xff]   ;;  %v5085_v58 = vld [vmem:[%s5748_s26 + $0x464] ss:$20 sps:$4 sm:$0xff]  }
 0x120   : > { %2501 = vmatpush1.bf16.msra.mxu0 %v4990_v59  ;;  %2271 = vmatprep.mubr.bf16.mxu0 %v4992_v60  ;;  %v5087_v59 = vld [vmem:[%s5748_s26 + $0x1ec] ss:$20 sps:$4 sm:$0xff]  }
 0x121   : > { %2502 = vmatprep.subr.bf16.mxu0 %v5247_v2  ;;  %2335 = vmatprep.mubr.bf16.mxu1 %v4994_v61  ;;  %v5089_v60 = vld [vmem:[%s5748_s26 + $0x460] ss:$20 sps:$4 sm:$0xff]   ;;  %v5090_v61 = vld [vmem:[%s5748_s26 + $0x1e8] ss:$20 sps:$4 sm:$0xff]  }
 0x124   : > { %2503 = vmatpush1.bf16.msra.mxu0 %v4991_v63  ;;  %v5093_v63 = vld [vmem:[%s5748_s26 + $0x214] ss:$20 sps:$4 sm:$0xff]  }
 0x125   : > { %2504 = vmatprep.subr.bf16.mxu0 %v5247_v2 }
 0x127   : > { %2272 = vmatmul.mubr.bf16.gmra.mrb[24].mxu0 %v4996_v0  ;;  %2336 = vmatmul.mubr.bf16.gmra.mrb[24].mxu1 %v4997_v1  ;;  %v5095_v0 = vld [vmem:[%s5748_s26 + $0x488] ss:$20 sps:$4 sm:$0xff]   ;;  %v5096_v1 = vld [vmem:[%s5748_s26 + $0x210] ss:$20 sps:$4 sm:$0xff]  }
 0x128   : > { %2505 = vmatpush1.bf16.msra.mxu0 %v4998_v3  ;;  %2279 = vmatprep.mubr.bf16.mxu0 %v5001_v4  ;;  %v5098_v3 = vld [vmem:[%s5748_s26 + $0x4b4] ss:$20 sps:$4 sm:$0xff]   ;;  %v5100_v4 = vld [vmem:[%s5748_s26 + $0x23c] ss:$20 sps:$4 sm:$0xff]  }
 0x129   : > { %2506 = vmatprep.subr.bf16.mxu0 %v5247_v2  ;;  %2343 = vmatprep.mubr.bf16.mxu1 %v5003_v5  ;;  %v5102_v5 = vld [vmem:[%s5748_s26 + $0x4b0] ss:$20 sps:$4 sm:$0xff]  }
 0x12c   : > { %2507 = vmatpush1.bf16.msra.mxu0 %v5000_v6  ;;  %v5103_v6 = vld [vmem:[%s5748_s26 + $0x238] ss:$20 sps:$4 sm:$0xff]  }
 0x12d   : > { %2508 = vmatprep.subr.bf16.mxu0 %v5247_v2 }
 0x12f   : > { %2280 = vmatmul.mubr.bf16.gmra.mrb[28].mxu0 %v5005_v7  ;;  %2344 = vmatmul.mubr.bf16.gmra.mrb[28].mxu1 %v5006_v8  ;;  %v5104_v7 = vld [vmem:[%s5748_s26 + $0x4dc] ss:$20 sps:$4 sm:$0xff]   ;;  %v5106_v8 = vld [vmem:[%s5748_s26 + $0x264] ss:$20 sps:$4 sm:$0xff]  }
 0x130   : > { %2509 = vmatpush1.bf16.msra.mxu0 %v5007_v9  ;;  %2351 = vmatprep.mubr.bf16.mxu1 %v5009_v10  ;;  %v5108_v9 = vld [vmem:[%s5748_s26 + $0x4d8] ss:$20 sps:$4 sm:$0xff]   ;;  %v5109_v10 = vld [vmem:[%s5748_s26 + $0x260] ss:$20 sps:$4 sm:$0xff]  }
 0x131   : > { %2510 = vmatprep.subr.bf16.mxu0 %v5247_v2  ;;  %2512 = vmatprep.mubr.bf16.mxu0 %v5013_v11  ;;  %v5024_v2 = vld [vmem:[%s5748_s26 + $0x5c] ss:$20 sps:$4 sm:$0xff]   ;;  %v5110_v11 = vld [vmem:[%s5748_s26 + $0x28c] ss:$20 sps:$4 sm:$0xff]  }
 0x134   : > { %2511 = vmatpush1.bf16.msra.mxu0 %v5008_v12  ;;  %v5112_v12 = vld [vmem:[%s5748_s26 + $0x10] ss:$20 sps:$4 sm:$0xff]  }
 0x137   : > { %2352 = vmatmul.mubr.bf16.gmra.mrb[32].mxu1 %v5014_v14  ;;  %2513 = vmatmul.mubr.bf16.vlgmr.msra.gmra.mrb[0].mxu0 %v5011_v13  ;;  %v5113_v13 = vld [vmem:[%s5748_s26 + $0x288] ss:$20 sps:$4 sm:$0xff]   ;;  %v5114_v14 = vld [vmem:[%s5748_s26 + $0x38] ss:$20 sps:$4 sm:$0xff]  }
 0x138   : > { %2359 = vmatprep.mubr.bf16.mxu1 %v5015_v15  ;;  %2520 = vmatprep.mubr.bf16.mxu0 %v5017_v16  ;;  %v5115_v15 = vld [vmem:[%s5748_s26 + $0x2b4] ss:$20 sps:$4 sm:$0xff]  }
 0x139   : > { %v5117_v16 = vld [vmem:[%s5748_s26 + $0x60] ss:$20 sps:$4 sm:$0xff]  }
 0x13f   : > { %2360 = vmatmul.mubr.bf16.gmra.mrb[36].mxu1 %v5019_v17  ;;  %2521 = vmatmul.mubr.bf16.gmra.mrb[4].mxu0 %v5020_v18  ;;  %v5118_v17 = vld [vmem:[%s5748_s26 + $0x2b0] ss:$20 sps:$4 sm:$0xff]   ;;  %v5119_v18 = vld [vmem:[%s5748_s26 + $0x88] ss:$20 sps:$4 sm:$0xff]  }
 0x140   : > { %2367 = vmatprep.mubr.bf16.mxu1 %v5022_v19  ;;  %2528 = vmatprep.mubr.bf16.mxu0 %v5024_v2  ;;  %v5120_v19 = vld [vmem:[%s5748_s26 + $0x2dc] ss:$20 sps:$4 sm:$0xff]  }
 0x141   : > { %v5122_v2 = vld [vmem:[%s5748_s26 + $0xb0] ss:$20 sps:$4 sm:$0xff]  }
 0x147   : > { %2368 = vmatmul.mubr.bf16.gmra.mrb[40].mxu1 %v5026_v20  ;;  %2529 = vmatmul.mubr.bf16.gmra.mrb[8].mxu0 %v5027_v21  ;;  %v5123_v20 = vld [vmem:[%s5748_s26 + $0x2d8] ss:$20 sps:$4 sm:$0xff]  }
 0x148   : > { %2375 = vmatprep.mubr.bf16.mxu1 %v5028_v22  ;;  %2536 = vmatprep.mubr.bf16.mxu0 %v5030_v23  ;;  %v5124_v21 = vld [vmem:[%s5748_s26 + $0xd8] ss:$20 sps:$4 sm:$0xff]   ;;  %v5127_v23 = vld [vmem:[%s5748_s26 + $0x100] ss:$20 sps:$4 sm:$0xff]  }
 0x149   : > { %v5125_v22 = vld [vmem:[%s5748_s26 + $0x304] ss:$20 sps:$4 sm:$0xff]  }
 0x14f   : > { %2376 = vmatmul.mubr.bf16.gmra.mrb[44].mxu1 %v5032_v24  ;;  %2537 = vmatmul.mubr.bf16.gmra.mrb[12].mxu0 %v5033_v25 }
 0x150   : > { %2383 = vmatprep.mubr.bf16.mxu1 %v5034_v26  ;;  %2544 = vmatprep.mubr.bf16.mxu0 %v5036_v27  ;;  %v5128_v26 = vld [vmem:[%s5748_s26 + $0x300] ss:$20 sps:$4 sm:$0xff]   ;;  %v5129_v27 = vld [vmem:[%s5748_s26 + $0x128] ss:$20 sps:$4 sm:$0xff]  }
 0x157   : > { %2384 = vmatmul.mubr.bf16.gmra.mrb[48].mxu1 %v5038_v28  ;;  %2545 = vmatmul.mubr.bf16.gmra.mrb[16].mxu0 %v5039_v29  ;;  %v5130_v29 = vld [vmem:[%s5748_s26 + $0x32c] ss:$20 sps:$4 sm:$0xff]  }
 0x158   : > { %2391 = vmatprep.mubr.bf16.mxu1 %v5041_v30  ;;  %2552 = vmatprep.mubr.bf16.mxu0 %v5043_v31  ;;  %v5132_v30 = vld [vmem:[%s5748_s26 + $0x150] ss:$20 sps:$4 sm:$0xff]  }
 0x15f   : > { %2392 = vmatmul.mubr.bf16.gmra.mrb[52].mxu1 %v5045_v32  ;;  %2553 = vmatmul.mubr.bf16.gmra.mrb[20].mxu0 %v5046_v33 }
 0x160   : > { %2399 = vmatprep.mubr.bf16.mxu1 %v5047_v34  ;;  %2560 = vmatprep.mubr.bf16.mxu0 %v5049_v35  ;;  %v5133_v34 = vld [vmem:[%s5748_s26 + $0x328] ss:$20 sps:$4 sm:$0xff]   ;;  %v5134_v35 = vld [vmem:[%s5748_s26 + $0x178] ss:$20 sps:$4 sm:$0xff]  }
 0x167   : > { %2400 = vmatmul.mubr.bf16.gmra.mrb[56].mxu1 %v5051_v36  ;;  %2561 = vmatmul.mubr.bf16.gmra.mrb[24].mxu0 %v5052_v37  ;;  %v5135_v37 = vld [vmem:[%s5748_s26 + $0x354] ss:$20 sps:$4 sm:$0xff]  }
 0x168   : > { %2407 = vmatprep.mubr.bf16.mxu1 %v5053_v38  ;;  %2568 = vmatprep.mubr.bf16.mxu0 %v5055_v39  ;;  %v5137_v38 = vld [vmem:[%s5748_s26 + $0x1a0] ss:$20 sps:$4 sm:$0xff]  }
 0x16f   : > { %2408 = vmatmul.mubr.bf16.gmra.mrb[60].mxu1 %v5057_v40  ;;  %2569 = vmatmul.mubr.bf16.gmra.mrb[28].mxu0 %v5058_v41 }
 0x170   : > { %2415 = vmatprep.mubr.bf16.mxu1 %v5060_v42  ;;  %2576 = vmatprep.mubr.bf16.mxu0 %v5062_v43  ;;  %v5138_v42 = vld [vmem:[%s5748_s26 + $0x350] ss:$20 sps:$4 sm:$0xff]   ;;  %v5139_v43 = vld [vmem:[%s5748_s26 + $0x1c8] ss:$20 sps:$4 sm:$0xff]  }
 0x177   : > { %2416 = vmatmul.mubr.bf16.gmra.mrb[64].mxu1 %v5064_v44  ;;  %2577 = vmatmul.mubr.bf16.gmra.mrb[32].mxu0 %v5065_v45  ;;  %v5140_v45 = vld [vmem:[%s5748_s26 + $0x37c] ss:$20 sps:$4 sm:$0xff]  }
 0x178   : > { %2423 = vmatprep.mubr.bf16.mxu1 %v5066_v46  ;;  %2584 = vmatprep.mubr.bf16.mxu0 %v5068_v47  ;;  %v5142_v46 = vld [vmem:[%s5748_s26 + $0x1f0] ss:$20 sps:$4 sm:$0xff]  }
 0x17f   : > { %2424 = vmatmul.mubr.bf16.gmra.mrb[68].mxu1 %v5070_v48  ;;  %2585 = vmatmul.mubr.bf16.gmra.mrb[36].mxu0 %v5071_v49 }
 0x180   : > { %2431 = vmatprep.mubr.bf16.mxu1 %v5072_v50  ;;  %2592 = vmatprep.mubr.bf16.mxu0 %v5074_v51  ;;  %v5143_v50 = vld [vmem:[%s5748_s26 + $0x378] ss:$20 sps:$4 sm:$0xff]  }
 0x181   : > { %v5144_v51 = vld [vmem:[%s5748_s26 + $0x218] ss:$20 sps:$4 sm:$0xff]  }
 0x187   : > { %2432 = vmatmul.mubr.bf16.gmra.mrb[72].mxu1 %v5076_v52  ;;  %2593 = vmatmul.mubr.bf16.gmra.mrb[40].mxu0 %v5077_v53  ;;  %v5145_v53 = vld [vmem:[%s5748_s26 + $0x3a4] ss:$20 sps:$4 sm:$0xff]  }
 0x188   : > { %2439 = vmatprep.mubr.bf16.mxu1 %v5079_v54  ;;  %2600 = vmatprep.mubr.bf16.mxu0 %v5081_v55  ;;  %v5147_v54 = vld [vmem:[%s5748_s26 + $0x240] ss:$20 sps:$4 sm:$0xff]  }
 0x18f   : > { %2440 = vmatmul.mubr.bf16.gmra.mrb[76].mxu1 %v5083_v56  ;;  %2601 = vmatmul.mubr.bf16.gmra.mrb[44].mxu0 %v5084_v57 }
 0x190   : > { %2447 = vmatprep.mubr.bf16.mxu1 %v5085_v58  ;;  %2608 = vmatprep.mubr.bf16.mxu0 %v5087_v59  ;;  %v5148_v58 = vld [vmem:[%s5748_s26 + $0x3a0] ss:$20 sps:$4 sm:$0xff]   ;;  %v5149_v59 = vld [vmem:[%s5748_s26 + $0x268] ss:$20 sps:$4 sm:$0xff]  }
 0x197   : > { %2448 = vmatmul.mubr.bf16.gmra.mrb[80].mxu1 %v5089_v60  ;;  %2609 = vmatmul.mubr.bf16.gmra.mrb[48].mxu0 %v5090_v61  ;;  %v5150_v61 = vld [vmem:[%s5748_s26 + $0x3cc] ss:$20 sps:$4 sm:$0xff]  }
 0x198   : > { %2455 = vmatprep.mubr.bf16.mxu1 %v5091_v62  ;;  %2616 = vmatprep.mubr.bf16.mxu0 %v5093_v63  ;;  %v5152_v62 = vld [vmem:[%s5748_s26 + $0x290] ss:$20 sps:$4 sm:$0xff]  }
 0x19f   : > { %2456 = vmatmul.mubr.bf16.gmra.mrb[84].mxu1 %v5095_v0  ;;  %2617 = vmatmul.mubr.bf16.gmra.mrb[52].mxu0 %v5096_v1 }
 0x1a0   : > { %2463 = vmatprep.mubr.bf16.mxu1 %v5098_v3  ;;  %2624 = vmatprep.mubr.bf16.mxu0 %v5100_v4  ;;  %v5153_v3 = vld [vmem:[%s5748_s26 + $0x3c8] ss:$20 sps:$4 sm:$0xff]   ;;  %v5154_v4 = vld [vmem:[%s5748_s26 + $0x2b8] ss:$20 sps:$4 sm:$0xff]  }
 0x1a7   : > { %2464 = vmatmul.mubr.bf16.gmra.mrb[88].mxu1 %v5102_v5  ;;  %2625 = vmatmul.mubr.bf16.gmra.mrb[56].mxu0 %v5103_v6  ;;  %v5155_v6 = vld [vmem:[%s5748_s26 + $0x3f4] ss:$20 sps:$4 sm:$0xff]  }
 0x1a8   : > { %2471 = vmatprep.mubr.bf16.mxu1 %v5104_v7  ;;  %2632 = vmatprep.mubr.bf16.mxu0 %v5106_v8  ;;  %v5157_v7 = vld [vmem:[%s5748_s26 + $0x2e0] ss:$20 sps:$4 sm:$0xff]  }
 0x1af   : > { %2472 = vmatmul.mubr.bf16.gmra.mrb[92].mxu1 %v5108_v9  ;;  %2633 = vmatmul.mubr.bf16.gmra.mrb[60].mxu0 %v5109_v10 }
 0x1b0   : > { %2640 = vmatprep.mubr.bf16.mxu0 %v5110_v11  ;;  %4689 = vmatprep.mubr.bf16.mxu1 %v5112_v12  ;;  %v5158_v11 = vld [vmem:[%s5748_s26 + $0x3f0] ss:$20 sps:$4 sm:$0xff]   ;;  %v5159_v12 = vld [vmem:[%s5748_s26 + $0x308] ss:$20 sps:$4 sm:$0xff]  }
 0x1b7   : > { %2641 = vmatmul.mubr.bf16.gmra.mrb[64].mxu0 %v5113_v13  ;;  %4690 = vmatmul.mubr.bf16.vlgmr.msra.gmra.mrb[96].mxu1 %v5114_v14  ;;  %v5160_v14 = vld [vmem:[%s5748_s26 + $0x41c] ss:$20 sps:$4 sm:$0xff]  }
 0x1b8   : > { %2648 = vmatprep.mubr.bf16.mxu0 %v5115_v15  ;;  %4693 = vmatprep.mubr.bf16.mxu1 %v5117_v16  ;;  %v5162_v15 = vld [vmem:[%s5748_s26 + $0x330] ss:$20 sps:$4 sm:$0xff]  }
 0x1bf   : > { %2649 = vmatmul.mubr.bf16.gmra.mrb[68].mxu0 %v5118_v17  ;;  %4694 = vmatmul.mubr.bf16.gmra.mrb[100].mxu1 %v5119_v18 }
 0x1c0   : > { %2656 = vmatprep.mubr.bf16.mxu0 %v5120_v19  ;;  %4697 = vmatprep.mubr.bf16.mxu1 %v5122_v2  ;;  %v5163_v19 = vld [vmem:[%s5748_s26 + $0x418] ss:$20 sps:$4 sm:$0xff]  }
 0x1c1   : > { %v5164_v2 = vld [vmem:[%s5748_s26 + $0x358] ss:$20 sps:$4 sm:$0xff]  }
 0x1c7   : > { %2657 = vmatmul.mubr.bf16.gmra.mrb[72].mxu0 %v5123_v20  ;;  %4698 = vmatmul.mubr.bf16.gmra.mrb[104].mxu1 %v5124_v21  ;;  %v5165_v21 = vld [vmem:[%s5748_s26 + $0x444] ss:$20 sps:$4 sm:$0xff]  }
 0x1c8   : > { %2664 = vmatprep.mubr.bf16.mxu0 %v5125_v22  ;;  %4701 = vmatprep.mubr.bf16.mxu1 %v5127_v23  ;;  %v5167_v22 = vld [vmem:[%s5748_s26 + $0x380] ss:$20 sps:$4 sm:$0xff]  }
 0x1ca   : > { %v6013_v24 = vpop.f32.mrb[0].mxu1 }
 0x1cb   : > { %v2291_v25 = vpop.f32.mrb[1].mxu1 }
 0x1cc   : > { %v6017_v28 = vpop.f32.mrb[2].mxu1 }
 0x1cd   : > { %v2294_v31 = vpop.f32.mrb[3].mxu1 }
 0x1ce   : > { %v5169_v31 = vld [vmem:[%s5748_s26 + $0x3a8] ss:$20 sps:$4 sm:$0xff]  }
 0x1cf   : > { %2665 = vmatmul.mubr.bf16.gmra.mrb[76].mxu0 %v5128_v26  ;;  %4702 = vmatmul.mubr.bf16.gmra.mrb[108].mxu1 %v5129_v27 }
 0x1d0   : > { %2672 = vmatprep.mubr.bf16.mxu0 %v5130_v29  ;;  %4705 = vmatprep.mubr.bf16.mxu1 %v5132_v30  ;;  %v5168_v30 = vld [vmem:[%s5748_s26 + $0x440] ss:$20 sps:$4 sm:$0xff]  }
 0x1d2   : > { %v6021_v32 = vpop.f32.mrb[4].mxu1 }
 0x1d3   : > { %v2299_v33 = vpop.f32.mrb[5].mxu1 }
 0x1d4   : > { %v6025_v36 = vpop.f32.mrb[6].mxu1 }
 0x1d5   : > { %v2302_v39 = vpop.f32.mrb[7].mxu1 }
 0x1d7   : > { %2673 = vmatmul.mubr.bf16.gmra.mrb[80].mxu0 %v5133_v34  ;;  %4706 = vmatmul.mubr.bf16.gmra.mrb[112].mxu1 %v5134_v35  ;;  %v5170_v35 = vld [vmem:[%s5748_s26 + $0x46c] ss:$20 sps:$4 sm:$0xff]  }
 0x1d8   : > { %2680 = vmatprep.mubr.bf16.mxu0 %v5135_v37  ;;  %4709 = vmatprep.mubr.bf16.mxu1 %v5137_v38  ;;  %v5172_v37 = vld [vmem:[%s5748_s26 + $0x3d0] ss:$20 sps:$4 sm:$0xff]  }
 0x1da   : > { %v6029_v40 = vpop.f32.mrb[8].mxu1 }
 0x1db   : > { %v2307_v41 = vpop.f32.mrb[9].mxu1 }
 0x1dc   : > { %v6033_v44 = vpop.f32.mrb[10].mxu1 }
 0x1dd   : > { %v2310_v47 = vpop.f32.mrb[11].mxu1 }
 0x1de   : > { %v5174_v47 = vld [vmem:[%s5748_s26 + $0x3f8] ss:$20 sps:$4 sm:$0xff]  }
 0x1df   : > { %2681 = vmatmul.mubr.bf16.gmra.mrb[84].mxu0 %v5138_v42  ;;  %4710 = vmatmul.mubr.bf16.gmra.mrb[116].mxu1 %v5139_v43 }
 0x1e0   : > { %2688 = vmatprep.mubr.bf16.mxu0 %v5140_v45  ;;  %4713 = vmatprep.mubr.bf16.mxu1 %v5142_v46  ;;  %v5173_v46 = vld [vmem:[%s5748_s26 + $0x468] ss:$20 sps:$4 sm:$0xff]  }
 0x1e2   : > { %v6037_v48 = vpop.f32.mrb[12].mxu1 }
 0x1e3   : > { %v2315_v49 = vpop.f32.mrb[13].mxu1 }
 0x1e4   : > { %v6041_v52 = vpop.f32.mrb[14].mxu1 }
 0x1e5   : > { %v2318_v55 = vpop.f32.mrb[15].mxu1 }
 0x1e7   : > { %2689 = vmatmul.mubr.bf16.gmra.mrb[88].mxu0 %v5143_v50  ;;  %4714 = vmatmul.mubr.bf16.gmra.mrb[120].mxu1 %v5144_v51  ;;  %v5175_v51 = vld [vmem:[%s5748_s26 + $0x494] ss:$20 sps:$4 sm:$0xff]  }
 0x1e8   : > { %2696 = vmatprep.mubr.bf16.mxu0 %v5145_v53  ;;  %4717 = vmatprep.mubr.bf16.mxu1 %v5147_v54  ;;  %v5177_v53 = vld [vmem:[%s5748_s26 + $0x420] ss:$20 sps:$4 sm:$0xff]  }
 0x1ea   : > { %v6045_v56 = vpop.f32.mrb[16].mxu1 }
 0x1eb   : > { %v2323_v57 = vpop.f32.mrb[17].mxu1 }
 0x1ec   : > { %v6049_v60 = vpop.f32.mrb[18].mxu1 }
 0x1ed   : > { %v2326_v63 = vpop.f32.mrb[19].mxu1 }
 0x1ee   : > { %v5179_v63 = vld [vmem:[%s5748_s26 + $0x448] ss:$20 sps:$4 sm:$0xff]  }
 0x1ef   : > { %2697 = vmatmul.mubr.bf16.gmra.mrb[92].mxu0 %v5148_v58  ;;  %4718 = vmatmul.mubr.bf16.gmra.mrb[124].mxu1 %v5149_v59 }
 0x1f0   : > { %2704 = vmatprep.mubr.bf16.mxu0 %v5150_v61  ;;  %4721 = vmatprep.mubr.bf16.mxu1 %v5152_v62  ;;  %v5178_v62 = vld [vmem:[%s5748_s26 + $0x490] ss:$20 sps:$4 sm:$0xff]  }
 0x1f2   : > { %v6053_v0 = vpop.f32.mrb[20].mxu1 }
 0x1f3   : > { %v2331_v1 = vpop.f32.mrb[21].mxu1 }
 0x1f4   : > { %v6057_v5 = vpop.f32.mrb[22].mxu1 }
 0x1f5   : > { %v2334_v8 = vpop.f32.mrb[23].mxu1 }
 0x1f7   : > { %2705 = vmatmul.mubr.bf16.gmra.mrb[96].mxu0 %v5153_v3  ;;  %4722 = vmatmul.mubr.bf16.gmra.mrb[128].mxu1 %v5154_v4  ;;  %v5180_v4 = vld [vmem:[%s5748_s26 + $0x4bc] ss:$20 sps:$4 sm:$0xff]  }
 0x1f8   : > { %2712 = vmatprep.mubr.bf16.mxu0 %v5155_v6  ;;  %4725 = vmatprep.mubr.bf16.mxu1 %v5157_v7  ;;  %v5182_v6 = vld [vmem:[%s5748_s26 + $0x470] ss:$20 sps:$4 sm:$0xff]  }
 0x1fa   : > { %v6061_v9 = vpop.f32.mrb[24].mxu1 }
 0x1fb   : > { %v2339_v10 = vpop.f32.mrb[25].mxu1 }
 0x1fc   : > { %v6065_v13 = vpop.f32.mrb[26].mxu1 }
 0x1fd   : > { %v2342_v16 = vpop.f32.mrb[27].mxu1 }
 0x1fe   : > { %v5184_v16 = vld [vmem:[%s5748_s26 + $0x498] ss:$20 sps:$4 sm:$0xff]  }
 0x1ff   : > { %2713 = vmatmul.mubr.bf16.gmra.mrb[100].mxu0 %v5158_v11  ;;  %4726 = vmatmul.mubr.bf16.gmra.mrb[132].mxu1 %v5159_v12 }
 0x200   : > { %2720 = vmatprep.mubr.bf16.mxu0 %v5160_v14  ;;  %4729 = vmatprep.mubr.bf16.mxu1 %v5162_v15  ;;  %v5183_v15 = vld [vmem:[%s5748_s26 + $0x4b8] ss:$20 sps:$4 sm:$0xff]  }
 0x202   : > { %v6069_v17 = vpop.f32.mrb[28].mxu1 }
 0x203   : > { %v2347_v18 = vpop.f32.mrb[29].mxu1 }
 0x204   : > { %v6073_v20 = vpop.f32.mrb[30].mxu1 }
 0x205   : > { %v2350_v23 = vpop.f32.mrb[31].mxu1 }
 0x207   : > { %2721 = vmatmul.mubr.bf16.gmra.mrb[104].mxu0 %v5163_v19  ;;  %4730 = vmatmul.mubr.bf16.gmra.mrb[136].mxu1 %v5164_v2  ;;  %v5185_v2 = vld [vmem:[%s5748_s26 + $0x4e4] ss:$20 sps:$4 sm:$0xff]  }
 0x208   : > { %2728 = vmatprep.mubr.bf16.mxu0 %v5165_v21  ;;  %4733 = vmatprep.mubr.bf16.mxu1 %v5167_v22  ;;  %v5187_v21 = vld [vmem:[%s5748_s26 + $0x4c0] ss:$20 sps:$4 sm:$0xff]  }
 0x20a   : > { %v6077_v25 = vpop.f32.mrb[32].mxu1  ;;  %v6079_v26 = vpop.f32.mrb[0].mxu0 }
 0x20b   : > { %v2355_v27 = vpop.f32.mrb[33].mxu1  ;;  %v2516_v29 = vpop.f32.mrb[1].mxu0 }
 0x20c   : > { %v6083_v33 = vpop.f32.mrb[34].mxu1  ;;  %v6085_v34 = vpop.f32.mrb[2].mxu0 }
 0x20d   : > { %v2358_v38 = vpop.f32.mrb[35].mxu1  ;;  %v2519_v39 = vpop.f32.mrb[3].mxu0 }
 0x20f   : > { %2729 = vmatmul.mubr.bf16.gmra.mrb[108].mxu0 %v5168_v30  ;;  %4734 = vmatmul.mubr.bf16.gmra.mrb[140].mxu1 %v5169_v31 }
 0x210   : > { %2736 = vmatprep.mubr.bf16.mxu0 %v5170_v35  ;;  %4737 = vmatprep.mubr.bf16.mxu1 %v5172_v37  ;;  %v5188_v35 = vld [vmem:[%s5748_s26 + $0x4e0] ss:$20 sps:$4 sm:$0xff]   ;;  %v5189_v37 = vld [vmem:[%s5748_s26 + $0x4e8] ss:$20 sps:$4 sm:$0xff]  }
 0x212   : > { %v6089_v41 = vpop.f32.mrb[36].mxu1  ;;  %v6091_v42 = vpop.f32.mrb[4].mxu0 }
 0x213   : > { %v2363_v43 = vpop.f32.mrb[37].mxu1  ;;  %v2524_v45 = vpop.f32.mrb[5].mxu0 }
 0x214   : > { %v6095_v49 = vpop.f32.mrb[38].mxu1  ;;  %v6097_v50 = vpop.f32.mrb[6].mxu0 }
 0x215   : > { %v2366_v54 = vpop.f32.mrb[39].mxu1  ;;  %v2527_v55 = vpop.f32.mrb[7].mxu0 }
 0x217   : > { %2737 = vmatmul.mubr.bf16.gmra.mrb[112].mxu0 %v5173_v46  ;;  %4738 = vmatmul.mubr.bf16.gmra.mrb[144].mxu1 %v5174_v47 }
 0x218   : > { %2744 = vmatprep.mubr.bf16.mxu0 %v5175_v51  ;;  %4741 = vmatprep.mubr.bf16.mxu1 %v5177_v53 }
 0x21a   : > { %v6101_v57 = vpop.f32.mrb[40].mxu1  ;;  %v6103_v58 = vpop.f32.mrb[8].mxu0 }
 0x21b   : > { %v2371_v59 = vpop.f32.mrb[41].mxu1  ;;  %v2532_v61 = vpop.f32.mrb[9].mxu0 }
 0x21c   : > { %v6107_v1 = vpop.f32.mrb[42].mxu1  ;;  %v6109_v3 = vpop.f32.mrb[10].mxu0 }
 0x21d   : > { %v2374_v7 = vpop.f32.mrb[43].mxu1  ;;  %v2535_v8 = vpop.f32.mrb[11].mxu0 }
 0x21f   : > { %2745 = vmatmul.mubr.bf16.gmra.mrb[116].mxu0 %v5178_v62  ;;  %4742 = vmatmul.mubr.bf16.gmra.mrb[148].mxu1 %v5179_v63 }
 0x220   : > { %2752 = vmatprep.mubr.bf16.mxu0 %v5180_v4  ;;  %4745 = vmatprep.mubr.bf16.mxu1 %v5182_v6 }
 0x222   : > { %v6113_v10 = vpop.f32.mrb[44].mxu1  ;;  %v6115_v11 = vpop.f32.mrb[12].mxu0 }
 0x223   : > { %v2379_v12 = vpop.f32.mrb[45].mxu1  ;;  %v2540_v14 = vpop.f32.mrb[13].mxu0 }
 0x224   : > { %v6119_v18 = vpop.f32.mrb[46].mxu1  ;;  %v6121_v19 = vpop.f32.mrb[14].mxu0 }
 0x225   : > { %v2382_v22 = vpop.f32.mrb[47].mxu1  ;;  %v2543_v23 = vpop.f32.mrb[15].mxu0 }
 0x227   : > { %2753 = vmatmul.mubr.bf16.gmra.mrb[120].mxu0 %v5183_v15  ;;  %4746 = vmatmul.mubr.bf16.gmra.mrb[152].mxu1 %v5184_v16 }
 0x228   : > { %2760 = vmatprep.mubr.bf16.mxu0 %v5185_v2  ;;  %4749 = vmatprep.mubr.bf16.mxu1 %v5187_v21 }
 0x22a   : > { %v6125_v27 = vpop.f32.mrb[48].mxu1  ;;  %v6127_v29 = vpop.f32.mrb[16].mxu0 }
 0x22b   : > { %v2387_v30 = vpop.f32.mrb[49].mxu1  ;;  %v2548_v31 = vpop.f32.mrb[17].mxu0 }
 0x22c   : > { %v6131_v38 = vpop.f32.mrb[50].mxu1  ;;  %v6133_v39 = vpop.f32.mrb[18].mxu0 }
 0x22d   : > { %v2390_v43 = vpop.f32.mrb[51].mxu1  ;;  %v2551_v45 = vpop.f32.mrb[19].mxu0 }
 0x22f   : > { %2761 = vmatmul.mubr.bf16.gmra.mrb[124].mxu0 %v5188_v35  ;;  %4750 = vmatmul.mubr.bf16.gmra.mrb[156].mxu1 %v5189_v37 }
 0x232   : > { %v6135_v46 = vpop.f32.mrb[52].mxu1  ;;  %v6137_v47 = vpop.f32.mrb[20].mxu0 }
 0x233   : > { %v2395_v51 = vpop.f32.mrb[53].mxu1  ;;  %v2556_v53 = vpop.f32.mrb[21].mxu0 }
 0x234   : > { %v6139_v54 = vpop.f32.mrb[54].mxu1  ;;  %v6141_v55 = vpop.f32.mrb[22].mxu0 }
 0x235   : > { %v2398_v59 = vpop.f32.mrb[55].mxu1  ;;  %v2559_v61 = vpop.f32.mrb[23].mxu0 }
 0x23a   : > { %v6143_v62 = vpop.f32.mrb[56].mxu1  ;;  %v6145_v63 = vpop.f32.mrb[24].mxu0 }
 0x23b   : > { %v2403_v4 = vpop.f32.mrb[57].mxu1  ;;  %v2564_v6 = vpop.f32.mrb[25].mxu0 }
 0x23c   : > { %v6147_v7 = vpop.f32.mrb[58].mxu1  ;;  %v6149_v8 = vpop.f32.mrb[26].mxu0 }
 0x23d   : > { %v2406_v12 = vpop.f32.mrb[59].mxu1  ;;  %v2567_v14 = vpop.f32.mrb[27].mxu0 }
 0x242   : > { %v6151_v15 = vpop.f32.mrb[60].mxu1  ;;  %v6153_v16 = vpop.f32.mrb[28].mxu0 }
 0x243   : > { %v2411_v2 = vpop.f32.mrb[61].mxu1  ;;  %v2572_v21 = vpop.f32.mrb[29].mxu0 }
 0x244   : > { %v6155_v22 = vpop.f32.mrb[62].mxu1  ;;  %v6157_v23 = vpop.f32.mrb[30].mxu0 }
 0x245   : > { %v2414_v30 = vpop.f32.mrb[63].mxu1  ;;  %v2575_v31 = vpop.f32.mrb[31].mxu0 }
 0x24a   : > { %v6159_v35 = vpop.f32.mrb[64].mxu1  ;;  %v2578_v37 = vpop.f32.mrb[32].mxu0 }
 0x24b   : > { %6766 = vst [vmem:[#allocation4_spill] sm:$0xff] %v6159_v35  ;;  %v6162_v43 = vadd.f32 %v2578_v37, %v6013_v24  ;;  %v2419_v45 = vpop.f32.mrb[65].mxu1  ;;  %v2580_v51 = vpop.f32.mrb[33].mxu0 }
 0x24c   : > { %v6164_v53 = vpop.f32.mrb[66].mxu1  ;;  %v2581_v59 = vpop.f32.mrb[34].mxu0 }
 0x24d   : > { %6767 = vst [vmem:[#allocation5_spill] sm:$0xff] %v6164_v53  ;;  %v6167_v61 = vadd.f32 %v2581_v59, %v6017_v28  ;;  %v2422_v4 = vpop.f32.mrb[67].mxu1  ;;  %v2583_v6 = vpop.f32.mrb[35].mxu0  ;;  %v786_v53 = vld [vmem:[#allocation2 + $0x18] sm:$0xff] }
 0x252   : > { %v6169_v12 = vpop.f32.mrb[68].mxu1  ;;  %v2586_v14 = vpop.f32.mrb[36].mxu0 }
 0x253   : > { %6768 = vst [vmem:[#allocation6_spill] sm:$0xff] %v6169_v12  ;;  %v6172_v2 = vadd.f32 %v2586_v14, %v6021_v32  ;;  %v2427_v21 = vpop.f32.mrb[69].mxu1  ;;  %v2588_v30 = vpop.f32.mrb[37].mxu0 }
 0x254   : > { %v6174_v24 = vpop.f32.mrb[70].mxu1  ;;  %v2589_v31 = vpop.f32.mrb[38].mxu0 }
 0x255   : > { %6769 = vst [vmem:[#allocation7_spill] sm:$0xff] %v6174_v24  ;;  %v6177_v37 = vadd.f32 %v2589_v31, %v6025_v36  ;;  %v2430_v45 = vpop.f32.mrb[71].mxu1  ;;  %v2591_v51 = vpop.f32.mrb[39].mxu0 }
 0x25a   : > { %v6179_v28 = vpop.f32.mrb[72].mxu1  ;;  %v2594_v59 = vpop.f32.mrb[40].mxu0 }
 0x25b   : > { %6770 = vst [vmem:[#allocation8_spill] sm:$0xff] %v6179_v28  ;;  %v6182_v4 = vadd.f32 %v2594_v59, %v6029_v40  ;;  %v2435_v6 = vpop.f32.mrb[73].mxu1  ;;  %v2596_v12 = vpop.f32.mrb[41].mxu0 }
 0x25c   : > { %v6184_v32 = vpop.f32.mrb[74].mxu1  ;;  %v2597_v14 = vpop.f32.mrb[42].mxu0 }
 0x25d   : > { %6771 = vst [vmem:[#allocation9_spill] sm:$0xff] %v6184_v32  ;;  %v6187_v21 = vadd.f32 %v2597_v14, %v6033_v44  ;;  %v2438_v30 = vpop.f32.mrb[75].mxu1  ;;  %v2599_v24 = vpop.f32.mrb[43].mxu0 }
 0x262   : > { %v6189_v36 = vpop.f32.mrb[76].mxu1  ;;  %v2602_v31 = vpop.f32.mrb[44].mxu0 }
 0x263   : > { %6772 = vst [vmem:[#allocation10_spill] sm:$0xff] %v6189_v36  ;;  %v6192_v45 = vadd.f32 %v2602_v31, %v6037_v48  ;;  %v2443_v51 = vpop.f32.mrb[77].mxu1  ;;  %v2604_v28 = vpop.f32.mrb[45].mxu0 }
 0x264   : > { %v6194_v40 = vpop.f32.mrb[78].mxu1  ;;  %v2605_v59 = vpop.f32.mrb[46].mxu0 }
 0x265   : > { %6773 = vst [vmem:[#allocation11_spill] sm:$0xff] %v6194_v40  ;;  %v6197_v12 = vadd.f32 %v2605_v59, %v6041_v52  ;;  %v2446_v6 = vpop.f32.mrb[79].mxu1  ;;  %v2607_v32 = vpop.f32.mrb[47].mxu0 }
 0x26a   : > { %v6199_v44 = vpop.f32.mrb[80].mxu1  ;;  %v2610_v14 = vpop.f32.mrb[48].mxu0 }
 0x26b   : > { %6774 = vst [vmem:[#allocation12_spill] sm:$0xff] %v6199_v44  ;;  %v6202_v24 = vadd.f32 %v2610_v14, %v6045_v56  ;;  %v2451_v30 = vpop.f32.mrb[81].mxu1  ;;  %v2612_v36 = vpop.f32.mrb[49].mxu0 }
 0x26c   : > { %v6204_v48 = vpop.f32.mrb[82].mxu1  ;;  %v2613_v31 = vpop.f32.mrb[50].mxu0 }
 0x26d   : > { %6775 = vst [vmem:[#allocation13_spill] sm:$0xff] %v6204_v48  ;;  %v6207_v28 = vadd.f32 %v2613_v31, %v6049_v60  ;;  %v2454_v51 = vpop.f32.mrb[83].mxu1  ;;  %v2615_v40 = vpop.f32.mrb[51].mxu0 }
 0x272   : > { %v6209_v52 = vpop.f32.mrb[84].mxu1  ;;  %v2618_v59 = vpop.f32.mrb[52].mxu0 }
 0x273   : > { %6776 = vst [vmem:[#allocation14_spill] sm:$0xff] %v6209_v52  ;;  %v6212_v32 = vadd.f32 %v2618_v59, %v6053_v0  ;;  %v2459_v6 = vpop.f32.mrb[85].mxu1  ;;  %v2620_v44 = vpop.f32.mrb[53].mxu0 }
 0x274   : > { %v6214_v56 = vpop.f32.mrb[86].mxu1  ;;  %v2621_v14 = vpop.f32.mrb[54].mxu0 }
 0x275   : > { %6777 = vst [vmem:[#allocation15_spill] sm:$0xff] %v6214_v56  ;;  %v6217_v36 = vadd.f32 %v2621_v14, %v6057_v5  ;;  %v2462_v30 = vpop.f32.mrb[87].mxu1  ;;  %v2623_v48 = vpop.f32.mrb[55].mxu0 }
 0x27a   : > { %v6219_v60 = vpop.f32.mrb[88].mxu1  ;;  %v2626_v31 = vpop.f32.mrb[56].mxu0 }
 0x27b   : > { %6778 = vst [vmem:[#allocation16_spill] sm:$0xff] %v6219_v60  ;;  %v6222_v40 = vadd.f32 %v2626_v31, %v6061_v9  ;;  %v2467_v51 = vpop.f32.mrb[89].mxu1  ;;  %v2628_v52 = vpop.f32.mrb[57].mxu0 }
 0x27c   : > { %v6224_v0 = vpop.f32.mrb[90].mxu1  ;;  %v2629_v59 = vpop.f32.mrb[58].mxu0 }
 0x27d   : > { %6779 = vst [vmem:[#allocation17_spill] sm:$0xff] %v6224_v0  ;;  %v6227_v44 = vadd.f32 %v2629_v59, %v6065_v13  ;;  %v2470_v6 = vpop.f32.mrb[91].mxu1  ;;  %v2631_v56 = vpop.f32.mrb[59].mxu0  ;;  %v785_v59 = vld [vmem:[#allocation2 + $0x10] sm:$0xff] }
 0x27f   : > { %6780 = vst [vmem:[#allocation18_spill] sm:$0xff] %v6227_v44  ;;  %v784_v44 = vld [vmem:[#allocation2 + $0x8] sm:$0xff] }
 0x282   : > { %v6229_v5 = vpop.f32.mrb[92].mxu1  ;;  %v2634_v14 = vpop.f32.mrb[60].mxu0 }
 0x283   : > { %6781 = vst [vmem:[#allocation19_spill] sm:$0xff] %v6229_v5  ;;  %v6232_v48 = vadd.f32 %v2634_v14, %v6069_v17  ;;  %v2475_v30 = vpop.f32.mrb[93].mxu1  ;;  %v2636_v60 = vpop.f32.mrb[61].mxu0  ;;  %v783_v14 = vld [vmem:[#allocation2] sm:$0xff] }
 0x284   : > { %v6234_v9 = vpop.f32.mrb[94].mxu1  ;;  %v2637_v31 = vpop.f32.mrb[62].mxu0 }
 0x285   : > { %6782 = vst [vmem:[#allocation20_spill] sm:$0xff] %v6234_v9  ;;  %v6237_v52 = vadd.f32 %v2637_v31, %v6073_v20  ;;  %v2478_v51 = vpop.f32.mrb[95].mxu1  ;;  %v2639_v0 = vpop.f32.mrb[63].mxu0 }
 0x28a   : > { %v2642_v13 = vpop.f32.mrb[64].mxu0  ;;  %v4691_v6 = vpop.f32.mrb[96].mxu1 }
 0x28b   : > { %v6240_v56 = vadd.f32 %v2642_v13, %v6077_v25  ;;  %v2812_v5 = vadd.f32 %v4691_v6, %v6091_v42  ;;  %v2644_v17 = vpop.f32.mrb[65].mxu0  ;;  %v2803_v30 = vpop.f32.mrb[97].mxu1 }
 0x28c   : > { %v2804_v60 = vadd.f32 %v2803_v30, %v6079_v26  ;;  %v2645_v9 = vpop.f32.mrb[66].mxu0  ;;  %v4692_v35 = vpop.f32.mrb[98].mxu1  ;;  %v789_v30 = vld [vmem:[#allocation2 + $0x30] sm:$0xff] }
 0x28d   : > { %v3060_v20 = vadd.f32 %v2812_v5, %v785_v59  ;;  %v6245_v31 = vadd.f32 %v2645_v9, %v6083_v33  ;;  %v2815_v0 = vadd.f32 %v4692_v35, %v6097_v50  ;;  %v2647_v51 = vpop.f32.mrb[67].mxu0  ;;  %v2806_v25 = vpop.f32.mrb[99].mxu1  ;;  %v787_v9 = vld [vmem:[#allocation2 + $0x20] sm:$0xff] }
 0x28e   : > { %v3058_v13 = vadd.f32 %v2804_v60, %v783_v14  ;;  %v2807_v42 = vadd.f32 %v2806_v25, %v6085_v34  ;;  %v790_v60 = vld [vmem:[#allocation2 + $0x38] sm:$0xff]  ;;  %v788_v25 = vld [vmem:[#allocation2 + $0x28] sm:$0xff] }
 0x28f   : > { %3124 = vst [vmem:[#allocation2 + $0x10] sm:$0xff] %v3060_v20  ;;  %v3061_v6 = vadd.f32 %v2815_v0, %v786_v53 }
 0x290   : > { %3122 = vst [vmem:[#allocation2] sm:$0xff] %v3058_v13  ;;  %v3059_v17 = vadd.f32 %v2807_v42, %v784_v44 }
 0x291   : > { %3125 = vst [vmem:[#allocation2 + $0x18] sm:$0xff] %v3061_v6 }
 0x292   : > { %3123 = vst [vmem:[#allocation2 + $0x8] sm:$0xff] %v3059_v17  ;;  %v2650_v26 = vpop.f32.mrb[68].mxu0  ;;  %v4695_v5 = vpop.f32.mrb[100].mxu1  ;;  %v793_v17 = vld [vmem:[#allocation2 + $0x50] sm:$0xff] }
 0x293   : > { %v6250_v33 = vadd.f32 %v2650_v26, %v6089_v41  ;;  %v2828_v50 = vadd.f32 %v4695_v5, %v6115_v11  ;;  %v2652_v35 = vpop.f32.mrb[69].mxu0  ;;  %v2819_v59 = vpop.f32.mrb[101].mxu1  ;;  %v791_v5 = vld [vmem:[#allocation2 + $0x40] sm:$0xff] }
 0x294   : > { %v2820_v14 = vadd.f32 %v2819_v59, %v6103_v58  ;;  %v2653_v34 = vpop.f32.mrb[70].mxu0  ;;  %v4696_v53 = vpop.f32.mrb[102].mxu1 }
 0x295   : > { %v3064_v20 = vadd.f32 %v2828_v50, %v789_v30  ;;  %v6255_v44 = vadd.f32 %v2653_v34, %v6095_v49  ;;  %v2831_v0 = vadd.f32 %v4696_v53, %v6121_v19  ;;  %v2655_v51 = vpop.f32.mrb[71].mxu0  ;;  %v2822_v41 = vpop.f32.mrb[103].mxu1 }
 0x296   : > { %v3062_v13 = vadd.f32 %v2820_v14, %v787_v9  ;;  %v2823_v11 = vadd.f32 %v2822_v41, %v6109_v3  ;;  %v794_v9 = vld [vmem:[#allocation2 + $0x58] sm:$0xff]  ;;  %v797_v41 = vld [vmem:[#allocation2 + $0x70] sm:$0xff] }
 0x297   : > { %3128 = vst [vmem:[#allocation2 + $0x30] sm:$0xff] %v3064_v20  ;;  %v3065_v42 = vadd.f32 %v2831_v0, %v790_v60  ;;  %v792_v20 = vld [vmem:[#allocation2 + $0x48] sm:$0xff] }
 0x298   : > { %3126 = vst [vmem:[#allocation2 + $0x20] sm:$0xff] %v3062_v13  ;;  %v3063_v6 = vadd.f32 %v2823_v11, %v788_v25 }
 0x299   : > { %3129 = vst [vmem:[#allocation2 + $0x38] sm:$0xff] %v3065_v42  ;;  %v795_v42 = vld [vmem:[#allocation2 + $0x60] sm:$0xff] }
 0x29a   : > { %3127 = vst [vmem:[#allocation2 + $0x28] sm:$0xff] %v3063_v6  ;;  %v2658_v58 = vpop.f32.mrb[72].mxu0  ;;  %v4699_v26 = vpop.f32.mrb[104].mxu1 }
 0x29b   : > { %v6260_v49 = vadd.f32 %v2658_v58, %v6101_v57  ;;  %v2844_v19 = vadd.f32 %v4699_v26, %v6137_v47  ;;  %v2660_v30 = vpop.f32.mrb[73].mxu0  ;;  %v2835_v50 = vpop.f32.mrb[105].mxu1 }
 0x29c   : > { %v2836_v35 = vadd.f32 %v2835_v50, %v6127_v29  ;;  %v2661_v3 = vpop.f32.mrb[74].mxu0  ;;  %v4700_v59 = vpop.f32.mrb[106].mxu1 }
 0x29d   : > { %v3068_v14 = vadd.f32 %v2844_v19, %v793_v17  ;;  %v6265_v34 = vadd.f32 %v2661_v3, %v6107_v1  ;;  %v2847_v60 = vadd.f32 %v4700_v59, %v6141_v55  ;;  %v2663_v53 = vpop.f32.mrb[75].mxu0  ;;  %v2838_v57 = vpop.f32.mrb[107].mxu1  ;;  %v798_v17 = vld [vmem:[#allocation2 + $0x78] sm:$0xff] }
 0x29e   : > { %v3066_v0 = vadd.f32 %v2836_v35, %v791_v5  ;;  %v2839_v47 = vadd.f32 %v2838_v57, %v6133_v39  ;;  %v796_v35 = vld [vmem:[#allocation2 + $0x68] sm:$0xff] }
 0x29f   : > { %3132 = vst [vmem:[#allocation2 + $0x50] sm:$0xff] %v3068_v14  ;;  %v3069_v51 = vadd.f32 %v2847_v60, %v794_v9  ;;  %v801_v14 = vld [vmem:[#allocation2 + $0x90] sm:$0xff] }
 0x2a0   : > { %3130 = vst [vmem:[#allocation2 + $0x40] sm:$0xff] %v3066_v0  ;;  %v3067_v25 = vadd.f32 %v2839_v47, %v792_v20  ;;  %v799_v20 = vld [vmem:[#allocation2 + $0x80] sm:$0xff]  ;;  %v802_v47 = vld [vmem:[#allocation2 + $0x98] sm:$0xff] }
 0x2a1   : > { %3133 = vst [vmem:[#allocation2 + $0x58] sm:$0xff] %v3069_v51 }
 0x2a2   : > { %3131 = vst [vmem:[#allocation2 + $0x48] sm:$0xff] %v3067_v25  ;;  %v2666_v29 = vpop.f32.mrb[76].mxu0  ;;  %v4703_v13 = vpop.f32.mrb[108].mxu1 }
 0x2a3   : > { %v6270_v1 = vadd.f32 %v2666_v29, %v6113_v10  ;;  %v2860_v55 = vadd.f32 %v4703_v13, %v6153_v16  ;;  %v2668_v11 = vpop.f32.mrb[77].mxu0  ;;  %v2851_v6 = vpop.f32.mrb[109].mxu1 }
 0x2a4   : > { %v2852_v58 = vadd.f32 %v2851_v6, %v6145_v63  ;;  %v2669_v39 = vpop.f32.mrb[78].mxu0  ;;  %v4704_v26 = vpop.f32.mrb[110].mxu1 }
 0x2a5   : > { %v3072_v19 = vadd.f32 %v2860_v55, %v797_v41  ;;  %v6275_v30 = vadd.f32 %v2669_v39, %v6119_v18  ;;  %v2863_v5 = vadd.f32 %v4704_v26, %v6157_v23  ;;  %v2671_v50 = vpop.f32.mrb[79].mxu0  ;;  %v2854_v10 = vpop.f32.mrb[111].mxu1  ;;  %v800_v55 = vld [vmem:[#allocation2 + $0x88] sm:$0xff]  ;;  %v803_v26 = vld [vmem:[#allocation2 + $0xa0] sm:$0xff] }
 0x2a6   : > { %v3070_v3 = vadd.f32 %v2852_v58, %v795_v42  ;;  %v2855_v16 = vadd.f32 %v2854_v10, %v6149_v8  ;;  %v805_v58 = vld [vmem:[#allocation2 + $0xb0] sm:$0xff]  ;;  %v806_v50 = vld [vmem:[#allocation2 + $0xb8] sm:$0xff] }
 0x2a7   : > { %3136 = vst [vmem:[#allocation2 + $0x70] sm:$0xff] %v3072_v19  ;;  %v3073_v9 = vadd.f32 %v2863_v5, %v798_v17 }
 0x2a8   : > { %3134 = vst [vmem:[#allocation2 + $0x60] sm:$0xff] %v3070_v3  ;;  %v3071_v59 = vadd.f32 %v2855_v16, %v796_v35 }
 0x2a9   : > { %3137 = vst [vmem:[#allocation2 + $0x78] sm:$0xff] %v3073_v9 }
 0x2aa   : > { %3135 = vst [vmem:[#allocation2 + $0x68] sm:$0xff] %v3071_v59  ;;  %v2674_v63 = vpop.f32.mrb[80].mxu0  ;;  %v4707_v60 = vpop.f32.mrb[112].mxu1  ;;  %v804_v59 = vld [vmem:[#allocation2 + $0xa8] sm:$0xff] }
 0x2ab   : > { %v6280_v18 = vadd.f32 %v2674_v63, %v6125_v27  ;;  %v2876_v23 = vadd.f32 %v4707_v60, %v6172_v2  ;;  %v2676_v53 = vpop.f32.mrb[81].mxu0  ;;  %v2867_v57 = vpop.f32.mrb[113].mxu1 }
 0x2ac   : > { %v2868_v0 = vadd.f32 %v2867_v57, %v6162_v43  ;;  %v2677_v8 = vpop.f32.mrb[82].mxu0  ;;  %v4708_v51 = vpop.f32.mrb[114].mxu1  ;;  %v807_v57 = vld [vmem:[#allocation2 + $0xc0] sm:$0xff] }
 0x2ad   : > { %v3076_v25 = vadd.f32 %v2876_v23, %v801_v14  ;;  %v6285_v29 = vadd.f32 %v2677_v8, %v6131_v38  ;;  %v2879_v41 = vadd.f32 %v4708_v51, %v6177_v37  ;;  %v2679_v13 = vpop.f32.mrb[83].mxu0  ;;  %v2870_v27 = vpop.f32.mrb[115].mxu1  ;;  %v809_v23 = vld [vmem:[#allocation2 + $0xd0] sm:$0xff] }
 0x2ae   : > { %v3074_v11 = vadd.f32 %v2868_v0, %v799_v20  ;;  %v2871_v2 = vadd.f32 %v2870_v27, %v6167_v61  ;;  %v808_v27 = vld [vmem:[#allocation2 + $0xc8] sm:$0xff] }
 0x2af   : > { %3140 = vst [vmem:[#allocation2 + $0x90] sm:$0xff] %v3076_v25  ;;  %v3077_v42 = vadd.f32 %v2879_v41, %v802_v47  ;;  %v810_v47 = vld [vmem:[#allocation2 + $0xd8] sm:$0xff] }
 0x2b0   : > { %3138 = vst [vmem:[#allocation2 + $0x80] sm:$0xff] %v3074_v11  ;;  %v3075_v6 = vadd.f32 %v2871_v2, %v800_v55 }
 0x2b1   : > { %3141 = vst [vmem:[#allocation2 + $0x98] sm:$0xff] %v3077_v42 }
 0x2b2   : > { %3139 = vst [vmem:[#allocation2 + $0x88] sm:$0xff] %v3075_v6  ;;  %v2682_v43 = vpop.f32.mrb[84].mxu0  ;;  %v4711_v39 = vpop.f32.mrb[116].mxu1  ;;  %v813_v6 = vld [vmem:[#allocation2 + $0xf0] sm:$0xff] }
 0x2b3   : > { %v6290_v38 = vadd.f32 %v2682_v43, %v6135_v46  ;;  %v2892_v37 = vadd.f32 %v4711_v39, %v6192_v45  ;;  %v2684_v17 = vpop.f32.mrb[85].mxu0  ;;  %v2883_v19 = vpop.f32.mrb[117].mxu1  ;;  %v811_v39 = vld [vmem:[#allocation2 + $0xe0] sm:$0xff] }
 0x2b4   : > { %v2884_v5 = vadd.f32 %v2883_v19, %v6182_v4  ;;  %v2685_v61 = vpop.f32.mrb[86].mxu0  ;;  %v4712_v35 = vpop.f32.mrb[118].mxu1 }
 0x2b5   : > { %v3080_v10 = vadd.f32 %v2892_v37, %v805_v58  ;;  %v6295_v3 = vadd.f32 %v2685_v61, %v6139_v54  ;;  %v2895_v16 = vadd.f32 %v4712_v35, %v6197_v12  ;;  %v2687_v9 = vpop.f32.mrb[87].mxu0  ;;  %v2886_v46 = vpop.f32.mrb[119].mxu1 }
 0x2b6   : > { %v3078_v63 = vadd.f32 %v2884_v5, %v803_v26  ;;  %v2887_v45 = vadd.f32 %v2886_v46, %v6187_v21  ;;  %v814_v26 = vld [vmem:[#allocation2 + $0xf8] sm:$0xff]  ;;  %v6783_v9 = vld [vmem:[#allocation18_spill] sm:$0xff] }
 0x2b7   : > { %3144 = vst [vmem:[#allocation2 + $0xb0] sm:$0xff] %v3080_v10  ;;  %v3081_v14 = vadd.f32 %v2895_v16, %v806_v50  ;;  %v812_v10 = vld [vmem:[#allocation2 + $0xe8] sm:$0xff] }
 0x2b8   : > { %3142 = vst [vmem:[#allocation2 + $0xa0] sm:$0xff] %v3078_v63  ;;  %v3079_v60 = vadd.f32 %v2887_v45, %v804_v59  ;;  %v817_v63 = vld [vmem:[#allocation2 + $0x110] sm:$0xff] }
 0x2b9   : > { %3145 = vst [vmem:[#allocation2 + $0xb8] sm:$0xff] %v3081_v14  ;;  %v6784_v14 = vld [vmem:[#allocation4_spill] sm:$0xff] }
 0x2ba   : > { %3143 = vst [vmem:[#allocation2 + $0xa8] sm:$0xff] %v3079_v60  ;;  %v2690_v4 = vpop.f32.mrb[88].mxu0  ;;  %v4715_v53 = vpop.f32.mrb[120].mxu1 }
 0x2bb   : > { %v6300_v54 = vadd.f32 %v2690_v4, %v6143_v62  ;;  %v2908_v12 = vadd.f32 %v4715_v53, %v6212_v32  ;;  %v2692_v20 = vpop.f32.mrb[89].mxu0  ;;  %v2899_v0 = vpop.f32.mrb[121].mxu1  ;;  %v815_v4 = vld [vmem:[#allocation2 + $0x100] sm:$0xff] }
 0x2bc   : > { %v2900_v8 = vadd.f32 %v2899_v0, %v6202_v24  ;;  %v2693_v21 = vpop.f32.mrb[90].mxu0  ;;  %v4716_v51 = vpop.f32.mrb[122].mxu1  ;;  %v818_v20 = vld [vmem:[#allocation2 + $0x118] sm:$0xff] }
 0x2bd   : > { %v3084_v25 = vadd.f32 %v2908_v12, %v809_v23  ;;  %v6305_v41 = vadd.f32 %v2693_v21, %v6147_v7  ;;  %v2911_v13 = vadd.f32 %v4716_v51, %v6217_v36  ;;  %v2695_v55 = vpop.f32.mrb[91].mxu0  ;;  %v2902_v62 = vpop.f32.mrb[123].mxu1 }
 0x2be   : > { %v3082_v11 = vadd.f32 %v2900_v8, %v807_v57  ;;  %v2903_v32 = vadd.f32 %v2902_v62, %v6207_v28  ;;  %v6785_v8 = vld [vmem:[#allocation5_spill] sm:$0xff] }
 0x2bf   : > { %3148 = vst [vmem:[#allocation2 + $0xd0] sm:$0xff] %v3084_v25  ;;  %v3085_v2 = vadd.f32 %v2911_v13, %v810_v47  ;;  %v816_v25 = vld [vmem:[#allocation2 + $0x108] sm:$0xff] }
 0x2c0   : > { %3146 = vst [vmem:[#allocation2 + $0xc0] sm:$0xff] %v3082_v11  ;;  %v3083_v42 = vadd.f32 %v2903_v32, %v808_v27  ;;  %v821_v11 = vld [vmem:[#allocation2 + $0x130] sm:$0xff] }
 0x2c1   : > { %3149 = vst [vmem:[#allocation2 + $0xd8] sm:$0xff] %v3085_v2  ;;  %v6786_v2 = vld [vmem:[#allocation6_spill] sm:$0xff] }
 0x2c2   : > { %3147 = vst [vmem:[#allocation2 + $0xc8] sm:$0xff] %v3083_v42  ;;  %v2698_v24 = vpop.f32.mrb[92].mxu0  ;;  %v4719_v43 = vpop.f32.mrb[124].mxu1 }
 0x2c3   : > { %v6310_v7 = vadd.f32 %v2698_v24, %v6151_v15  ;;  %v2924_v36 = vadd.f32 %v4719_v43, %v6232_v48  ;;  %v2700_v58 = vpop.f32.mrb[93].mxu0  ;;  %v2915_v37 = vpop.f32.mrb[125].mxu1 }
 0x2c4   : > { %v2916_v17 = vadd.f32 %v2915_v37, %v6222_v40  ;;  %v2701_v28 = vpop.f32.mrb[94].mxu0  ;;  %v4720_v19 = vpop.f32.mrb[126].mxu1  ;;  %v822_v58 = vld [vmem:[#allocation2 + $0x138] sm:$0xff] }
 0x2c5   : > { %v3088_v5 = vadd.f32 %v2924_v36, %v813_v6  ;;  %v6315_v61 = vadd.f32 %v2701_v28, %v6155_v22  ;;  %v2927_v50 = vadd.f32 %v4720_v19, %v6237_v52  ;;  %v2703_v35 = vpop.f32.mrb[95].mxu0  ;;  %v2918_v15 = vpop.f32.mrb[127].mxu1  ;;  %v819_v6 = vld [vmem:[#allocation2 + $0x120] sm:$0xff] }
 0x2c6   : > { %v3086_v16 = vadd.f32 %v2916_v17, %v811_v39  ;;  %v2919_v48 = vadd.f32 %v2918_v15, %v6783_v9  ;;  %v6787_v17 = vld [vmem:[#allocation7_spill] sm:$0xff] }
 0x2c7   : > { %3152 = vst [vmem:[#allocation2 + $0xf0] sm:$0xff] %v3088_v5  ;;  %v3089_v59 = vadd.f32 %v2927_v50, %v814_v26  ;;  %v820_v5 = vld [vmem:[#allocation2 + $0x128] sm:$0xff] }
 0x2c8   : > { %3150 = vst [vmem:[#allocation2 + $0xe0] sm:$0xff] %v3086_v16  ;;  %v3087_v46 = vadd.f32 %v2919_v48, %v812_v10  ;;  %v825_v16 = vld [vmem:[#allocation2 + $0x150] sm:$0xff]  ;;  %v6788_v48 = vld [vmem:[#allocation8_spill] sm:$0xff] }
 0x2c9   : > { %3153 = vst [vmem:[#allocation2 + $0xf8] sm:$0xff] %v3089_v59 }
 0x2ca   : > { %3151 = vst [vmem:[#allocation2 + $0xe8] sm:$0xff] %v3087_v46  ;;  %v2706_v40 = vpop.f32.mrb[96].mxu0  ;;  %v4723_v45 = vpop.f32.mrb[128].mxu1 }
 0x2cb   : > { %v6320_v22 = vadd.f32 %v2706_v40, %v6784_v14  ;;  %v2940_v52 = vadd.f32 %v4723_v45, %v6250_v33  ;;  %v2708_v60 = vpop.f32.mrb[97].mxu0  ;;  %v2931_v23 = vpop.f32.mrb[129].mxu1  ;;  %v823_v40 = vld [vmem:[#allocation2 + $0x140] sm:$0xff]  ;;  %v826_v14 = vld [vmem:[#allocation2 + $0x158] sm:$0xff] }
 0x2cc   : > { %v2932_v53 = vadd.f32 %v2931_v23, %v6240_v56  ;;  %v2709_v12 = vpop.f32.mrb[98].mxu0  ;;  %v4724_v57 = vpop.f32.mrb[130].mxu1 }
 0x2cd   : > { %v3092_v0 = vadd.f32 %v2940_v52, %v817_v63  ;;  %v6325_v21 = vadd.f32 %v2709_v12, %v6785_v8  ;;  %v2943_v47 = vadd.f32 %v4724_v57, %v6255_v44  ;;  %v2711_v51 = vpop.f32.mrb[99].mxu0  ;;  %v2934_v13 = vpop.f32.mrb[131].mxu1 }
 0x2ce   : > { %v3090_v55 = vadd.f32 %v2932_v53, %v815_v4  ;;  %v2935_v33 = vadd.f32 %v2934_v13, %v6245_v31  ;;  %v6789_v4 = vld [vmem:[#allocation9_spill] sm:$0xff]  ;;  %v829_v51 = vld [vmem:[#allocation2 + $0x170] sm:$0xff] }
 0x2cf   : > { %3156 = vst [vmem:[#allocation2 + $0x110] sm:$0xff] %v3092_v0  ;;  %v3093_v27 = vadd.f32 %v2943_v47, %v818_v20  ;;  %v824_v20 = vld [vmem:[#allocation2 + $0x148] sm:$0xff]  ;;  %v6790_v13 = vld [vmem:[#allocation10_spill] sm:$0xff] }
 0x2d0   : > { %3154 = vst [vmem:[#allocation2 + $0x100] sm:$0xff] %v3090_v55  ;;  %v3091_v62 = vadd.f32 %v2935_v33, %v816_v25 }
 0x2d1   : > { %3157 = vst [vmem:[#allocation2 + $0x118] sm:$0xff] %v3093_v27  ;;  %v827_v27 = vld [vmem:[#allocation2 + $0x160] sm:$0xff] }
 0x2d2   : > { %3155 = vst [vmem:[#allocation2 + $0x108] sm:$0xff] %v3091_v62  ;;  %v2714_v56 = vpop.f32.mrb[100].mxu0  ;;  %v4727_v32 = vpop.f32.mrb[132].mxu1 }
 0x2d3   : > { %v6330_v42 = vadd.f32 %v2714_v56, %v6786_v2  ;;  %v2956_v44 = vadd.f32 %v4727_v32, %v6270_v1  ;;  %v2716_v24 = vpop.f32.mrb[101].mxu0  ;;  %v2947_v43 = vpop.f32.mrb[133].mxu1 }
 0x2d4   : > { %v2948_v36 = vadd.f32 %v2947_v43, %v6260_v49  ;;  %v2717_v31 = vpop.f32.mrb[102].mxu0  ;;  %v4728_v39 = vpop.f32.mrb[134].mxu1 }
 0x2d5   : > { %v3096_v37 = vadd.f32 %v2956_v44, %v821_v11  ;;  %v6335_v28 = vadd.f32 %v2717_v31, %v6787_v17  ;;  %v2959_v26 = vadd.f32 %v4728_v39, %v6275_v30  ;;  %v2719_v19 = vpop.f32.mrb[103].mxu0  ;;  %v2950_v50 = vpop.f32.mrb[135].mxu1  ;;  %v6791_v44 = vld [vmem:[#allocation11_spill] sm:$0xff]  ;;  %v833_v17 = vld [vmem:[#allocation2 + $0x190] sm:$0xff] }
 0x2d6   : > { %v3094_v35 = vadd.f32 %v2948_v36, %v819_v6  ;;  %v2951_v1 = vadd.f32 %v2950_v50, %v6265_v34  ;;  %v828_v36 = vld [vmem:[#allocation2 + $0x168] sm:$0xff]  ;;  %v6792_v19 = vld [vmem:[#allocation12_spill] sm:$0xff] }
 0x2d7   : > { %3160 = vst [vmem:[#allocation2 + $0x130] sm:$0xff] %v3096_v37  ;;  %v3097_v10 = vadd.f32 %v2959_v26, %v822_v58 }
 0x2d8   : > { %3158 = vst [vmem:[#allocation2 + $0x120] sm:$0xff] %v3094_v35  ;;  %v3095_v15 = vadd.f32 %v2951_v1, %v820_v5  ;;  %v831_v35 = vld [vmem:[#allocation2 + $0x180] sm:$0xff] }
 0x2d9   : > { %3161 = vst [vmem:[#allocation2 + $0x138] sm:$0xff] %v3097_v10 }
 0x2da   : > { %3159 = vst [vmem:[#allocation2 + $0x128] sm:$0xff] %v3095_v15  ;;  %v2722_v49 = vpop.f32.mrb[104].mxu0  ;;  %v4731_v9 = vpop.f32.mrb[136].mxu1 }
 0x2db   : > { %v6340_v59 = vadd.f32 %v2722_v49, %v6788_v48  ;;  %v2972_v30 = vadd.f32 %v4731_v9, %v6290_v38  ;;  %v2724_v46 = vpop.f32.mrb[105].mxu0  ;;  %v2963_v63 = vpop.f32.mrb[137].mxu1  ;;  %v6793_v9 = vld [vmem:[#allocation13_spill] sm:$0xff] }
 0x2dc   : > { %v2964_v45 = vadd.f32 %v2963_v63, %v6280_v18  ;;  %v2725_v34 = vpop.f32.mrb[106].mxu0  ;;  %v4732_v52 = vpop.f32.mrb[138].mxu1 }
 0x2dd   : > { %v3100_v60 = vadd.f32 %v2972_v30, %v825_v16  ;;  %v6345_v23 = vadd.f32 %v2725_v34, %v6789_v4  ;;  %v2975_v53 = vadd.f32 %v4732_v52, %v6295_v3  ;;  %v2727_v12 = vpop.f32.mrb[107].mxu0  ;;  %v2966_v57 = vpop.f32.mrb[139].mxu1  ;;  %v837_v52 = vld [vmem:[#allocation2 + $0x1b0] sm:$0xff] }
 0x2de   : > { %v3098_v0 = vadd.f32 %v2964_v45, %v823_v40  ;;  %v2967_v38 = vadd.f32 %v2966_v57, %v6285_v29  ;;  %v830_v29 = vld [vmem:[#allocation2 + $0x178] sm:$0xff]  ;;  %v832_v40 = vld [vmem:[#allocation2 + $0x188] sm:$0xff]  ;;  %v6794_v4 = vld [vmem:[#allocation14_spill] sm:$0xff] }
 0x2df   : > { %3164 = vst [vmem:[#allocation2 + $0x150] sm:$0xff] %v3100_v60  ;;  %v3101_v8 = vadd.f32 %v2975_v53, %v826_v14 }
 0x2e0   : > { %3162 = vst [vmem:[#allocation2 + $0x140] sm:$0xff] %v3098_v0  ;;  %v3099_v47 = vadd.f32 %v2967_v38, %v824_v20 }
 0x2e1   : > { %3165 = vst [vmem:[#allocation2 + $0x158] sm:$0xff] %v3101_v8  ;;  %v838_v8 = vld [vmem:[#allocation2 + $0x1b8] sm:$0xff] }
 0x2e2   : > { %3163 = vst [vmem:[#allocation2 + $0x148] sm:$0xff] %v3099_v47  ;;  %v2730_v18 = vpop.f32.mrb[108].mxu0  ;;  %v4735_v25 = vpop.f32.mrb[140].mxu1 }
 0x2e3   : > { %v2731_v55 = vadd.f32 %v2730_v18, %v6790_v13  ;;  %v2988_v33 = vadd.f32 %v4735_v25, %v6310_v7  ;;  %v2732_v3 = vpop.f32.mrb[109].mxu0  ;;  %v2979_v62 = vpop.f32.mrb[141].mxu1  ;;  %v6795_v18 = vld [vmem:[#allocation15_spill] sm:$0xff] }
 0x2e4   : > { %v2980_v56 = vadd.f32 %v2979_v62, %v6300_v54  ;;  %v2733_v11 = vpop.f32.mrb[110].mxu0  ;;  %v4736_v32 = vpop.f32.mrb[142].mxu1 }
 0x2e5   : > { %v3104_v2 = vadd.f32 %v2988_v33, %v829_v51  ;;  %v2734_v24 = vadd.f32 %v2733_v11, %v6791_v44  ;;  %v2991_v6 = vadd.f32 %v4736_v32, %v6315_v61  ;;  %v2735_v43 = vpop.f32.mrb[111].mxu0  ;;  %v2982_v31 = vpop.f32.mrb[143].mxu1  ;;  %v836_v33 = vld [vmem:[#allocation2 + $0x1a8] sm:$0xff]  ;;  %v841_v11 = vld [vmem:[#allocation2 + $0x1d0] sm:$0xff]  ;;  %v6796_v32 = vld [vmem:[#allocation16_spill] sm:$0xff] }
 0x2e6   : > { %v3102_v58 = vadd.f32 %v2980_v56, %v827_v27  ;;  %v2983_v39 = vadd.f32 %v2982_v31, %v6305_v41  ;;  %v834_v41 = vld [vmem:[#allocation2 + $0x198] sm:$0xff] }
 0x2e7   : > { %3168 = vst [vmem:[#allocation2 + $0x170] sm:$0xff] %v3104_v2  ;;  %v3105_v7 = vadd.f32 %v2991_v6, %v830_v29 }
 0x2e8   : > { %3166 = vst [vmem:[#allocation2 + $0x160] sm:$0xff] %v3102_v58  ;;  %v3103_v37 = vadd.f32 %v2983_v39, %v828_v36  ;;  %v842_v58 = vld [vmem:[#allocation2 + $0x1d8] sm:$0xff] }
 0x2e9   : > { %3169 = vst [vmem:[#allocation2 + $0x178] sm:$0xff] %v3105_v7  ;;  %v6797_v7 = vld [vmem:[#allocation17_spill] sm:$0xff] }
 0x2ea   : > { %3167 = vst [vmem:[#allocation2 + $0x168] sm:$0xff] %v3103_v37  ;;  %v2738_v54 = vpop.f32.mrb[112].mxu0  ;;  %v4739_v26 = vpop.f32.mrb[144].mxu1 }
 0x2eb   : > { %v2739_v5 = vadd.f32 %v2738_v54, %v6792_v19  ;;  %v3004_v50 = vadd.f32 %v4739_v26, %v6330_v42  ;;  %v2740_v61 = vpop.f32.mrb[113].mxu0  ;;  %v2995_v1 = vpop.f32.mrb[145].mxu1  ;;  %v840_v26 = vld [vmem:[#allocation2 + $0x1c8] sm:$0xff] }
 0x2ec   : > { %v2996_v10 = vadd.f32 %v2995_v1, %v6320_v22  ;;  %v2741_v15 = vpop.f32.mrb[114].mxu0  ;;  %v4740_v49 = vpop.f32.mrb[146].mxu1 }
 0x2ed   : > { %v3108_v16 = vadd.f32 %v3004_v50, %v833_v17  ;;  %v2742_v48 = vadd.f32 %v2741_v15, %v6793_v9  ;;  %v3007_v30 = vadd.f32 %v4740_v49, %v6335_v28  ;;  %v2743_v46 = vpop.f32.mrb[115].mxu0  ;;  %v2998_v63 = vpop.f32.mrb[147].mxu1  ;;  %v835_v28 = vld [vmem:[#allocation2 + $0x1a0] sm:$0xff]  ;;  %v6798_v15 = vld [vmem:[#allocation19_spill] sm:$0xff] }
 0x2ee   : > { %v3106_v45 = vadd.f32 %v2996_v10, %v831_v35  ;;  %v2999_v34 = vadd.f32 %v2998_v63, %v6325_v21 }
 0x2ef   : > { %3172 = vst [vmem:[#allocation2 + $0x190] sm:$0xff] %v3108_v16  ;;  %v3109_v42 = vadd.f32 %v3007_v30, %v834_v41  ;;  %v843_v16 = vld [vmem:[#allocation2 + $0x1e0] sm:$0xff]  ;;  %v845_v30 = vld [vmem:[#allocation2 + $0x1f0] sm:$0xff] }
 0x2f0   : > { %3170 = vst [vmem:[#allocation2 + $0x180] sm:$0xff] %v3106_v45  ;;  %v3107_v14 = vadd.f32 %v2999_v34, %v832_v40  ;;  %v6799_v34 = vld [vmem:[#allocation20_spill] sm:$0xff] }
 0x2f1   : > { %3173 = vst [vmem:[#allocation2 + $0x198] sm:$0xff] %v3109_v42 }
 0x2f2   : > { %3171 = vst [vmem:[#allocation2 + $0x188] sm:$0xff] %v3107_v14  ;;  %v2746_v22 = vpop.f32.mrb[116].mxu0  ;;  %v4743_v60 = vpop.f32.mrb[148].mxu1  ;;  %v844_v14 = vld [vmem:[#allocation2 + $0x1e8] sm:$0xff] }
 0x2f3   : > { %v2747_v53 = vadd.f32 %v2746_v22, %v6794_v4  ;;  %v3020_v12 = vadd.f32 %v4743_v60, %v2731_v55  ;;  %v2748_v20 = vpop.f32.mrb[117].mxu0  ;;  %v3011_v57 = vpop.f32.mrb[149].mxu1  ;;  %v846_v60 = vld [vmem:[#allocation2 + $0x1f8] sm:$0xff] }
 0x2f4   : > { %v3012_v0 = vadd.f32 %v3011_v57, %v6340_v59  ;;  %v2749_v38 = vpop.f32.mrb[118].mxu0  ;;  %v4744_v21 = vpop.f32.mrb[150].mxu1  ;;  %v3190_v57 = vld [vmem:[#allocation2] sm:$0xff] (!%p4311_p0) }
 0x2f5   : > { %v3112_v47 = vadd.f32 %v3020_v12, %v837_v52  ;;  %v2750_v51 = vadd.f32 %v2749_v38, %v6795_v18  ;;  %v3023_v25 = vadd.f32 %v4744_v21, %v2734_v24  ;;  %v2751_v13 = vpop.f32.mrb[119].mxu0  ;;  %v3014_v3 = vpop.f32.mrb[151].mxu1  ;;  %v839_v24 = vld [vmem:[#allocation2 + $0x1c0] sm:$0xff]  ;;  %v3192_v38 = vld [vmem:[#allocation2 + $0x10] sm:$0xff] (!%p4311_p0) }
 0x2f6   : > { %v3110_v27 = vadd.f32 %v3012_v0, %v835_v28  ;;  %v3015_v62 = vadd.f32 %v3014_v3, %v6345_v23  ;;  %v3191_v0 = vld [vmem:[#allocation2 + $0x8] sm:$0xff] (!%p4311_p0)  ;;  %v3645_v3 = vmul.f32 (!%p4311_p0), %v3192_v38, %v3192_v38 }
 0x2f7   : > { %3176 = vst [vmem:[#allocation2 + $0x1b0] sm:$0xff] %v3112_v47  ;;  %v3113_v55 = vadd.f32 %v3023_v25, %v838_v8  ;;  %v4445_v8 = vpack.c.bf16 (!%p4311_p0), %v3191_v0, %v3190_v57  ;;  %v3574_v21 = vadd.f32 (!%p4311_p0), %v3191_v0, %v3190_v57  ;;  %v3643_v47 = vmul.f32 (!%p4311_p0), %v3190_v57, %v3190_v57  ;;  %v3194_v25 = vld [vmem:[#allocation2 + $0x20] sm:$0xff] (!%p4311_p0)  ;;  %v3195_v13 = vld [vmem:[#allocation2 + $0x28] sm:$0xff] (!%p4311_p0) }
 0x2f8   : > { %3174 = vst [vmem:[#allocation2 + $0x1a0] sm:$0xff] %v3110_v27  ;;  %v3111_v56 = vadd.f32 %v3015_v62, %v836_v33  ;;  %v3644_v18 = vmul.f32 (!%p4311_p0), %v3191_v0, %v3191_v0  ;;  %v4455_v27 = vpack.c.bf16 (!%p4311_p0), %v3195_v13, %v3194_v25  ;;  %v3196_v62 = vld [vmem:[#allocation2 + $0x30] sm:$0xff] (!%p4311_p0)  ;;  %v6443_v57 = vld [vmem:[#allocation2 + $0xe8] sm:$0xff] (!%p4311_p0) }
 0x2f9   : > { %3177 = vst [vmem:[#allocation2 + $0x1b8] sm:$0xff] %v3113_v55  ;;  %4446 = vst [vmem:[%s5735_s8] sm:$0xff] (!%p4311_p0), %v4445_v8   ;;  %v6451_v8 = vld [vmem:[#allocation2 + $0xf0] sm:$0xff] (!%p4311_p0) }
 0x2fa   : > { %3175 = vst [vmem:[#allocation2 + $0x1a8] sm:$0xff] %v3111_v56  ;;  %v2754_v59 = vpop.f32.mrb[120].mxu0  ;;  %v4747_v29 = vpop.f32.mrb[152].mxu1  ;;  %v3707_v55 = vadd.f32 (!%p4311_p0), %v3644_v18, %v3643_v47  ;;  %v3575_v56 = vadd.f32 (!%p4311_p0), %v3574_v21, %v3192_v38  ;;  %4603 = vst [vmem:[%s5735_s8 + $0x10] sm:$0xff] (!%p4311_p0), %v4455_v27   ;;  %v6468_v27 = vld [vmem:[#allocation2 + $0x110] sm:$0xff] (!%p4311_p0) }
 0x2fb   : > { %v2755_v2 = vadd.f32 %v2754_v59, %v6796_v32  ;;  %v3036_v44 = vadd.f32 %v4747_v29, %v2747_v53  ;;  %v2756_v6 = vpop.f32.mrb[121].mxu0  ;;  %v3027_v43 = vpop.f32.mrb[153].mxu1  ;;  %v6371_v29 = vld [vmem:[#allocation2 + $0x40] sm:$0xff] (!%p4311_p0)  ;;  %v6373_v32 = vld [vmem:[#allocation2 + $0x48] sm:$0xff] (!%p4311_p0) }
 0x2fc   : > { %v3028_v36 = vadd.f32 %v3027_v43, %v2739_v5  ;;  %v2757_v31 = vpop.f32.mrb[122].mxu0  ;;  %v4748_v39 = vpop.f32.mrb[154].mxu1  ;;  %v6379_v6 = vld [vmem:[#allocation2 + $0x50] sm:$0xff] (!%p4311_p0)  ;;  %v3708_v43 = vadd.f32 (!%p4311_p0), %v3707_v55, %v3645_v3  ;;  %v3652_v18 = vmul.f32 (!%p4311_p0), %v6373_v32, %v6373_v32 }
 0x2fd   : > { %v3116_v23 = vadd.f32 %v3036_v44, %v841_v11  ;;  %v2758_v37 = vadd.f32 %v2757_v31, %v6797_v7  ;;  %v3039_v54 = vadd.f32 %v4748_v39, %v2750_v51  ;;  %v2759_v17 = vpop.f32.mrb[123].mxu0  ;;  %v3030_v19 = vpop.f32.mrb[155].mxu1  ;;  %v3193_v51 = vld [vmem:[#allocation2 + $0x18] sm:$0xff] (!%p4311_p0)  ;;  %v4465_v44 = vpack.c.bf16 (!%p4311_p0), %v6373_v32, %v6371_v29  ;;  %v6385_v39 = vld [vmem:[#allocation2 + $0x68] sm:$0xff] (!%p4311_p0) }
 0x2fe   : > { %v3114_v50 = vadd.f32 %v3028_v36, %v839_v24  ;;  %v3031_v61 = vadd.f32 %v3030_v19, %v2742_v48  ;;  %v4450_v33 = vpack.c.bf16 (!%p4311_p0), %v3193_v51, %v3192_v38  ;;  %v3646_v59 = vmul.f32 (!%p4311_p0), %v3193_v51, %v3193_v51  ;;  %v3197_v11 = vld [vmem:[#allocation2 + $0x38] sm:$0xff] (!%p4311_p0) }
 0x2ff   : > { %3180 = vst [vmem:[#allocation2 + $0x1d0] sm:$0xff] %v3116_v23  ;;  %v3117_v35 = vadd.f32 %v3039_v54, %v842_v58  ;;  %v3576_v24 = vadd.f32 (!%p4311_p0), %v3575_v56, %v3193_v51  ;;  %v3647_v36 = vmul.f32 (!%p4311_p0), %v3194_v25, %v3194_v25  ;;  %v6381_v31 = vld [vmem:[#allocation2 + $0x58] sm:$0xff] (!%p4311_p0)  ;;  %v6383_v58 = vld [vmem:[#allocation2 + $0x60] sm:$0xff] (!%p4311_p0)  ;;  %4605 = vst [vmem:[%s5735_s8 + $0x20] sm:$0xff] (!%p4311_p0), %v4465_v44  }
 0x300   : > { %3178 = vst [vmem:[#allocation2 + $0x1c0] sm:$0xff] %v3114_v50  ;;  %v3115_v1 = vadd.f32 %v3031_v61, %v840_v26  ;;  %4602 = vst [vmem:[%s5735_s8 + $0x8] sm:$0xff] (!%p4311_p0), %v4450_v33   ;;  %v4470_v23 = vpack.c.bf16 (!%p4311_p0), %v6381_v31, %v6379_v6  ;;  %v4475_v7 = vpack.c.bf16 (!%p4311_p0), %v6385_v39, %v6383_v58  ;;  %v6395_v19 = vld [vmem:[#allocation2 + $0x78] sm:$0xff] (!%p4311_p0)  ;;  %v6397_v50 = vld [vmem:[#allocation2 + $0x80] sm:$0xff] (!%p4311_p0) }
 0x301   : > { %3181 = vst [vmem:[#allocation2 + $0x1d8] sm:$0xff] %v3117_v35  ;;  %v3709_v54 = vadd.f32 (!%p4311_p0), %v3708_v43, %v3646_v59  ;;  %v3577_v17 = vadd.f32 (!%p4311_p0), %v3576_v24, %v3194_v25  ;;  %v3648_v26 = vmul.f32 (!%p4311_p0), %v3195_v13, %v3195_v13  ;;  %v6399_v61 = vld [vmem:[#allocation2 + $0x88] sm:$0xff] (!%p4311_p0)  ;;  %v6456_v51 = vld [vmem:[#allocation2 + $0xf8] sm:$0xff] (!%p4311_p0)  ;;  %v6458_v25 = vld [vmem:[#allocation2 + $0x100] sm:$0xff] (!%p4311_p0)  ;;  %v3653_v56 = vmul.f32 (!%p4311_p0), %v6379_v6, %v6379_v6 }
 0x302   : > { %3179 = vst [vmem:[#allocation2 + $0x1c8] sm:$0xff] %v3115_v1  ;;  %v2762_v10 = vpop.f32.mrb[124].mxu0  ;;  %v4751_v5 = vpop.f32.mrb[156].mxu1  ;;  %4606 = vst [vmem:[%s5735_s8 + $0x28] sm:$0xff] (!%p4311_p0), %v4470_v23   ;;  %v4485_v1 = vpack.c.bf16 (!%p4311_p0), %v6399_v61, %v6397_v50  ;;  %v4520_v33 = vpack.c.bf16 (!%p4311_p0), %v6456_v51, %v6451_v8  ;;  %v6473_v59 = vld [vmem:[#allocation2 + $0x118] sm:$0xff] (!%p4311_p0)  ;;  %v6485_v44 = vld [vmem:[#allocation2 + $0x130] sm:$0xff] (!%p4311_p0) }
 0x303   : > { %v2763_v41 = vadd.f32 %v2762_v10, %v6798_v15  ;;  %v2764_v49 = vpop.f32.mrb[125].mxu0  ;;  %v3043_v9 = vpop.f32.mrb[157].mxu1  ;;  %4607 = vst [vmem:[%s5735_s8 + $0x30] sm:$0xff] (!%p4311_p0), %v4475_v7   ;;  %v6407_v10 = vld [vmem:[#allocation2 + $0x90] sm:$0xff] (!%p4311_p0)  ;;  %v3710_v15 = vadd.f32 (!%p4311_p0), %v3709_v54, %v3647_v36  ;;  %v3654_v36 = vmul.f32 (!%p4311_p0), %v6381_v31, %v6381_v31  ;;  %v6490_v23 = vld [vmem:[#allocation2 + $0x138] sm:$0xff] (!%p4311_p0)  ;;  %v6492_v7 = vld [vmem:[#allocation2 + $0x140] sm:$0xff] (!%p4311_p0) }
 0x304   : > { %v3044_v46 = vadd.f32 %v3043_v9, %v2755_v2  ;;  %v2765_v40 = vpop.f32.mrb[126].mxu0  ;;  %v4752_v63 = vpop.f32.mrb[158].mxu1  ;;  %v4460_v2 = vpack.c.bf16 (!%p4311_p0), %v3197_v11, %v3196_v62  ;;  %v6409_v49 = vld [vmem:[#allocation2 + $0x98] sm:$0xff] (!%p4311_p0)  ;;  %v6413_v9 = vld [vmem:[#allocation2 + $0xa8] sm:$0xff] (!%p4311_p0)  ;;  %4609 = vst [vmem:[%s5735_s8 + $0x40] sm:$0xff] (!%p4311_p0), %v4485_v1   ;;  %4616 = vst [vmem:[%s5735_s8 + $0x78] sm:$0xff] (!%p4311_p0), %v4520_v33  }
 0x305   : > { %v3052_v45 = vadd.f32 %v4751_v5, %v2763_v41  ;;  %v2766_v48 = vadd.f32 %v2765_v40, %v6799_v34  ;;  %v2767_v42 = vpop.f32.mrb[127].mxu0  ;;  %v3046_v22 = vpop.f32.mrb[159].mxu1  ;;  %3189 = sbr.rel (%p4311_p0) target bundleno = 907 (0x38b), region = 62  ;;  %v3578_v5 = vadd.f32 (!%p4311_p0), %v3577_v17, %v3195_v13  ;;  %v3649_v41 = vmul.f32 (!%p4311_p0), %v3196_v62, %v3196_v62  ;;  %v6421_v40 = vld [vmem:[#allocation2 + $0xb0] sm:$0xff] (!%p4311_p0)  ;;  %v6460_v13 = vld [vmem:[#allocation2 + $0x108] sm:$0xff] (!%p4311_p0)  ;;  %v6543_v33 = vld [vmem:[#allocation2 + $0x1a0] sm:$0xff] (!%p4311_p0) }
 0x306   : > { %v3118_v52 = vadd.f32 %v3044_v46, %v843_v16  ;;  %v3047_v4 = vadd.f32 %v3046_v22, %v2758_v37  ;;  %4604 = vst [vmem:[%s5735_s8 + $0x18] sm:$0xff] (!%p4311_p0), %v4460_v2   ;;  %v6393_v37 = vld [vmem:[#allocation2 + $0x70] sm:$0xff] (!%p4311_p0)  ;;  %v6411_v16 = vld [vmem:[#allocation2 + $0xa0] sm:$0xff] (!%p4311_p0)  ;;  %v3650_v34 = vmul.f32 (!%p4311_p0), %v3197_v11, %v3197_v11  ;;  %v4525_v3 = vpack.c.bf16 (!%p4311_p0), %v6460_v13, %v6458_v25  ;;  %v6494_v54 = vld [vmem:[#allocation2 + $0x148] sm:$0xff] (!%p4311_p0) }
 0x307   : > { %v3120_v53 = vadd.f32 %v3052_v45, %v845_v30  ;;  %v3055_v12 = vadd.f32 %v4752_v63, %v2766_v48  ;;  %v4480_v35 = vpack.c.bf16 (!%p4311_p0), %v6395_v19, %v6393_v37  ;;  %v4490_v30 = vpack.c.bf16 (!%p4311_p0), %v6409_v49, %v6407_v10  ;;  %v6423_v48 = vld [vmem:[#allocation2 + $0xb8] sm:$0xff] (!%p4311_p0)  ;;  %v6425_v42 = vld [vmem:[#allocation2 + $0xc0] sm:$0xff] (!%p4311_p0) }
 0x308   : > { %3182 = vst [vmem:[#allocation2 + $0x1e0] sm:$0xff] %v3118_v52  ;;  %v3119_v20 = vadd.f32 %v3047_v4, %v844_v14  ;;  %v4495_v46 = vpack.c.bf16 (!%p4311_p0), %v6413_v9, %v6411_v16  ;;  %v3711_v63 = vadd.f32 (!%p4311_p0), %v3710_v15, %v3648_v26  ;;  %v3579_v45 = vadd.f32 (!%p4311_p0), %v3578_v5, %v3196_v62  ;;  %v6427_v14 = vld [vmem:[#allocation2 + $0xc8] sm:$0xff] (!%p4311_p0)  ;;  %v6507_v15 = vld [vmem:[#allocation2 + $0x158] sm:$0xff] (!%p4311_p0) }
 0x309   : > { %3184 = vst [vmem:[#allocation2 + $0x1f0] sm:$0xff] %v3120_v53  ;;  %v3121_v28 = vadd.f32 %v3055_v12, %v846_v60  ;;  %4608 = vst [vmem:[%s5735_s8 + $0x38] sm:$0xff] (!%p4311_p0), %v4480_v35   ;;  %v4500_v22 = vpack.c.bf16 (!%p4311_p0), %v6423_v48, %v6421_v40  ;;  %v4505_v52 = vpack.c.bf16 (!%p4311_p0), %v6427_v14, %v6425_v42  ;;  %v6435_v60 = vld [vmem:[#allocation2 + $0xd0] sm:$0xff] (!%p4311_p0) }
 0x30a   : > { %3183 = vst [vmem:[#allocation2 + $0x1e8] sm:$0xff] %v3119_v20  ;;  %4610 = vst [vmem:[%s5735_s8 + $0x48] sm:$0xff] (!%p4311_p0), %v4490_v30   ;;  %v3580_v4 = vadd.f32 (!%p4311_p0), %v3579_v45, %v3197_v11  ;;  %v3712_v53 = vadd.f32 (!%p4311_p0), %v3711_v63, %v3649_v41  ;;  %v3651_v12 = vmul.f32 (!%p4311_p0), %v6371_v29, %v6371_v29  ;;  %v6439_v20 = vld [vmem:[#allocation2 + $0xd8] sm:$0xff] (!%p4311_p0)  ;;  %v6475_v11 = vld [vmem:[#allocation2 + $0x120] sm:$0xff] (!%p4311_p0) }
 0x30b   : > { %3185 = vst [vmem:[#allocation2 + $0x1f8] sm:$0xff] %v3121_v28  ;;  %4611 = vst [vmem:[%s5735_s8 + $0x50] sm:$0xff] (!%p4311_p0), %v4495_v46   ;;  %v6441_v28 = vld [vmem:[#allocation2 + $0xe0] sm:$0xff] (!%p4311_p0)  ;;  %v4510_v0 = vpack.c.bf16 (!%p4311_p0), %v6439_v20, %v6435_v60  ;;  %v4530_v2 = vpack.c.bf16 (!%p4311_p0), %v6473_v59, %v6468_v27  ;;  %v4540_v17 = vpack.c.bf16 (!%p4311_p0), %v6490_v23, %v6485_v44  ;;  %v6511_v30 = vld [vmem:[#allocation2 + $0x168] sm:$0xff] (!%p4311_p0) }
 0x30c   : > { %4612 = vst [vmem:[%s5735_s8 + $0x58] sm:$0xff] %v4500_v22   ;;  %4613 = vst [vmem:[%s5735_s8 + $0x60] sm:$0xff] %v4505_v52   ;;  %v4515_v38 = vpack.c.bf16 %v6443_v57, %v6441_v28  ;;  %v3713_v21 = vadd.f32 %v3712_v53, %v3650_v34  ;;  %v3581_v47 = vadd.f32 %v3580_v4, %v6371_v29  ;;  %v6477_v29 = vld [vmem:[#allocation2 + $0x128] sm:$0xff]  ;;  %v6509_v41 = vld [vmem:[#allocation2 + $0x160] sm:$0xff] }
 0x30d   : > { %4614 = vst [vmem:[%s5735_s8 + $0x68] sm:$0xff] %v4510_v0   ;;  %4617 = vst [vmem:[%s5735_s8 + $0x80] sm:$0xff] %v4525_v3   ;;  %v4545_v26 = vpack.c.bf16 %v6494_v54, %v6492_v7  ;;  %v3655_v5 = vmul.f32 %v6383_v58, %v6383_v58  ;;  %v6519_v63 = vld [vmem:[#allocation2 + $0x170] sm:$0xff]  ;;  %v3656_v22 = vmul.f32 %v6385_v39, %v6385_v39  ;;  %v6524_v52 = vld [vmem:[#allocation2 + $0x178] sm:$0xff] }
 0x30e   : > { %4615 = vst [vmem:[%s5735_s8 + $0x70] sm:$0xff] %v4515_v38   ;;  %v3582_v62 = vadd.f32 %v3581_v47, %v6373_v32  ;;  %v3714_v55 = vadd.f32 %v3713_v21, %v3651_v12  ;;  %v4535_v32 = vpack.c.bf16 %v6477_v29, %v6475_v11  ;;  %4618 = vst [vmem:[%s5735_s8 + $0x88] sm:$0xff] %v4530_v2   ;;  %v6526_v4 = vld [vmem:[#allocation2 + $0x180] sm:$0xff]  ;;  %v6528_v53 = vld [vmem:[#allocation2 + $0x188] sm:$0xff] }
 0x30f   : > { %4620 = vst [vmem:[%s5735_s8 + $0x98] sm:$0xff] %v4540_v17   ;;  %4621 = vst [vmem:[%s5735_s8 + $0xa0] sm:$0xff] %v4545_v26   ;;  %v4560_v12 = vpack.c.bf16 %v6524_v52, %v6519_v63  ;;  %v4565_v0 = vpack.c.bf16 %v6528_v53, %v6526_v4  ;;  %v3657_v47 = vmul.f32 %v6393_v37, %v6393_v37  ;;  %v6545_v3 = vld [vmem:[#allocation2 + $0x1a8] sm:$0xff] }
 0x310   : > { %v3715_v24 = vadd.f32 %v3714_v55, %v3652_v18  ;;  %v3583_v43 = vadd.f32 %v3582_v62, %v6379_v6  ;;  %4619 = vst [vmem:[%s5735_s8 + $0x90] sm:$0xff] %v4535_v32   ;;  %v6502_v6 = vld [vmem:[#allocation2 + $0x150] sm:$0xff]  ;;  %v6541_v18 = vld [vmem:[#allocation2 + $0x198] sm:$0xff]  ;;  %v3658_v32 = vmul.f32 %v6395_v19, %v6395_v19 }
 0x311   : > { %v4550_v46 = vpack.c.bf16 %v6507_v15, %v6502_v6  ;;  %4624 = vst [vmem:[%s5735_s8 + $0xb8] sm:$0xff] %v4560_v12   ;;  %4625 = vst [vmem:[%s5735_s8 + $0xc0] sm:$0xff] %v4565_v0   ;;  %v6553_v55 = vld [vmem:[#allocation2 + $0x1b0] sm:$0xff]  ;;  %v3660_v0 = vmul.f32 %v6399_v61, %v6399_v61 }
 0x312   : > { %v3584_v35 = vadd.f32 %v3583_v43, %v6381_v31  ;;  %v3716_v1 = vadd.f32 %v3715_v24, %v3653_v56  ;;  %v4555_v31 = vpack.c.bf16 %v6511_v30, %v6509_v41  ;;  %v6558_v24 = vld [vmem:[#allocation2 + $0x1b8] sm:$0xff]  ;;  %v6560_v43 = vld [vmem:[#allocation2 + $0x1c0] sm:$0xff] }
 0x313   : > { %4622 = vst [vmem:[%s5735_s8 + $0xa8] sm:$0xff] %v4550_v46   ;;  %v4580_v17 = vpack.c.bf16 %v6558_v24, %v6553_v55  ;;  %v6575_v46 = vld [vmem:[#allocation2 + $0x1d8] sm:$0xff] }
 0x314   : > { %v3717_v45 = vadd.f32 %v3716_v1, %v3654_v36  ;;  %v3585_v34 = vadd.f32 %v3584_v35, %v6383_v58  ;;  %4623 = vst [vmem:[%s5735_s8 + $0xb0] sm:$0xff] %v4555_v31   ;;  %v6536_v58 = vld [vmem:[#allocation2 + $0x190] sm:$0xff]  ;;  %v6562_v36 = vld [vmem:[#allocation2 + $0x1c8] sm:$0xff]  ;;  %v6577_v31 = vld [vmem:[#allocation2 + $0x1e0] sm:$0xff] }
 0x315   : > { %v4570_v62 = vpack.c.bf16 %v6541_v18, %v6536_v58  ;;  %v4585_v26 = vpack.c.bf16 %v6562_v36, %v6560_v43  ;;  %4628 = vst [vmem:[%s5735_s8 + $0xd8] sm:$0xff] %v4580_v17  }
 0x316   : > { %v3586_v38 = vadd.f32 %v3585_v34, %v6385_v39  ;;  %v3718_v21 = vadd.f32 %v3717_v45, %v3655_v5  ;;  %v4575_v39 = vpack.c.bf16 %v6545_v3, %v6543_v33  ;;  %v3659_v5 = vmul.f32 %v6397_v50, %v6397_v50  ;;  %v6579_v45 = vld [vmem:[#allocation2 + $0x1e8] sm:$0xff] }
 0x317   : > { %4626 = vst [vmem:[%s5735_s8 + $0xc8] sm:$0xff] %v4570_v62   ;;  %4629 = vst [vmem:[%s5735_s8 + $0xe0] sm:$0xff] %v4585_v26  }
 0x318   : > { %v3719_v56 = vadd.f32 %v3718_v21, %v3656_v22  ;;  %v3587_v2 = vadd.f32 %v3586_v38, %v6393_v37  ;;  %4627 = vst [vmem:[%s5735_s8 + $0xd0] sm:$0xff] %v4575_v39   ;;  %v6570_v37 = vld [vmem:[#allocation2 + $0x1d0] sm:$0xff]  ;;  %v6592_v21 = vld [vmem:[#allocation2 + $0x1f8] sm:$0xff] }
 0x319   : > { %v4590_v34 = vpack.c.bf16 %v6575_v46, %v6570_v37  ;;  %v6590_v38 = vld [vmem:[#allocation2 + $0x1f0] sm:$0xff] }
 0x31a   : > { %v3588_v35 = vadd.f32 %v3587_v2, %v6395_v19  ;;  %v3720_v1 = vadd.f32 %v3719_v56, %v3657_v47  ;;  %v4595_v19 = vpack.c.bf16 %v6579_v45, %v6577_v31  ;;  %v4600_v47 = vpack.c.bf16 %v6592_v21, %v6590_v38 }
 0x31b   : > { %4630 = vst [vmem:[%s5735_s8 + $0xe8] sm:$0xff] %v4590_v34   ;;  %v3661_v56 = vmul.f32 %v6407_v10, %v6407_v10 }
 0x31c   : > { %v3721_v22 = vadd.f32 %v3720_v1, %v3658_v32  ;;  %v3589_v12 = vadd.f32 %v3588_v35, %v6397_v50  ;;  %4631 = vst [vmem:[%s5735_s8 + $0xf0] sm:$0xff] %v4595_v19   ;;  %4632 = vst [vmem:[%s5735_s8 + $0xf8] sm:$0xff] %v4600_v47   ;;  %v3662_v32 = vmul.f32 %v6409_v49, %v6409_v49 }
 0x31d   : > { %v3663_v35 = vmul.f32 %v6411_v16, %v6411_v16 }
 0x31e   : > { %v3590_v62 = vadd.f32 %v3589_v12, %v6399_v61  ;;  %v3722_v39 = vadd.f32 %v3721_v22, %v3659_v5  ;;  %v3664_v5 = vmul.f32 %v6413_v9, %v6413_v9 }
 0x320   : > { %v3723_v50 = vadd.f32 %v3722_v39, %v3660_v0  ;;  %v3591_v2 = vadd.f32 %v3590_v62, %v6407_v10  ;;  %v3665_v10 = vmul.f32 %v6421_v40, %v6421_v40 }
 0x322   : > { %v3592_v17 = vadd.f32 %v3591_v2, %v6409_v49  ;;  %v3724_v26 = vadd.f32 %v3723_v50, %v3661_v56  ;;  %v3666_v49 = vmul.f32 %v6423_v48, %v6423_v48 }
 0x324   : > { %v3725_v1 = vadd.f32 %v3724_v26, %v3662_v32  ;;  %v3593_v61 = vadd.f32 %v3592_v17, %v6411_v16  ;;  %v3667_v16 = vmul.f32 %v6425_v42, %v6425_v42 }
 0x326   : > { %v3594_v34 = vadd.f32 %v3593_v61, %v6413_v9  ;;  %v3726_v19 = vadd.f32 %v3725_v1, %v3663_v35  ;;  %v3668_v9 = vmul.f32 %v6427_v14, %v6427_v14 }
 0x328   : > { %v3727_v22 = vadd.f32 %v3726_v19, %v3664_v5  ;;  %v3595_v12 = vadd.f32 %v3594_v34, %v6421_v40  ;;  %v3669_v40 = vmul.f32 %v6435_v60, %v6435_v60 }
 0x32a   : > { %v3596_v0 = vadd.f32 %v3595_v12, %v6423_v48  ;;  %v3728_v47 = vadd.f32 %v3727_v22, %v3665_v10  ;;  %v3670_v48 = vmul.f32 %v6439_v20, %v6439_v20 }
 0x32c   : > { %v3729_v62 = vadd.f32 %v3728_v47, %v3666_v49  ;;  %v3597_v39 = vadd.f32 %v3596_v0, %v6425_v42  ;;  %v3671_v42 = vmul.f32 %v6441_v28, %v6441_v28 }
 0x32e   : > { %v3598_v56 = vadd.f32 %v3597_v39, %v6427_v14  ;;  %v3730_v50 = vadd.f32 %v3729_v62, %v3667_v16  ;;  %v3672_v14 = vmul.f32 %v6443_v57, %v6443_v57 }
 0x330   : > { %v3731_v2 = vadd.f32 %v3730_v50, %v3668_v9  ;;  %v3599_v32 = vadd.f32 %v3598_v56, %v6435_v60  ;;  %v3673_v60 = vmul.f32 %v6451_v8, %v6451_v8 }
 0x332   : > { %v3600_v17 = vadd.f32 %v3599_v32, %v6439_v20  ;;  %v3732_v26 = vadd.f32 %v3731_v2, %v3669_v40  ;;  %v3674_v20 = vmul.f32 %v6456_v51, %v6456_v51 }
 0x334   : > { %v3733_v35 = vadd.f32 %v3732_v26, %v3670_v48  ;;  %v3601_v1 = vadd.f32 %v3600_v17, %v6441_v28  ;;  %v3675_v28 = vmul.f32 %v6458_v25, %v6458_v25 }
 0x336   : > { %v3602_v61 = vadd.f32 %v3601_v1, %v6443_v57  ;;  %v3734_v5 = vadd.f32 %v3733_v35, %v3671_v42  ;;  %v3676_v57 = vmul.f32 %v6460_v13, %v6460_v13 }
 0x338   : > { %v3735_v34 = vadd.f32 %v3734_v5, %v3672_v14  ;;  %v3603_v19 = vadd.f32 %v3602_v61, %v6451_v8  ;;  %v3677_v8 = vmul.f32 %v6468_v27, %v6468_v27 }
 0x33a   : > { %v3604_v10 = vadd.f32 %v3603_v19, %v6456_v51  ;;  %v3736_v22 = vadd.f32 %v3735_v34, %v3673_v60  ;;  %v3678_v51 = vmul.f32 %v6473_v59, %v6473_v59 }
 0x33c   : > { %v3737_v12 = vadd.f32 %v3736_v22, %v3674_v20  ;;  %v3605_v49 = vadd.f32 %v3604_v10, %v6458_v25  ;;  %v3679_v25 = vmul.f32 %v6475_v11, %v6475_v11 }
 0x33e   : > { %v3606_v0 = vadd.f32 %v3605_v49, %v6460_v13  ;;  %v3738_v47 = vadd.f32 %v3737_v12, %v3675_v28  ;;  %v3680_v13 = vmul.f32 %v6477_v29, %v6477_v29 }
 0x340   : > { %v3739_v16 = vadd.f32 %v3738_v47, %v3676_v57  ;;  %v3607_v62 = vadd.f32 %v3606_v0, %v6468_v27  ;;  %v3681_v27 = vmul.f32 %v6485_v44, %v6485_v44 }
 0x342   : > { %v3608_v39 = vadd.f32 %v3607_v62, %v6473_v59  ;;  %v3740_v9 = vadd.f32 %v3739_v16, %v3677_v8  ;;  %v3682_v59 = vmul.f32 %v6490_v23, %v6490_v23 }
 0x344   : > { %v3741_v56 = vadd.f32 %v3740_v9, %v3678_v51  ;;  %v3609_v50 = vadd.f32 %v3608_v39, %v6475_v11  ;;  %v3683_v11 = vmul.f32 %v6492_v7, %v6492_v7 }
 0x346   : > { %v3610_v40 = vadd.f32 %v3609_v50, %v6477_v29  ;;  %v3742_v2 = vadd.f32 %v3741_v56, %v3679_v25  ;;  %v3684_v29 = vmul.f32 %v6494_v54, %v6494_v54 }
 0x348   : > { %v3743_v32 = vadd.f32 %v3742_v2, %v3680_v13  ;;  %v3611_v48 = vadd.f32 %v3610_v40, %v6485_v44  ;;  %v3685_v44 = vmul.f32 %v6502_v6, %v6502_v6 }
 0x34a   : > { %v3612_v17 = vadd.f32 %v3611_v48, %v6490_v23  ;;  %v3744_v26 = vadd.f32 %v3743_v32, %v3681_v27  ;;  %v3686_v23 = vmul.f32 %v6507_v15, %v6507_v15 }
 0x34c   : > { %v3745_v42 = vadd.f32 %v3744_v26, %v3682_v59  ;;  %v3613_v35 = vadd.f32 %v3612_v17, %v6492_v7  ;;  %v3687_v7 = vmul.f32 %v6509_v41, %v6509_v41 }
 0x34e   : > { %v3614_v1 = vadd.f32 %v3613_v35, %v6494_v54  ;;  %v3746_v14 = vadd.f32 %v3745_v42, %v3683_v11  ;;  %v3688_v54 = vmul.f32 %v6511_v30, %v6511_v30 }
 0x350   : > { %v3747_v61 = vadd.f32 %v3746_v14, %v3684_v29  ;;  %v3615_v5 = vadd.f32 %v3614_v1, %v6502_v6  ;;  %v3689_v6 = vmul.f32 %v6519_v63, %v6519_v63 }
 0x352   : > { %v3616_v60 = vadd.f32 %v3615_v5, %v6507_v15  ;;  %v3748_v34 = vadd.f32 %v3747_v61, %v3685_v44  ;;  %v3690_v15 = vmul.f32 %v6524_v52, %v6524_v52 }
 0x354   : > { %v3749_v19 = vadd.f32 %v3748_v34, %v3686_v23  ;;  %v3617_v20 = vadd.f32 %v3616_v60, %v6509_v41  ;;  %v3691_v41 = vmul.f32 %v6526_v4, %v6526_v4 }
 0x356   : > { %v3618_v10 = vadd.f32 %v3617_v20, %v6511_v30  ;;  %v3750_v22 = vadd.f32 %v3749_v19, %v3687_v7  ;;  %v3692_v30 = vmul.f32 %v6528_v53, %v6528_v53 }
 0x358   : > { %v3751_v28 = vadd.f32 %v3750_v22, %v3688_v54  ;;  %v3619_v12 = vadd.f32 %v3618_v10, %v6519_v63  ;;  %v3693_v63 = vmul.f32 %v6536_v58, %v6536_v58 }
 0x35a   : > { %v3620_v49 = vadd.f32 %v3619_v12, %v6524_v52  ;;  %v3752_v57 = vadd.f32 %v3751_v28, %v3689_v6  ;;  %v3694_v52 = vmul.f32 %v6541_v18, %v6541_v18 }
 0x35c   : > { %v3753_v0 = vadd.f32 %v3752_v57, %v3690_v15  ;;  %v3621_v47 = vadd.f32 %v3620_v49, %v6526_v4  ;;  %v3695_v4 = vmul.f32 %v6543_v33, %v6543_v33 }
 0x35e   : > { %v3622_v8 = vadd.f32 %v3621_v47, %v6528_v53  ;;  %v3754_v16 = vadd.f32 %v3753_v0, %v3691_v41  ;;  %v3696_v53 = vmul.f32 %v6545_v3, %v6545_v3 }
 0x360   : > { %v3755_v62 = vadd.f32 %v3754_v16, %v3692_v30  ;;  %v3623_v51 = vadd.f32 %v3622_v8, %v6536_v58  ;;  %v3697_v58 = vmul.f32 %v6553_v55, %v6553_v55 }
 0x362   : > { %v3624_v39 = vadd.f32 %v3623_v51, %v6541_v18  ;;  %v3756_v9 = vadd.f32 %v3755_v62, %v3693_v63  ;;  %v3698_v18 = vmul.f32 %v6558_v24, %v6558_v24 }
 0x364   : > { %v3757_v25 = vadd.f32 %v3756_v9, %v3694_v52  ;;  %v3625_v56 = vadd.f32 %v3624_v39, %v6543_v33  ;;  %v3699_v33 = vmul.f32 %v6560_v43, %v6560_v43 }
 0x366   : > { %v3626_v50 = vadd.f32 %v3625_v56, %v6545_v3  ;;  %v3758_v13 = vadd.f32 %v3757_v25, %v3695_v4  ;;  %v3700_v3 = vmul.f32 %v6562_v36, %v6562_v36 }
 0x368   : > { %v3759_v40 = vadd.f32 %v3758_v13, %v3696_v53  ;;  %v3627_v2 = vadd.f32 %v3626_v50, %v6553_v55  ;;  %v3701_v55 = vmul.f32 %v6570_v37, %v6570_v37 }
 0x36a   : > { %v3628_v27 = vadd.f32 %v3627_v2, %v6558_v24  ;;  %v3760_v32 = vadd.f32 %v3759_v40, %v3697_v58  ;;  %v3702_v24 = vmul.f32 %v6575_v46, %v6575_v46 }
 0x36c   : > { %v3761_v48 = vadd.f32 %v3760_v32, %v3698_v18  ;;  %v3629_v59 = vadd.f32 %v3628_v27, %v6560_v43  ;;  %v3703_v43 = vmul.f32 %v6577_v31, %v6577_v31 }
 0x36e   : > { %v3630_v17 = vadd.f32 %v3629_v59, %v6562_v36  ;;  %v3762_v26 = vadd.f32 %v3761_v48, %v3699_v33  ;;  %v3704_v36 = vmul.f32 %v6579_v45, %v6579_v45 }
 0x370   : > { %v3763_v11 = vadd.f32 %v3762_v26, %v3700_v3  ;;  %v3631_v42 = vadd.f32 %v3630_v17, %v6570_v37  ;;  %v3705_v37 = vmul.f32 %v6590_v38, %v6590_v38 }
 0x372   : > { %v3632_v35 = vadd.f32 %v3631_v42, %v6575_v46  ;;  %v3764_v29 = vadd.f32 %v3763_v11, %v3701_v55  ;;  %v3706_v46 = vmul.f32 %v6592_v21, %v6592_v21 }
 0x374   : > { %v3765_v1 = vadd.f32 %v3764_v29, %v3702_v24  ;;  %v3633_v14 = vadd.f32 %v3632_v35, %v6577_v31 }
 0x376   : > { %v3634_v44 = vadd.f32 %v3633_v14, %v6579_v45  ;;  %v3766_v61 = vadd.f32 %v3765_v1, %v3703_v43 }
 0x378   : > { %v3767_v5 = vadd.f32 %v3766_v61, %v3704_v36  ;;  %v3635_v23 = vadd.f32 %v3634_v44, %v6590_v38 }
 0x37a   : > { %v3636_v60 = vadd.f32 %v3635_v23, %v6592_v21  ;;  %v3768_v31 = vadd.f32 %v3767_v5, %v3705_v37 }
 0x37c   : > { %v3637_v34 = vrot.slane %v3636_v60, 4  ;;  %v3769_v7 = vadd.f32 %v3768_v31, %v3706_v46 }
 0x37e   : > { %v3638_v19 = vadd.f32 %v3637_v34, %v3636_v60  ;;  %v3770_v20 = vrot.slane %v3769_v7, 4 }
 0x380   : > { %v3639_v45 = vrot.slane %v3638_v19, 2  ;;  %v3771_v54 = vadd.f32 %v3770_v20, %v3769_v7 }
 0x382   : > { %v3640_v10 = vadd.f32 %v3639_v45, %v3638_v19  ;;  %v3772_v22 = vrot.slane %v3771_v54, 2 }
 0x384   : > { %v3641_v6 = vrot.slane %v3640_v10, 1  ;;  %v3773_v28 = vadd.f32 %v3772_v22, %v3771_v54 }
 0x386   : > { %v3642_v12 = vadd.f32 %v3641_v6, %v3640_v10  ;;  %v3774_v38 = vrot.slane %v3773_v28, 1 }
 0x388   : > { %3776 = vst [vmem:[%s5741_s11] sm:$0xff] %v3642_v12  ;;  %v3775_v15 = vadd.f32 %v3774_v38, %v3773_v28 }
 0x38a   : > { %3777 = vst [vmem:[%s5746_s14] sm:$0xff] %v3775_v15 }
 0x38b PF: > { %s15_s21 = sadd.s32 1, %s5244_s21   ;;  %s6800_s15 = smov %s5224_s16 }
 0x38c   : > { %p12_p1 = scmp.ge.s32.totalorder %s15_s21, 6   ;;  %s6801_s16 = smov %s5324_s28 }
 0x38d   : > { %s6802_s17 = smov %s5236_s19  ;;  %s6803_s18 = smov %s5240_s20 }
 0x38e   : > { %s6804_s19 = smov %s6807_s22  ;;  %s6805_s20 = smov %s6811_s23 }
 0x38f   :  { %14 = sbr.rel (!%p12_p1) target bundleno = 4 (0x4), region = 130 }

// kernel: resnet_forward.28
= control target key start
LH: loop header
LB: loop body
LE: loop exit
PB: predicated region body
PF: predicated region fallthrough
CT: control target
= control target key end

     0   :  { %s324_s6 = smov 0   ;;  %s326_s7 = smov 0   ;;  %s357_s0 = inlined_call_operand.vmem [shape: bf16[27,16,128], index: 0, kind: input, shape index: {}]   ;;  %s358_s1 = inlined_call_operand.vmem [shape: bf16[16,128], index: 1, kind: output, shape index: {}]  }
   0x1   :  { %s328_s8 = smov 0  }
   0x2 LB: > { %s20_s9 = sadd.s32 1, %s307_s7  ;;  %p248_p0 = scmp.ge.s32.totalorder %s311_s8, 1  ;;  %s311_s8 = sphi %s328_s8, %s11_s8   ;;  %s307_s7 = sphi %s326_s7, %s360_s7   ;;  %s303_s6 = sphi %s324_s6, %s359_s6  }
   0x3   : > { %p21_p1 = scmp.ge.s32.totalorder %s20_s9, 27  ;;  %p106_p2 = scmp.lt.s32.totalorder %s311_s8, 28 }
   0x5   : > { %s362_s9 = smov (%p21_p1, %s20_s9), 0  ;;  %p107_p3 = pnand %p248_p0, %p106_p2 }
   0x6   : > { %p131_p4 = scmp.lt.s32.totalorder (!%p107_p3), %s303_s6, 26  ;;  %p251_p5 = scmp.ne.s32.totalorder (!%p107_p3), %s303_s6, 0 }
   0x7   : > { %110 = sbr.rel (%p107_p3) target bundleno = 37 (0x25), region = 24 }
   0xe   : > { %s132_s10 = scalar_select %p131_p4, %s303_s6, 26 }
   0xf   : > { %150 = sbr.rel (%p251_p5) target bundleno = 22 (0x16), region = 28  ;;  %v313_v0 = vmov (!%p251_p5), 4286644096  }
  0x10   : > { %s260_s11 = sshll.u32 %s132_s10, 3  ;;  %151 = vst [vmem:[#allocation2] sm:$0xff] (!%p251_p5), %v313_v0 }
  0x11   : > { %s138_s14 = scalar_lea.vmem %s357_s0, %s260_s11 }
  0x16 PF: > { %v286_v2 = vld [vmem:[%s138_s14] sm:$0xff]   ;;  %p253_p6 = scmp.ne.s32.totalorder %s303_s6, 26 }
  0x17   : > { %v152_v1 = vld [vmem:[#allocation2] sm:$0xff] }
  0x18   : > { %v161_v3 = vmax.bf16 %v286_v2, %v152_v1  ;;  %166 = sbr.rel (%p253_p6) target bundleno = 37 (0x25), region = 32 }
  0x1a   : > { %162 = vst [vmem:[#allocation2] sm:$0xff] %v161_v3 }
  0x21   : > { %v167_v4 = vld [vmem:[#allocation2] sm:$0xff] }
  0x22   : > { %v254_v5 = vcombine.low %v167_v4, %v167_v4  ;;  %v255_v6 = vcombine.high %v167_v4, %v167_v4 }
  0x24   : > { %175 = vst [vmem:[%s358_s1] sm:$0xf] %v254_v5  ;;  %176 = vst [vmem:[%s358_s1 + $0x4] sm:$0xf] %v255_v6 }
  0x25 PF: > { %s11_s8 = sadd.s32 1, %s311_s8   ;;  %s359_s6 = smov %s307_s7 }
  0x26   : > { %p8_p7 = scmp.ge.s32.totalorder %s11_s8, 29   ;;  %s360_s7 = smov %s362_s9 }
  0x28   :  { %10 = sbr.rel (!%p8_p7) target bundleno = 2 (0x2), region = 62 }

// kernel: resnet_forward.30
= control target key start
LH: loop header
LB: loop body
LE: loop exit
PB: predicated region body
PF: predicated region fallthrough
CT: control target
= control target key end

     0   :  { %s422_s0 = inlined_call_operand.vmem [shape: bf16[128,128], index: 0, kind: input, shape index: {}]   ;;  %s423_s1 = inlined_call_operand.vmem [shape: f32[1,128], index: 1, kind: input, shape index: {}]   ;;  %s424_s2 = inlined_call_operand.vmem [shape: f32[1,128], index: 2, kind: input, shape index: {}]   ;;  %s425_s3 = inlined_call_operand.vmem [shape: bf16[128,128], index: 3, kind: output, shape index: {}]  }
   0x1   :  { %v227_v0 = vld [vmem:[%s422_s0] sm:$0xff]   ;;  %v298_v4 = vld [vmem:[%s422_s0 + $0x8] sm:$0xff]   ;;  %v299_v5 = vld [vmem:[%s422_s0 + $0x10] sm:$0xff]  }
   0x2   :  { %v338_v1 = vld [vmem:[%s423_s1] ss:$0 sm:$0xff]  ;;  %v228_v2 = vunpack.c.l.bf16 %v227_v0  ;;  %v229_v3 = vunpack.c.h.bf16 %v227_v0  ;;  %v300_v6 = vld [vmem:[%s422_s0 + $0x18] sm:$0xff]   ;;  %v232_v8 = vunpack.c.l.bf16 %v298_v4  ;;  %v233_v9 = vunpack.c.h.bf16 %v298_v4  ;;  %v302_v33 = vld [vmem:[%s422_s0 + $0x28] sm:$0xff]  }
   0x3   :  { %v352_v7 = vld [vmem:[%s424_s2] ss:$0 sm:$0xff]  ;;  %v236_v10 = vunpack.c.l.bf16 %v299_v5  ;;  %v237_v11 = vunpack.c.h.bf16 %v299_v5  ;;  %v240_v14 = vunpack.c.l.bf16 %v300_v6  ;;  %v241_v15 = vunpack.c.h.bf16 %v300_v6  ;;  %v303_v38 = vld [vmem:[%s422_s0 + $0x30] sm:$0xff]   ;;  %v304_v43 = vld [vmem:[%s422_s0 + $0x38] sm:$0xff]  }
   0x4   :  { %v53_v12 = vmul.f32 %v228_v2, %v338_v1  ;;  %v54_v13 = vmul.f32 %v229_v3, %v338_v1  ;;  %v55_v16 = vmul.f32 %v232_v8, %v338_v1  ;;  %v56_v17 = vmul.f32 %v233_v9, %v338_v1  ;;  %v301_v28 = vld [vmem:[%s422_s0 + $0x20] sm:$0xff]  }
   0x5   :  { %v57_v18 = vmul.f32 %v236_v10, %v338_v1  ;;  %v58_v19 = vmul.f32 %v237_v11, %v338_v1  ;;  %v59_v22 = vmul.f32 %v240_v14, %v338_v1  ;;  %v60_v23 = vmul.f32 %v241_v15, %v338_v1 }
   0x6   :  { %v76_v20 = vadd.f32 %v352_v7, %v53_v12  ;;  %v77_v21 = vadd.f32 %v352_v7, %v54_v13  ;;  %v78_v24 = vadd.f32 %v352_v7, %v55_v16  ;;  %v79_v25 = vadd.f32 %v352_v7, %v56_v17 }
   0x7   :  { %v80_v26 = vadd.f32 %v352_v7, %v57_v18  ;;  %v81_v27 = vadd.f32 %v352_v7, %v58_v19  ;;  %v82_v31 = vadd.f32 %v352_v7, %v59_v22  ;;  %v83_v32 = vadd.f32 %v352_v7, %v60_v23 }
   0x8   :  { %v92_v29 = vmax.f32 %v76_v20, 0.0  ;;  %v93_v30 = vmax.f32 %v77_v21, 0.0  ;;  %v94_v34 = vmax.f32 %v78_v24, 0.0  ;;  %v95_v35 = vmax.f32 %v79_v25, 0.0 }
   0x9   :  { %v96_v36 = vmax.f32 %v80_v26, 0.0  ;;  %v97_v37 = vmax.f32 %v81_v27, 0.0  ;;  %v98_v40 = vmax.f32 %v82_v31, 0.0  ;;  %v99_v41 = vmax.f32 %v83_v32, 0.0 }
   0xa   :  { %v261_v39 = vpack.c.bf16 %v93_v30, %v92_v29  ;;  %v244_v42 = vunpack.c.l.bf16 %v301_v28  ;;  %v266_v44 = vpack.c.bf16 %v95_v35, %v94_v34  ;;  %v245_v46 = vunpack.c.h.bf16 %v301_v28 }
   0xb   :  { %v271_v45 = vpack.c.bf16 %v97_v37, %v96_v36  ;;  %v248_v47 = vunpack.c.l.bf16 %v302_v33  ;;  %v276_v48 = vpack.c.bf16 %v99_v41, %v98_v40  ;;  %v249_v50 = vunpack.c.h.bf16 %v302_v33 }
   0xc   :  { %262 = vst [vmem:[%s425_s3] sm:$0xff] %v261_v39   ;;  %v61_v49 = vmul.f32 %v244_v42, %v338_v1  ;;  %v252_v51 = vunpack.c.l.bf16 %v303_v38  ;;  %305 = vst [vmem:[%s425_s3 + $0x8] sm:$0xff] %v266_v44   ;;  %v62_v52 = vmul.f32 %v245_v46, %v338_v1  ;;  %v253_v54 = vunpack.c.h.bf16 %v303_v38 }
   0xd   :  { %306 = vst [vmem:[%s425_s3 + $0x10] sm:$0xff] %v271_v45   ;;  %v63_v53 = vmul.f32 %v248_v47, %v338_v1  ;;  %v256_v55 = vunpack.c.l.bf16 %v304_v43  ;;  %307 = vst [vmem:[%s425_s3 + $0x18] sm:$0xff] %v276_v48   ;;  %v64_v57 = vmul.f32 %v249_v50, %v338_v1  ;;  %v257_v59 = vunpack.c.h.bf16 %v304_v43 }
   0xe   :  { %v84_v56 = vadd.f32 %v352_v7, %v61_v49  ;;  %v65_v58 = vmul.f32 %v252_v51, %v338_v1  ;;  %v85_v60 = vadd.f32 %v352_v7, %v62_v52  ;;  %v66_v62 = vmul.f32 %v253_v54, %v338_v1 }
   0xf   :  { %v86_v61 = vadd.f32 %v352_v7, %v63_v53  ;;  %v67_v63 = vmul.f32 %v256_v55, %v338_v1  ;;  %v87_v2 = vadd.f32 %v352_v7, %v64_v57  ;;  %v68_v4 = vmul.f32 %v257_v59, %v338_v1 }
  0x10   :  { %v100_v0 = vmax.f32 %v84_v56, 0.0  ;;  %v88_v3 = vadd.f32 %v352_v7, %v65_v58  ;;  %v101_v5 = vmax.f32 %v85_v60, 0.0  ;;  %v89_v8 = vadd.f32 %v352_v7, %v66_v62 }
  0x11   :  { %v102_v6 = vmax.f32 %v86_v61, 0.0  ;;  %v90_v9 = vadd.f32 %v352_v7, %v67_v63  ;;  %v103_v10 = vmax.f32 %v87_v2, 0.0  ;;  %v91_v12 = vadd.f32 %v352_v7, %v68_v4 }
  0x12   :  { %v104_v11 = vmax.f32 %v88_v3, 0.0  ;;  %v281_v13 = vpack.c.bf16 %v101_v5, %v100_v0  ;;  %v105_v14 = vmax.f32 %v89_v8, 0.0 }
  0x13   :  { %v106_v15 = vmax.f32 %v90_v9, 0.0  ;;  %v286_v16 = vpack.c.bf16 %v103_v10, %v102_v6  ;;  %v107_v17 = vmax.f32 %v91_v12, 0.0 }
  0x14   :  { %308 = vst [vmem:[%s425_s3 + $0x20] sm:$0xff] %v281_v13   ;;  %v291_v1 = vpack.c.bf16 %v105_v14, %v104_v11 }
  0x15   :  { %309 = vst [vmem:[%s425_s3 + $0x28] sm:$0xff] %v286_v16   ;;  %v296_v18 = vpack.c.bf16 %v107_v17, %v106_v15 }
  0x16   :  { %310 = vst [vmem:[%s425_s3 + $0x30] sm:$0xff] %v291_v1  }
  0x17   :  { %311 = vst [vmem:[%s425_s3 + $0x38] sm:$0xff] %v296_v18  }

// kernel: resnet_forward.29
= control target key start
LH: loop header
LB: loop body
LE: loop exit
PB: predicated region body
PF: predicated region fallthrough
CT: control target
= control target key end

     0   :  { %s975_s1 = inlined_call_operand.vmem [shape: bf16[256,128], index: 1, kind: input, shape index: {}]   ;;  %s976_s0 = inlined_call_operand.vmem [shape: bf16[128,256], index: 0, kind: input, shape index: {}]   ;;  %s977_s2 = inlined_call_operand.vmem [shape: bf16[128,128], index: 2, kind: output, shape index: {0}]   ;;  %s978_s3 = inlined_call_operand.vmem [shape: f32[8,128], index: 3, kind: output, shape index: {1}]   ;;  %s979_s4 = inlined_call_operand.vmem [shape: f32[8,128], index: 4, kind: output, shape index: {2}]  }
   0x1   :  { %v766_v0 = vld [vmem:[%s975_s1 + $0x40] sm:$0xff]   ;;  %v768_v2 = vld [vmem:[%s975_s1 + $0x48] sm:$0xff]   ;;  %v770_v4 = vld [vmem:[%s975_s1 + $0x50] sm:$0xff]  }
   0x2   :  { %v767_v1 = vld [vmem:[%s975_s1] sm:$0xff]   ;;  %686 = vmatprep.subr.bf16.mxu0 %v766_v0  ;;  %750 = vmatprep.subr.bf16.mxu1 %v766_v0  ;;  %v769_v3 = vld [vmem:[%s975_s1 + $0x8] sm:$0xff]   ;;  %v771_v5 = vld [vmem:[%s975_s1 + $0x10] sm:$0xff]  }
   0x3   :  { %687 = vmatpush3.bf16.msra.mxu0 %v767_v1  ;;  %758 = vmatpush3.bf16.msra.mxu1 %v767_v1  ;;  %v772_v6 = vld [vmem:[%s975_s1 + $0x58] sm:$0xff]   ;;  %v774_v8 = vld [vmem:[%s975_s1 + $0x60] sm:$0xff]   ;;  %v776_v10 = vld [vmem:[%s975_s1 + $0x68] sm:$0xff]  }
   0x4   :  { %688 = vmatprep.subr.bf16.mxu0 %v768_v2  ;;  %751 = vmatprep.subr.bf16.mxu1 %v768_v2  ;;  %v773_v7 = vld [vmem:[%s975_s1 + $0x18] sm:$0xff]   ;;  %v775_v9 = vld [vmem:[%s975_s1 + $0x20] sm:$0xff]   ;;  %v777_v12 = vld [vmem:[%s975_s1 + $0x28] sm:$0xff]  }
   0x5   :  { %v784_v11 = vld [vmem:[%s976_s0 + $0x4] ss:$8 sps:$4 sm:$0xff]   ;;  %v778_v14 = vld [vmem:[%s975_s1 + $0x70] sm:$0xff]   ;;  %v780_v16 = vld [vmem:[%s975_s1 + $0x78] sm:$0xff]  }
   0x6   :  { %v790_v13 = vld [vmem:[%s976_s0 + $0x44] ss:$8 sps:$4 sm:$0xff]   ;;  %307 = vmatprep.mubr.bf16.mxu0 %v784_v11  ;;  %v779_v15 = vld [vmem:[%s975_s1 + $0x30] sm:$0xff]   ;;  %v781_v17 = vld [vmem:[%s975_s1 + $0x38] sm:$0xff]  }
   0x7   :  { %689 = vmatpush3.bf16.msra.mxu0 %v769_v3  ;;  %759 = vmatpush3.bf16.msra.mxu1 %v769_v3  ;;  %v782_v18 = vld [vmem:[%s976_s0] ss:$8 sps:$4 sm:$0xff]   ;;  %v785_v20 = vld [vmem:[%s976_s0 + $0x14] ss:$8 sps:$4 sm:$0xff]   ;;  %v787_v22 = vld [vmem:[%s976_s0 + $0x10] ss:$8 sps:$4 sm:$0xff]  }
   0x8   :  { %690 = vmatprep.subr.bf16.mxu0 %v770_v4  ;;  %752 = vmatprep.subr.bf16.mxu1 %v770_v4  ;;  %v788_v19 = vld [vmem:[%s976_s0 + $0x40] ss:$8 sps:$4 sm:$0xff]   ;;  %v794_v21 = vld [vmem:[%s976_s0 + $0x54] ss:$8 sps:$4 sm:$0xff]   ;;  %v796_v23 = vld [vmem:[%s976_s0 + $0x50] ss:$8 sps:$4 sm:$0xff]  }
   0x9   :  { %339 = vmatprep.mubr.bf16.mxu1 %v790_v13  ;;  %v791_v24 = vld [vmem:[%s976_s0 + $0x24] ss:$8 sps:$4 sm:$0xff]   ;;  %v793_v26 = vld [vmem:[%s976_s0 + $0x20] ss:$8 sps:$4 sm:$0xff]   ;;  %v797_v28 = vld [vmem:[%s976_s0 + $0x34] ss:$8 sps:$4 sm:$0xff]  }
   0xa   :  { %v800_v25 = vld [vmem:[%s976_s0 + $0x64] ss:$8 sps:$4 sm:$0xff]   ;;  %v802_v27 = vld [vmem:[%s976_s0 + $0x60] ss:$8 sps:$4 sm:$0xff]   ;;  %v803_v29 = vld [vmem:[%s976_s0 + $0x74] ss:$8 sps:$4 sm:$0xff]  }
   0xb   :  { %691 = vmatpush3.bf16.msra.mxu0 %v771_v5  ;;  %760 = vmatpush3.bf16.msra.mxu1 %v771_v5  ;;  %v799_v30 = vld [vmem:[%s976_s0 + $0x30] ss:$8 sps:$4 sm:$0xff]  }
   0xc   :  { %692 = vmatprep.subr.bf16.mxu0 %v772_v6  ;;  %753 = vmatprep.subr.bf16.mxu1 %v772_v6  ;;  %v805_v31 = vld [vmem:[%s976_s0 + $0x70] ss:$8 sps:$4 sm:$0xff]  }
   0xf   :  { %693 = vmatpush3.bf16.msra.mxu0 %v773_v7  ;;  %761 = vmatpush3.bf16.msra.mxu1 %v773_v7 }
  0x10   :  { %694 = vmatprep.subr.bf16.mxu0 %v774_v8  ;;  %754 = vmatprep.subr.bf16.mxu1 %v774_v8 }
  0x13   :  { %695 = vmatpush3.bf16.msra.mxu0 %v775_v9  ;;  %762 = vmatpush3.bf16.msra.mxu1 %v775_v9 }
  0x14   :  { %696 = vmatprep.subr.bf16.mxu0 %v776_v10  ;;  %755 = vmatprep.subr.bf16.mxu1 %v776_v10 }
  0x17   :  { %697 = vmatpush3.bf16.msra.mxu0 %v777_v12  ;;  %763 = vmatpush3.bf16.msra.mxu1 %v777_v12 }
  0x18   :  { %698 = vmatprep.subr.bf16.mxu0 %v778_v14  ;;  %756 = vmatprep.subr.bf16.mxu1 %v778_v14 }
  0x1b   :  { %699 = vmatpush3.bf16.msra.mxu0 %v779_v15  ;;  %764 = vmatpush3.bf16.msra.mxu1 %v779_v15 }
  0x1c   :  { %700 = vmatprep.subr.bf16.mxu0 %v780_v16  ;;  %757 = vmatprep.subr.bf16.mxu1 %v780_v16 }
  0x1f   :  { %701 = vmatpush3.bf16.msra.mxu0 %v781_v17  ;;  %765 = vmatpush3.bf16.msra.mxu1 %v781_v17 }
  0x22   :  { %308 = vmatmul.mubr.bf16.vlgmr.msra.gmra.mrb[0].mxu0 %v782_v18  ;;  %340 = vmatmul.mubr.bf16.vlgmr.msra.gmra.mrb[0].mxu1 %v788_v19 }
  0x23   :  { %315 = vmatprep.mubr.bf16.mxu0 %v785_v20  ;;  %347 = vmatprep.mubr.bf16.mxu1 %v794_v21 }
  0x2a   :  { %316 = vmatmul.mubr.bf16.gmra.mrb[4].mxu0 %v787_v22  ;;  %348 = vmatmul.mubr.bf16.gmra.mrb[4].mxu1 %v796_v23 }
  0x2b   :  { %323 = vmatprep.mubr.bf16.mxu0 %v791_v24  ;;  %355 = vmatprep.mubr.bf16.mxu1 %v800_v25 }
  0x32   :  { %324 = vmatmul.mubr.bf16.gmra.mrb[8].mxu0 %v793_v26  ;;  %356 = vmatmul.mubr.bf16.gmra.mrb[8].mxu1 %v802_v27 }
  0x33   :  { %331 = vmatprep.mubr.bf16.mxu0 %v797_v28  ;;  %363 = vmatprep.mubr.bf16.mxu1 %v803_v29 }
  0x3a   :  { %332 = vmatmul.mubr.bf16.gmra.mrb[12].mxu0 %v799_v30  ;;  %364 = vmatmul.mubr.bf16.gmra.mrb[12].mxu1 %v805_v31 }
  0xf5   :  { %v702_v32 = vpop.f32.mrb[0].mxu0  ;;  %v726_v33 = vpop.f32.mrb[0].mxu1 }
  0xf6   :  { %v703_v34 = vpop.f32.mrb[1].mxu0  ;;  %v727_v35 = vpop.f32.mrb[1].mxu1 }
  0xf7   :  { %v704_v36 = vadd.f32 %v703_v34, %v702_v32  ;;  %v705_v37 = vpop.f32.mrb[2].mxu0  ;;  %v927_v38 = vadd.f32 %v727_v35, %v726_v33  ;;  %v729_v39 = vpop.f32.mrb[2].mxu1 }
  0xf8   :  { %v706_v40 = vpop.f32.mrb[3].mxu0  ;;  %v730_v41 = vpop.f32.mrb[3].mxu1 }
  0xf9   :  { %v707_v42 = vadd.f32 %v706_v40, %v705_v37  ;;  %v929_v43 = vadd.f32 %v730_v41, %v729_v39  ;;  %v524_v44 = vmul.f32 %v704_v36, %v704_v36 }
  0xfb   :  { %v642_v45 = vpack.c.bf16 %v707_v42, %v704_v36  ;;  %v503_v46 = vadd.f32 %v707_v42, %v704_v36  ;;  %v525_v47 = vmul.f32 %v707_v42, %v707_v42  ;;  %v662_v48 = vpack.c.bf16 %v929_v43, %v927_v38 }
  0xfd   :  { %643 = vst [vmem:[%s977_s2] sm:$0xff] %v642_v45   ;;  %v540_v49 = vadd.f32 %v525_v47, %v524_v44  ;;  %v708_v50 = vpop.f32.mrb[4].mxu0  ;;  %682 = vst [vmem:[%s977_s2 + $0x20] sm:$0xff] %v662_v48   ;;  %v732_v51 = vpop.f32.mrb[4].mxu1  ;;  %v532_v47 = vmul.f32 %v927_v38, %v927_v38 }
  0xfe   :  { %v709_v52 = vpop.f32.mrb[5].mxu0  ;;  %v733_v53 = vpop.f32.mrb[5].mxu1 }
  0xff   :  { %v710_v54 = vadd.f32 %v709_v52, %v708_v50  ;;  %v711_v55 = vpop.f32.mrb[6].mxu0  ;;  %v939_v56 = vadd.f32 %v733_v53, %v732_v51  ;;  %v735_v57 = vpop.f32.mrb[6].mxu1  ;;  %v533_v50 = vmul.f32 %v929_v43, %v929_v43 }
 0x100   :  { %v712_v58 = vpop.f32.mrb[7].mxu0  ;;  %v736_v59 = vpop.f32.mrb[7].mxu1 }
 0x101   :  { %v504_v60 = vadd.f32 %v710_v54, %v503_v46  ;;  %v526_v61 = vmul.f32 %v710_v54, %v710_v54  ;;  %v713_v62 = vadd.f32 %v712_v58, %v711_v55  ;;  %v737_v63 = vadd.f32 %v736_v59, %v735_v57 }
 0x102   :  { %v534_v53 = vmul.f32 %v939_v56, %v939_v56 }
 0x103   :  { %v541_v0 = vadd.f32 %v540_v49, %v526_v61  ;;  %v647_v1 = vpack.c.bf16 %v713_v62, %v710_v54  ;;  %v505_v2 = vadd.f32 %v713_v62, %v504_v60  ;;  %v527_v3 = vmul.f32 %v713_v62, %v713_v62 }
 0x104   :  { %v667_v4 = vpack.c.bf16 %v737_v63, %v939_v56  ;;  %v535_v57 = vmul.f32 %v737_v63, %v737_v63 }
 0x105   :  { %679 = vst [vmem:[%s977_s2 + $0x8] sm:$0xff] %v647_v1   ;;  %v542_v5 = vadd.f32 %v541_v0, %v527_v3  ;;  %v714_v6 = vpop.f32.mrb[8].mxu0  ;;  %v738_v7 = vpop.f32.mrb[8].mxu1 }
 0x106   :  { %v715_v8 = vpop.f32.mrb[9].mxu0  ;;  %683 = vst [vmem:[%s977_s2 + $0x28] sm:$0xff] %v667_v4   ;;  %v739_v9 = vpop.f32.mrb[9].mxu1 }
 0x107   :  { %v716_v10 = vadd.f32 %v715_v8, %v714_v6  ;;  %v717_v11 = vpop.f32.mrb[10].mxu0  ;;  %v740_v12 = vadd.f32 %v739_v9, %v738_v7  ;;  %v741_v13 = vpop.f32.mrb[10].mxu1 }
 0x108   :  { %v718_v14 = vpop.f32.mrb[11].mxu0  ;;  %v742_v15 = vpop.f32.mrb[11].mxu1 }
 0x109   :  { %v506_v16 = vadd.f32 %v716_v10, %v505_v2  ;;  %v528_v17 = vmul.f32 %v716_v10, %v716_v10  ;;  %v719_v18 = vadd.f32 %v718_v14, %v717_v11  ;;  %v743_v19 = vadd.f32 %v742_v15, %v741_v13 }
 0x10a   :  { %v536_v60 = vmul.f32 %v740_v12, %v740_v12 }
 0x10b   :  { %v543_v20 = vadd.f32 %v542_v5, %v528_v17  ;;  %v652_v21 = vpack.c.bf16 %v719_v18, %v716_v10  ;;  %v507_v22 = vadd.f32 %v719_v18, %v506_v16  ;;  %v529_v23 = vmul.f32 %v719_v18, %v719_v18 }
 0x10c   :  { %v672_v24 = vpack.c.bf16 %v743_v19, %v740_v12  ;;  %v537_v1 = vmul.f32 %v743_v19, %v743_v19 }
 0x10d   :  { %680 = vst [vmem:[%s977_s2 + $0x10] sm:$0xff] %v652_v21   ;;  %v544_v25 = vadd.f32 %v543_v20, %v529_v23  ;;  %v720_v26 = vpop.f32.mrb[12].mxu0  ;;  %v744_v27 = vpop.f32.mrb[12].mxu1 }
 0x10e   :  { %v721_v28 = vpop.f32.mrb[13].mxu0  ;;  %684 = vst [vmem:[%s977_s2 + $0x30] sm:$0xff] %v672_v24   ;;  %v745_v29 = vpop.f32.mrb[13].mxu1 }
 0x10f   :  { %v722_v30 = vadd.f32 %v721_v28, %v720_v26  ;;  %v723_v31 = vpop.f32.mrb[14].mxu0  ;;  %v746_v32 = vadd.f32 %v745_v29, %v744_v27  ;;  %v747_v33 = vpop.f32.mrb[14].mxu1 }
 0x110   :  { %v724_v34 = vpop.f32.mrb[15].mxu0  ;;  %v748_v35 = vpop.f32.mrb[15].mxu1 }
 0x111   :  { %v508_v36 = vadd.f32 %v722_v30, %v507_v22  ;;  %v530_v37 = vmul.f32 %v722_v30, %v722_v30  ;;  %v725_v39 = vadd.f32 %v724_v34, %v723_v31  ;;  %v749_v40 = vadd.f32 %v748_v35, %v747_v33 }
 0x112   :  { %v538_v2 = vmul.f32 %v746_v32, %v746_v32 }
 0x113   :  { %v545_v41 = vadd.f32 %v544_v25, %v530_v37  ;;  %v657_v42 = vpack.c.bf16 %v725_v39, %v722_v30  ;;  %v509_v44 = vadd.f32 %v725_v39, %v508_v36  ;;  %v531_v45 = vmul.f32 %v725_v39, %v725_v39 }
 0x114   :  { %v677_v46 = vpack.c.bf16 %v749_v40, %v746_v32  ;;  %v539_v6 = vmul.f32 %v749_v40, %v749_v40 }
 0x115   :  { %681 = vst [vmem:[%s977_s2 + $0x18] sm:$0xff] %v657_v42   ;;  %v510_v48 = vadd.f32 %v927_v38, %v509_v44  ;;  %v546_v49 = vadd.f32 %v545_v41, %v531_v45 }
 0x116   :  { %685 = vst [vmem:[%s977_s2 + $0x38] sm:$0xff] %v677_v46  }
 0x117   :  { %v511_v51 = vadd.f32 %v929_v43, %v510_v48  ;;  %v547_v52 = vadd.f32 %v546_v49, %v532_v47 }
 0x119   :  { %v548_v54 = vadd.f32 %v547_v52, %v533_v50  ;;  %v512_v55 = vadd.f32 %v939_v56, %v511_v51 }
 0x11b   :  { %v513_v58 = vadd.f32 %v737_v63, %v512_v55  ;;  %v549_v38 = vadd.f32 %v548_v54, %v534_v53 }
 0x11d   :  { %v514_v59 = vadd.f32 %v740_v12, %v513_v58  ;;  %v550_v61 = vadd.f32 %v549_v38, %v535_v57 }
 0x11f   :  { %v551_v62 = vadd.f32 %v550_v61, %v536_v60  ;;  %v515_v0 = vadd.f32 %v743_v19, %v514_v59 }
 0x121   :  { %v552_v3 = vadd.f32 %v551_v62, %v537_v1  ;;  %v516_v4 = vadd.f32 %v746_v32, %v515_v0 }
 0x123   :  { %v553_v43 = vadd.f32 %v552_v3, %v538_v2  ;;  %v517_v5 = vadd.f32 %v749_v40, %v516_v4 }
 0x125   :  { %v518_v7 = vrot.slane %v517_v5, 4  ;;  %v554_v8 = vadd.f32 %v553_v43, %v539_v6 }
 0x127   :  { %v519_v9 = vadd.f32 %v518_v7, %v517_v5  ;;  %v555_v10 = vrot.slane %v554_v8, 4 }
 0x129   :  { %v520_v56 = vrot.slane %v519_v9, 2  ;;  %v556_v11 = vadd.f32 %v555_v10, %v554_v8 }
 0x12b   :  { %v521_v63 = vadd.f32 %v520_v56, %v519_v9  ;;  %v557_v13 = vrot.slane %v556_v11, 2 }
 0x12d   :  { %v522_v14 = vrot.slane %v521_v63, 1  ;;  %v558_v12 = vadd.f32 %v557_v13, %v556_v11 }
 0x12f   :  { %v523_v15 = vadd.f32 %v522_v14, %v521_v63  ;;  %v559_v16 = vrot.slane %v558_v12, 1 }
 0x131   :  { %v560_v17 = vadd.f32 %v559_v16, %v558_v12  ;;  %561 = vst [vmem:[%s978_s3] sm:$0xff] %v523_v15 }
 0x133   :  { %562 = vst [vmem:[%s979_s4] sm:$0xff] %v560_v17 }

// kernel: resnet_forward.32
= control target key start
LH: loop header
LB: loop body
LE: loop exit
PB: predicated region body
PF: predicated region fallthrough
CT: control target
= control target key end

     0   :  { %s541_s0 = inlined_call_operand.vmem [shape: bf16[128,128], index: 0, kind: input, shape index: {}]   ;;  %s542_s1 = inlined_call_operand.vmem [shape: f32[1,128], index: 1, kind: input, shape index: {}]   ;;  %s543_s2 = inlined_call_operand.vmem [shape: f32[1,128], index: 2, kind: input, shape index: {}]   ;;  %s544_s3 = inlined_call_operand.vmem [shape: bf16[128,128], index: 3, kind: input, shape index: {}]   ;;  %s545_s4 = inlined_call_operand.vmem [shape: bf16[128,128], index: 4, kind: output, shape index: {}]  }
   0x1   :  { %v278_v0 = vld [vmem:[%s541_s0] sm:$0xff]   ;;  %v381_v5 = vld [vmem:[%s541_s0 + $0x8] sm:$0xff]   ;;  %v382_v12 = vld [vmem:[%s541_s0 + $0x10] sm:$0xff]  }
   0x2   :  { %v433_v1 = vld [vmem:[%s542_s1] ss:$0 sm:$0xff]  ;;  %v279_v2 = vunpack.c.l.bf16 %v278_v0  ;;  %v280_v3 = vunpack.c.h.bf16 %v278_v0  ;;  %v388_v6 = vld [vmem:[%s544_s3 + $0x8] sm:$0xff]   ;;  %v283_v10 = vunpack.c.l.bf16 %v381_v5  ;;  %v284_v11 = vunpack.c.h.bf16 %v381_v5  ;;  %v389_v13 = vld [vmem:[%s544_s3 + $0x10] sm:$0xff]  }
   0x3   :  { %v310_v4 = vld [vmem:[%s544_s3] sm:$0xff]   ;;  %v315_v16 = vunpack.c.l.bf16 %v388_v6  ;;  %v316_v17 = vunpack.c.h.bf16 %v388_v6  ;;  %v287_v20 = vunpack.c.l.bf16 %v382_v12  ;;  %v288_v21 = vunpack.c.h.bf16 %v382_v12  ;;  %v383_v22 = vld [vmem:[%s541_s0 + $0x18] sm:$0xff]   ;;  %v385_v54 = vld [vmem:[%s541_s0 + $0x28] sm:$0xff]  }
   0x4   :  { %v447_v7 = vld [vmem:[%s543_s2] ss:$0 sm:$0xff]  ;;  %v311_v8 = vunpack.c.l.bf16 %v310_v4  ;;  %v312_v9 = vunpack.c.h.bf16 %v310_v4  ;;  %v56_v14 = vmul.f32 %v279_v2, %v433_v1  ;;  %v57_v15 = vmul.f32 %v280_v3, %v433_v1  ;;  %v390_v39 = vld [vmem:[%s544_s3 + $0x18] sm:$0xff]   ;;  %v392_v63 = vld [vmem:[%s544_s3 + $0x28] sm:$0xff]  }
   0x5   :  { %v58_v18 = vmul.f32 %v283_v10, %v433_v1  ;;  %v59_v19 = vmul.f32 %v284_v11, %v433_v1  ;;  %v319_v25 = vunpack.c.l.bf16 %v389_v13  ;;  %v320_v26 = vunpack.c.h.bf16 %v389_v13  ;;  %v384_v48 = vld [vmem:[%s541_s0 + $0x20] sm:$0xff]   ;;  %v386_v5 = vld [vmem:[%s541_s0 + $0x30] sm:$0xff]  }
   0x6   :  { %v79_v23 = vadd.f32 %v447_v7, %v56_v14  ;;  %v80_v24 = vadd.f32 %v447_v7, %v57_v15  ;;  %v60_v29 = vmul.f32 %v287_v20, %v433_v1  ;;  %v61_v30 = vmul.f32 %v288_v21, %v433_v1  ;;  %v391_v49 = vld [vmem:[%s544_s3 + $0x20] sm:$0xff]   ;;  %v393_v11 = vld [vmem:[%s544_s3 + $0x30] sm:$0xff]   ;;  %v387_v20 = vld [vmem:[%s541_s0 + $0x38] sm:$0xff]  }
   0x7   :  { %v81_v27 = vadd.f32 %v447_v7, %v58_v18  ;;  %v82_v28 = vadd.f32 %v447_v7, %v59_v19  ;;  %v291_v33 = vunpack.c.l.bf16 %v383_v22  ;;  %v292_v34 = vunpack.c.h.bf16 %v383_v22 }
   0x8   :  { %v127_v31 = vadd.f32 %v311_v8, %v79_v23  ;;  %v128_v32 = vadd.f32 %v312_v9, %v80_v24  ;;  %v83_v37 = vadd.f32 %v447_v7, %v60_v29  ;;  %v84_v38 = vadd.f32 %v447_v7, %v61_v30 }
   0x9   :  { %v129_v35 = vadd.f32 %v315_v16, %v81_v27  ;;  %v130_v36 = vadd.f32 %v316_v17, %v82_v28  ;;  %v62_v42 = vmul.f32 %v291_v33, %v433_v1  ;;  %v63_v43 = vmul.f32 %v292_v34, %v433_v1  ;;  %v394_v33 = vld [vmem:[%s544_s3 + $0x38] sm:$0xff]  }
   0xa   :  { %v143_v40 = vmax.f32 %v127_v31, 0.0  ;;  %v144_v41 = vmax.f32 %v128_v32, 0.0  ;;  %v131_v46 = vadd.f32 %v319_v25, %v83_v37  ;;  %v132_v47 = vadd.f32 %v320_v26, %v84_v38 }
   0xb   :  { %v145_v44 = vmax.f32 %v129_v35, 0.0  ;;  %v146_v45 = vmax.f32 %v130_v36, 0.0  ;;  %v85_v51 = vadd.f32 %v447_v7, %v62_v42  ;;  %v86_v52 = vadd.f32 %v447_v7, %v63_v43 }
   0xc   :  { %v344_v50 = vpack.c.bf16 %v144_v41, %v143_v40  ;;  %v323_v53 = vunpack.c.l.bf16 %v390_v39  ;;  %v147_v56 = vmax.f32 %v131_v46, 0.0  ;;  %v148_v57 = vmax.f32 %v132_v47, 0.0 }
   0xd   :  { %v349_v55 = vpack.c.bf16 %v146_v45, %v145_v44  ;;  %v324_v58 = vunpack.c.h.bf16 %v390_v39  ;;  %v295_v60 = vunpack.c.l.bf16 %v384_v48  ;;  %v296_v61 = vunpack.c.h.bf16 %v384_v48 }
   0xe   :  { %345 = vst [vmem:[%s545_s4] sm:$0xff] %v344_v50   ;;  %v133_v59 = vadd.f32 %v323_v53, %v85_v51  ;;  %v327_v62 = vunpack.c.l.bf16 %v391_v49  ;;  %v354_v0 = vpack.c.bf16 %v148_v57, %v147_v56  ;;  %v328_v3 = vunpack.c.h.bf16 %v391_v49 }
   0xf   :  { %395 = vst [vmem:[%s545_s4 + $0x8] sm:$0xff] %v349_v55   ;;  %v134_v2 = vadd.f32 %v324_v58, %v86_v52  ;;  %v299_v4 = vunpack.c.l.bf16 %v385_v54  ;;  %v64_v8 = vmul.f32 %v295_v60, %v433_v1  ;;  %v65_v9 = vmul.f32 %v296_v61, %v433_v1 }
  0x10   :  { %v149_v6 = vmax.f32 %v133_v59, 0.0  ;;  %v300_v10 = vunpack.c.h.bf16 %v385_v54  ;;  %396 = vst [vmem:[%s545_s4 + $0x10] sm:$0xff] %v354_v0   ;;  %v331_v14 = vunpack.c.l.bf16 %v392_v63  ;;  %v332_v15 = vunpack.c.h.bf16 %v392_v63 }
  0x11   :  { %v150_v12 = vmax.f32 %v134_v2, 0.0  ;;  %v66_v13 = vmul.f32 %v299_v4, %v433_v1  ;;  %v87_v16 = vadd.f32 %v447_v7, %v64_v8  ;;  %v88_v17 = vadd.f32 %v447_v7, %v65_v9 }
  0x12   :  { %v67_v18 = vmul.f32 %v300_v10, %v433_v1  ;;  %v303_v19 = vunpack.c.l.bf16 %v386_v5  ;;  %v304_v23 = vunpack.c.h.bf16 %v386_v5  ;;  %v335_v24 = vunpack.c.l.bf16 %v393_v11 }
  0x13   :  { %v359_v21 = vpack.c.bf16 %v150_v12, %v149_v6  ;;  %v89_v22 = vadd.f32 %v447_v7, %v66_v13  ;;  %v135_v25 = vadd.f32 %v327_v62, %v87_v16  ;;  %v136_v26 = vadd.f32 %v328_v3, %v88_v17 }
  0x14   :  { %v90_v27 = vadd.f32 %v447_v7, %v67_v18  ;;  %v68_v28 = vmul.f32 %v303_v19, %v433_v1  ;;  %v69_v30 = vmul.f32 %v304_v23, %v433_v1  ;;  %v336_v31 = vunpack.c.h.bf16 %v393_v11 }
  0x15   :  { %397 = vst [vmem:[%s545_s4 + $0x18] sm:$0xff] %v359_v21   ;;  %v137_v29 = vadd.f32 %v331_v14, %v89_v22  ;;  %v307_v32 = vunpack.c.l.bf16 %v387_v20  ;;  %v151_v34 = vmax.f32 %v135_v25, 0.0  ;;  %v152_v35 = vmax.f32 %v136_v26, 0.0 }
  0x16   :  { %v138_v36 = vadd.f32 %v332_v15, %v90_v27  ;;  %v91_v37 = vadd.f32 %v447_v7, %v68_v28  ;;  %v92_v39 = vadd.f32 %v447_v7, %v69_v30  ;;  %v308_v40 = vunpack.c.h.bf16 %v387_v20 }
  0x17   :  { %v153_v38 = vmax.f32 %v137_v29, 0.0  ;;  %v70_v41 = vmul.f32 %v307_v32, %v433_v1  ;;  %v364_v42 = vpack.c.bf16 %v152_v35, %v151_v34  ;;  %v339_v45 = vunpack.c.l.bf16 %v394_v33 }
  0x18   :  { %v154_v43 = vmax.f32 %v138_v36, 0.0  ;;  %v139_v44 = vadd.f32 %v335_v24, %v91_v37  ;;  %v140_v46 = vadd.f32 %v336_v31, %v92_v39  ;;  %v71_v47 = vmul.f32 %v308_v40, %v433_v1 }
  0x19   :  { %v93_v48 = vadd.f32 %v447_v7, %v70_v41  ;;  %v340_v49 = vunpack.c.h.bf16 %v394_v33  ;;  %398 = vst [vmem:[%s545_s4 + $0x20] sm:$0xff] %v364_v42  }
  0x1a   :  { %v369_v50 = vpack.c.bf16 %v154_v43, %v153_v38  ;;  %v155_v51 = vmax.f32 %v139_v44, 0.0  ;;  %v156_v52 = vmax.f32 %v140_v46, 0.0  ;;  %v94_v53 = vadd.f32 %v447_v7, %v71_v47 }
  0x1b   :  { %v141_v54 = vadd.f32 %v339_v45, %v93_v48 }
  0x1c   :  { %399 = vst [vmem:[%s545_s4 + $0x28] sm:$0xff] %v369_v50   ;;  %v374_v55 = vpack.c.bf16 %v156_v52, %v155_v51  ;;  %v142_v56 = vadd.f32 %v340_v49, %v94_v53 }
  0x1d   :  { %v157_v1 = vmax.f32 %v141_v54, 0.0 }
  0x1e   :  { %400 = vst [vmem:[%s545_s4 + $0x30] sm:$0xff] %v374_v55   ;;  %v158_v57 = vmax.f32 %v142_v56, 0.0 }
  0x20   :  { %v379_v58 = vpack.c.bf16 %v158_v57, %v157_v1 }
  0x22   :  { %401 = vst [vmem:[%s545_s4 + $0x38] sm:$0xff] %v379_v58  }

// kernel: resnet_forward.36
= control target key start
LH: loop header
LB: loop body
LE: loop exit
PB: predicated region body
PF: predicated region fallthrough
CT: control target
= control target key end

     0   :  { %s97_s0 = inlined_call_operand.vmem [shape: bf16[16,128], index: 0, kind: input, shape index: {}]   ;;  %s98_s1 = inlined_call_operand.vmem [shape: f32[1,128], index: 1, kind: input, shape index: {}]   ;;  %s99_s2 = inlined_call_operand.vmem [shape: f32[1,128], index: 2, kind: input, shape index: {}]   ;;  %s100_s3 = inlined_call_operand.vmem [shape: bf16[16,128], index: 3, kind: output, shape index: {}]  }
   0x1   :  { %v57_v0 = vld [vmem:[%s97_s0] sm:$0xff]  }
   0x2   :  { %v50_v1 = vld [vmem:[%s98_s1] ss:$0 sm:$0xff]  ;;  %v58_v2 = vunpack.c.l.bf16 %v57_v0  ;;  %v59_v3 = vunpack.c.h.bf16 %v57_v0 }
   0x3   :  { %v51_v4 = vld [vmem:[%s99_s2] ss:$0 sm:$0xff] }
   0x4   :  { %v25_v5 = vmul.f32 %v58_v2, %v50_v1  ;;  %v26_v6 = vmul.f32 %v59_v3, %v50_v1 }
   0x6   :  { %v34_v7 = vadd.f32 %v51_v4, %v25_v5  ;;  %v35_v8 = vadd.f32 %v51_v4, %v26_v6 }
   0x8   :  { %v63_v9 = vpack.c.bf16 %v35_v8, %v34_v7 }
   0xa   :  { %64 = vst [vmem:[%s100_s3] sm:$0xff] %v63_v9  }

// kernel: resnet_forward.35
= control target key start
LH: loop header
LB: loop body
LE: loop exit
PB: predicated region body
PF: predicated region fallthrough
CT: control target
= control target key end

     0   :  { %v243_v0 = vmov 0.0   ;;  %vm244_vm0 = vmmov 0   ;;  %s306_s1 = inlined_call_operand.vmem [shape: bf16[128,128], index: 1, kind: input, shape index: {}]   ;;  %s307_s0 = inlined_call_operand.vmem [shape: bf16[16,128], index: 0, kind: input, shape index: {}]   ;;  %s308_s2 = inlined_call_operand.vmem [shape: bf16[16,128], index: 2, kind: output, shape index: {0}]   ;;  %s309_s3 = inlined_call_operand.vmem [shape: f32[8,128], index: 3, kind: output, shape index: {1}]   ;;  %s310_s4 = inlined_call_operand.vmem [shape: f32[8,128], index: 4, kind: output, shape index: {2}]  }
   0x1   :  { %212 = vmatprep.subr.bf16.mxu0 %v243_v0  ;;  %v234_v1 = vld [vmem:[%s306_s1] sm:$0xff]   ;;  %228 = vmatprep.mubr.msk.bf16.mxu0 %vm244_vm0, %v243_v0  ;;  %v235_v2 = vld [vmem:[%s306_s1 + $0x8] sm:$0xff]   ;;  %v236_v3 = vld [vmem:[%s306_s1 + $0x10] sm:$0xff]  }
   0x2   :  { %213 = vmatpush3.bf16.msra.mxu0 %v234_v1  ;;  %v237_v4 = vld [vmem:[%s306_s1 + $0x18] sm:$0xff]   ;;  %v238_v5 = vld [vmem:[%s306_s1 + $0x20] sm:$0xff]   ;;  %v239_v6 = vld [vmem:[%s306_s1 + $0x28] sm:$0xff]  }
   0x3   :  { %214 = vmatprep.subr.bf16.mxu0 %v243_v0  ;;  %v240_v7 = vld [vmem:[%s306_s1 + $0x30] sm:$0xff]   ;;  %v241_v8 = vld [vmem:[%s306_s1 + $0x38] sm:$0xff]   ;;  %v242_v9 = vld [vmem:[%s307_s0] sm:$0xff]  }
   0x6   :  { %215 = vmatpush3.bf16.msra.mxu0 %v235_v2 }
   0x7   :  { %216 = vmatprep.subr.bf16.mxu0 %v243_v0 }
   0xa   :  { %217 = vmatpush3.bf16.msra.mxu0 %v236_v3 }
   0xb   :  { %218 = vmatprep.subr.bf16.mxu0 %v243_v0 }
   0xe   :  { %219 = vmatpush3.bf16.msra.mxu0 %v237_v4 }
   0xf   :  { %220 = vmatprep.subr.bf16.mxu0 %v243_v0 }
  0x12   :  { %221 = vmatpush3.bf16.msra.mxu0 %v238_v5 }
  0x13   :  { %222 = vmatprep.subr.bf16.mxu0 %v243_v0 }
  0x16   :  { %223 = vmatpush3.bf16.msra.mxu0 %v239_v6 }
  0x17   :  { %224 = vmatprep.subr.bf16.mxu0 %v243_v0 }
  0x1a   :  { %225 = vmatpush3.bf16.msra.mxu0 %v240_v7 }
  0x1b   :  { %226 = vmatprep.subr.bf16.mxu0 %v243_v0 }
  0x1e   :  { %227 = vmatpush3.bf16.msra.mxu0 %v241_v8 }
  0x21   :  { %229 = vmatmul.mubr.bf16.vlgmr.msra.gmra.mrb[0].mxu0 %v242_v9 }
  0xf4   :  { %v129_v10 = vpop.f32.mrb[0].mxu0 }
  0xf5   :  { %v230_v11 = vpop.f32.mrb[1].mxu0  ;;  %v162_v13 = vmul.f32 %v129_v10, %v129_v10 }
  0xf6   :  { %v132_v12 = vpop.f32.mrb[2].mxu0 }
  0xf7   :  { %v201_v14 = vpack.c.bf16 %v132_v12, %v129_v10  ;;  %v155_v15 = vadd.f32 %v132_v12, %v129_v10  ;;  %v163_v16 = vmul.f32 %v132_v12, %v132_v12  ;;  %v231_v17 = vpop.f32.mrb[3].mxu0 }
  0xf9   :  { %202 = vst [vmem:[%s308_s2] sm:$0xff] %v201_v14   ;;  %v156_v18 = vrot.slane %v155_v15, 4  ;;  %v164_v19 = vadd.f32 %v163_v16, %v162_v13 }
  0xfb   :  { %v157_v20 = vadd.f32 %v156_v18, %v155_v15  ;;  %v165_v21 = vrot.slane %v164_v19, 4 }
  0xfd   :  { %v158_v22 = vrot.slane %v157_v20, 2  ;;  %v166_v23 = vadd.f32 %v165_v21, %v164_v19 }
  0xff   :  { %v159_v24 = vadd.f32 %v158_v22, %v157_v20  ;;  %v167_v25 = vrot.slane %v166_v23, 2 }
 0x101   :  { %v160_v26 = vrot.slane %v159_v24, 1  ;;  %v168_v27 = vadd.f32 %v167_v25, %v166_v23 }
 0x103   :  { %v161_v28 = vadd.f32 %v160_v26, %v159_v24  ;;  %v169_v29 = vrot.slane %v168_v27, 1 }
 0x105   :  { %v170_v30 = vadd.f32 %v169_v29, %v168_v27  ;;  %171 = vst [vmem:[%s309_s3] sm:$0xff] %v161_v28 }
 0x107   :  { %172 = vst [vmem:[%s310_s4] sm:$0xff] %v170_v30 }

// kernel: resnet_forward.34
= control target key start
LH: loop header
LB: loop body
LE: loop exit
PB: predicated region body
PF: predicated region fallthrough
CT: control target
= control target key end

     0   :  { %s99_s0 = inlined_call_operand.vmem [shape: bf16[16,128], index: 0, kind: input, shape index: {}]   ;;  %s100_s1 = inlined_call_operand.vmem [shape: f32[1,128], index: 1, kind: input, shape index: {}]   ;;  %s101_s2 = inlined_call_operand.vmem [shape: f32[1,128], index: 2, kind: input, shape index: {}]   ;;  %s102_s3 = inlined_call_operand.vmem [shape: bf16[16,128], index: 3, kind: output, shape index: {}]  }
   0x1   :  { %v59_v0 = vld [vmem:[%s99_s0] sm:$0xff]  }
   0x2   :  { %v52_v1 = vld [vmem:[%s100_s1] ss:$0 sm:$0xff]  ;;  %v60_v2 = vunpack.c.l.bf16 %v59_v0  ;;  %v61_v3 = vunpack.c.h.bf16 %v59_v0 }
   0x3   :  { %v53_v4 = vld [vmem:[%s101_s2] ss:$0 sm:$0xff] }
   0x4   :  { %v25_v5 = vmul.f32 %v60_v2, %v52_v1  ;;  %v26_v6 = vmul.f32 %v61_v3, %v52_v1 }
   0x6   :  { %v34_v7 = vadd.f32 %v53_v4, %v25_v5  ;;  %v35_v8 = vadd.f32 %v53_v4, %v26_v6 }
   0x8   :  { %v36_v9 = vmax.f32 %v34_v7, 0.0  ;;  %v37_v10 = vmax.f32 %v35_v8, 0.0 }
   0xa   :  { %v65_v11 = vpack.c.bf16 %v37_v10, %v36_v9 }
   0xc   :  { %66 = vst [vmem:[%s102_s3] sm:$0xff] %v65_v11  }

// kernel: resnet_forward.33
= control target key start
LH: loop header
LB: loop body
LE: loop exit
PB: predicated region body
PF: predicated region fallthrough
CT: control target
= control target key end

     0   :  { %s409_s1 = inlined_call_operand.vmem [shape: bf16[256,128], index: 1, kind: input, shape index: {}]   ;;  %s410_s0 = inlined_call_operand.vmem [shape: bf16[16,256], index: 0, kind: input, shape index: {}]   ;;  %s411_s2 = inlined_call_operand.vmem [shape: bf16[16,128], index: 2, kind: output, shape index: {0}]   ;;  %s412_s3 = inlined_call_operand.vmem [shape: f32[8,128], index: 3, kind: output, shape index: {1}]   ;;  %s413_s4 = inlined_call_operand.vmem [shape: f32[8,128], index: 4, kind: output, shape index: {2}]  }
   0x1   :  { %v302_v0 = vld [vmem:[%s409_s1 + $0x40] sm:$0xff]   ;;  %v304_v2 = vld [vmem:[%s409_s1 + $0x48] sm:$0xff]   ;;  %v306_v4 = vld [vmem:[%s409_s1 + $0x50] sm:$0xff]  }
   0x2   :  { %v303_v1 = vld [vmem:[%s409_s1] sm:$0xff]   ;;  %280 = vmatprep.subr.bf16.mxu0 %v302_v0  ;;  %v305_v3 = vld [vmem:[%s409_s1 + $0x8] sm:$0xff]   ;;  %v307_v5 = vld [vmem:[%s409_s1 + $0x10] sm:$0xff]  }
   0x3   :  { %281 = vmatpush3.bf16.msra.mxu0 %v303_v1  ;;  %v308_v6 = vld [vmem:[%s409_s1 + $0x58] sm:$0xff]   ;;  %v310_v8 = vld [vmem:[%s409_s1 + $0x60] sm:$0xff]   ;;  %v312_v10 = vld [vmem:[%s409_s1 + $0x68] sm:$0xff]  }
   0x4   :  { %282 = vmatprep.subr.bf16.mxu0 %v304_v2  ;;  %v309_v7 = vld [vmem:[%s409_s1 + $0x18] sm:$0xff]   ;;  %v311_v9 = vld [vmem:[%s409_s1 + $0x20] sm:$0xff]   ;;  %v313_v12 = vld [vmem:[%s409_s1 + $0x28] sm:$0xff]  }
   0x5   :  { %v320_v11 = vld [vmem:[%s410_s0 + $0x4] ss:$8 sps:$4 sm:$0xff]   ;;  %v314_v13 = vld [vmem:[%s409_s1 + $0x70] sm:$0xff]   ;;  %v316_v15 = vld [vmem:[%s409_s1 + $0x78] sm:$0xff]  }
   0x6   :  { %195 = vmatprep.mubr.bf16.mxu0 %v320_v11  ;;  %v315_v14 = vld [vmem:[%s409_s1 + $0x30] sm:$0xff]   ;;  %v317_v16 = vld [vmem:[%s409_s1 + $0x38] sm:$0xff]   ;;  %v318_v17 = vld [vmem:[%s410_s0] ss:$8 sps:$4 sm:$0xff]  }
   0x7   :  { %283 = vmatpush3.bf16.msra.mxu0 %v305_v3 }
   0x8   :  { %284 = vmatprep.subr.bf16.mxu0 %v306_v4 }
   0xb   :  { %285 = vmatpush3.bf16.msra.mxu0 %v307_v5 }
   0xc   :  { %286 = vmatprep.subr.bf16.mxu0 %v308_v6 }
   0xf   :  { %287 = vmatpush3.bf16.msra.mxu0 %v309_v7 }
  0x10   :  { %288 = vmatprep.subr.bf16.mxu0 %v310_v8 }
  0x13   :  { %289 = vmatpush3.bf16.msra.mxu0 %v311_v9 }
  0x14   :  { %290 = vmatprep.subr.bf16.mxu0 %v312_v10 }
  0x17   :  { %291 = vmatpush3.bf16.msra.mxu0 %v313_v12 }
  0x18   :  { %292 = vmatprep.subr.bf16.mxu0 %v314_v13 }
  0x1b   :  { %293 = vmatpush3.bf16.msra.mxu0 %v315_v14 }
  0x1c   :  { %294 = vmatprep.subr.bf16.mxu0 %v316_v15 }
  0x1f   :  { %295 = vmatpush3.bf16.msra.mxu0 %v317_v16 }
  0x22   :  { %196 = vmatmul.mubr.bf16.vlgmr.msra.gmra.mrb[0].mxu0 %v318_v17 }
  0xf5   :  { %v296_v18 = vpop.f32.mrb[0].mxu0 }
  0xf6   :  { %v297_v19 = vpop.f32.mrb[1].mxu0 }
  0xf7   :  { %v298_v20 = vadd.f32 %v297_v19, %v296_v18  ;;  %v299_v21 = vpop.f32.mrb[2].mxu0 }
  0xf8   :  { %v300_v22 = vpop.f32.mrb[3].mxu0 }
  0xf9   :  { %v301_v23 = vadd.f32 %v300_v22, %v299_v21  ;;  %v230_v24 = vmul.f32 %v298_v20, %v298_v20 }
  0xfb   :  { %v278_v25 = vpack.c.bf16 %v301_v23, %v298_v20  ;;  %v223_v26 = vadd.f32 %v301_v23, %v298_v20  ;;  %v231_v27 = vmul.f32 %v301_v23, %v301_v23 }
  0xfd   :  { %279 = vst [vmem:[%s411_s2] sm:$0xff] %v278_v25   ;;  %v224_v28 = vrot.slane %v223_v26, 4  ;;  %v232_v29 = vadd.f32 %v231_v27, %v230_v24 }
  0xff   :  { %v225_v30 = vadd.f32 %v224_v28, %v223_v26  ;;  %v233_v31 = vrot.slane %v232_v29, 4 }
 0x101   :  { %v226_v32 = vrot.slane %v225_v30, 2  ;;  %v234_v33 = vadd.f32 %v233_v31, %v232_v29 }
 0x103   :  { %v227_v34 = vadd.f32 %v226_v32, %v225_v30  ;;  %v235_v35 = vrot.slane %v234_v33, 2 }
 0x105   :  { %v228_v36 = vrot.slane %v227_v34, 1  ;;  %v236_v37 = vadd.f32 %v235_v35, %v234_v33 }
 0x107   :  { %v229_v38 = vadd.f32 %v228_v36, %v227_v34  ;;  %v237_v39 = vrot.slane %v236_v37, 1 }
 0x109   :  { %v238_v40 = vadd.f32 %v237_v39, %v236_v37  ;;  %239 = vst [vmem:[%s412_s3] sm:$0xff] %v229_v38 }
 0x10b   :  { %240 = vst [vmem:[%s413_s4] sm:$0xff] %v238_v40 }

// kernel: resnet_forward.38
= control target key start
LH: loop header
LB: loop body
LE: loop exit
PB: predicated region body
PF: predicated region fallthrough
CT: control target
= control target key end

     0   :  { %s120_s0 = inlined_call_operand.vmem [shape: bf16[16,128], index: 0, kind: input, shape index: {}]   ;;  %s121_s1 = inlined_call_operand.vmem [shape: f32[1,128], index: 1, kind: input, shape index: {}]   ;;  %s122_s2 = inlined_call_operand.vmem [shape: f32[1,128], index: 2, kind: input, shape index: {}]   ;;  %s123_s3 = inlined_call_operand.vmem [shape: bf16[16,128], index: 3, kind: input, shape index: {}]   ;;  %s124_s4 = inlined_call_operand.vmem [shape: bf16[16,128], index: 4, kind: output, shape index: {}]  }
   0x1   :  { %v68_v0 = vld [vmem:[%s120_s0] sm:$0xff]  }
   0x2   :  { %v61_v1 = vld [vmem:[%s121_s1] ss:$0 sm:$0xff]  ;;  %v69_v2 = vunpack.c.l.bf16 %v68_v0  ;;  %v70_v3 = vunpack.c.h.bf16 %v68_v0 }
   0x3   :  { %v72_v4 = vld [vmem:[%s123_s3] sm:$0xff]  }
   0x4   :  { %v62_v5 = vld [vmem:[%s122_s2] ss:$0 sm:$0xff]  ;;  %v28_v6 = vmul.f32 %v69_v2, %v61_v1  ;;  %v29_v7 = vmul.f32 %v70_v3, %v61_v1  ;;  %v73_v8 = vunpack.c.l.bf16 %v72_v4  ;;  %v74_v9 = vunpack.c.h.bf16 %v72_v4 }
   0x6   :  { %v37_v10 = vadd.f32 %v62_v5, %v28_v6  ;;  %v38_v11 = vadd.f32 %v62_v5, %v29_v7 }
   0x8   :  { %v43_v12 = vadd.f32 %v73_v8, %v37_v10  ;;  %v44_v13 = vadd.f32 %v74_v9, %v38_v11 }
   0xa   :  { %v45_v14 = vmax.f32 %v43_v12, 0.0  ;;  %v46_v15 = vmax.f32 %v44_v13, 0.0 }
   0xc   :  { %v78_v16 = vpack.c.bf16 %v46_v15, %v45_v14 }
   0xe   :  { %79 = vst [vmem:[%s124_s4] sm:$0xff] %v78_v16  }

// kernel: resnet_forward.37
= control target key start
LH: loop header
LB: loop body
LE: loop exit
PB: predicated region body
PF: predicated region fallthrough
CT: control target
= control target key end

     0   :  { %s703_s1 = inlined_call_operand.vmem [shape: bf16[512,128], index: 1, kind: input, shape index: {}]   ;;  %s704_s0 = inlined_call_operand.vmem [shape: bf16[16,512], index: 0, kind: input, shape index: {}]   ;;  %s705_s2 = inlined_call_operand.vmem [shape: bf16[16,128], index: 2, kind: output, shape index: {0}]   ;;  %s706_s3 = inlined_call_operand.vmem [shape: f32[8,128], index: 3, kind: output, shape index: {1}]   ;;  %s707_s4 = inlined_call_operand.vmem [shape: f32[8,128], index: 4, kind: output, shape index: {2}]  }
   0x1   :  { %v523_v0 = vld [vmem:[%s703_s1 + $0x40] sm:$0xff]   ;;  %v527_v4 = vld [vmem:[%s703_s1 + $0x48] sm:$0xff]   ;;  %v531_v8 = vld [vmem:[%s703_s1 + $0x50] sm:$0xff]  }
   0x2   :  { %v524_v1 = vld [vmem:[%s703_s1 + $0xc0] sm:$0xff]   ;;  %479 = vmatprep.subr.bf16.mxu0 %v523_v0  ;;  %v528_v5 = vld [vmem:[%s703_s1 + $0xc8] sm:$0xff]   ;;  %v532_v9 = vld [vmem:[%s703_s1 + $0xd0] sm:$0xff]  }
   0x3   :  { %v525_v2 = vld [vmem:[%s703_s1] sm:$0xff]   ;;  %501 = vmatprep.subr.bf16.mxu1 %v524_v1  ;;  %v529_v6 = vld [vmem:[%s703_s1 + $0x8] sm:$0xff]   ;;  %v533_v10 = vld [vmem:[%s703_s1 + $0x10] sm:$0xff]  }
   0x4   :  { %v526_v3 = vld [vmem:[%s703_s1 + $0x80] sm:$0xff]   ;;  %480 = vmatpush3.bf16.msra.mxu0 %v525_v2  ;;  %v530_v7 = vld [vmem:[%s703_s1 + $0x88] sm:$0xff]   ;;  %v534_v11 = vld [vmem:[%s703_s1 + $0x90] sm:$0xff]  }
   0x5   :  { %502 = vmatpush3.bf16.msra.mxu1 %v526_v3  ;;  %481 = vmatprep.subr.bf16.mxu0 %v527_v4  ;;  %v535_v12 = vld [vmem:[%s703_s1 + $0x58] sm:$0xff]   ;;  %v539_v16 = vld [vmem:[%s703_s1 + $0x60] sm:$0xff]   ;;  %v543_v20 = vld [vmem:[%s703_s1 + $0x68] sm:$0xff]  }
   0x6   :  { %503 = vmatprep.subr.bf16.mxu1 %v528_v5  ;;  %v536_v13 = vld [vmem:[%s703_s1 + $0xd8] sm:$0xff]   ;;  %v540_v17 = vld [vmem:[%s703_s1 + $0xe0] sm:$0xff]   ;;  %v544_v21 = vld [vmem:[%s703_s1 + $0xe8] sm:$0xff]  }
   0x7   :  { %v537_v14 = vld [vmem:[%s703_s1 + $0x18] sm:$0xff]   ;;  %v541_v18 = vld [vmem:[%s703_s1 + $0x20] sm:$0xff]   ;;  %v545_v22 = vld [vmem:[%s703_s1 + $0x28] sm:$0xff]  }
   0x8   :  { %482 = vmatpush3.bf16.msra.mxu0 %v529_v6  ;;  %v538_v15 = vld [vmem:[%s703_s1 + $0x98] sm:$0xff]   ;;  %v542_v19 = vld [vmem:[%s703_s1 + $0xa0] sm:$0xff]   ;;  %v546_v23 = vld [vmem:[%s703_s1 + $0xa8] sm:$0xff]  }
   0x9   :  { %504 = vmatpush3.bf16.msra.mxu1 %v530_v7  ;;  %483 = vmatprep.subr.bf16.mxu0 %v531_v8  ;;  %v547_v24 = vld [vmem:[%s703_s1 + $0x70] sm:$0xff]   ;;  %v551_v28 = vld [vmem:[%s703_s1 + $0x78] sm:$0xff]  }
   0xa   :  { %505 = vmatprep.subr.bf16.mxu1 %v532_v9  ;;  %v548_v25 = vld [vmem:[%s703_s1 + $0xf0] sm:$0xff]   ;;  %v552_v29 = vld [vmem:[%s703_s1 + $0xf8] sm:$0xff]  }
   0xb   :  { %v549_v26 = vld [vmem:[%s703_s1 + $0x30] sm:$0xff]   ;;  %v553_v30 = vld [vmem:[%s703_s1 + $0x38] sm:$0xff]  }
   0xc   :  { %484 = vmatpush3.bf16.msra.mxu0 %v533_v10  ;;  %v550_v27 = vld [vmem:[%s703_s1 + $0xb0] sm:$0xff]   ;;  %v554_v31 = vld [vmem:[%s703_s1 + $0xb8] sm:$0xff]  }
   0xd   :  { %506 = vmatpush3.bf16.msra.mxu1 %v534_v11  ;;  %485 = vmatprep.subr.bf16.mxu0 %v535_v12  ;;  %v555_v32 = vld [vmem:[%s704_s0] ss:$16 sps:$4 sm:$0xff]   ;;  %v557_v33 = vld [vmem:[%s704_s0 + $0x4] ss:$16 sps:$4 sm:$0xff]   ;;  %v558_v34 = vld [vmem:[%s704_s0 + $0x8] ss:$16 sps:$4 sm:$0xff]  }
   0xe   :  { %507 = vmatprep.subr.bf16.mxu1 %v536_v13  ;;  %v560_v35 = vld [vmem:[%s704_s0 + $0xc] ss:$16 sps:$4 sm:$0xff]   ;;  %335 = vmatprep.mubr.bf16.mxu0 %v557_v33 }
   0xf   :  { %376 = vmatprep.mubr.bf16.mxu1 %v560_v35 }
  0x10   :  { %486 = vmatpush3.bf16.msra.mxu0 %v537_v14 }
  0x11   :  { %508 = vmatpush3.bf16.msra.mxu1 %v538_v15  ;;  %487 = vmatprep.subr.bf16.mxu0 %v539_v16 }
  0x12   :  { %509 = vmatprep.subr.bf16.mxu1 %v540_v17 }
  0x14   :  { %488 = vmatpush3.bf16.msra.mxu0 %v541_v18 }
  0x15   :  { %510 = vmatpush3.bf16.msra.mxu1 %v542_v19  ;;  %489 = vmatprep.subr.bf16.mxu0 %v543_v20 }
  0x16   :  { %511 = vmatprep.subr.bf16.mxu1 %v544_v21 }
  0x18   :  { %490 = vmatpush3.bf16.msra.mxu0 %v545_v22 }
  0x19   :  { %512 = vmatpush3.bf16.msra.mxu1 %v546_v23  ;;  %491 = vmatprep.subr.bf16.mxu0 %v547_v24 }
  0x1a   :  { %513 = vmatprep.subr.bf16.mxu1 %v548_v25 }
  0x1c   :  { %492 = vmatpush3.bf16.msra.mxu0 %v549_v26 }
  0x1d   :  { %514 = vmatpush3.bf16.msra.mxu1 %v550_v27  ;;  %493 = vmatprep.subr.bf16.mxu0 %v551_v28 }
  0x1e   :  { %515 = vmatprep.subr.bf16.mxu1 %v552_v29 }
  0x20   :  { %494 = vmatpush3.bf16.msra.mxu0 %v553_v30 }
  0x21   :  { %516 = vmatpush3.bf16.msra.mxu1 %v554_v31 }
  0x23   :  { %336 = vmatmul.mubr.bf16.vlgmr.msra.gmra.mrb[0].mxu0 %v555_v32 }
  0x24   :  { %377 = vmatmul.mubr.bf16.vlgmr.msra.gmra.mrb[0].mxu1 %v558_v34 }
  0xf6   :  { %v495_v36 = vpop.f32.mrb[0].mxu0 }
  0xf7   :  { %v517_v37 = vpop.f32.mrb[0].mxu1  ;;  %v496_v38 = vpop.f32.mrb[1].mxu0 }
  0xf8   :  { %v497_v39 = vadd.f32 %v496_v38, %v495_v36  ;;  %v518_v40 = vpop.f32.mrb[1].mxu1  ;;  %v498_v41 = vpop.f32.mrb[2].mxu0 }
  0xf9   :  { %v519_v42 = vadd.f32 %v518_v40, %v517_v37  ;;  %v520_v43 = vpop.f32.mrb[2].mxu1  ;;  %v499_v44 = vpop.f32.mrb[3].mxu0 }
  0xfa   :  { %v500_v45 = vadd.f32 %v499_v44, %v498_v41  ;;  %v521_v46 = vpop.f32.mrb[3].mxu1 }
  0xfb   :  { %v379_v47 = vadd.f32 %v519_v42, %v497_v39  ;;  %v522_v48 = vadd.f32 %v521_v46, %v520_v43 }
  0xfd   :  { %v382_v49 = vadd.f32 %v522_v48, %v500_v45  ;;  %v411_v50 = vmul.f32 %v379_v47, %v379_v47 }
  0xff   :  { %v477_v51 = vpack.c.bf16 %v382_v49, %v379_v47  ;;  %v404_v52 = vadd.f32 %v382_v49, %v379_v47  ;;  %v412_v53 = vmul.f32 %v382_v49, %v382_v49 }
 0x101   :  { %478 = vst [vmem:[%s705_s2] sm:$0xff] %v477_v51   ;;  %v405_v54 = vrot.slane %v404_v52, 4  ;;  %v413_v55 = vadd.f32 %v412_v53, %v411_v50 }
 0x103   :  { %v406_v56 = vadd.f32 %v405_v54, %v404_v52  ;;  %v414_v57 = vrot.slane %v413_v55, 4 }
 0x105   :  { %v407_v58 = vrot.slane %v406_v56, 2  ;;  %v415_v59 = vadd.f32 %v414_v57, %v413_v55 }
 0x107   :  { %v408_v60 = vadd.f32 %v407_v58, %v406_v56  ;;  %v416_v61 = vrot.slane %v415_v59, 2 }
 0x109   :  { %v409_v62 = vrot.slane %v408_v60, 1  ;;  %v417_v63 = vadd.f32 %v416_v61, %v415_v59 }
 0x10b   :  { %v410_v0 = vadd.f32 %v409_v62, %v408_v60  ;;  %v418_v1 = vrot.slane %v417_v63, 1 }
 0x10d   :  { %v419_v2 = vadd.f32 %v418_v1, %v417_v63  ;;  %420 = vst [vmem:[%s706_s3] sm:$0xff] %v410_v0 }
 0x10f   :  { %421 = vst [vmem:[%s707_s4] sm:$0xff] %v419_v2 }

// kernel: resnet_forward.43
= control target key start
LH: loop header
LB: loop body
LE: loop exit
PB: predicated region body
PF: predicated region fallthrough
CT: control target
= control target key end

     0   :  { %v963_v36 = vmov 0.0   ;;  %vm964_vm0 = vmmov 0   ;;  %s1188_s1 = inlined_call_operand.vmem [shape: bf16[896,128], index: 1, kind: input, shape index: {}]   ;;  %s1189_s0 = inlined_call_operand.vmem [shape: bf16[16,896], index: 0, kind: input, shape index: {}]   ;;  %s1190_s2 = inlined_call_operand.vmem [shape: bf16[16,128], index: 2, kind: output, shape index: {0}]   ;;  %s1191_s3 = inlined_call_operand.vmem [shape: f32[8,128], index: 3, kind: output, shape index: {1}]   ;;  %s1192_s4 = inlined_call_operand.vmem [shape: f32[8,128], index: 4, kind: output, shape index: {2}]  }
   0x1   :  { %v897_v0 = vld [vmem:[%s1188_s1 + $0x40] sm:$0xff]   ;;  %v901_v4 = vld [vmem:[%s1188_s1 + $0x48] sm:$0xff]   ;;  %v905_v8 = vld [vmem:[%s1188_s1 + $0x50] sm:$0xff]  }
   0x2   :  { %v898_v1 = vld [vmem:[%s1188_s1 + $0xc0] sm:$0xff]   ;;  %800 = vmatprep.subr.bf16.mxu0 %v897_v0  ;;  %v902_v5 = vld [vmem:[%s1188_s1 + $0xc8] sm:$0xff]   ;;  %v906_v9 = vld [vmem:[%s1188_s1 + $0xd0] sm:$0xff]  }
   0x3   :  { %v899_v2 = vld [vmem:[%s1188_s1] sm:$0xff]   ;;  %822 = vmatprep.subr.bf16.mxu1 %v898_v1  ;;  %v903_v6 = vld [vmem:[%s1188_s1 + $0x8] sm:$0xff]   ;;  %v907_v10 = vld [vmem:[%s1188_s1 + $0x10] sm:$0xff]  }
   0x4   :  { %v900_v3 = vld [vmem:[%s1188_s1 + $0x80] sm:$0xff]   ;;  %801 = vmatpush3.bf16.msra.mxu0 %v899_v2  ;;  %v904_v7 = vld [vmem:[%s1188_s1 + $0x88] sm:$0xff]   ;;  %v908_v11 = vld [vmem:[%s1188_s1 + $0x90] sm:$0xff]  }
   0x5   :  { %823 = vmatpush3.bf16.msra.mxu1 %v900_v3  ;;  %802 = vmatprep.subr.bf16.mxu0 %v901_v4  ;;  %v909_v12 = vld [vmem:[%s1188_s1 + $0x58] sm:$0xff]   ;;  %v913_v16 = vld [vmem:[%s1188_s1 + $0x60] sm:$0xff]   ;;  %v917_v20 = vld [vmem:[%s1188_s1 + $0x68] sm:$0xff]  }
   0x6   :  { %824 = vmatprep.subr.bf16.mxu1 %v902_v5  ;;  %v910_v13 = vld [vmem:[%s1188_s1 + $0xd8] sm:$0xff]   ;;  %v914_v17 = vld [vmem:[%s1188_s1 + $0xe0] sm:$0xff]   ;;  %v918_v21 = vld [vmem:[%s1188_s1 + $0xe8] sm:$0xff]  }
   0x7   :  { %v911_v14 = vld [vmem:[%s1188_s1 + $0x18] sm:$0xff]   ;;  %v915_v18 = vld [vmem:[%s1188_s1 + $0x20] sm:$0xff]   ;;  %v919_v22 = vld [vmem:[%s1188_s1 + $0x28] sm:$0xff]  }
   0x8   :  { %803 = vmatpush3.bf16.msra.mxu0 %v903_v6  ;;  %v912_v15 = vld [vmem:[%s1188_s1 + $0x98] sm:$0xff]   ;;  %v916_v19 = vld [vmem:[%s1188_s1 + $0xa0] sm:$0xff]   ;;  %v920_v23 = vld [vmem:[%s1188_s1 + $0xa8] sm:$0xff]  }
   0x9   :  { %825 = vmatpush3.bf16.msra.mxu1 %v904_v7  ;;  %804 = vmatprep.subr.bf16.mxu0 %v905_v8  ;;  %v921_v24 = vld [vmem:[%s1188_s1 + $0x70] sm:$0xff]   ;;  %v925_v28 = vld [vmem:[%s1188_s1 + $0x78] sm:$0xff]   ;;  %v931_v33 = vld [vmem:[%s1189_s0 + $0x4] ss:$28 sps:$4 sm:$0xff]  }
   0xa   :  { %826 = vmatprep.subr.bf16.mxu1 %v906_v9  ;;  %v922_v25 = vld [vmem:[%s1188_s1 + $0xf0] sm:$0xff]   ;;  %v926_v29 = vld [vmem:[%s1188_s1 + $0xf8] sm:$0xff]   ;;  %v932_v34 = vld [vmem:[%s1189_s0 + $0x8] ss:$28 sps:$4 sm:$0xff]   ;;  %547 = vmatprep.mubr.bf16.mxu0 %v931_v33 }
   0xb   :  { %v923_v26 = vld [vmem:[%s1188_s1 + $0x30] sm:$0xff]   ;;  %v927_v30 = vld [vmem:[%s1188_s1 + $0x38] sm:$0xff]   ;;  %v934_v35 = vld [vmem:[%s1189_s0 + $0xc] ss:$28 sps:$4 sm:$0xff]  }
   0xc   :  { %805 = vmatpush3.bf16.msra.mxu0 %v907_v10  ;;  %v924_v27 = vld [vmem:[%s1188_s1 + $0xb0] sm:$0xff]   ;;  %v928_v31 = vld [vmem:[%s1188_s1 + $0xb8] sm:$0xff]   ;;  %v935_v37 = vld [vmem:[%s1188_s1 + $0x140] sm:$0xff]   ;;  %588 = vmatprep.mubr.bf16.mxu1 %v934_v35 }
   0xd   :  { %827 = vmatpush3.bf16.msra.mxu1 %v908_v11  ;;  %806 = vmatprep.subr.bf16.mxu0 %v909_v12  ;;  %v929_v32 = vld [vmem:[%s1189_s0] ss:$28 sps:$4 sm:$0xff]   ;;  %v938_v40 = vld [vmem:[%s1188_s1 + $0x148] sm:$0xff]   ;;  %v941_v43 = vld [vmem:[%s1188_s1 + $0x150] sm:$0xff]  }
   0xe   :  { %828 = vmatprep.subr.bf16.mxu1 %v910_v13  ;;  %v936_v38 = vld [vmem:[%s1188_s1 + $0x100] sm:$0xff]   ;;  %v939_v41 = vld [vmem:[%s1188_s1 + $0x108] sm:$0xff]   ;;  %v942_v44 = vld [vmem:[%s1188_s1 + $0x110] sm:$0xff]  }
   0xf   :  { %v937_v39 = vld [vmem:[%s1188_s1 + $0x180] sm:$0xff]   ;;  %v940_v42 = vld [vmem:[%s1188_s1 + $0x188] sm:$0xff]   ;;  %v943_v45 = vld [vmem:[%s1188_s1 + $0x190] sm:$0xff]  }
  0x10   :  { %807 = vmatpush3.bf16.msra.mxu0 %v911_v14  ;;  %v944_v46 = vld [vmem:[%s1188_s1 + $0x158] sm:$0xff]   ;;  %v947_v49 = vld [vmem:[%s1188_s1 + $0x160] sm:$0xff]   ;;  %v950_v52 = vld [vmem:[%s1188_s1 + $0x168] sm:$0xff]  }
  0x11   :  { %829 = vmatpush3.bf16.msra.mxu1 %v912_v15  ;;  %808 = vmatprep.subr.bf16.mxu0 %v913_v16  ;;  %v945_v47 = vld [vmem:[%s1188_s1 + $0x118] sm:$0xff]   ;;  %v948_v50 = vld [vmem:[%s1188_s1 + $0x120] sm:$0xff]   ;;  %v951_v53 = vld [vmem:[%s1188_s1 + $0x128] sm:$0xff]  }
  0x12   :  { %830 = vmatprep.subr.bf16.mxu1 %v914_v17  ;;  %v946_v48 = vld [vmem:[%s1188_s1 + $0x198] sm:$0xff]   ;;  %v949_v51 = vld [vmem:[%s1188_s1 + $0x1a0] sm:$0xff]   ;;  %v952_v54 = vld [vmem:[%s1188_s1 + $0x1a8] sm:$0xff]  }
  0x13   :  { %v953_v55 = vld [vmem:[%s1188_s1 + $0x170] sm:$0xff]   ;;  %v956_v59 = vld [vmem:[%s1188_s1 + $0x178] sm:$0xff]  }
  0x14   :  { %809 = vmatpush3.bf16.msra.mxu0 %v915_v18  ;;  %v954_v56 = vld [vmem:[%s1188_s1 + $0x130] sm:$0xff]   ;;  %v957_v60 = vld [vmem:[%s1188_s1 + $0x138] sm:$0xff]  }
  0x15   :  { %831 = vmatpush3.bf16.msra.mxu1 %v916_v19  ;;  %810 = vmatprep.subr.bf16.mxu0 %v917_v20  ;;  %v955_v57 = vld [vmem:[%s1188_s1 + $0x1b0] sm:$0xff]   ;;  %v961_v61 = vld [vmem:[%s1188_s1 + $0x1b8] sm:$0xff]  }
  0x16   :  { %832 = vmatprep.subr.bf16.mxu1 %v918_v21  ;;  %v960_v58 = vld [vmem:[%s1189_s0 + $0x14] ss:$28 sps:$4 sm:$0xff]  }
  0x17   :  { %v958_v62 = vld [vmem:[%s1189_s0 + $0x10] ss:$28 sps:$4 sm:$0xff]   ;;  %v962_v63 = vld [vmem:[%s1189_s0 + $0x18] ss:$28 sps:$4 sm:$0xff]  }
  0x18   :  { %811 = vmatpush3.bf16.msra.mxu0 %v919_v22 }
  0x19   :  { %833 = vmatpush3.bf16.msra.mxu1 %v920_v23  ;;  %812 = vmatprep.subr.bf16.mxu0 %v921_v24 }
  0x1a   :  { %834 = vmatprep.subr.bf16.mxu1 %v922_v25 }
  0x1c   :  { %813 = vmatpush3.bf16.msra.mxu0 %v923_v26 }
  0x1d   :  { %835 = vmatpush3.bf16.msra.mxu1 %v924_v27  ;;  %814 = vmatprep.subr.bf16.mxu0 %v925_v28 }
  0x1e   :  { %836 = vmatprep.subr.bf16.mxu1 %v926_v29 }
  0x20   :  { %815 = vmatpush3.bf16.msra.mxu0 %v927_v30 }
  0x21   :  { %837 = vmatpush3.bf16.msra.mxu1 %v928_v31  ;;  %844 = vmatprep.subr.bf16.mxu0 %v935_v37 }
  0x22   :  { %875 = vmatprep.subr.bf16.mxu1 %v963_v36 }
  0x23   :  { %548 = vmatmul.mubr.bf16.vlgmr.msra.gmra.mrb[0].mxu0 %v929_v32 }
  0x24   :  { %589 = vmatmul.mubr.bf16.vlgmr.msra.gmra.mrb[0].mxu1 %v932_v34  ;;  %845 = vmatpush3.bf16.msra.mxu0 %v936_v38 }
  0x25   :  { %891 = vmatprep.mubr.msk.bf16.mxu1 %vm964_vm0, %v963_v36  ;;  %876 = vmatpush3.bf16.msra.mxu1 %v937_v39 }
  0x26   :  { %846 = vmatprep.subr.bf16.mxu0 %v938_v40  ;;  %877 = vmatprep.subr.bf16.mxu1 %v963_v36 }
  0x27   :  { %629 = vmatprep.mubr.bf16.mxu0 %v960_v58 }
  0x28   :  { %847 = vmatpush3.bf16.msra.mxu0 %v939_v41 }
  0x29   :  { %878 = vmatpush3.bf16.msra.mxu1 %v940_v42  ;;  %848 = vmatprep.subr.bf16.mxu0 %v941_v43 }
  0x2a   :  { %879 = vmatprep.subr.bf16.mxu1 %v963_v36 }
  0x2c   :  { %849 = vmatpush3.bf16.msra.mxu0 %v942_v44 }
  0x2d   :  { %880 = vmatpush3.bf16.msra.mxu1 %v943_v45  ;;  %850 = vmatprep.subr.bf16.mxu0 %v944_v46 }
  0x2e   :  { %881 = vmatprep.subr.bf16.mxu1 %v963_v36 }
  0x30   :  { %851 = vmatpush3.bf16.msra.mxu0 %v945_v47 }
  0x31   :  { %882 = vmatpush3.bf16.msra.mxu1 %v946_v48  ;;  %852 = vmatprep.subr.bf16.mxu0 %v947_v49 }
  0x32   :  { %883 = vmatprep.subr.bf16.mxu1 %v963_v36 }
  0x34   :  { %853 = vmatpush3.bf16.msra.mxu0 %v948_v50 }
  0x35   :  { %884 = vmatpush3.bf16.msra.mxu1 %v949_v51  ;;  %854 = vmatprep.subr.bf16.mxu0 %v950_v52 }
  0x36   :  { %885 = vmatprep.subr.bf16.mxu1 %v963_v36 }
  0x38   :  { %855 = vmatpush3.bf16.msra.mxu0 %v951_v53 }
  0x39   :  { %886 = vmatpush3.bf16.msra.mxu1 %v952_v54  ;;  %856 = vmatprep.subr.bf16.mxu0 %v953_v55 }
  0x3a   :  { %887 = vmatprep.subr.bf16.mxu1 %v963_v36 }
  0x3c   :  { %857 = vmatpush3.bf16.msra.mxu0 %v954_v56 }
  0x3d   :  { %888 = vmatpush3.bf16.msra.mxu1 %v955_v57  ;;  %858 = vmatprep.subr.bf16.mxu0 %v956_v59 }
  0x3e   :  { %889 = vmatprep.subr.bf16.mxu1 %v963_v36 }
  0x40   :  { %859 = vmatpush3.bf16.msra.mxu0 %v957_v60 }
  0x41   :  { %890 = vmatpush3.bf16.msra.mxu1 %v961_v61 }
  0x43   :  { %630 = vmatmul.mubr.bf16.vlgmr.msra.gmra.mrb[4].mxu0 %v958_v62 }
  0x44   :  { %892 = vmatmul.mubr.bf16.vlgmr.msra.gmra.mrb[4].mxu1 %v962_v63 }
  0xf6   :  { %v816_v0 = vpop.f32.mrb[0].mxu0 }
  0xf7   :  { %v838_v1 = vpop.f32.mrb[0].mxu1  ;;  %v817_v2 = vpop.f32.mrb[1].mxu0 }
  0xf8   :  { %v818_v3 = vadd.f32 %v817_v2, %v816_v0  ;;  %v839_v4 = vpop.f32.mrb[1].mxu1  ;;  %v819_v5 = vpop.f32.mrb[2].mxu0 }
  0xf9   :  { %v840_v6 = vadd.f32 %v839_v4, %v838_v1  ;;  %v841_v7 = vpop.f32.mrb[2].mxu1  ;;  %v820_v8 = vpop.f32.mrb[3].mxu0 }
  0xfa   :  { %v821_v9 = vadd.f32 %v820_v8, %v819_v5  ;;  %v842_v10 = vpop.f32.mrb[3].mxu1 }
  0xfb   :  { %v591_v11 = vadd.f32 %v840_v6, %v818_v3  ;;  %v843_v12 = vadd.f32 %v842_v10, %v841_v7 }
  0xfd   :  { %v594_v13 = vadd.f32 %v843_v12, %v821_v9 }
 0x116   :  { %v860_v14 = vpop.f32.mrb[4].mxu0 }
 0x117   :  { %v861_v15 = vpop.f32.mrb[5].mxu0  ;;  %v672_v16 = vpop.f32.mrb[4].mxu1 }
 0x118   :  { %v862_v17 = vadd.f32 %v861_v15, %v860_v14  ;;  %v863_v18 = vpop.f32.mrb[6].mxu0  ;;  %v893_v19 = vpop.f32.mrb[5].mxu1 }
 0x119   :  { %v864_v20 = vpop.f32.mrb[7].mxu0  ;;  %v675_v21 = vpop.f32.mrb[6].mxu1 }
 0x11a   :  { %v632_v22 = vadd.f32 %v862_v17, %v591_v11  ;;  %v865_v23 = vadd.f32 %v864_v20, %v863_v18  ;;  %v894_v24 = vpop.f32.mrb[7].mxu1 }
 0x11c   :  { %v673_v25 = vadd.f32 %v672_v16, %v632_v22  ;;  %v635_v26 = vadd.f32 %v865_v23, %v594_v13 }
 0x11e   :  { %v676_v27 = vadd.f32 %v675_v21, %v635_v26  ;;  %v705_v28 = vmul.f32 %v673_v25, %v673_v25 }
 0x120   :  { %v798_v29 = vpack.c.bf16 %v676_v27, %v673_v25  ;;  %v698_v30 = vadd.f32 %v676_v27, %v673_v25  ;;  %v706_v31 = vmul.f32 %v676_v27, %v676_v27 }
 0x122   :  { %799 = vst [vmem:[%s1190_s2] sm:$0xff] %v798_v29   ;;  %v699_v32 = vrot.slane %v698_v30, 4  ;;  %v707_v33 = vadd.f32 %v706_v31, %v705_v28 }
 0x124   :  { %v700_v34 = vadd.f32 %v699_v32, %v698_v30  ;;  %v708_v35 = vrot.slane %v707_v33, 4 }
 0x126   :  { %v701_v36 = vrot.slane %v700_v34, 2  ;;  %v709_v37 = vadd.f32 %v708_v35, %v707_v33 }
 0x128   :  { %v702_v38 = vadd.f32 %v701_v36, %v700_v34  ;;  %v710_v39 = vrot.slane %v709_v37, 2 }
 0x12a   :  { %v703_v40 = vrot.slane %v702_v38, 1  ;;  %v711_v41 = vadd.f32 %v710_v39, %v709_v37 }
 0x12c   :  { %v704_v42 = vadd.f32 %v703_v40, %v702_v38  ;;  %v712_v43 = vrot.slane %v711_v41, 1 }
 0x12e   :  { %v713_v44 = vadd.f32 %v712_v43, %v711_v41  ;;  %714 = vst [vmem:[%s1191_s3] sm:$0xff] %v704_v42 }
 0x130   :  { %715 = vst [vmem:[%s1192_s4] sm:$0xff] %v713_v44 }

// kernel: resnet_forward.49
= control target key start
LH: loop header
LB: loop body
LE: loop exit
PB: predicated region body
PF: predicated region fallthrough
CT: control target
= control target key end

     0   :  { %s1593_s15 = smov 0   ;;  %s1595_s16 = smov 0   ;;  %s1736_s0 = inlined_call_operand.vmem [shape: bf16[16,1792], index: 0, kind: input, shape index: {}]   ;;  %s1737_s1 = inlined_call_operand.vmem [shape: bf16[1792,128], index: 1, kind: input, shape index: {}]   ;;  %s1738_s2 = inlined_call_operand.vmem [shape: bf16[16,128], index: 2, kind: output, shape index: {0}]   ;;  %s1739_s3 = inlined_call_operand.vmem [shape: f32[8,128], index: 3, kind: output, shape index: {1}]   ;;  %s1740_s4 = inlined_call_operand.vmem [shape: f32[8,128], index: 4, kind: output, shape index: {2}]  }
   0x1   :  { %s1597_s17 = smov 0   ;;  %s1599_s18 = smov 0  }
   0x2   :  { %s1601_s19 = smov 0  }
   0x3 LB: > { %s27_s20 = sadd.s32 1, %s1559_s18  ;;  %p50_p1 = scmp.ne.s32.totalorder %s1551_s16, %s1547_s15  ;;  %s1563_s19 = sphi %s1601_s19, %s15_s19   ;;  %s1559_s18 = sphi %s1599_s18, %s1744_s18   ;;  %s1555_s17 = sphi %s1597_s17, %s1743_s17   ;;  %s1551_s16 = sphi %s1595_s16, %s1742_s16   ;;  %s1547_s15 = sphi %s1593_s15, %s1741_s15  }
   0x4   : > { %p28_p0 = scmp.ge.s32.totalorder %s27_s20, 2  ;;  %p51_p2 = scmp.eq.s32.totalorder %s1563_s19, 0 }
   0x5   : > { %s43_s22 = sadd.s32 1, %s1551_s16  ;;  %p1230_p5 = scmp.ge.s32.totalorder %s1563_s19, 2 }
   0x6   : > { %s1746_s20 = smov (%p28_p0, %s27_s20), 0  ;;  %p52_p3 = por %p51_p2, %p50_p1 }
   0x7   : > { %s39_s21 = ssub.s32 %s1559_s18, %s1746_s20  ;;  %188 = sbr.rel (%p1230_p5) target bundleno = 23 (0x17), region = 16 }
   0x8   : > { %p41_p4 = scmp.eq.s32.totalorder %s39_s21, 0 }
   0xa   : > { %s1628_s23 = scalar_select %p41_p4, %s1551_s16, %s43_s22  }
   0xe   : > { %191 = sbr.rel (!%p52_p3) target bundleno = 23 (0x17), region = 20  ;;  %s193_s24 = sand.u32 (%p52_p3), 1, %s1551_s16  }
   0xf   : > { %s1311_s25 = smul.u32 (%p52_p3), 28, %s1559_s18 }
  0x10   : > { %s1414_s26 = smul.u32 (%p52_p3), 56, %s193_s24 }
  0x11   : > { %s201_s29 = scalar_lea.vmem (%p52_p3), %s1736_s0, %s1311_s25 }
  0x12   : > { %v216_v0 = vld [vmem:[%s201_s29] sm:$0xff] (%p52_p3)  ;;  %v218_v1 = vld [vmem:[%s201_s29 + $0x8] sm:$0xff] (%p52_p3)  ;;  %v220_v2 = vld [vmem:[%s201_s29 + $0x10] sm:$0xff] (%p52_p3)  ;;  %s195_s30 = scalar_lea.vmem (%p52_p3), [#allocation3], %s1414_s26 }
  0x13   : > { %217 = vst [vmem:[%s195_s30] sm:$0xff] (%p52_p3), %v216_v0  ;;  %219 = vst [vmem:[%s195_s30 + $0x8] sm:$0xff] (%p52_p3), %v218_v1  ;;  %v222_v3 = vld [vmem:[%s201_s29 + $0x38] sm:$0xff] (%p52_p3)  ;;  %v224_v4 = vld [vmem:[%s201_s29 + $0x40] sm:$0xff] (%p52_p3) }
  0x14   : > { %221 = vst [vmem:[%s195_s30 + $0x10] sm:$0xff] (%p52_p3), %v220_v2  ;;  %v226_v5 = vld [vmem:[%s201_s29 + $0x48] sm:$0xff] (%p52_p3)  ;;  %223 = vst [vmem:[%s195_s30 + $0x1c] sm:$0xff] (%p52_p3), %v222_v3  ;;  %v1232_v6 = vld [vmem:[%s201_s29 + $0x18] sm:$0xf] (%p52_p3) }
  0x15   : > { %225 = vst [vmem:[%s195_s30 + $0x24] sm:$0xff] %v224_v4  ;;  %227 = vst [vmem:[%s195_s30 + $0x2c] sm:$0xff] %v226_v5  ;;  %v1234_v7 = vld [vmem:[%s201_s29 + $0x50] sm:$0xf] }
  0x16   : > { %1233 = vst [vmem:[%s195_s30 + $0x18] sm:$0xf] %v1232_v6  ;;  %1235 = vst [vmem:[%s195_s30 + $0x34] sm:$0xf] %v1234_v7 }
  0x17 PF: > { %p1236_p6 = scmp.ge.s32.totalorder %s1563_s19, 1  ;;  %p255_p7 = scmp.lt.s32.totalorder %s1563_s19, 3 }
  0x19   : > { %p256_p8 = pnand %p1236_p6, %p255_p7 }
  0x1a   : > { %s262_s5 = sand.u32 (!%p256_p8), 1, %s1547_s15   ;;  %s314_s6 = smul.u32 (!%p256_p8), 112, %s1555_s17 }
  0x1b   : > { %259 = sbr.rel (%p256_p8) target bundleno = 355 (0x163), region = 50  ;;  %p1238_p10 = scmp.ne.s32.totalorder (!%p256_p8), %s1555_s17, 0 }
  0x1c   : > { %s1415_s7 = smul.u32 (!%p256_p8), 56, %s262_s5  ;;  %p315_p9 = scmp.lt.s32.totalorder (!%p256_p8), %s314_s6, 223 }
  0x1e   : > { %s1645_s12 = scalar_lea.vmem (!%p256_p8), [#allocation3], %s1415_s7 }
  0x22   : > { %s1748_s6 = smov (!%p315_p9, %s314_s6), 223  ;;  %350 = sbr.rel (%p1238_p10) target bundleno = 41 (0x29), region = 58 }
  0x23   : > { %s1237_s8 = sshll.u32 %s1748_s6, 2  ;;  %v1565_v8 = vmov (!%p1238_p10), 0.0  }
  0x24   : > { %s1643_s11 = scalar_lea.vmem %s1737_s1, %s1237_s8  ;;  %351 = vst [vmem:[#allocation2] sm:$0xff] (!%p1238_p10), %v1565_v8  ;;  %352 = vst [vmem:[#allocation2 + $0x8] sm:$0xff] (!%p1238_p10), %v1565_v8 }
  0x29 PF: > { %v1459_v9 = vld [vmem:[%s1643_s11 + $0x40] sm:$0xff]   ;;  %v1463_v13 = vld [vmem:[%s1643_s11 + $0x48] sm:$0xff]   ;;  %v1467_v17 = vld [vmem:[%s1643_s11 + $0x50] sm:$0xff]   ;;  %v1566_v45 = vmov 0.0   ;;  %vm1567_vm0 = vmmov 0   ;;  %p1302_p11 = scmp.ne.s32.totalorder %s1555_s17, 1 }
  0x2a   : > { %v1460_v10 = vld [vmem:[%s1643_s11 + $0xc0] sm:$0xff]   ;;  %1319 = vmatprep.subr.bf16.mxu0 %v1459_v9  ;;  %v1464_v14 = vld [vmem:[%s1643_s11 + $0xc8] sm:$0xff]   ;;  %v1468_v18 = vld [vmem:[%s1643_s11 + $0xd0] sm:$0xff]  }
  0x2b   : > { %v1461_v11 = vld [vmem:[%s1643_s11] sm:$0xff]   ;;  %1341 = vmatprep.subr.bf16.mxu1 %v1460_v10  ;;  %v1465_v15 = vld [vmem:[%s1643_s11 + $0x8] sm:$0xff]   ;;  %v1469_v19 = vld [vmem:[%s1643_s11 + $0x10] sm:$0xff]  }
  0x2c   : > { %v1462_v12 = vld [vmem:[%s1643_s11 + $0x80] sm:$0xff]   ;;  %1320 = vmatpush3.bf16.msra.mxu0 %v1461_v11  ;;  %v1466_v16 = vld [vmem:[%s1643_s11 + $0x88] sm:$0xff]   ;;  %v1470_v20 = vld [vmem:[%s1643_s11 + $0x90] sm:$0xff]  }
  0x2d   : > { %1342 = vmatpush3.bf16.msra.mxu1 %v1462_v12  ;;  %1321 = vmatprep.subr.bf16.mxu0 %v1463_v13  ;;  %v1471_v21 = vld [vmem:[%s1643_s11 + $0x58] sm:$0xff]   ;;  %v1475_v25 = vld [vmem:[%s1643_s11 + $0x60] sm:$0xff]   ;;  %v1479_v29 = vld [vmem:[%s1643_s11 + $0x68] sm:$0xff]  }
  0x2e   : > { %1343 = vmatprep.subr.bf16.mxu1 %v1464_v14  ;;  %v1472_v22 = vld [vmem:[%s1643_s11 + $0xd8] sm:$0xff]   ;;  %v1476_v26 = vld [vmem:[%s1643_s11 + $0xe0] sm:$0xff]   ;;  %v1480_v30 = vld [vmem:[%s1643_s11 + $0xe8] sm:$0xff]  }
  0x2f   : > { %v1473_v23 = vld [vmem:[%s1643_s11 + $0x18] sm:$0xff]   ;;  %v1477_v27 = vld [vmem:[%s1643_s11 + $0x20] sm:$0xff]   ;;  %v1481_v31 = vld [vmem:[%s1643_s11 + $0x28] sm:$0xff]  }
  0x30   : > { %1322 = vmatpush3.bf16.msra.mxu0 %v1465_v15  ;;  %v1474_v24 = vld [vmem:[%s1643_s11 + $0x98] sm:$0xff]   ;;  %v1478_v28 = vld [vmem:[%s1643_s11 + $0xa0] sm:$0xff]   ;;  %v1482_v32 = vld [vmem:[%s1643_s11 + $0xa8] sm:$0xff]  }
  0x31   : > { %1344 = vmatpush3.bf16.msra.mxu1 %v1466_v16  ;;  %1323 = vmatprep.subr.bf16.mxu0 %v1467_v17  ;;  %v1483_v33 = vld [vmem:[%s1643_s11 + $0x70] sm:$0xff]   ;;  %v1487_v37 = vld [vmem:[%s1643_s11 + $0x78] sm:$0xff]   ;;  %v1496_v44 = vld [vmem:[%s1645_s12 + $0xc] ss:$28 sps:$4 sm:$0xff]  }
  0x32   : > { %1345 = vmatprep.subr.bf16.mxu1 %v1468_v18  ;;  %v1484_v34 = vld [vmem:[%s1643_s11 + $0xf0] sm:$0xff]   ;;  %v1488_v38 = vld [vmem:[%s1643_s11 + $0xf8] sm:$0xff]   ;;  %v1497_v46 = vld [vmem:[%s1643_s11 + $0x140] sm:$0xff]   ;;  %920 = vmatprep.mubr.bf16.mxu1 %v1496_v44 }
  0x33   : > { %v1485_v35 = vld [vmem:[%s1643_s11 + $0x30] sm:$0xff]   ;;  %v1489_v39 = vld [vmem:[%s1643_s11 + $0x38] sm:$0xff]   ;;  %v1498_v47 = vld [vmem:[%s1643_s11 + $0x100] sm:$0xff]  }
  0x34   : > { %1324 = vmatpush3.bf16.msra.mxu0 %v1469_v19  ;;  %v1486_v36 = vld [vmem:[%s1643_s11 + $0xb0] sm:$0xff]   ;;  %v1490_v40 = vld [vmem:[%s1643_s11 + $0xb8] sm:$0xff]   ;;  %v1499_v48 = vld [vmem:[%s1643_s11 + $0x180] sm:$0xff]  }
  0x35   : > { %1346 = vmatpush3.bf16.msra.mxu1 %v1470_v20  ;;  %1325 = vmatprep.subr.bf16.mxu0 %v1471_v21  ;;  %v1491_v41 = vld [vmem:[%s1645_s12] ss:$28 sps:$4 sm:$0xff]   ;;  %v1494_v43 = vld [vmem:[%s1645_s12 + $0x8] ss:$28 sps:$4 sm:$0xff]   ;;  %v1522_v3 = vld [vmem:[%s1645_s12 + $0x14] ss:$28 sps:$4 sm:$0xff]  }
  0x36   : > { %1347 = vmatprep.subr.bf16.mxu1 %v1472_v22  ;;  %v1493_v42 = vld [vmem:[%s1645_s12 + $0x4] ss:$28 sps:$4 sm:$0xff]   ;;  %v1500_v49 = vld [vmem:[%s1643_s11 + $0x148] sm:$0xff]   ;;  %v1503_v52 = vld [vmem:[%s1643_s11 + $0x150] sm:$0xff]  }
  0x37   : > { %879 = vmatprep.mubr.bf16.mxu0 %v1493_v42  ;;  %v1501_v50 = vld [vmem:[%s1643_s11 + $0x108] sm:$0xff]   ;;  %v1504_v53 = vld [vmem:[%s1643_s11 + $0x110] sm:$0xff]   ;;  %v1506_v55 = vld [vmem:[%s1643_s11 + $0x158] sm:$0xff]  }
  0x38   : > { %1326 = vmatpush3.bf16.msra.mxu0 %v1473_v23  ;;  %v1502_v51 = vld [vmem:[%s1643_s11 + $0x188] sm:$0xff]   ;;  %v1505_v54 = vld [vmem:[%s1643_s11 + $0x190] sm:$0xff]   ;;  %v1507_v56 = vld [vmem:[%s1643_s11 + $0x118] sm:$0xff]  }
  0x39   : > { %1348 = vmatpush3.bf16.msra.mxu1 %v1474_v24  ;;  %1327 = vmatprep.subr.bf16.mxu0 %v1475_v25  ;;  %v1508_v57 = vld [vmem:[%s1643_s11 + $0x198] sm:$0xff]   ;;  %v1509_v58 = vld [vmem:[%s1643_s11 + $0x160] sm:$0xff]   ;;  %v1512_v61 = vld [vmem:[%s1643_s11 + $0x168] sm:$0xff]  }
  0x3a   : > { %1349 = vmatprep.subr.bf16.mxu1 %v1476_v26  ;;  %v1510_v59 = vld [vmem:[%s1643_s11 + $0x120] sm:$0xff]   ;;  %v1513_v62 = vld [vmem:[%s1643_s11 + $0x128] sm:$0xff]   ;;  %v1515_v0 = vld [vmem:[%s1643_s11 + $0x170] sm:$0xff]  }
  0x3b   : > { %v1511_v60 = vld [vmem:[%s1643_s11 + $0x1a0] sm:$0xff]   ;;  %v1514_v63 = vld [vmem:[%s1643_s11 + $0x1a8] sm:$0xff]   ;;  %v1516_v1 = vld [vmem:[%s1643_s11 + $0x130] sm:$0xff]  }
  0x3c   : > { %1328 = vmatpush3.bf16.msra.mxu0 %v1477_v27  ;;  %v1517_v2 = vld [vmem:[%s1643_s11 + $0x1b0] sm:$0xff]   ;;  %v1518_v4 = vld [vmem:[%s1643_s11 + $0x178] sm:$0xff]  }
  0x3d   : > { %1350 = vmatpush3.bf16.msra.mxu1 %v1478_v28  ;;  %1329 = vmatprep.subr.bf16.mxu0 %v1479_v29  ;;  %v1519_v5 = vld [vmem:[%s1643_s11 + $0x138] sm:$0xff]   ;;  %v1520_v7 = vld [vmem:[%s1645_s12 + $0x10] ss:$28 sps:$4 sm:$0xff]  }
  0x3e   : > { %1351 = vmatprep.subr.bf16.mxu1 %v1480_v30  ;;  %v1523_v6 = vld [vmem:[%s1643_s11 + $0x1b8] sm:$0xff]  }
  0x3f   : > { %v1524_v8 = vld [vmem:[%s1645_s12 + $0x18] ss:$28 sps:$4 sm:$0xff]  }
  0x40   : > { %1330 = vmatpush3.bf16.msra.mxu0 %v1481_v31 }
  0x41   : > { %1352 = vmatpush3.bf16.msra.mxu1 %v1482_v32  ;;  %1331 = vmatprep.subr.bf16.mxu0 %v1483_v33 }
  0x42   : > { %1353 = vmatprep.subr.bf16.mxu1 %v1484_v34  ;;  %v353_v34 = vld [vmem:[#allocation2] sm:$0xff] }
  0x44   : > { %1332 = vmatpush3.bf16.msra.mxu0 %v1485_v35 }
  0x45   : > { %1354 = vmatpush3.bf16.msra.mxu1 %v1486_v36  ;;  %1333 = vmatprep.subr.bf16.mxu0 %v1487_v37  ;;  %v354_v37 = vld [vmem:[#allocation2 + $0x8] sm:$0xff] }
  0x46   : > { %1355 = vmatprep.subr.bf16.mxu1 %v1488_v38 }
  0x48   : > { %1334 = vmatpush3.bf16.msra.mxu0 %v1489_v39 }
  0x49   : > { %1356 = vmatpush3.bf16.msra.mxu1 %v1490_v40  ;;  %1363 = vmatprep.subr.bf16.mxu0 %v1497_v46 }
  0x4a   : > { %1394 = vmatprep.subr.bf16.mxu1 %v1566_v45 }
  0x4b   : > { %880 = vmatmul.mubr.bf16.vlgmr.msra.gmra.mrb[0].mxu0 %v1491_v41 }
  0x4c   : > { %921 = vmatmul.mubr.bf16.vlgmr.msra.gmra.mrb[0].mxu1 %v1494_v43  ;;  %1364 = vmatpush3.bf16.msra.mxu0 %v1498_v47 }
  0x4d   : > { %1410 = vmatprep.mubr.msk.bf16.mxu1 %vm1567_vm0, %v1566_v45  ;;  %1395 = vmatpush3.bf16.msra.mxu1 %v1499_v48 }
  0x4e   : > { %1365 = vmatprep.subr.bf16.mxu0 %v1500_v49  ;;  %1396 = vmatprep.subr.bf16.mxu1 %v1566_v45 }
  0x4f   : > { %961 = vmatprep.mubr.bf16.mxu0 %v1522_v3 }
  0x50   : > { %1366 = vmatpush3.bf16.msra.mxu0 %v1501_v50 }
  0x51   : > { %1397 = vmatpush3.bf16.msra.mxu1 %v1502_v51  ;;  %1367 = vmatprep.subr.bf16.mxu0 %v1503_v52 }
  0x52   : > { %1398 = vmatprep.subr.bf16.mxu1 %v1566_v45 }
  0x54   : > { %1368 = vmatpush3.bf16.msra.mxu0 %v1504_v53 }
  0x55   : > { %1399 = vmatpush3.bf16.msra.mxu1 %v1505_v54  ;;  %1369 = vmatprep.subr.bf16.mxu0 %v1506_v55 }
  0x56   : > { %1400 = vmatprep.subr.bf16.mxu1 %v1566_v45 }
  0x58   : > { %1370 = vmatpush3.bf16.msra.mxu0 %v1507_v56 }
  0x59   : > { %1401 = vmatpush3.bf16.msra.mxu1 %v1508_v57  ;;  %1371 = vmatprep.subr.bf16.mxu0 %v1509_v58 }
  0x5a   : > { %1402 = vmatprep.subr.bf16.mxu1 %v1566_v45 }
  0x5c   : > { %1372 = vmatpush3.bf16.msra.mxu0 %v1510_v59 }
  0x5d   : > { %1403 = vmatpush3.bf16.msra.mxu1 %v1511_v60  ;;  %1373 = vmatprep.subr.bf16.mxu0 %v1512_v61 }
  0x5e   : > { %1404 = vmatprep.subr.bf16.mxu1 %v1566_v45 }
  0x60   : > { %1374 = vmatpush3.bf16.msra.mxu0 %v1513_v62 }
  0x61   : > { %1405 = vmatpush3.bf16.msra.mxu1 %v1514_v63  ;;  %1375 = vmatprep.subr.bf16.mxu0 %v1515_v0 }
  0x62   : > { %1406 = vmatprep.subr.bf16.mxu1 %v1566_v45 }
  0x64   : > { %1376 = vmatpush3.bf16.msra.mxu0 %v1516_v1 }
  0x65   : > { %1407 = vmatpush3.bf16.msra.mxu1 %v1517_v2  ;;  %1377 = vmatprep.subr.bf16.mxu0 %v1518_v4 }
  0x66   : > { %1408 = vmatprep.subr.bf16.mxu1 %v1566_v45 }
  0x68   : > { %1378 = vmatpush3.bf16.msra.mxu0 %v1519_v5 }
  0x69   : > { %1409 = vmatpush3.bf16.msra.mxu1 %v1523_v6 }
  0x6b   : > { %962 = vmatmul.mubr.bf16.vlgmr.msra.gmra.mrb[4].mxu0 %v1520_v7 }
  0x6c   : > { %1411 = vmatmul.mubr.bf16.vlgmr.msra.gmra.mrb[4].mxu1 %v1524_v8 }
 0x11e   : > { %v1335_v9 = vpop.f32.mrb[0].mxu0 }
 0x11f   : > { %v1357_v10 = vpop.f32.mrb[0].mxu1  ;;  %v1336_v11 = vpop.f32.mrb[1].mxu0 }
 0x120   : > { %v1337_v12 = vadd.f32 %v1336_v11, %v1335_v9  ;;  %v1358_v13 = vpop.f32.mrb[1].mxu1  ;;  %v1338_v14 = vpop.f32.mrb[2].mxu0 }
 0x121   : > { %v1359_v15 = vadd.f32 %v1358_v13, %v1357_v10  ;;  %v1360_v16 = vpop.f32.mrb[2].mxu1  ;;  %v1339_v17 = vpop.f32.mrb[3].mxu0 }
 0x122   : > { %v1340_v18 = vadd.f32 %v1339_v17, %v1338_v14  ;;  %v1361_v19 = vpop.f32.mrb[3].mxu1 }
 0x123   : > { %v923_v20 = vadd.f32 %v1359_v15, %v1337_v12  ;;  %v1362_v21 = vadd.f32 %v1361_v19, %v1360_v16 }
 0x125   : > { %v926_v22 = vadd.f32 %v1362_v21, %v1340_v18 }
 0x13e   : > { %v1379_v23 = vpop.f32.mrb[4].mxu0 }
 0x13f   : > { %v1380_v24 = vpop.f32.mrb[5].mxu0  ;;  %v1004_v25 = vpop.f32.mrb[4].mxu1 }
 0x140   : > { %v1381_v26 = vadd.f32 %v1380_v24, %v1379_v23  ;;  %v1382_v27 = vpop.f32.mrb[6].mxu0  ;;  %v1412_v28 = vpop.f32.mrb[5].mxu1 }
 0x141   : > { %v1383_v29 = vpop.f32.mrb[7].mxu0  ;;  %v1007_v30 = vpop.f32.mrb[6].mxu1 }
 0x142   : > { %v964_v31 = vadd.f32 %v1381_v26, %v923_v20  ;;  %v1384_v32 = vadd.f32 %v1383_v29, %v1382_v27  ;;  %v1413_v33 = vpop.f32.mrb[7].mxu1 }
 0x144   : > { %v1005_v35 = vadd.f32 %v1004_v25, %v964_v31  ;;  %v967_v36 = vadd.f32 %v1384_v32, %v926_v22  ;;  %1018 = sbr.rel (%p1302_p11) target bundleno = 355 (0x163), region = 62 }
 0x146   : > { %v1011_v38 = vadd.f32 %v1005_v35, %v353_v34  ;;  %v1008_v39 = vadd.f32 %v1007_v30, %v967_v36 }
 0x148   : > { %1013 = vst [vmem:[#allocation2] sm:$0xff] %v1011_v38  ;;  %v1012_v40 = vadd.f32 %v1008_v39, %v354_v37 }
 0x14a   : > { %1014 = vst [vmem:[#allocation2 + $0x8] sm:$0xff] %v1012_v40 }
 0x14f   : > { %v1019_v41 = vld [vmem:[#allocation2] sm:$0xff] }
 0x150   : > { %v1038_v45 = vmul.f32 %v1019_v41, %v1019_v41 }
 0x151   : > { %v1020_v42 = vld [vmem:[#allocation2 + $0x8] sm:$0xff] }
 0x152   : > { %v1317_v43 = vpack.c.bf16 %v1020_v42, %v1019_v41  ;;  %v1031_v44 = vadd.f32 %v1020_v42, %v1019_v41  ;;  %v1039_v46 = vmul.f32 %v1020_v42, %v1020_v42 }
 0x154   : > { %1318 = vst [vmem:[%s1738_s2] sm:$0xff] %v1317_v43   ;;  %v1032_v47 = vrot.slane %v1031_v44, 4  ;;  %v1040_v48 = vadd.f32 %v1039_v46, %v1038_v45 }
 0x156   : > { %v1033_v49 = vadd.f32 %v1032_v47, %v1031_v44  ;;  %v1041_v50 = vrot.slane %v1040_v48, 4 }
 0x158   : > { %v1034_v51 = vrot.slane %v1033_v49, 2  ;;  %v1042_v52 = vadd.f32 %v1041_v50, %v1040_v48 }
 0x15a   : > { %v1035_v53 = vadd.f32 %v1034_v51, %v1033_v49  ;;  %v1043_v54 = vrot.slane %v1042_v52, 2 }
 0x15c   : > { %v1036_v55 = vrot.slane %v1035_v53, 1  ;;  %v1044_v56 = vadd.f32 %v1043_v54, %v1042_v52 }
 0x15e   : > { %v1037_v57 = vadd.f32 %v1036_v55, %v1035_v53  ;;  %v1045_v58 = vrot.slane %v1044_v56, 1 }
 0x160   : > { %1047 = vst [vmem:[%s1739_s3] sm:$0xff] %v1037_v57  ;;  %v1046_v59 = vadd.f32 %v1045_v58, %v1044_v56 }
 0x162   : > { %1048 = vst [vmem:[%s1740_s4] sm:$0xff] %v1046_v59 }
 0x163 PF: > { %s15_s19 = sadd.s32 1, %s1563_s19   ;;  %s1741_s15 = smov %s1551_s16 }
 0x164   : > { %p12_p12 = scmp.ge.s32.totalorder %s15_s19, 4   ;;  %s1742_s16 = smov %s1628_s23 }
 0x165   : > { %s1743_s17 = smov %s1559_s18  ;;  %s1744_s18 = smov %s1746_s20 }
 0x166   :  { %14 = sbr.rel (!%p12_p12) target bundleno = 3 (0x3), region = 130 }

// kernel: resnet_forward.51
= control target key start
LH: loop header
LB: loop body
LE: loop exit
PB: predicated region body
PF: predicated region fallthrough
CT: control target
= control target key end

     0   :  { %v50_v3 = vlaneseq  ;;  %v393_v4 = vmov 0.0|0.0   ;;  %vm394_vm0 = vmmov 0   ;;  %v395_v7 = vmov 0.0   ;;  %s517_s0 = inlined_call_operand.vmem [shape: bf16[2,1,64], index: 0, kind: input, shape index: {}]   ;;  %s518_s1 = inlined_call_operand.vmem [shape: f32[64,64], index: 1, kind: input, shape index: {}]   ;;  %s519_s2 = inlined_call_operand.vmem [shape: f32[1,64], index: 2, kind: input, shape index: {}]   ;;  %s520_s3 = inlined_call_operand.vmem [shape: f32[1,64], index: 3, kind: input, shape index: {}]   ;;  %s521_s4 = inlined_call_operand.vmem [shape: f32[1,64], index: 4, kind: input, shape index: {}]   ;;  %s522_s5 = inlined_call_operand.vmem [shape: f32[64,16], index: 5, kind: input, shape index: {}]   ;;  %s523_s6 = inlined_call_operand.vmem [shape: f32[1,16], index: 6, kind: input, shape index: {}]   ;;  %s524_s7 = inlined_call_operand.hbm [shape: f32[2,16], index: 7, kind: output, shape index: {}]  }
   0x1   :  { %v33_v0 = vld [vmem:[%s518_s1] sm:$0xff]  ;;  %v34_v1 = vld [vmem:[%s518_s1 + $0x8] sm:$0xff]  ;;  %v35_v2 = vld [vmem:[%s518_s1 + $0x10] sm:$0xff]  ;;  %339 = vmatprep.subr.bf16.mxu0 %v393_v4  ;;  %317 = vmatprep.mubr.msk.f32.mxu0 %vm394_vm0, %v395_v7 }
   0x2   :  { %v340_v5 = vpack.c.bf16 %v34_v1, %v33_v0  ;;  %v36_v6 = vld [vmem:[%s518_s1 + $0x18] sm:$0xff]  ;;  %351 = vmatprep.subr.bf16.mxu1 %v393_v4  ;;  %336 = vmatprep.mubr.msk.f32.mxu1 %vm394_vm0, %v395_v7  ;;  %v37_v9 = vld [vmem:[%s518_s1 + $0x20] sm:$0xff]  ;;  %v51_v10 = vshrl.u32 %v50_v3, 7 }
   0x3   :  { %v343_v8 = vpack.c.bf16 %v36_v6, %v35_v2 }
   0x4   :  { %341 = vmatpush3.bf16.msra.mxu0 %v340_v5 }
   0x5   :  { %12 = vsyncpa [#allocation3], 0  ;;  %342 = vmatprep.subr.bf16.mxu0 %v393_v4  ;;  %v38_v11 = vld [vmem:[%s518_s1 + $0x28] sm:$0xff]  ;;  %v27_v12 = vld [vmem:[%s517_s0] sm:$0x1]  ;;  %v52_v17 = vsub.s32 0, %v51_v10 }
   0x6   :  { %v28_v13 = vld [vmem:[%s517_s0 + $0x1] sm:$0x1]  ;;  %v346_v14 = vpack.c.bf16 %v38_v11, %v37_v9  ;;  %v29_v15 = vunpack.c.l.bf16 %v27_v12  ;;  %v39_v18 = vld [vmem:[%s518_s1 + $0x30] sm:$0xff]  ;;  %v40_v19 = vld [vmem:[%s518_s1 + $0x38] sm:$0xff]  ;;  %vm58_vm1 = vcmask 1041409   ;;  %vm60_vm2 = vcmask 523264  }
   0x7   :  { %v30_v16 = vunpack.c.l.bf16 %v28_v13  ;;  %v349_v20 = vpack.c.bf16 %v40_v19, %v39_v18  ;;  %v173_v24 = vld [vmem:[%s522_s5] sm:$0xff]  ;;  %v174_v25 = vld [vmem:[%s522_s5 + $0x8] sm:$0xff]  ;;  %v175_v27 = vld [vmem:[%s522_s5 + $0x10] sm:$0xff]  ;;  %vm133_vm3 = vcmask 517120   ;;  %s396_s18 = smov [#allocation2]   ;;  %vm261_vm4 = vcmask 123904  }
   0x8   :  { %344 = vmatpush3.bf16.msra.mxu0 %v343_v8  ;;  %v53_v21 = vrot.slane %v29_v15, %v52_v17  ;;  %v352_v26 = vpack.c.bf16 %v174_v25, %v173_v24  ;;  %v176_v28 = vld [vmem:[%s522_s5 + $0x18] sm:$0xff]  ;;  %v177_v30 = vld [vmem:[%s522_s5 + $0x20] sm:$0xff]  ;;  %v178_v31 = vld [vmem:[%s522_s5 + $0x28] sm:$0xff]  ;;  %s269_s19 = sshll.u32 %s396_s18, 4  ;;  %s270_s19 = int_to_ptr.vmem [resolvable:$true] %s269_s19 }
   0x9   :  { %345 = vmatprep.subr.bf16.mxu0 %v393_v4  ;;  %v57_v22 = vrot.slane %v30_v16, %v52_v17  ;;  %v355_v29 = vpack.c.bf16 %v176_v28, %v175_v27  ;;  %v358_v32 = vpack.c.bf16 %v178_v31, %v177_v30  ;;  %v179_v33 = vld [vmem:[%s522_s5 + $0x30] sm:$0xff]  ;;  %v180_v34 = vld [vmem:[%s522_s5 + $0x38] sm:$0xff]  ;;  %v277_v36 = vld [vmem:[%s519_s2] ss:$0 sm:$0xff]  ;;  %p374_p1 = scmp.lt.s32.totalorder %s270_s19, %s270_s19 }
   0xa   :  { %353 = vmatpush3.bf16.msra.mxu1 %v352_v26  ;;  %v361_v35 = vpack.c.bf16 %v180_v34, %v179_v33  ;;  %v279_v60 = vld [vmem:[%s520_s3] ss:$0 sm:$0xff]  ;;  %s369_s3 = scalar_lea.vmem %s270_s19, 32 }
   0xb   :  { %v59_v23 = vsel %vm58_vm1, %v57_v22, %v53_v21  ;;  %354 = vmatprep.subr.bf16.mxu1 %v393_v4  ;;  %v280_v62 = vld [vmem:[%s521_s4] ss:$0 sm:$0xff]  ;;  %p370_p0 = scmp.ne.s32.totalorder %s270_s19, %s369_s3  ;;  %p375_p2 = scmp.lt.s32.totalorder %s369_s3, %s369_s3 }
   0xc   :  { %347 = vmatpush3.bf16.msra.mxu0 %v346_v14  ;;  %v281_v2 = vld [vmem:[%s523_s6] ss:$0 sm:$0xff] }
   0xd   :  { %348 = vmatprep.subr.bf16.mxu0 %v393_v4  ;;  %p376_p3 = por %p375_p2, %p374_p1 }
   0xe   :  { %356 = vmatpush3.bf16.msra.mxu1 %v355_v29 }
   0xf   :  { %357 = vmatprep.subr.bf16.mxu1 %v393_v4  ;;  %p377_p4 = pnand %p376_p3, %p370_p0 }
  0x10   :  { %350 = vmatpush3.bf16.msra.mxu0 %v349_v20 }
  0x12   :  { %359 = vmatpush3.bf16.msra.mxu1 %v358_v32 }
  0x13   :  { %318 = vmatmul.mubr.msk.f32.vlgmr.msra.gmra.mrb[0].mxu0 %vm60_vm2, %v59_v23  ;;  %360 = vmatprep.subr.bf16.mxu1 %v393_v4 }
  0x16   :  { %362 = vmatpush3.bf16.msra.mxu1 %v361_v35 }
  0xe6   :  { %v129_v37 = vpop.f32.mrb[0].mxu0 }
  0xe7   :  { %v130_v38 = vadd.f32 %v277_v36, %v129_v37  ;;  %v319_v39 = vpop.f32.mrb[1].mxu0 }
  0xe9   :  { %v134_v40 = vsel %vm133_vm3, %v130_v38, 0.0 }
  0xea   :  { %v135_v41 = vrot.slane %v134_v40, 4 }
  0xec   :  { %v136_v42 = vadd.f32 %v135_v41, %v134_v40 }
  0xee   :  { %v137_v43 = vrot.slane %v136_v42, 2 }
  0xf0   :  { %v138_v44 = vadd.f32 %v137_v43, %v136_v42 }
  0xf2   :  { %v139_v45 = vrot.slane %v138_v44, 1 }
  0xf4   :  { %v140_v46 = vadd.f32 %v139_v45, %v138_v44 }
  0xf6   :  { %v142_v47 = vmul.f32 0.5, %v140_v46 }
  0xf8   :  { %v143_v48 = vsub.f32 %v130_v38, %v142_v47 }
  0xfa   :  { %v144_v49 = vmul.f32 %v143_v48, %v143_v48 }
  0xfc   :  { %v145_v50 = vsel %vm133_vm3, %v144_v49, 0.0 }
  0xfd   :  { %v146_v51 = vrot.slane %v145_v50, 4 }
  0xff   :  { %v147_v52 = vadd.f32 %v146_v51, %v145_v50 }
 0x101   :  { %v148_v53 = vrot.slane %v147_v52, 2 }
 0x103   :  { %v149_v54 = vadd.f32 %v148_v53, %v147_v52 }
 0x105   :  { %v150_v55 = vrot.slane %v149_v54, 1 }
 0x107   :  { %v151_v56 = vadd.f32 %v150_v55, %v149_v54 }
 0x109   :  { %v152_v57 = vmul.f32 0.5, %v151_v56 }
 0x10b   :  { %v153_v58 = vadd.f32 1e-05, %v152_v57 }
 0x10d   :  { %367 = vrsqrt.f32 %v153_v58 }
 0x117   :  { %v368_v59 = vpop.eup %367 }
 0x118   :  { %v155_v61 = vmul.f32 %v368_v59, %v143_v48 }
 0x11a   :  { %v163_v63 = vmul.f32 %v279_v60, %v155_v61 }
 0x11c   :  { %v171_v0 = vadd.f32 %v280_v62, %v163_v63 }
 0x11e   :  { %v172_v1 = vmax.f32 %v171_v0, 0.0 }
 0x120   :  { %337 = vmatmul.mubr.msk.f32.vlgmr.msra.gmra.mrb[0].mxu1 %vm60_vm2, %v172_v1 }
 0x1f3   :  { %v257_v3 = vpop.f32.mrb[0].mxu1 }
 0x1f4   :  { %v258_v4 = vadd.f32 %v281_v2, %v257_v3  ;;  %v338_v5 = vpop.f32.mrb[1].mxu1 }
 0x1f6   :  { %262 = vst.msk [vmem:[#allocation2] sm:$0x3] %vm261_vm4, %v258_v4 }
 0x1f7   :  { %380 = shalt.err (!%p377_p4)
}
 0x1f8   :  { %s381_s0 = scalar_lea.hbm %s524_s7, 32 }
 0x1f9   :  { %p382_p5 = scmp.ne.s32.totalorder %s524_s7, %s381_s0  ;;  %p385_p6 = scmp.lt.u32.totalorder %s381_s0, %s524_s7 }
 0x1fb   :  { %p387_p7 = pnand %p385_p6, %p382_p5 }
 0x1fd   :  { %390 = shalt.err (!%p387_p7)
}
 0x1fe   :  { %272 = dma.vmem_to_hbm [thread:$0]  %s270_s19, 32, %s524_s7, [#allocation3]  }
 0x1ff   :  { %391 = dma.done.wait [#allocation3], 32  }
 0x200   :  { %392 = vsyncadd [#allocation3], 4294967264 }
 0x201   :  { %276 = vsyncpa [#allocation3], 1 }

</bundles_post_ra>
